<compile_context>
chip_gen: v6e
topology: v6e:2x2x1
jax: 0.10.0
libtpu: 0.0.40
codegen_flags: <defaults>
</compile_context>

<pallas_src>
import numpy as np

import jax
import jax.numpy as jnp
from jax.experimental import pallas as pl
from jax.experimental.pallas import tpu as pltpu

EPS = 1e-5
H = 28          # input spatial size implied by Linear(512 = 32*4*4, ...)
W = 28
IN_C = 3
NC_PAD = 128    # lane-dense logits width (num_classes padded to 128)
ACT_W = 416     # widest activation row (conv1 output: 26 cols * 16 ch)


# ----------------------------------------------------------------------------
# Fused whole-network kernel
# ----------------------------------------------------------------------------
def _cnn_kernel(x_ref,
                t1_ref, b1_ref, t2_ref, b2_ref,
                t3_ref, b3_ref, t4_ref, b4_ref,
                w5_ref, b5_ref, w6_ref, b6_ref,
                o_ref, act_ref):
    f32, bf16 = jnp.float32, jnp.bfloat16
    n = o_ref.shape[0]                       # samples in this block

    # Stage the input block once, in bf16.  Row r = spatial_row * n + sample.
    act_ref[0:H * n, 0:W * IN_C] = x_ref[...].astype(bf16)

    def conv(hi, wi_phys, t_ref, b_ref, wo_phys):
        # 3x3 valid conv as 3 row-shifted GEMMs against banded weights
        # (BN scale folded in); f32 accumulation, single bf16 cast at the end.
        ho = hi - 2
        r = ho * n
        y = jnp.dot(act_ref[0:r, 0:wi_phys], t_ref[0],
                    preferred_element_type=f32)
        y = y + jnp.dot(act_ref[n:n + r, 0:wi_phys], t_ref[1],
                        preferred_element_type=f32)
        y = y + jnp.dot(act_ref[2 * n:2 * n + r, 0:wi_phys], t_ref[2],
                        preferred_element_type=f32)
        act_ref[0:r, 0:wo_phys] = jnp.maximum(y + b_ref[...], 0.0).astype(bf16)
        return ho, wo_phys

    def pool(hi, wi_phys, oc):
        # 2x2 / stride-2 max-pool.  Output ROWS are written compactly (dense,
        # no garbage); output COLUMNS keep the doubled pitch -- the next
        # layer's banded weights simply have zeros on the dead columns.
        ho = hi // 2
        wo_phys = wi_phys - oc
        for m in range(ho):
            rmax = jnp.maximum(act_ref[(2 * m) * n:(2 * m + 1) * n, 0:wi_phys],
                               act_ref[(2 * m + 1) * n:(2 * m + 2) * n, 0:wi_phys])
            cmax = jnp.maximum(rmax[:, 0:wo_phys], rmax[:, oc:oc + wo_phys])
            act_ref[m * n:(m + 1) * n, 0:wo_phys] = cmax
        return ho, wo_phys

    hi, wp = H, W * IN_C                     # 28, 84
    hi, wp = conv(hi, wp, t1_ref, b1_ref, 26 * 16)   # 26, 416
    hi, wp = conv(hi, wp, t2_ref, b2_ref, 24 * 16)   # 24, 384
    hi, wp = pool(hi, wp, 16)                        # 12, 368 (pitch 32)
    hi, wp = conv(hi, wp, t3_ref, b3_ref, 10 * 32)   # 10, 320
    hi, wp = conv(hi, wp, t4_ref, b4_ref, 8 * 32)    #  8, 256
    hi, wp = pool(hi, wp, 32)                        #  4, 224 (pitch 64)

    # Linear(512,256) + BN1d + ReLU: 4 contiguous (n, 224) blocks, one per
    # pooled spatial row (NCHW flatten order baked into w5 on the host).
    h = jnp.dot(act_ref[0:n, 0:wp], w5_ref[0], preferred_element_type=f32)
    for i in range(1, 4):
        h = h + jnp.dot(act_ref[i * n:(i + 1) * n, 0:wp], w5_ref[i],
                        preferred_element_type=f32)
    h = jnp.maximum(h + b5_ref[...], 0.0).astype(bf16)

    # Linear(256, num_classes), classes padded to 128 lanes; one row / sample.
    logits = jnp.dot(h, w6_ref[...], preferred_element_type=f32) + b6_ref[...]
    o_ref[...] = logits.astype(o_ref.dtype)


# ----------------------------------------------------------------------------
# Host-side weight preparation (trace-time folding / banded matrices)
# ----------------------------------------------------------------------------
def _conv_band_weights(w, s, wi, ci, pitch, phys_in):
    """Per-kh banded weight matrices for conv-as-row-GEMM.

    w: (OC, IC, 3, 3) PyTorch conv weight; s: (OC,) folded BN scale.
    The incoming activation stores (spatial col j, channel c) of each image
    row at physical column j*pitch + c inside a row of width phys_in.
    Returns T of shape (3, phys_in, (wi-2)*OC) with
      T[kh, (j+kw)*pitch + c, j*OC + oc] = w[oc, c, kh, kw] * s[oc],
    zeros elsewhere (garbage columns produced by pooling are ignored).
    """
    oc, ic = w.shape[0], w.shape[1]
    assert ic == ci
    wo = wi - 2
    ws = (w * s[:, None, None, None]).astype(np.float32)
    t = np.zeros((3, phys_in, wo * oc), np.float32)
    for kh in range(3):
        for kw in range(3):
            blk = ws[:, :, kh, kw].T          # (IC, OC)
            for j in range(wo):
                q = (j + kw) * pitch
                t[kh, q:q + ci, j * oc:(j + 1) * oc] = blk
    return t


def _head_band_weights(w1, s, pitch, c, hh, ww, phys_in):
    """Per-spatial-row blocks of the Linear(512,256) weight (BN scale folded),
    remapped from the PyTorch NCHW flatten order (f = ch*hh*ww + i*ww + j) to
    the kernel's physical column layout (col j, channel ch -> j*pitch + ch).
    Returns (hh, phys_in, 256)."""
    out_units = w1.shape[0]
    w1t = (w1.T * s[None, :]).astype(np.float32)      # (512, 256)
    blocks = np.zeros((hh, phys_in, out_units), np.float32)
    for i in range(hh):
        for j in range(ww):
            for ch in range(c):
                f = ch * hh * ww + i * ww + j
                blocks[i, j * pitch + ch, :] = w1t[f, :]
    return blocks


def prepare_weights(p, num_classes):
    """Fold eval-mode BatchNorm into the weights and build the banded
    row-GEMM matrices consumed by the fused Pallas kernel (bf16)."""
    f = lambda a: np.asarray(a, np.float32)

    def fold(bn, bias):
        s = f(bn["gamma"]) / np.sqrt(f(bn["var"]) + EPS)
        b = f(bn["beta"]) + s * (f(bias) - f(bn["mean"]))
        return s, b

    s1, bb1 = fold(p["bn1"], p["c1_b"])
    s2, bb2 = fold(p["bn2"], p["c2_b"])
    s3, bb3 = fold(p["bn3"], p["c3_b"])
    s4, bb4 = fold(p["bn4"], p["c4_b"])
    s5, bb5 = fold(p["bn5"], p["l1_b"])

    # Column geometry per stage: (valid width, channels, pitch, physical width)
    #   input     : 28 x  3 ch, pitch  3, phys  84
    #   conv1 out : 26 x 16 ch, pitch 16, phys 416
    #   conv2 out : 24 x 16 ch, pitch 16, phys 384
    #   pool1 out : 12 x 16 ch, pitch 32, phys 368
    #   conv3 out : 10 x 32 ch, pitch 32, phys 320
    #   conv4 out :  8 x 32 ch, pitch 32, phys 256
    #   pool2 out :  4 x 32 ch, pitch 64, phys 224
    t1 = _conv_band_weights(f(p["c1_w"]), s1, wi=28, ci=3,  pitch=3,  phys_in=84)
    t2 = _conv_band_weights(f(p["c2_w"]), s2, wi=26, ci=16, pitch=16, phys_in=416)
    t3 = _conv_band_weights(f(p["c3_w"]), s3, wi=12, ci=16, pitch=32, phys_in=368)
    t4 = _conv_band_weights(f(p["c4_w"]), s4, wi=10, ci=32, pitch=32, phys_in=320)
    w5 = _head_band_weights(f(p["l1_w"]), s5, pitch=64, c=32, hh=4, ww=4,
                            phys_in=224)

    w6 = np.zeros((256, NC_PAD), np.float32)
    w6[:, :num_classes] = f(p["l2_w"]).T
    b6 = np.zeros((NC_PAD,), np.float32)
    b6[:num_classes] = f(p["l2_b"])

    bf = jnp.bfloat16
    row = lambda v: jnp.asarray(v, jnp.float32)[None, :]
    return dict(
        t1=jnp.asarray(t1, bf), b1=row(np.tile(bb1, 26)),
        t2=jnp.asarray(t2, bf), b2=row(np.tile(bb2, 24)),
        t3=jnp.asarray(t3, bf), b3=row(np.tile(bb3, 10)),
        t4=jnp.asarray(t4, bf), b4=row(np.tile(bb4, 8)),
        w5=jnp.asarray(w5, bf), b5=row(bb5),
        w6=jnp.asarray(w6, bf), b6=row(b6),
    )


# ----------------------------------------------------------------------------
# Batch-tile selection (tuning knob: block_n)
# ----------------------------------------------------------------------------
def _pick_block_n(n, requested):
    """Pick samples per grid step.  Multi-step blocks are multiples of 8 so
    the (block_n, 128) output block satisfies the sublane rule; single-step
    blocks just cover the (padded) batch.  >= 2 steps when the batch allows
    so the 'parallel' axis can shard across both v7x TensorCores."""
    if requested is not None:
        bn = max(1, min(int(requested), n))
        if bn >= n:
            return bn + (bn % 2)
        return max(8, (bn // 8) * 8)
    if n <= 8:
        return n + (n % 2)
    bn = max(8, (min(32, n) // 8) * 8)
    steps = max(2, -(-n // bn))
    return max(8, ((-(-n // steps) + 7) // 8) * 8)


# ----------------------------------------------------------------------------
# Forward pass wrapper
# ----------------------------------------------------------------------------
def cnn_mnist_forward(x_nchw, prep, *, num_classes, block_n=None):
    """Fused CNN_MNIST forward.  BatchNorm uses eval-mode running statistics."""
    # TODO(synk): training-mode BatchNorm (batch statistics) is not implemented;
    # eval-mode running-stat semantics are folded into the weights instead.
    n = x_nchw.shape[0]
    bn = _pick_block_n(n, block_n)
    n_pad = -(-n // bn) * bn
    g = n_pad // bn
    rb = H * bn

    # NCHW -> NHWC -> per-block (spatial_row, sample) row order:
    #   physical row = block*H*bn + spatial_row*bn + sample
    x = jnp.transpose(x_nchw, (0, 2, 3, 1)).astype(jnp.float32)
    if n_pad != n:
        x = jnp.pad(x, ((0, n_pad - n), (0, 0), (0, 0), (0, 0)))
    x = x.reshape(g, bn, H, W * IN_C)
    x = jnp.transpose(x, (0, 2, 1, 3)).reshape(g * rb, W * IN_C)

    weights = [prep["t1"], prep["b1"], prep["t2"], prep["b2"],
               prep["t3"], prep["b3"], prep["t4"], prep["b4"],
               prep["w5"], prep["b5"], prep["w6"], prep["b6"]]

    def resident(a):     # full-array block, constant index_map -> stays in VMEM
        return pl.BlockSpec(a.shape, lambda i, _z=(0,) * a.ndim: _z)

    out = pl.pallas_call(
        _cnn_kernel,
        out_shape=jax.ShapeDtypeStruct((n_pad, NC_PAD), jnp.float32),
        grid=(g,),
        in_specs=[pl.BlockSpec((rb, W * IN_C), lambda i: (i, 0))]
                 + [resident(a) for a in weights],
        out_specs=pl.BlockSpec((bn, NC_PAD), lambda i: (i, 0)),
        scratch_shapes=[pltpu.VMEM((rb, ACT_W), jnp.bfloat16)],
        compiler_params=pltpu.CompilerParams(
            dimension_semantics=("parallel",),
            vmem_limit_bytes=48 * 1024 * 1024),
    )(x, *weights)

    return out[:n, :num_classes]


# ----------------------------------------------------------------------------
# Pure-JAX reference (for a loose numerical sanity check against bf16 kernel)
# ----------------------------------------------------------------------------
def _reference_forward(x, p):
    def bn(y, b, caxis):
        s = b["gamma"] / jnp.sqrt(b["var"] + EPS)
        shape = [1] * y.ndim
        shape[caxis] = -1
        return y * s.reshape(shape) + (b["beta"] - b["mean"] * s).reshape(shape)

    def conv(y, w, bias):
        y = jax.lax.conv_general_dilated(
            y, w, (1, 1), "VALID", dimension_numbers=("NCHW", "OIHW", "NCHW"))
        return y + bias.reshape(1, -1, 1, 1)

    def pool(y):
        return jax.lax.reduce_window(y, -jnp.inf, jax.lax.max,
                                     (1, 1, 2, 2), (1, 1, 2, 2), "VALID")

    y = jax.nn.relu(bn(conv(x, p["c1_w"], p["c1_b"]), p["bn1"], 1))
    y = pool(jax.nn.relu(bn(conv(y, p["c2_w"], p["c2_b"]), p["bn2"], 1)))
    y = jax.nn.relu(bn(conv(y, p["c3_w"], p["c3_b"]), p["bn3"], 1))
    y = pool(jax.nn.relu(bn(conv(y, p["c4_w"], p["c4_b"]), p["bn4"], 1)))
    y = y.reshape(y.shape[0], -1)
    y = jax.nn.relu(bn(y @ p["l1_w"].T + p["l1_b"], p["bn5"], 1))
    return y @ p["l2_w"].T + p["l2_b"]


# ----------------------------------------------------------------------------
# Parameter init (PyTorch-layout parameters, random running stats)
# ----------------------------------------------------------------------------
def make_params(key, num_classes):
    def nrm(k, shape, scale=0.05):
        return scale * jax.random.normal(k, shape, dtype=jnp.float32)

    keys = jax.random.split(key, 32)
    ki = iter(keys)
    p = {}

    def bn(c):
        return dict(
            gamma=1.0 + nrm(next(ki), (c,)),
            beta=nrm(next(ki), (c,)),
            mean=nrm(next(ki), (c,)),
            var=jax.random.uniform(next(ki), (c,), jnp.float32, 0.5, 1.5),
        )

    p["c1_w"], p["c1_b"], p["bn1"] = nrm(next(ki), (16, 3, 3, 3)), nrm(next(ki), (16,)), bn(16)
    p["c2_w"], p["c2_b"], p["bn2"] = nrm(next(ki), (16, 16, 3, 3)), nrm(next(ki), (16,)), bn(16)
    p["c3_w"], p["c3_b"], p["bn3"] = nrm(next(ki), (32, 16, 3, 3)), nrm(next(ki), (32,)), bn(32)
    p["c4_w"], p["c4_b"], p["bn4"] = nrm(next(ki), (32, 32, 3, 3)), nrm(next(ki), (32,)), bn(32)
    p["l1_w"], p["l1_b"], p["bn5"] = nrm(next(ki), (256, 512)), nrm(next(ki), (256,)), bn(256)
    p["l2_w"], p["l2_b"] = nrm(next(ki), (num_classes, 256)), nrm(next(ki), (num_classes,))
    return p


if __name__ == "__main__":
    key = jax.random.PRNGKey(0)
    k_x, k_p = jax.random.split(key)

    batch, num_classes = 2, 10
    # 28x28 input is required by Linear(512, ...): 32 * 4 * 4 = 512.
    x = jax.random.normal(k_x, (batch, 3, 28, 28), dtype=jnp.float32)

    params = make_params(k_p, num_classes)
    prep = prepare_weights(params, num_classes)   # host-side BN fold / banding

    fwd = jax.jit(cnn_mnist_forward, static_argnames=("num_classes", "block_n"))
    logits = fwd(x, prep, num_classes=num_classes)
    jax.block_until_ready(logits)
    assert logits.shape == (batch, num_classes), logits.shape

    # Loose sanity check vs a pure-JAX f32 reference (kernel uses bf16 MXU ops).
    ref = _reference_forward(x, params)
    assert bool(jnp.allclose(logits, ref, atol=5e-2, rtol=5e-2)), (
        float(jnp.max(jnp.abs(logits - ref))))

    print("KERNEL_OK")
</pallas_src>

<mosaic_0001>
module attributes {stable_mosaic.version = 11 : i64} {
  func.func @_cnn_kernel(%arg0: i32, %arg1: memref<56x84xf32, #tpu.memory_space<vmem>>, %arg2: memref<3x84x416xbf16, #tpu.memory_space<vmem>>, %arg3: memref<1x416xf32, #tpu.memory_space<vmem>>, %arg4: memref<3x416x384xbf16, #tpu.memory_space<vmem>>, %arg5: memref<1x384xf32, #tpu.memory_space<vmem>>, %arg6: memref<3x368x320xbf16, #tpu.memory_space<vmem>>, %arg7: memref<1x320xf32, #tpu.memory_space<vmem>>, %arg8: memref<3x320x256xbf16, #tpu.memory_space<vmem>>, %arg9: memref<1x256xf32, #tpu.memory_space<vmem>>, %arg10: memref<4x224x256xbf16, #tpu.memory_space<vmem>>, %arg11: memref<1x256xf32, #tpu.memory_space<vmem>>, %arg12: memref<256x128xbf16, #tpu.memory_space<vmem>>, %arg13: memref<1x128xf32, #tpu.memory_space<vmem>>, %arg14: memref<2x128xf32, #tpu.memory_space<vmem>>, %arg15: memref<56x416xbf16, #tpu.memory_space<vmem>>) attributes {dimension_semantics = [#tpu.dimension_semantics<parallel>], iteration_bounds = array<i64: 1>, scalar_prefetch = 0 : i64, scratch_operands = 1 : i64, tpu.core_type = #tpu.core_type<tc>, window_params = [{transform_indices = @transform_0, window_bounds = array<i64: 56, 84>}, {pipeline_mode = #tpu.pipeline_mode<synchronous>, transform_indices = @transform_1, window_bounds = array<i64: 3, 84, 416>}, {pipeline_mode = #tpu.pipeline_mode<synchronous>, transform_indices = @transform_2, window_bounds = array<i64: 1, 416>}, {pipeline_mode = #tpu.pipeline_mode<synchronous>, transform_indices = @transform_3, window_bounds = array<i64: 3, 416, 384>}, {pipeline_mode = #tpu.pipeline_mode<synchronous>, transform_indices = @transform_4, window_bounds = array<i64: 1, 384>}, {pipeline_mode = #tpu.pipeline_mode<synchronous>, transform_indices = @transform_5, window_bounds = array<i64: 3, 368, 320>}, {pipeline_mode = #tpu.pipeline_mode<synchronous>, transform_indices = @transform_6, window_bounds = array<i64: 1, 320>}, {pipeline_mode = #tpu.pipeline_mode<synchronous>, transform_indices = @transform_7, window_bounds = array<i64: 3, 320, 256>}, {pipeline_mode = #tpu.pipeline_mode<synchronous>, transform_indices = @transform_8, window_bounds = array<i64: 1, 256>}, {pipeline_mode = #tpu.pipeline_mode<synchronous>, transform_indices = @transform_9, window_bounds = array<i64: 4, 224, 256>}, {pipeline_mode = #tpu.pipeline_mode<synchronous>, transform_indices = @transform_10, window_bounds = array<i64: 1, 256>}, {pipeline_mode = #tpu.pipeline_mode<synchronous>, transform_indices = @transform_11, window_bounds = array<i64: 256, 128>}, {pipeline_mode = #tpu.pipeline_mode<synchronous>, transform_indices = @transform_12, window_bounds = array<i64: 1, 128>}, {transform_indices = @transform_13, window_bounds = array<i64: 2, 128>}]} {
    %c0 = arith.constant 0 : index
    %c0_0 = arith.constant 0 : index
    %0 = vector.load %arg1[%c0, %c0_0] : memref<56x84xf32, #tpu.memory_space<vmem>>, vector<56x84xf32>
    %1 = arith.truncf %0 : vector<56x84xf32> to vector<56x84xbf16>
    %c0_1 = arith.constant 0 : index
    %c0_2 = arith.constant 0 : index
    %2 = vector.load %arg15[%c0_1, %c0_2] : memref<56x416xbf16, #tpu.memory_space<vmem>>, vector<56x84xbf16>
    tpu.vector_store %arg15[%c0_1, %c0_2], %1 {strides = array<i32>} : memref<56x416xbf16, #tpu.memory_space<vmem>>, vector<56x84xbf16>,
    %c0_3 = arith.constant 0 : index
    %c0_4 = arith.constant 0 : index
    %3 = vector.load %arg15[%c0_3, %c0_4] : memref<56x416xbf16, #tpu.memory_space<vmem>>, vector<52x84xbf16>
    %c0_5 = arith.constant 0 : index
    %c0_6 = arith.constant 0 : index
    %c0_7 = arith.constant 0 : index
    %4 = vector.load %arg2[%c0_5, %c0_6, %c0_7] : memref<3x84x416xbf16, #tpu.memory_space<vmem>>, vector<1x84x416xbf16>
    %5 = vector.shape_cast %4 : vector<1x84x416xbf16> to vector<84x416xbf16>
    %cst = arith.constant dense<0.000000e+00> : vector<52x416xf32>
    %6 = tpu.matmul %3, %5, %cst {dimension_numbers = #tpu.dot_dimension_numbers<[1], [0], [0], [1], [0, 0, 1, 1], [], []>} : vector<52x84xbf16>, vector<84x416xbf16>, vector<52x416xf32> -> vector<52x416xf32>
    %c2 = arith.constant 2 : index
    %c0_8 = arith.constant 0 : index
    %7 = vector.load %arg15[%c2, %c0_8] : memref<56x416xbf16, #tpu.memory_space<vmem>>, vector<52x84xbf16>
    %c1 = arith.constant 1 : index
    %c0_9 = arith.constant 0 : index
    %c0_10 = arith.constant 0 : index
    %8 = vector.load %arg2[%c1, %c0_9, %c0_10] : memref<3x84x416xbf16, #tpu.memory_space<vmem>>, vector<1x84x416xbf16>
    %9 = vector.shape_cast %8 : vector<1x84x416xbf16> to vector<84x416xbf16>
    %cst_11 = arith.constant dense<0.000000e+00> : vector<52x416xf32>
    %10 = tpu.matmul %7, %9, %cst_11 {dimension_numbers = #tpu.dot_dimension_numbers<[1], [0], [0], [1], [0, 0, 1, 1], [], []>} : vector<52x84xbf16>, vector<84x416xbf16>, vector<52x416xf32> -> vector<52x416xf32>
    %11 = arith.addf %6, %10 : vector<52x416xf32>
    %c4 = arith.constant 4 : index
    %c0_12 = arith.constant 0 : index
    %12 = vector.load %arg15[%c4, %c0_12] : memref<56x416xbf16, #tpu.memory_space<vmem>>, vector<52x84xbf16>
    %c2_13 = arith.constant 2 : index
    %c0_14 = arith.constant 0 : index
    %c0_15 = arith.constant 0 : index
    %13 = vector.load %arg2[%c2_13, %c0_14, %c0_15] : memref<3x84x416xbf16, #tpu.memory_space<vmem>>, vector<1x84x416xbf16>
    %14 = vector.shape_cast %13 : vector<1x84x416xbf16> to vector<84x416xbf16>
    %cst_16 = arith.constant dense<0.000000e+00> : vector<52x416xf32>
    %15 = tpu.matmul %12, %14, %cst_16 {dimension_numbers = #tpu.dot_dimension_numbers<[1], [0], [0], [1], [0, 0, 1, 1], [], []>} : vector<52x84xbf16>, vector<84x416xbf16>, vector<52x416xf32> -> vector<52x416xf32>
    %16 = arith.addf %11, %15 : vector<52x416xf32>
    %c0_17 = arith.constant 0 : index
    %c0_18 = arith.constant 0 : index
    %17 = vector.load %arg3[%c0_17, %c0_18] : memref<1x416xf32, #tpu.memory_space<vmem>>, vector<1x416xf32>
    %18 = vector.broadcast %17 : vector<1x416xf32> to vector<52x416xf32>
    %19 = arith.addf %16, %18 : vector<52x416xf32>
    %cst_19 = arith.constant 0.000000e+00 : f32
    %20 = vector.broadcast %cst_19 : f32 to vector<52x416xf32>
    %21 = arith.maximumf %19, %20 : vector<52x416xf32>
    %22 = arith.truncf %21 : vector<52x416xf32> to vector<52x416xbf16>
    %c0_20 = arith.constant 0 : index
    %c0_21 = arith.constant 0 : index
    %23 = vector.load %arg15[%c0_20, %c0_21] : memref<56x416xbf16, #tpu.memory_space<vmem>>, vector<52x416xbf16>
    tpu.vector_store %arg15[%c0_20, %c0_21], %22 {strides = array<i32>} : memref<56x416xbf16, #tpu.memory_space<vmem>>, vector<52x416xbf16>,
    %c0_22 = arith.constant 0 : index
    %c0_23 = arith.constant 0 : index
    %24 = vector.load %arg15[%c0_22, %c0_23] : memref<56x416xbf16, #tpu.memory_space<vmem>>, vector<48x416xbf16>
    %c0_24 = arith.constant 0 : index
    %c0_25 = arith.constant 0 : index
    %c0_26 = arith.constant 0 : index
    %25 = vector.load %arg4[%c0_24, %c0_25, %c0_26] : memref<3x416x384xbf16, #tpu.memory_space<vmem>>, vector<1x416x384xbf16>
    %26 = vector.shape_cast %25 : vector<1x416x384xbf16> to vector<416x384xbf16>
    %cst_27 = arith.constant dense<0.000000e+00> : vector<48x384xf32>
    %27 = tpu.matmul %24, %26, %cst_27 {dimension_numbers = #tpu.dot_dimension_numbers<[1], [0], [0], [1], [0, 0, 1, 1], [], []>} : vector<48x416xbf16>, vector<416x384xbf16>, vector<48x384xf32> -> vector<48x384xf32>
    %c2_28 = arith.constant 2 : index
    %c0_29 = arith.constant 0 : index
    %28 = vector.load %arg15[%c2_28, %c0_29] : memref<56x416xbf16, #tpu.memory_space<vmem>>, vector<48x416xbf16>
    %c1_30 = arith.constant 1 : index
    %c0_31 = arith.constant 0 : index
    %c0_32 = arith.constant 0 : index
    %29 = vector.load %arg4[%c1_30, %c0_31, %c0_32] : memref<3x416x384xbf16, #tpu.memory_space<vmem>>, vector<1x416x384xbf16>
    %30 = vector.shape_cast %29 : vector<1x416x384xbf16> to vector<416x384xbf16>
    %cst_33 = arith.constant dense<0.000000e+00> : vector<48x384xf32>
    %31 = tpu.matmul %28, %30, %cst_33 {dimension_numbers = #tpu.dot_dimension_numbers<[1], [0], [0], [1], [0, 0, 1, 1], [], []>} : vector<48x416xbf16>, vector<416x384xbf16>, vector<48x384xf32> -> vector<48x384xf32>
    %32 = arith.addf %27, %31 : vector<48x384xf32>
    %c4_34 = arith.constant 4 : index
    %c0_35 = arith.constant 0 : index
    %33 = vector.load %arg15[%c4_34, %c0_35] : memref<56x416xbf16, #tpu.memory_space<vmem>>, vector<48x416xbf16>
    %c2_36 = arith.constant 2 : index
    %c0_37 = arith.constant 0 : index
    %c0_38 = arith.constant 0 : index
    %34 = vector.load %arg4[%c2_36, %c0_37, %c0_38] : memref<3x416x384xbf16, #tpu.memory_space<vmem>>, vector<1x416x384xbf16>
    %35 = vector.shape_cast %34 : vector<1x416x384xbf16> to vector<416x384xbf16>
    %cst_39 = arith.constant dense<0.000000e+00> : vector<48x384xf32>
    %36 = tpu.matmul %33, %35, %cst_39 {dimension_numbers = #tpu.dot_dimension_numbers<[1], [0], [0], [1], [0, 0, 1, 1], [], []>} : vector<48x416xbf16>, vector<416x384xbf16>, vector<48x384xf32> -> vector<48x384xf32>
    %37 = arith.addf %32, %36 : vector<48x384xf32>
    %c0_40 = arith.constant 0 : index
    %c0_41 = arith.constant 0 : index
    %38 = vector.load %arg5[%c0_40, %c0_41] : memref<1x384xf32, #tpu.memory_space<vmem>>, vector<1x384xf32>
    %39 = vector.broadcast %38 : vector<1x384xf32> to vector<48x384xf32>
    %40 = arith.addf %37, %39 : vector<48x384xf32>
    %cst_42 = arith.constant 0.000000e+00 : f32
    %41 = vector.broadcast %cst_42 : f32 to vector<48x384xf32>
    %42 = arith.maximumf %40, %41 : vector<48x384xf32>
    %43 = arith.truncf %42 : vector<48x384xf32> to vector<48x384xbf16>
    %c0_43 = arith.constant 0 : index
    %c0_44 = arith.constant 0 : index
    %44 = vector.load %arg15[%c0_43, %c0_44] : memref<56x416xbf16, #tpu.memory_space<vmem>>, vector<48x384xbf16>
    tpu.vector_store %arg15[%c0_43, %c0_44], %43 {strides = array<i32>} : memref<56x416xbf16, #tpu.memory_space<vmem>>, vector<48x384xbf16>,
    %c0_45 = arith.constant 0 : index
    %c0_46 = arith.constant 0 : index
    %45 = vector.load %arg15[%c0_45, %c0_46] : memref<56x416xbf16, #tpu.memory_space<vmem>>, vector<2x384xbf16>
    %c2_47 = arith.constant 2 : index
    %c0_48 = arith.constant 0 : index
    %46 = vector.load %arg15[%c2_47, %c0_48] : memref<56x416xbf16, #tpu.memory_space<vmem>>, vector<2x384xbf16>
    %47 = arith.maximumf %45, %46 : vector<2x384xbf16>
    %48 = vector.extract_strided_slice %47 {offsets = [0, 0], sizes = [2, 368], strides = [1, 1]} : vector<2x384xbf16> to vector<2x368xbf16>
    %49 = vector.extract_strided_slice %47 {offsets = [0, 16], sizes = [2, 368], strides = [1, 1]} : vector<2x384xbf16> to vector<2x368xbf16>
    %50 = arith.maximumf %48, %49 : vector<2x368xbf16>
    %c0_49 = arith.constant 0 : index
    %c0_50 = arith.constant 0 : index
    %51 = vector.load %arg15[%c0_49, %c0_50] : memref<56x416xbf16, #tpu.memory_space<vmem>>, vector<2x368xbf16>
    tpu.vector_store %arg15[%c0_49, %c0_50], %50 {strides = array<i32>} : memref<56x416xbf16, #tpu.memory_space<vmem>>, vector<2x368xbf16>,
    %c4_51 = arith.constant 4 : index
    %c0_52 = arith.constant 0 : index
    %52 = vector.load %arg15[%c4_51, %c0_52] : memref<56x416xbf16, #tpu.memory_space<vmem>>, vector<2x384xbf16>
    %c6 = arith.constant 6 : index
    %c0_53 = arith.constant 0 : index
    %53 = vector.load %arg15[%c6, %c0_53] : memref<56x416xbf16, #tpu.memory_space<vmem>>, vector<2x384xbf16>
    %54 = arith.maximumf %52, %53 : vector<2x384xbf16>
    %55 = vector.extract_strided_slice %54 {offsets = [0, 0], sizes = [2, 368], strides = [1, 1]} : vector<2x384xbf16> to vector<2x368xbf16>
    %56 = vector.extract_strided_slice %54 {offsets = [0, 16], sizes = [2, 368], strides = [1, 1]} : vector<2x384xbf16> to vector<2x368xbf16>
    %57 = arith.maximumf %55, %56 : vector<2x368xbf16>
    %c2_54 = arith.constant 2 : index
    %c0_55 = arith.constant 0 : index
    %58 = vector.load %arg15[%c2_54, %c0_55] : memref<56x416xbf16, #tpu.memory_space<vmem>>, vector<2x368xbf16>
    tpu.vector_store %arg15[%c2_54, %c0_55], %57 {strides = array<i32>} : memref<56x416xbf16, #tpu.memory_space<vmem>>, vector<2x368xbf16>,
    %c8 = arith.constant 8 : index
    %c0_56 = arith.constant 0 : index
    %59 = vector.load %arg15[%c8, %c0_56] : memref<56x416xbf16, #tpu.memory_space<vmem>>, vector<2x384xbf16>
    %c10 = arith.constant 10 : index
    %c0_57 = arith.constant 0 : index
    %60 = vector.load %arg15[%c10, %c0_57] : memref<56x416xbf16, #tpu.memory_space<vmem>>, vector<2x384xbf16>
    %61 = arith.maximumf %59, %60 : vector<2x384xbf16>
    %62 = vector.extract_strided_slice %61 {offsets = [0, 0], sizes = [2, 368], strides = [1, 1]} : vector<2x384xbf16> to vector<2x368xbf16>
    %63 = vector.extract_strided_slice %61 {offsets = [0, 16], sizes = [2, 368], strides = [1, 1]} : vector<2x384xbf16> to vector<2x368xbf16>
    %64 = arith.maximumf %62, %63 : vector<2x368xbf16>
    %c4_58 = arith.constant 4 : index
    %c0_59 = arith.constant 0 : index
    %65 = vector.load %arg15[%c4_58, %c0_59] : memref<56x416xbf16, #tpu.memory_space<vmem>>, vector<2x368xbf16>
    tpu.vector_store %arg15[%c4_58, %c0_59], %64 {strides = array<i32>} : memref<56x416xbf16, #tpu.memory_space<vmem>>, vector<2x368xbf16>,
    %c12 = arith.constant 12 : index
    %c0_60 = arith.constant 0 : index
    %66 = vector.load %arg15[%c12, %c0_60] : memref<56x416xbf16, #tpu.memory_space<vmem>>, vector<2x384xbf16>
    %c14 = arith.constant 14 : index
    %c0_61 = arith.constant 0 : index
    %67 = vector.load %arg15[%c14, %c0_61] : memref<56x416xbf16, #tpu.memory_space<vmem>>, vector<2x384xbf16>
    %68 = arith.maximumf %66, %67 : vector<2x384xbf16>
    %69 = vector.extract_strided_slice %68 {offsets = [0, 0], sizes = [2, 368], strides = [1, 1]} : vector<2x384xbf16> to vector<2x368xbf16>
    %70 = vector.extract_strided_slice %68 {offsets = [0, 16], sizes = [2, 368], strides = [1, 1]} : vector<2x384xbf16> to vector<2x368xbf16>
    %71 = arith.maximumf %69, %70 : vector<2x368xbf16>
    %c6_62 = arith.constant 6 : index
    %c0_63 = arith.constant 0 : index
    %72 = vector.load %arg15[%c6_62, %c0_63] : memref<56x416xbf16, #tpu.memory_space<vmem>>, vector<2x368xbf16>
    tpu.vector_store %arg15[%c6_62, %c0_63], %71 {strides = array<i32>} : memref<56x416xbf16, #tpu.memory_space<vmem>>, vector<2x368xbf16>,
    %c16 = arith.constant 16 : index
    %c0_64 = arith.constant 0 : index
    %73 = vector.load %arg15[%c16, %c0_64] : memref<56x416xbf16, #tpu.memory_space<vmem>>, vector<2x384xbf16>
    %c18 = arith.constant 18 : index
    %c0_65 = arith.constant 0 : index
    %74 = vector.load %arg15[%c18, %c0_65] : memref<56x416xbf16, #tpu.memory_space<vmem>>, vector<2x384xbf16>
    %75 = arith.maximumf %73, %74 : vector<2x384xbf16>
    %76 = vector.extract_strided_slice %75 {offsets = [0, 0], sizes = [2, 368], strides = [1, 1]} : vector<2x384xbf16> to vector<2x368xbf16>
    %77 = vector.extract_strided_slice %75 {offsets = [0, 16], sizes = [2, 368], strides = [1, 1]} : vector<2x384xbf16> to vector<2x368xbf16>
    %78 = arith.maximumf %76, %77 : vector<2x368xbf16>
    %c8_66 = arith.constant 8 : index
    %c0_67 = arith.constant 0 : index
    %79 = vector.load %arg15[%c8_66, %c0_67] : memref<56x416xbf16, #tpu.memory_space<vmem>>, vector<2x368xbf16>
    tpu.vector_store %arg15[%c8_66, %c0_67], %78 {strides = array<i32>} : memref<56x416xbf16, #tpu.memory_space<vmem>>, vector<2x368xbf16>,
    %c20 = arith.constant 20 : index
    %c0_68 = arith.constant 0 : index
    %80 = vector.load %arg15[%c20, %c0_68] : memref<56x416xbf16, #tpu.memory_space<vmem>>, vector<2x384xbf16>
    %c22 = arith.constant 22 : index
    %c0_69 = arith.constant 0 : index
    %81 = vector.load %arg15[%c22, %c0_69] : memref<56x416xbf16, #tpu.memory_space<vmem>>, vector<2x384xbf16>
    %82 = arith.maximumf %80, %81 : vector<2x384xbf16>
    %83 = vector.extract_strided_slice %82 {offsets = [0, 0], sizes = [2, 368], strides = [1, 1]} : vector<2x384xbf16> to vector<2x368xbf16>
    %84 = vector.extract_strided_slice %82 {offsets = [0, 16], sizes = [2, 368], strides = [1, 1]} : vector<2x384xbf16> to vector<2x368xbf16>
    %85 = arith.maximumf %83, %84 : vector<2x368xbf16>
    %c10_70 = arith.constant 10 : index
    %c0_71 = arith.constant 0 : index
    %86 = vector.load %arg15[%c10_70, %c0_71] : memref<56x416xbf16, #tpu.memory_space<vmem>>, vector<2x368xbf16>
    tpu.vector_store %arg15[%c10_70, %c0_71], %85 {strides = array<i32>} : memref<56x416xbf16, #tpu.memory_space<vmem>>, vector<2x368xbf16>,
    %c24 = arith.constant 24 : index
    %c0_72 = arith.constant 0 : index
    %87 = vector.load %arg15[%c24, %c0_72] : memref<56x416xbf16, #tpu.memory_space<vmem>>, vector<2x384xbf16>
    %c26 = arith.constant 26 : index
    %c0_73 = arith.constant 0 : index
    %88 = vector.load %arg15[%c26, %c0_73] : memref<56x416xbf16, #tpu.memory_space<vmem>>, vector<2x384xbf16>
    %89 = arith.maximumf %87, %88 : vector<2x384xbf16>
    %90 = vector.extract_strided_slice %89 {offsets = [0, 0], sizes = [2, 368], strides = [1, 1]} : vector<2x384xbf16> to vector<2x368xbf16>
    %91 = vector.extract_strided_slice %89 {offsets = [0, 16], sizes = [2, 368], strides = [1, 1]} : vector<2x384xbf16> to vector<2x368xbf16>
    %92 = arith.maximumf %90, %91 : vector<2x368xbf16>
    %c12_74 = arith.constant 12 : index
    %c0_75 = arith.constant 0 : index
    %93 = vector.load %arg15[%c12_74, %c0_75] : memref<56x416xbf16, #tpu.memory_space<vmem>>, vector<2x368xbf16>
    tpu.vector_store %arg15[%c12_74, %c0_75], %92 {strides = array<i32>} : memref<56x416xbf16, #tpu.memory_space<vmem>>, vector<2x368xbf16>,
    %c28 = arith.constant 28 : index
    %c0_76 = arith.constant 0 : index
    %94 = vector.load %arg15[%c28, %c0_76] : memref<56x416xbf16, #tpu.memory_space<vmem>>, vector<2x384xbf16>
    %c30 = arith.constant 30 : index
    %c0_77 = arith.constant 0 : index
    %95 = vector.load %arg15[%c30, %c0_77] : memref<56x416xbf16, #tpu.memory_space<vmem>>, vector<2x384xbf16>
    %96 = arith.maximumf %94, %95 : vector<2x384xbf16>
    %97 = vector.extract_strided_slice %96 {offsets = [0, 0], sizes = [2, 368], strides = [1, 1]} : vector<2x384xbf16> to vector<2x368xbf16>
    %98 = vector.extract_strided_slice %96 {offsets = [0, 16], sizes = [2, 368], strides = [1, 1]} : vector<2x384xbf16> to vector<2x368xbf16>
    %99 = arith.maximumf %97, %98 : vector<2x368xbf16>
    %c14_78 = arith.constant 14 : index
    %c0_79 = arith.constant 0 : index
    %100 = vector.load %arg15[%c14_78, %c0_79] : memref<56x416xbf16, #tpu.memory_space<vmem>>, vector<2x368xbf16>
    tpu.vector_store %arg15[%c14_78, %c0_79], %99 {strides = array<i32>} : memref<56x416xbf16, #tpu.memory_space<vmem>>, vector<2x368xbf16>,
    %c32 = arith.constant 32 : index
    %c0_80 = arith.constant 0 : index
    %101 = vector.load %arg15[%c32, %c0_80] : memref<56x416xbf16, #tpu.memory_space<vmem>>, vector<2x384xbf16>
    %c34 = arith.constant 34 : index
    %c0_81 = arith.constant 0 : index
    %102 = vector.load %arg15[%c34, %c0_81] : memref<56x416xbf16, #tpu.memory_space<vmem>>, vector<2x384xbf16>
    %103 = arith.maximumf %101, %102 : vector<2x384xbf16>
    %104 = vector.extract_strided_slice %103 {offsets = [0, 0], sizes = [2, 368], strides = [1, 1]} : vector<2x384xbf16> to vector<2x368xbf16>
    %105 = vector.extract_strided_slice %103 {offsets = [0, 16], sizes = [2, 368], strides = [1, 1]} : vector<2x384xbf16> to vector<2x368xbf16>
    %106 = arith.maximumf %104, %105 : vector<2x368xbf16>
    %c16_82 = arith.constant 16 : index
    %c0_83 = arith.constant 0 : index
    %107 = vector.load %arg15[%c16_82, %c0_83] : memref<56x416xbf16, #tpu.memory_space<vmem>>, vector<2x368xbf16>
    tpu.vector_store %arg15[%c16_82, %c0_83], %106 {strides = array<i32>} : memref<56x416xbf16, #tpu.memory_space<vmem>>, vector<2x368xbf16>,
    %c36 = arith.constant 36 : index
    %c0_84 = arith.constant 0 : index
    %108 = vector.load %arg15[%c36, %c0_84] : memref<56x416xbf16, #tpu.memory_space<vmem>>, vector<2x384xbf16>
    %c38 = arith.constant 38 : index
    %c0_85 = arith.constant 0 : index
    %109 = vector.load %arg15[%c38, %c0_85] : memref<56x416xbf16, #tpu.memory_space<vmem>>, vector<2x384xbf16>
    %110 = arith.maximumf %108, %109 : vector<2x384xbf16>
    %111 = vector.extract_strided_slice %110 {offsets = [0, 0], sizes = [2, 368], strides = [1, 1]} : vector<2x384xbf16> to vector<2x368xbf16>
    %112 = vector.extract_strided_slice %110 {offsets = [0, 16], sizes = [2, 368], strides = [1, 1]} : vector<2x384xbf16> to vector<2x368xbf16>
    %113 = arith.maximumf %111, %112 : vector<2x368xbf16>
    %c18_86 = arith.constant 18 : index
    %c0_87 = arith.constant 0 : index
    %114 = vector.load %arg15[%c18_86, %c0_87] : memref<56x416xbf16, #tpu.memory_space<vmem>>, vector<2x368xbf16>
    tpu.vector_store %arg15[%c18_86, %c0_87], %113 {strides = array<i32>} : memref<56x416xbf16, #tpu.memory_space<vmem>>, vector<2x368xbf16>,
    %c40 = arith.constant 40 : index
    %c0_88 = arith.constant 0 : index
    %115 = vector.load %arg15[%c40, %c0_88] : memref<56x416xbf16, #tpu.memory_space<vmem>>, vector<2x384xbf16>
    %c42 = arith.constant 42 : index
    %c0_89 = arith.constant 0 : index
    %116 = vector.load %arg15[%c42, %c0_89] : memref<56x416xbf16, #tpu.memory_space<vmem>>, vector<2x384xbf16>
    %117 = arith.maximumf %115, %116 : vector<2x384xbf16>
    %118 = vector.extract_strided_slice %117 {offsets = [0, 0], sizes = [2, 368], strides = [1, 1]} : vector<2x384xbf16> to vector<2x368xbf16>
    %119 = vector.extract_strided_slice %117 {offsets = [0, 16], sizes = [2, 368], strides = [1, 1]} : vector<2x384xbf16> to vector<2x368xbf16>
    %120 = arith.maximumf %118, %119 : vector<2x368xbf16>
    %c20_90 = arith.constant 20 : index
    %c0_91 = arith.constant 0 : index
    %121 = vector.load %arg15[%c20_90, %c0_91] : memref<56x416xbf16, #tpu.memory_space<vmem>>, vector<2x368xbf16>
    tpu.vector_store %arg15[%c20_90, %c0_91], %120 {strides = array<i32>} : memref<56x416xbf16, #tpu.memory_space<vmem>>, vector<2x368xbf16>,
    %c44 = arith.constant 44 : index
    %c0_92 = arith.constant 0 : index
    %122 = vector.load %arg15[%c44, %c0_92] : memref<56x416xbf16, #tpu.memory_space<vmem>>, vector<2x384xbf16>
    %c46 = arith.constant 46 : index
    %c0_93 = arith.constant 0 : index
    %123 = vector.load %arg15[%c46, %c0_93] : memref<56x416xbf16, #tpu.memory_space<vmem>>, vector<2x384xbf16>
    %124 = arith.maximumf %122, %123 : vector<2x384xbf16>
    %125 = vector.extract_strided_slice %124 {offsets = [0, 0], sizes = [2, 368], strides = [1, 1]} : vector<2x384xbf16> to vector<2x368xbf16>
    %126 = vector.extract_strided_slice %124 {offsets = [0, 16], sizes = [2, 368], strides = [1, 1]} : vector<2x384xbf16> to vector<2x368xbf16>
    %127 = arith.maximumf %125, %126 : vector<2x368xbf16>
    %c22_94 = arith.constant 22 : index
    %c0_95 = arith.constant 0 : index
    %128 = vector.load %arg15[%c22_94, %c0_95] : memref<56x416xbf16, #tpu.memory_space<vmem>>, vector<2x368xbf16>
    tpu.vector_store %arg15[%c22_94, %c0_95], %127 {strides = array<i32>} : memref<56x416xbf16, #tpu.memory_space<vmem>>, vector<2x368xbf16>,
    %c0_96 = arith.constant 0 : index
    %c0_97 = arith.constant 0 : index
    %129 = vector.load %arg15[%c0_96, %c0_97] : memref<56x416xbf16, #tpu.memory_space<vmem>>, vector<20x368xbf16>
    %c0_98 = arith.constant 0 : index
    %c0_99 = arith.constant 0 : index
    %c0_100 = arith.constant 0 : index
    %130 = vector.load %arg6[%c0_98, %c0_99, %c0_100] : memref<3x368x320xbf16, #tpu.memory_space<vmem>>, vector<1x368x320xbf16>
    %131 = vector.shape_cast %130 : vector<1x368x320xbf16> to vector<368x320xbf16>
    %cst_101 = arith.constant dense<0.000000e+00> : vector<20x320xf32>
    %132 = tpu.matmul %129, %131, %cst_101 {dimension_numbers = #tpu.dot_dimension_numbers<[1], [0], [0], [1], [0, 0, 1, 1], [], []>} : vector<20x368xbf16>, vector<368x320xbf16>, vector<20x320xf32> -> vector<20x320xf32>
    %c2_102 = arith.constant 2 : index
    %c0_103 = arith.constant 0 : index
    %133 = vector.load %arg15[%c2_102, %c0_103] : memref<56x416xbf16, #tpu.memory_space<vmem>>, vector<20x368xbf16>
    %c1_104 = arith.constant 1 : index
    %c0_105 = arith.constant 0 : index
    %c0_106 = arith.constant 0 : index
    %134 = vector.load %arg6[%c1_104, %c0_105, %c0_106] : memref<3x368x320xbf16, #tpu.memory_space<vmem>>, vector<1x368x320xbf16>
    %135 = vector.shape_cast %134 : vector<1x368x320xbf16> to vector<368x320xbf16>
    %cst_107 = arith.constant dense<0.000000e+00> : vector<20x320xf32>
    %136 = tpu.matmul %133, %135, %cst_107 {dimension_numbers = #tpu.dot_dimension_numbers<[1], [0], [0], [1], [0, 0, 1, 1], [], []>} : vector<20x368xbf16>, vector<368x320xbf16>, vector<20x320xf32> -> vector<20x320xf32>
    %137 = arith.addf %132, %136 : vector<20x320xf32>
    %c4_108 = arith.constant 4 : index
    %c0_109 = arith.constant 0 : index
    %138 = vector.load %arg15[%c4_108, %c0_109] : memref<56x416xbf16, #tpu.memory_space<vmem>>, vector<20x368xbf16>
    %c2_110 = arith.constant 2 : index
    %c0_111 = arith.constant 0 : index
    %c0_112 = arith.constant 0 : index
    %139 = vector.load %arg6[%c2_110, %c0_111, %c0_112] : memref<3x368x320xbf16, #tpu.memory_space<vmem>>, vector<1x368x320xbf16>
    %140 = vector.shape_cast %139 : vector<1x368x320xbf16> to vector<368x320xbf16>
    %cst_113 = arith.constant dense<0.000000e+00> : vector<20x320xf32>
    %141 = tpu.matmul %138, %140, %cst_113 {dimension_numbers = #tpu.dot_dimension_numbers<[1], [0], [0], [1], [0, 0, 1, 1], [], []>} : vector<20x368xbf16>, vector<368x320xbf16>, vector<20x320xf32> -> vector<20x320xf32>
    %142 = arith.addf %137, %141 : vector<20x320xf32>
    %c0_114 = arith.constant 0 : index
    %c0_115 = arith.constant 0 : index
    %143 = vector.load %arg7[%c0_114, %c0_115] : memref<1x320xf32, #tpu.memory_space<vmem>>, vector<1x320xf32>
    %144 = vector.broadcast %143 : vector<1x320xf32> to vector<20x320xf32>
    %145 = arith.addf %142, %144 : vector<20x320xf32>
    %cst_116 = arith.constant 0.000000e+00 : f32
    %146 = vector.broadcast %cst_116 : f32 to vector<20x320xf32>
    %147 = arith.maximumf %145, %146 : vector<20x320xf32>
    %148 = arith.truncf %147 : vector<20x320xf32> to vector<20x320xbf16>
    %c0_117 = arith.constant 0 : index
    %c0_118 = arith.constant 0 : index
    %149 = vector.load %arg15[%c0_117, %c0_118] : memref<56x416xbf16, #tpu.memory_space<vmem>>, vector<20x320xbf16>
    tpu.vector_store %arg15[%c0_117, %c0_118], %148 {strides = array<i32>} : memref<56x416xbf16, #tpu.memory_space<vmem>>, vector<20x320xbf16>,
    %c0_119 = arith.constant 0 : index
    %c0_120 = arith.constant 0 : index
    %150 = vector.load %arg15[%c0_119, %c0_120] : memref<56x416xbf16, #tpu.memory_space<vmem>>, vector<16x320xbf16>
    %c0_121 = arith.constant 0 : index
    %c0_122 = arith.constant 0 : index
    %c0_123 = arith.constant 0 : index
    %151 = vector.load %arg8[%c0_121, %c0_122, %c0_123] : memref<3x320x256xbf16, #tpu.memory_space<vmem>>, vector<1x320x256xbf16>
    %152 = vector.shape_cast %151 : vector<1x320x256xbf16> to vector<320x256xbf16>
    %cst_124 = arith.constant dense<0.000000e+00> : vector<16x256xf32>
    %153 = tpu.matmul %150, %152, %cst_124 {dimension_numbers = #tpu.dot_dimension_numbers<[1], [0], [0], [1], [0, 0, 1, 1], [], []>} : vector<16x320xbf16>, vector<320x256xbf16>, vector<16x256xf32> -> vector<16x256xf32>
    %c2_125 = arith.constant 2 : index
    %c0_126 = arith.constant 0 : index
    %154 = vector.load %arg15[%c2_125, %c0_126] : memref<56x416xbf16, #tpu.memory_space<vmem>>, vector<16x320xbf16>
    %c1_127 = arith.constant 1 : index
    %c0_128 = arith.constant 0 : index
    %c0_129 = arith.constant 0 : index
    %155 = vector.load %arg8[%c1_127, %c0_128, %c0_129] : memref<3x320x256xbf16, #tpu.memory_space<vmem>>, vector<1x320x256xbf16>
    %156 = vector.shape_cast %155 : vector<1x320x256xbf16> to vector<320x256xbf16>
    %cst_130 = arith.constant dense<0.000000e+00> : vector<16x256xf32>
    %157 = tpu.matmul %154, %156, %cst_130 {dimension_numbers = #tpu.dot_dimension_numbers<[1], [0], [0], [1], [0, 0, 1, 1], [], []>} : vector<16x320xbf16>, vector<320x256xbf16>, vector<16x256xf32> -> vector<16x256xf32>
    %158 = arith.addf %153, %157 : vector<16x256xf32>
    %c4_131 = arith.constant 4 : index
    %c0_132 = arith.constant 0 : index
    %159 = vector.load %arg15[%c4_131, %c0_132] : memref<56x416xbf16, #tpu.memory_space<vmem>>, vector<16x320xbf16>
    %c2_133 = arith.constant 2 : index
    %c0_134 = arith.constant 0 : index
    %c0_135 = arith.constant 0 : index
    %160 = vector.load %arg8[%c2_133, %c0_134, %c0_135] : memref<3x320x256xbf16, #tpu.memory_space<vmem>>, vector<1x320x256xbf16>
    %161 = vector.shape_cast %160 : vector<1x320x256xbf16> to vector<320x256xbf16>
    %cst_136 = arith.constant dense<0.000000e+00> : vector<16x256xf32>
    %162 = tpu.matmul %159, %161, %cst_136 {dimension_numbers = #tpu.dot_dimension_numbers<[1], [0], [0], [1], [0, 0, 1, 1], [], []>} : vector<16x320xbf16>, vector<320x256xbf16>, vector<16x256xf32> -> vector<16x256xf32>
    %163 = arith.addf %158, %162 : vector<16x256xf32>
    %c0_137 = arith.constant 0 : index
    %c0_138 = arith.constant 0 : index
    %164 = vector.load %arg9[%c0_137, %c0_138] : memref<1x256xf32, #tpu.memory_space<vmem>>, vector<1x256xf32>
    %165 = vector.broadcast %164 : vector<1x256xf32> to vector<16x256xf32>
    %166 = arith.addf %163, %165 : vector<16x256xf32>
    %cst_139 = arith.constant 0.000000e+00 : f32
    %167 = vector.broadcast %cst_139 : f32 to vector<16x256xf32>
    %168 = arith.maximumf %166, %167 : vector<16x256xf32>
    %169 = arith.truncf %168 : vector<16x256xf32> to vector<16x256xbf16>
    %c0_140 = arith.constant 0 : index
    %c0_141 = arith.constant 0 : index
    %170 = vector.load %arg15[%c0_140, %c0_141] : memref<56x416xbf16, #tpu.memory_space<vmem>>, vector<16x256xbf16>
    tpu.vector_store %arg15[%c0_140, %c0_141], %169 {strides = array<i32>} : memref<56x416xbf16, #tpu.memory_space<vmem>>, vector<16x256xbf16>,
    %c0_142 = arith.constant 0 : index
    %c0_143 = arith.constant 0 : index
    %171 = vector.load %arg15[%c0_142, %c0_143] : memref<56x416xbf16, #tpu.memory_space<vmem>>, vector<2x256xbf16>
    %c2_144 = arith.constant 2 : index
    %c0_145 = arith.constant 0 : index
    %172 = vector.load %arg15[%c2_144, %c0_145] : memref<56x416xbf16, #tpu.memory_space<vmem>>, vector<2x256xbf16>
    %173 = arith.maximumf %171, %172 : vector<2x256xbf16>
    %174 = vector.extract_strided_slice %173 {offsets = [0, 0], sizes = [2, 224], strides = [1, 1]} : vector<2x256xbf16> to vector<2x224xbf16>
    %175 = vector.extract_strided_slice %173 {offsets = [0, 32], sizes = [2, 224], strides = [1, 1]} : vector<2x256xbf16> to vector<2x224xbf16>
    %176 = arith.maximumf %174, %175 : vector<2x224xbf16>
    %c0_146 = arith.constant 0 : index
    %c0_147 = arith.constant 0 : index
    %177 = vector.load %arg15[%c0_146, %c0_147] : memref<56x416xbf16, #tpu.memory_space<vmem>>, vector<2x224xbf16>
    tpu.vector_store %arg15[%c0_146, %c0_147], %176 {strides = array<i32>} : memref<56x416xbf16, #tpu.memory_space<vmem>>, vector<2x224xbf16>,
    %c4_148 = arith.constant 4 : index
    %c0_149 = arith.constant 0 : index
    %178 = vector.load %arg15[%c4_148, %c0_149] : memref<56x416xbf16, #tpu.memory_space<vmem>>, vector<2x256xbf16>
    %c6_150 = arith.constant 6 : index
    %c0_151 = arith.constant 0 : index
    %179 = vector.load %arg15[%c6_150, %c0_151] : memref<56x416xbf16, #tpu.memory_space<vmem>>, vector<2x256xbf16>
    %180 = arith.maximumf %178, %179 : vector<2x256xbf16>
    %181 = vector.extract_strided_slice %180 {offsets = [0, 0], sizes = [2, 224], strides = [1, 1]} : vector<2x256xbf16> to vector<2x224xbf16>
    %182 = vector.extract_strided_slice %180 {offsets = [0, 32], sizes = [2, 224], strides = [1, 1]} : vector<2x256xbf16> to vector<2x224xbf16>
    %183 = arith.maximumf %181, %182 : vector<2x224xbf16>
    %c2_152 = arith.constant 2 : index
    %c0_153 = arith.constant 0 : index
    %184 = vector.load %arg15[%c2_152, %c0_153] : memref<56x416xbf16, #tpu.memory_space<vmem>>, vector<2x224xbf16>
    tpu.vector_store %arg15[%c2_152, %c0_153], %183 {strides = array<i32>} : memref<56x416xbf16, #tpu.memory_space<vmem>>, vector<2x224xbf16>,
    %c8_154 = arith.constant 8 : index
    %c0_155 = arith.constant 0 : index
    %185 = vector.load %arg15[%c8_154, %c0_155] : memref<56x416xbf16, #tpu.memory_space<vmem>>, vector<2x256xbf16>
    %c10_156 = arith.constant 10 : index
    %c0_157 = arith.constant 0 : index
    %186 = vector.load %arg15[%c10_156, %c0_157] : memref<56x416xbf16, #tpu.memory_space<vmem>>, vector<2x256xbf16>
    %187 = arith.maximumf %185, %186 : vector<2x256xbf16>
    %188 = vector.extract_strided_slice %187 {offsets = [0, 0], sizes = [2, 224], strides = [1, 1]} : vector<2x256xbf16> to vector<2x224xbf16>
    %189 = vector.extract_strided_slice %187 {offsets = [0, 32], sizes = [2, 224], strides = [1, 1]} : vector<2x256xbf16> to vector<2x224xbf16>
    %190 = arith.maximumf %188, %189 : vector<2x224xbf16>
    %c4_158 = arith.constant 4 : index
    %c0_159 = arith.constant 0 : index
    %191 = vector.load %arg15[%c4_158, %c0_159] : memref<56x416xbf16, #tpu.memory_space<vmem>>, vector<2x224xbf16>
    tpu.vector_store %arg15[%c4_158, %c0_159], %190 {strides = array<i32>} : memref<56x416xbf16, #tpu.memory_space<vmem>>, vector<2x224xbf16>,
    %c12_160 = arith.constant 12 : index
    %c0_161 = arith.constant 0 : index
    %192 = vector.load %arg15[%c12_160, %c0_161] : memref<56x416xbf16, #tpu.memory_space<vmem>>, vector<2x256xbf16>
    %c14_162 = arith.constant 14 : index
    %c0_163 = arith.constant 0 : index
    %193 = vector.load %arg15[%c14_162, %c0_163] : memref<56x416xbf16, #tpu.memory_space<vmem>>, vector<2x256xbf16>
    %194 = arith.maximumf %192, %193 : vector<2x256xbf16>
    %195 = vector.extract_strided_slice %194 {offsets = [0, 0], sizes = [2, 224], strides = [1, 1]} : vector<2x256xbf16> to vector<2x224xbf16>
    %196 = vector.extract_strided_slice %194 {offsets = [0, 32], sizes = [2, 224], strides = [1, 1]} : vector<2x256xbf16> to vector<2x224xbf16>
    %197 = arith.maximumf %195, %196 : vector<2x224xbf16>
    %c6_164 = arith.constant 6 : index
    %c0_165 = arith.constant 0 : index
    %198 = vector.load %arg15[%c6_164, %c0_165] : memref<56x416xbf16, #tpu.memory_space<vmem>>, vector<2x224xbf16>
    tpu.vector_store %arg15[%c6_164, %c0_165], %197 {strides = array<i32>} : memref<56x416xbf16, #tpu.memory_space<vmem>>, vector<2x224xbf16>,
    %c0_166 = arith.constant 0 : index
    %c0_167 = arith.constant 0 : index
    %199 = vector.load %arg15[%c0_166, %c0_167] : memref<56x416xbf16, #tpu.memory_space<vmem>>, vector<2x224xbf16>
    %c0_168 = arith.constant 0 : index
    %c0_169 = arith.constant 0 : index
    %c0_170 = arith.constant 0 : index
    %200 = vector.load %arg10[%c0_168, %c0_169, %c0_170] : memref<4x224x256xbf16, #tpu.memory_space<vmem>>, vector<1x224x256xbf16>
    %201 = vector.shape_cast %200 : vector<1x224x256xbf16> to vector<224x256xbf16>
    %cst_171 = arith.constant dense<0.000000e+00> : vector<2x256xf32>
    %202 = tpu.matmul %199, %201, %cst_171 {dimension_numbers = #tpu.dot_dimension_numbers<[1], [0], [0], [1], [0, 0, 1, 1], [], []>} : vector<2x224xbf16>, vector<224x256xbf16>, vector<2x256xf32> -> vector<2x256xf32>
    %c2_172 = arith.constant 2 : index
    %c0_173 = arith.constant 0 : index
    %203 = vector.load %arg15[%c2_172, %c0_173] : memref<56x416xbf16, #tpu.memory_space<vmem>>, vector<2x224xbf16>
    %c1_174 = arith.constant 1 : index
    %c0_175 = arith.constant 0 : index
    %c0_176 = arith.constant 0 : index
    %204 = vector.load %arg10[%c1_174, %c0_175, %c0_176] : memref<4x224x256xbf16, #tpu.memory_space<vmem>>, vector<1x224x256xbf16>
    %205 = vector.shape_cast %204 : vector<1x224x256xbf16> to vector<224x256xbf16>
    %cst_177 = arith.constant dense<0.000000e+00> : vector<2x256xf32>
    %206 = tpu.matmul %203, %205, %cst_177 {dimension_numbers = #tpu.dot_dimension_numbers<[1], [0], [0], [1], [0, 0, 1, 1], [], []>} : vector<2x224xbf16>, vector<224x256xbf16>, vector<2x256xf32> -> vector<2x256xf32>
    %207 = arith.addf %202, %206 : vector<2x256xf32>
    %c4_178 = arith.constant 4 : index
    %c0_179 = arith.constant 0 : index
    %208 = vector.load %arg15[%c4_178, %c0_179] : memref<56x416xbf16, #tpu.memory_space<vmem>>, vector<2x224xbf16>
    %c2_180 = arith.constant 2 : index
    %c0_181 = arith.constant 0 : index
    %c0_182 = arith.constant 0 : index
    %209 = vector.load %arg10[%c2_180, %c0_181, %c0_182] : memref<4x224x256xbf16, #tpu.memory_space<vmem>>, vector<1x224x256xbf16>
    %210 = vector.shape_cast %209 : vector<1x224x256xbf16> to vector<224x256xbf16>
    %cst_183 = arith.constant dense<0.000000e+00> : vector<2x256xf32>
    %211 = tpu.matmul %208, %210, %cst_183 {dimension_numbers = #tpu.dot_dimension_numbers<[1], [0], [0], [1], [0, 0, 1, 1], [], []>} : vector<2x224xbf16>, vector<224x256xbf16>, vector<2x256xf32> -> vector<2x256xf32>
    %212 = arith.addf %207, %211 : vector<2x256xf32>
    %c6_184 = arith.constant 6 : index
    %c0_185 = arith.constant 0 : index
    %213 = vector.load %arg15[%c6_184, %c0_185] : memref<56x416xbf16, #tpu.memory_space<vmem>>, vector<2x224xbf16>
    %c3 = arith.constant 3 : index
    %c0_186 = arith.constant 0 : index
    %c0_187 = arith.constant 0 : index
    %214 = vector.load %arg10[%c3, %c0_186, %c0_187] : memref<4x224x256xbf16, #tpu.memory_space<vmem>>, vector<1x224x256xbf16>
    %215 = vector.shape_cast %214 : vector<1x224x256xbf16> to vector<224x256xbf16>
    %cst_188 = arith.constant dense<0.000000e+00> : vector<2x256xf32>
    %216 = tpu.matmul %213, %215, %cst_188 {dimension_numbers = #tpu.dot_dimension_numbers<[1], [0], [0], [1], [0, 0, 1, 1], [], []>} : vector<2x224xbf16>, vector<224x256xbf16>, vector<2x256xf32> -> vector<2x256xf32>
    %217 = arith.addf %212, %216 : vector<2x256xf32>
    %c0_189 = arith.constant 0 : index
    %c0_190 = arith.constant 0 : index
    %218 = vector.load %arg11[%c0_189, %c0_190] : memref<1x256xf32, #tpu.memory_space<vmem>>, vector<1x256xf32>
    %219 = vector.broadcast %218 : vector<1x256xf32> to vector<2x256xf32>
    %220 = arith.addf %217, %219 : vector<2x256xf32>
    %cst_191 = arith.constant 0.000000e+00 : f32
    %221 = vector.broadcast %cst_191 : f32 to vector<2x256xf32>
    %222 = arith.maximumf %220, %221 : vector<2x256xf32>
    %223 = arith.truncf %222 : vector<2x256xf32> to vector<2x256xbf16>
    %c0_192 = arith.constant 0 : index
    %c0_193 = arith.constant 0 : index
    %224 = vector.load %arg12[%c0_192, %c0_193] : memref<256x128xbf16, #tpu.memory_space<vmem>>, vector<256x128xbf16>
    %cst_194 = arith.constant dense<0.000000e+00> : vector<2x128xf32>
    %225 = tpu.matmul %223, %224, %cst_194 {dimension_numbers = #tpu.dot_dimension_numbers<[1], [0], [0], [1], [0, 0, 1, 1], [], []>} : vector<2x256xbf16>, vector<256x128xbf16>, vector<2x128xf32> -> vector<2x128xf32>
    %c0_195 = arith.constant 0 : index
    %c0_196 = arith.constant 0 : index
    %226 = vector.load %arg13[%c0_195, %c0_196] : memref<1x128xf32, #tpu.memory_space<vmem>>, vector<1x128xf32>
    %227 = vector.broadcast %226 : vector<1x128xf32> to vector<2x128xf32>
    %228 = arith.addf %225, %227 : vector<2x128xf32>
    %c0_197 = arith.constant 0 : index
    %c0_198 = arith.constant 0 : index
    %229 = vector.load %arg14[%c0_197, %c0_198] : memref<2x128xf32, #tpu.memory_space<vmem>>, vector<2x128xf32>
    tpu.vector_store %arg14[%c0_197, %c0_198], %228 {strides = array<i32>} : memref<2x128xf32, #tpu.memory_space<vmem>>, vector<2x128xf32>,
    return
  }
  func.func @transform_0(%arg0: i32) -> (i32, i32) {
    %c0_i32 = arith.constant 0 : i32
    %c0_i32_0 = arith.constant 0 : i32
    return %arg0, %c0_i32 : i32, i32
  }
  func.func @transform_1(%arg0: i32) -> (i32, i32, i32) {
    %c0_i32 = arith.constant 0 : i32
    %c0_i32_0 = arith.constant 0 : i32
    %c0_i32_1 = arith.constant 0 : i32
    %c0_i32_2 = arith.constant 0 : i32
    return %c0_i32, %c0_i32_0, %c0_i32_1 : i32, i32, i32
  }
  func.func @transform_2(%arg0: i32) -> (i32, i32) {
    %c0_i32 = arith.constant 0 : i32
    %c0_i32_0 = arith.constant 0 : i32
    %c0_i32_1 = arith.constant 0 : i32
    return %c0_i32, %c0_i32_0 : i32, i32
  }
  func.func @transform_3(%arg0: i32) -> (i32, i32, i32) {
    %c0_i32 = arith.constant 0 : i32
    %c0_i32_0 = arith.constant 0 : i32
    %c0_i32_1 = arith.constant 0 : i32
    %c0_i32_2 = arith.constant 0 : i32
    return %c0_i32, %c0_i32_0, %c0_i32_1 : i32, i32, i32
  }
  func.func @transform_4(%arg0: i32) -> (i32, i32) {
    %c0_i32 = arith.constant 0 : i32
    %c0_i32_0 = arith.constant 0 : i32
    %c0_i32_1 = arith.constant 0 : i32
    return %c0_i32, %c0_i32_0 : i32, i32
  }
  func.func @transform_5(%arg0: i32) -> (i32, i32, i32) {
    %c0_i32 = arith.constant 0 : i32
    %c0_i32_0 = arith.constant 0 : i32
    %c0_i32_1 = arith.constant 0 : i32
    %c0_i32_2 = arith.constant 0 : i32
    return %c0_i32, %c0_i32_0, %c0_i32_1 : i32, i32, i32
  }
  func.func @transform_6(%arg0: i32) -> (i32, i32) {
    %c0_i32 = arith.constant 0 : i32
    %c0_i32_0 = arith.constant 0 : i32
    %c0_i32_1 = arith.constant 0 : i32
    return %c0_i32, %c0_i32_0 : i32, i32
  }
  func.func @transform_7(%arg0: i32) -> (i32, i32, i32) {
    %c0_i32 = arith.constant 0 : i32
    %c0_i32_0 = arith.constant 0 : i32
    %c0_i32_1 = arith.constant 0 : i32
    %c0_i32_2 = arith.constant 0 : i32
    return %c0_i32, %c0_i32_0, %c0_i32_1 : i32, i32, i32
  }
  func.func @transform_8(%arg0: i32) -> (i32, i32) {
    %c0_i32 = arith.constant 0 : i32
    %c0_i32_0 = arith.constant 0 : i32
    %c0_i32_1 = arith.constant 0 : i32
    return %c0_i32, %c0_i32_0 : i32, i32
  }
  func.func @transform_9(%arg0: i32) -> (i32, i32, i32) {
    %c0_i32 = arith.constant 0 : i32
    %c0_i32_0 = arith.constant 0 : i32
    %c0_i32_1 = arith.constant 0 : i32
    %c0_i32_2 = arith.constant 0 : i32
    return %c0_i32, %c0_i32_0, %c0_i32_1 : i32, i32, i32
  }
  func.func @transform_10(%arg0: i32) -> (i32, i32) {
    %c0_i32 = arith.constant 0 : i32
    %c0_i32_0 = arith.constant 0 : i32
    %c0_i32_1 = arith.constant 0 : i32
    return %c0_i32, %c0_i32_0 : i32, i32
  }
  func.func @transform_11(%arg0: i32) -> (i32, i32) {
    %c0_i32 = arith.constant 0 : i32
    %c0_i32_0 = arith.constant 0 : i32
    %c0_i32_1 = arith.constant 0 : i32
    return %c0_i32, %c0_i32_0 : i32, i32
  }
  func.func @transform_12(%arg0: i32) -> (i32, i32) {
    %c0_i32 = arith.constant 0 : i32
    %c0_i32_0 = arith.constant 0 : i32
    %c0_i32_1 = arith.constant 0 : i32
    return %c0_i32, %c0_i32_0 : i32, i32
  }
  func.func @transform_13(%arg0: i32) -> (i32, i32) {
    %c0_i32 = arith.constant 0 : i32
    %c0_i32_0 = arith.constant 0 : i32
    return %arg0, %c0_i32 : i32, i32
  }
}

</mosaic_0001>

<bundles_post_ra>
// kernel: cnn_mnist_forward.1
= control target key start
LH: loop header
LB: loop body
LE: loop exit
PB: predicated region body
PF: predicated region fallthrough
CT: control target
= control target key end

     0   :  { %18 = vsyncpa [#allocation4], 0  ;;  %s14968_s0 = inlined_call_operand.vmem [shape: f32[56,84], index: 0, kind: input, shape index: {}]   ;;  %s14969_s1 = inlined_call_operand.vmem [shape: bf16[3,84,416], index: 1, kind: input, shape index: {}]   ;;  %s14970_s2 = inlined_call_operand.vmem [shape: f32[1,416], index: 2, kind: input, shape index: {}]   ;;  %s14971_s3 = inlined_call_operand.vmem [shape: bf16[3,416,384], index: 3, kind: input, shape index: {}]   ;;  %s14972_s4 = inlined_call_operand.vmem [shape: f32[1,384], index: 4, kind: input, shape index: {}]   ;;  %s14973_s5 = inlined_call_operand.vmem [shape: bf16[3,368,320], index: 5, kind: input, shape index: {}]   ;;  %s14974_s6 = inlined_call_operand.vmem [shape: f32[1,320], index: 6, kind: input, shape index: {}]   ;;  %s14975_s7 = inlined_call_operand.vmem [shape: bf16[3,320,256], index: 7, kind: input, shape index: {}]   ;;  %s14976_s8 = inlined_call_operand.vmem [shape: f32[1,256], index: 8, kind: input, shape index: {}]   ;;  %s14977_s9 = inlined_call_operand.hbm [shape: bf16[4,224,256], index: 9, kind: input, shape index: {}]   ;;  %s14978_s10 = inlined_call_operand.vmem [shape: f32[1,256], index: 10, kind: input, shape index: {}]   ;;  %s14979_s11 = inlined_call_operand.vmem [shape: bf16[256,128], index: 11, kind: input, shape index: {}]   ;;  %s14980_s12 = inlined_call_operand.vmem [shape: f32[1,128], index: 12, kind: input, shape index: {}]   ;;  %s14981_s13 = inlined_call_operand.hbm [shape: f32[2,128], index: 13, kind: output, shape index: {}]  }
   0x1   :  { %19 = vsyncpa [#allocation5], 0  ;;  %s11810_s25 = smov [#allocation3]  }
   0x2   :  { %s43_s26 = sshll.u32 %s11810_s25, 4  ;;  %s44_s26 = int_to_ptr.vmem [resolvable:$true] %s43_s26 }
   0x3   :  { %s11774_s27 = scalar_lea.vmem %s44_s26, 14336  ;;  %p11779_p1 = scmp.lt.s32.totalorder %s44_s26, %s44_s26 }
   0x4   :  { %p11775_p0 = scmp.ne.s32.totalorder %s44_s26, %s11774_s27  ;;  %p11780_p2 = scmp.lt.s32.totalorder %s11774_s27, %s11774_s27 }
   0x6   :  { %p11781_p3 = por %p11780_p2, %p11779_p1 }
   0x8   :  { %p11782_p4 = pnand %p11781_p3, %p11775_p0 }
   0xa   :  { %11785 = shalt.err (!%p11782_p4)
}
   0xb   :  { %s11811_s28 = smov 128   ;;  %s11812_s29 = smov 8  }
   0xc   :  { %49 = dma.hbm_to_vmem [thread:$0]  %s14977_s9, 14336, %s44_s26, [#allocation4], %s11811_s28, %s11811_s28, %s11812_s29  }
   0xd   :  { %11806 = dma.done.wait [#allocation4], 14336  }
   0xe   :  { %11807 = vsyncadd [#allocation4], 4294952960  ;;  %v14982_v0 = vmov 0   ;;  %v8837_v1 = vld [vmem:[%s14969_s1 + $0x150] sm:$0x33]  ;;  %vm307_vm0 = vcmask 1041408  }
   0xf   :  { %352 = vmatprep.mubr.bf16.mxu0 %v14982_v0  ;;  %423 = vmatprep.mubr.bf16.mxu1 %v14982_v0  ;;  %v8838_v2 = vld [vmem:[%s14969_s1 + $0x158] sm:$0x33]  ;;  %v8864_v3 = vcombine.high %v8837_v1, %v8837_v1  ;;  %v8863_v5 = vcombine.low %v8837_v1, %v8837_v1  ;;  %v10649_v7 = vld [vmem:[%s14969_s1 + $0x134] ss:$16 sps:$4 sm:$0xff]   ;;  %v10653_v11 = vld [vmem:[%s14969_s1 + $0x130] ss:$16 sps:$4 sm:$0xff]  }
  0x10   :  { %v8866_v4 = vcombine.high %v8838_v2, %v8838_v2  ;;  %v8865_v6 = vcombine.low %v8838_v2, %v8838_v2  ;;  %v10651_v8 = vld [vmem:[%s14969_s1 + $0x13c] ss:$16 sps:$4 sm:$0xff]   ;;  %v10654_v12 = vld [vmem:[%s14969_s1 + $0x138] ss:$16 sps:$4 sm:$0xff]   ;;  %v10655_v13 = vld [vmem:[%s14969_s1 + $0x114] ss:$16 sps:$4 sm:$0xff]  }
  0x11   :  { %8867 = vmatprep.subr.msk.bf16.mxu0 %vm307_vm0, %v8864_v3  ;;  %v309_v9 = vsel %vm307_vm0, %v8863_v5, 0  ;;  %v10657_v14 = vld [vmem:[%s14969_s1 + $0x11c] ss:$16 sps:$4 sm:$0xff]   ;;  %v10659_v15 = vld [vmem:[%s14969_s1 + $0x110] ss:$16 sps:$4 sm:$0xff]   ;;  %vm96_vm1 = vcmask 683008  }
  0x12   :  { %8872 = vmatprep.subr.msk.bf16.mxu1 %vm307_vm0, %v8866_v4  ;;  %v315_v10 = vsel %vm307_vm0, %v8865_v6, 0  ;;  %325 = vmatpush1.bf16.msra.mxu0 %v309_v9  ;;  %v10660_v16 = vld [vmem:[%s14969_s1 + $0x118] ss:$16 sps:$4 sm:$0xff]   ;;  %v10661_v17 = vld [vmem:[%s14969_s1 + $0xf4] ss:$16 sps:$4 sm:$0xff]   ;;  %vm176_vm2 = vcmask 1046528  }
  0x13   :  { %396 = vmatpush1.bf16.msra.mxu1 %v315_v10  ;;  %326 = vmatprep.subr.bf16.mxu0 %v10649_v7  ;;  %v10663_v18 = vld [vmem:[%s14969_s1 + $0xfc] ss:$16 sps:$4 sm:$0xff]   ;;  %v10665_v19 = vld [vmem:[%s14969_s1 + $0xf0] ss:$16 sps:$4 sm:$0xff]   ;;  %v10666_v20 = vld [vmem:[%s14969_s1 + $0xf8] ss:$16 sps:$4 sm:$0xff]  }
  0x14   :  { %397 = vmatprep.subr.bf16.mxu1 %v10651_v8  ;;  %v10667_v21 = vld [vmem:[%s14969_s1 + $0xd4] ss:$16 sps:$4 sm:$0xff]   ;;  %v10669_v22 = vld [vmem:[%s14969_s1 + $0xdc] ss:$16 sps:$4 sm:$0xff]   ;;  %v10671_v23 = vld [vmem:[%s14969_s1 + $0xd0] ss:$16 sps:$4 sm:$0xff]  }
  0x15   :  { %v60_v24 = vld [vmem:[%s14968_s0] sm:$0xff]  ;;  %v61_v25 = vld [vmem:[%s14968_s0 + $0x8] sm:$0xff]  ;;  %v62_v26 = vld [vmem:[%s14968_s0 + $0x10] sm:$0xff]  ;;  %vm294_vm3 = vcmask 687104   ;;  %vm775_vm4 = vcmask 1045504   ;;  %vm1254_vm5 = vcmask 1043456  }
  0x16   :  { %327 = vmatpush1.bf16.msra.mxu0 %v10653_v11  ;;  %v10672_v27 = vld [vmem:[%s14969_s1 + $0xd8] ss:$16 sps:$4 sm:$0xff]   ;;  %v10308_v29 = vpack.c.bf16 %v60_v24, %v60_v24  ;;  %v10309_v30 = vpack.c.bf16 %v61_v25, %v61_v25  ;;  %v10310_v31 = vpack.c.bf16 %v62_v26, %v62_v26  ;;  %v10673_v32 = vld [vmem:[%s14969_s1 + $0xb4] ss:$16 sps:$4 sm:$0xff]   ;;  %v10675_v33 = vld [vmem:[%s14969_s1 + $0xbc] ss:$16 sps:$4 sm:$0xff]  }
  0x17   :  { %398 = vmatpush1.bf16.msra.mxu1 %v10654_v12  ;;  %328 = vmatprep.subr.bf16.mxu0 %v10655_v13  ;;  %v63_v28 = vld [vmem:[%s14968_s0 + $0x18] sm:$0xff]  ;;  %v132_v35 = vld [vmem:[%s14969_s1 + $0xa8] sm:$0x33]  ;;  %v64_v36 = vld [vmem:[%s14968_s0 + $0x20] sm:$0xff]  ;;  %vm1255_vm6 = vcmask 261124   ;;  %vm1269_vm8 = vcmask 259076  }
  0x18   :  { %399 = vmatprep.subr.bf16.mxu1 %v10657_v14  ;;  %v10311_v34 = vpack.c.bf16 %v63_v28, %v63_v28  ;;  %97 = vst.msk [vmem:[#allocation2] sm:$0xf] %vm96_vm1, %v10308_v29  ;;  %98 = vst.msk [vmem:[#allocation2 + $0x10] sm:$0xf] %vm96_vm1, %v10309_v30  ;;  %v65_v37 = vld [vmem:[%s14968_s0 + $0x28] sm:$0xff]  ;;  %v10312_v38 = vpack.c.bf16 %v64_v36, %v64_v36  ;;  %v66_v43 = vld [vmem:[%s14968_s0 + $0x30] sm:$0xff]  ;;  %v8902_v44 = vcombine.high %v132_v35, %v132_v35 }
  0x19   :  { %99 = vst.msk [vmem:[#allocation2 + $0x20] sm:$0xf] %vm96_vm1, %v10310_v31  ;;  %v10313_v39 = vpack.c.bf16 %v65_v37, %v65_v37  ;;  %v131_v40 = vld [vmem:[%s14969_s1 + $0xa0] sm:$0x33]  ;;  %v10678_v42 = vld [vmem:[%s14969_s1 + $0xb8] ss:$16 sps:$4 sm:$0xff]   ;;  %v10314_v46 = vpack.c.bf16 %v66_v43, %v66_v43  ;;  %v8901_v50 = vcombine.low %v132_v35, %v132_v35  ;;  %vm12508_vm7 = vmor %vm1255_vm6, %vm1254_vm5 }
  0x1a   :  { %329 = vmatpush1.bf16.msra.mxu0 %v10659_v15  ;;  %100 = vst.msk [vmem:[#allocation2 + $0x30] sm:$0xf] %vm96_vm1, %v10311_v34  ;;  %v10677_v41 = vld [vmem:[%s14969_s1 + $0xb0] ss:$16 sps:$4 sm:$0xff]   ;;  %101 = vst.msk [vmem:[#allocation2 + $0x40] sm:$0xf] %vm96_vm1, %v10312_v38  ;;  %v8900_v45 = vcombine.high %v131_v40, %v131_v40  ;;  %v8899_v53 = vcombine.low %v131_v40, %v131_v40 }
  0x1b   :  { %400 = vmatpush1.bf16.msra.mxu1 %v10660_v16  ;;  %330 = vmatprep.subr.bf16.mxu0 %v10661_v17  ;;  %102 = vst.msk [vmem:[#allocation2 + $0x50] sm:$0xf] %vm96_vm1, %v10313_v39  ;;  %103 = vst.msk [vmem:[#allocation2 + $0x60] sm:$0xf] %vm96_vm1, %v10314_v46  ;;  %v597_v56 = vsel %vm307_vm0, %v8901_v50, 0  ;;  %vm2008_vm9 = vcmask 261120  }
  0x1c   :  { %401 = vmatprep.subr.bf16.mxu1 %v10663_v18  ;;  %v10686_v57 = vld [vmem:[%s14969_s1 + $0x8c] ss:$16 sps:$4 sm:$0xff]   ;;  %v591_v59 = vsel %vm307_vm0, %v8899_v53, 0  ;;  %v10695_v60 = vld [vmem:[%s14969_s1 + $0x84] ss:$16 sps:$4 sm:$0xff]   ;;  %vm1270_vm10 = vmor %vm1269_vm8, %vm307_vm0  ;;  %s11814_s23 = smov 112  }
  0x1d   :  { %v10684_v61 = vld [vmem:[%s14969_s1 + $0x88] ss:$16 sps:$4 sm:$0xff]   ;;  %v10692_v63 = vld [vmem:[%s14969_s1 + $0x6c] ss:$16 sps:$4 sm:$0xff]   ;;  %v10693_v1 = vld [vmem:[%s14969_s1 + $0x80] ss:$16 sps:$4 sm:$0xff]  }
  0x1e   :  { %331 = vmatpush1.bf16.msra.mxu0 %v10665_v19  ;;  %v10690_v2 = vld [vmem:[%s14969_s1 + $0x68] ss:$16 sps:$4 sm:$0xff]   ;;  %v10699_v5 = vld [vmem:[%s14969_s1 + $0x64] ss:$16 sps:$4 sm:$0xff]   ;;  %v10697_v6 = vld [vmem:[%s14969_s1 + $0x60] ss:$16 sps:$4 sm:$0xff]  }
  0x1f   :  { %402 = vmatpush1.bf16.msra.mxu1 %v10666_v20  ;;  %332 = vmatprep.subr.bf16.mxu0 %v10667_v21  ;;  %v11996_v47 = vld [vmem:[#allocation2 + $0x10] sm:$0xf]  ;;  %v133_v48 = vld [vmem:[#allocation2] sm:$0xe]  ;;  %v10702_v7 = vld [vmem:[%s14969_s1 + $0x4c] ss:$16 sps:$4 sm:$0xff]  }
  0x20   :  { %403 = vmatprep.subr.bf16.mxu1 %v10669_v22  ;;  %v8839_v51 = vcombine.low %v133_v48, %v11996_v47  ;;  %v10705_v8 = vld [vmem:[%s14969_s1 + $0x44] ss:$16 sps:$4 sm:$0xff]   ;;  %v10700_v10 = vld [vmem:[%s14969_s1 + $0x48] ss:$16 sps:$4 sm:$0xff]   ;;  %v10708_v11 = vld [vmem:[%s14969_s1 + $0x2c] ss:$16 sps:$4 sm:$0xff]  }
  0x21   :  { %v11998_v49 = vld [vmem:[#allocation2 + $0x20] ss:$16 sps:$4 sm:$0xff]   ;;  %v10706_v14 = vld [vmem:[%s14969_s1 + $0x28] ss:$16 sps:$4 sm:$0xff]   ;;  %v10711_v16 = vld [vmem:[%s14969_s1 + $0x24] ss:$16 sps:$4 sm:$0xff]  }
  0x22   :  { %333 = vmatpush1.bf16.msra.mxu0 %v10671_v23  ;;  %v178_v52 = vrot.slane %v11998_v49, 1  ;;  %v177_v54 = vrot.slane %v8839_v51, 1  ;;  %v12004_v55 = vld [vmem:[#allocation2 + $0x40] ss:$16 sps:$4 sm:$0xff]   ;;  %v10714_v17 = vld [vmem:[%s14969_s1 + $0xc] ss:$16 sps:$4 sm:$0xff]  }
  0x23   :  { %404 = vmatpush1.bf16.msra.mxu1 %v10672_v27  ;;  %334 = vmatprep.subr.bf16.mxu0 %v10673_v32  ;;  %v180_v62 = vrot.slane %v12004_v55, 1  ;;  %v10696_v4 = vld [vmem:[#allocation2 + $0x60] ss:$0 sps:$4 sm:$0x77]   ;;  %v10717_v18 = vld [vmem:[%s14969_s1 + $0x4] ss:$16 sps:$4 sm:$0xff]  }
  0x24   :  { %405 = vmatprep.subr.bf16.mxu1 %v10675_v33  ;;  %v179_v58 = vsel %vm176_vm2, %v177_v54, %v178_v52  ;;  %v182_v9 = vrot.slane %v10696_v4, 1  ;;  %v10703_v12 = vld [vmem:[%s14969_s1 + $0x40] ss:$16 sps:$4 sm:$0xff]   ;;  %v8934_v19 = vld [vmem:[%s14969_s1 + $0x208] sm:$0x33]  ;;  %vm3940_vm11 = vcmask 916480  }
  0x25   :  { %v181_v3 = vsel %vm176_vm2, %v178_v52, %v180_v62  ;;  %v10709_v15 = vld [vmem:[%s14969_s1 + $0x20] ss:$16 sps:$4 sm:$0xff]   ;;  %v10712_v20 = vld [vmem:[%s14969_s1 + $0x8] ss:$16 sps:$4 sm:$0xff]   ;;  %v8960_v23 = vcombine.high %v8934_v19, %v8934_v19  ;;  %v8959_v26 = vcombine.low %v8934_v19, %v8934_v19  ;;  %v10722_v28 = vld [vmem:[%s14969_s1 + $0x1ec] ss:$16 sps:$4 sm:$0xff]  }
  0x26   :  { %335 = vmatpush1.bf16.msra.mxu0 %v10677_v41  ;;  %v183_v13 = vsel %vm176_vm2, %v180_v62, %v182_v9  ;;  %v10715_v21 = vld [vmem:[%s14969_s1] ss:$16 sps:$4 sm:$0xff]   ;;  %v10730_v31 = vld [vmem:[%s14969_s1 + $0x1e4] ss:$16 sps:$4 sm:$0xff]   ;;  %v10720_v32 = vld [vmem:[%s14969_s1 + $0x1e8] ss:$16 sps:$4 sm:$0xff]  }
  0x27   :  { %406 = vmatpush1.bf16.msra.mxu1 %v10678_v42  ;;  %8903 = vmatprep.subr.msk.bf16.mxu0 %vm307_vm0, %v8900_v45  ;;  %v8933_v22 = vld [vmem:[%s14969_s1 + $0x200] sm:$0x33]  ;;  %v912_v30 = vsel %vm307_vm0, %v8959_v26, 0  ;;  %v10727_v34 = vld [vmem:[%s14969_s1 + $0x1cc] ss:$16 sps:$4 sm:$0xff]   ;;  %vm3986_vm12 = vcmask 910337  }
  0x28   :  { %8908 = vmatprep.subr.msk.bf16.mxu1 %vm307_vm0, %v8902_v44  ;;  %v8958_v24 = vcombine.high %v8933_v22, %v8933_v22  ;;  %v104_v25 = vld [vmem:[#allocation2] sm:$0xf]  ;;  %v8957_v29 = vcombine.low %v8933_v22, %v8933_v22  ;;  %v10725_v36 = vld [vmem:[%s14969_s1 + $0x1c8] ss:$16 sps:$4 sm:$0xff]   ;;  %v10733_v37 = vld [vmem:[%s14969_s1 + $0x1c4] ss:$16 sps:$4 sm:$0xff]  }
  0x29   :  { %8868 = vmatmul.mubr.msk.bf16.vlgmr.msra.gmra.mxu0 %vm294_vm3, %v179_v58  ;;  %v8877_v27 = vcombine.low %v104_v25, %v11996_v47  ;;  %v10728_v35 = vld [vmem:[%s14969_s1 + $0x1e0] ss:$16 sps:$4 sm:$0xff]   ;;  %v10736_v39 = vld [vmem:[%s14969_s1 + $0x1ac] ss:$16 sps:$4 sm:$0xff]   ;;  %v10739_v40 = vld [vmem:[%s14969_s1 + $0x1a4] ss:$16 sps:$4 sm:$0xff]  }
  0x2a   :  { %8873 = vmatmul.mubr.msk.bf16.vlgmr.msra.gmra.mxu1 %vm294_vm3, %v179_v58  ;;  %362 = vmatprep.mubr.bf16.mxu0 %v14982_v0  ;;  %v906_v33 = vsel %vm307_vm0, %v8957_v29, 0  ;;  %v10731_v38 = vld [vmem:[%s14969_s1 + $0x1c0] ss:$16 sps:$4 sm:$0xff]   ;;  %v10734_v41 = vld [vmem:[%s14969_s1 + $0x1a8] ss:$16 sps:$4 sm:$0xff]   ;;  %v777_v58 = vrot.slane %v11998_v49, 2 }
  0x2b   :  { %678 = vmatpush1.bf16.msra.mxu1 %v597_v56  ;;  %433 = vmatprep.mubr.bf16.mxu1 %v14982_v0  ;;  %v10742_v42 = vld [vmem:[%s14969_s1 + $0x18c] ss:$16 sps:$4 sm:$0xff]   ;;  %v10737_v43 = vld [vmem:[%s14969_s1 + $0x1a0] ss:$16 sps:$4 sm:$0xff]   ;;  %v10740_v44 = vld [vmem:[%s14969_s1 + $0x188] ss:$16 sps:$4 sm:$0xff]  }
  0x2c   :  { %679 = vmatprep.subr.bf16.mxu1 %v10686_v57  ;;  %607 = vmatpush1.bf16.msra.mxu0 %v591_v59  ;;  %v10746_v45 = vld [vmem:[%s14969_s1 + $0x184] ss:$16 sps:$4 sm:$0xff]   ;;  %v10744_v46 = vld [vmem:[%s14969_s1 + $0x180] ss:$16 sps:$4 sm:$0xff]   ;;  %v10749_v48 = vld [vmem:[%s14969_s1 + $0x16c] ss:$16 sps:$4 sm:$0xff]  }
  0x2d   :  { %608 = vmatprep.subr.bf16.mxu0 %v10695_v60  ;;  %v10752_v50 = vld [vmem:[%s14969_s1 + $0x164] ss:$16 sps:$4 sm:$0xff]   ;;  %v10747_v51 = vld [vmem:[%s14969_s1 + $0x168] ss:$16 sps:$4 sm:$0xff]   ;;  %v744_v52 = vld [vmem:[#allocation2] sm:$0xc] }
  0x2e   :  { %v10750_v53 = vld [vmem:[%s14969_s1 + $0x160] ss:$16 sps:$4 sm:$0xff]   ;;  %v8935_v56 = vcombine.low %v744_v52, %v11996_v47  ;;  %v779_v47 = vrot.slane %v12004_v55, 2  ;;  %v10760_v4 = vld [vmem:[%s14971_s3 + $0x2e8] ss:$12 sps:$4 sm:$0xff]   ;;  %vm3947_vm13 = vcmask 909312  }
  0x2f   :  { %680 = vmatpush1.bf16.msra.mxu1 %v10684_v61  ;;  %v10743_v54 = vld [vmem:[#allocation2 + $0x60] ss:$0 sps:$4 sm:$0x33]   ;;  %v10783_v19 = vld [vmem:[%s14971_s3 + $0x484] ss:$12 sps:$4 sm:$0xff]   ;;  %vm4060_vm14 = vcmask 912387  }
  0x30   :  { %681 = vmatprep.subr.bf16.mxu1 %v10692_v63  ;;  %609 = vmatpush1.bf16.msra.mxu0 %v10693_v1  ;;  %v776_v57 = vrot.slane %v8935_v56, 2  ;;  %v10753_v60 = vld [vmem:[#allocation2 + $0x60] ss:$0 sps:$4 sm:$0xff]   ;;  %v780_v61 = vsel %vm775_vm4, %v777_v58, %v779_v47  ;;  %v10754_v63 = vld [vmem:[%s14971_s3 + $0x318] ss:$12 sps:$4 sm:$0xff]   ;;  %vm4023_vm15 = vcmask 911362  }
  0x31   :  { %8869 = vmatmul.mubr.msk.bf16.gmra.mxu0 %vm294_vm3, %v181_v3  ;;  %610 = vmatprep.subr.bf16.mxu0 %v10699_v5  ;;  %v10759_v1 = vld [vmem:[%s14971_s3 + $0x304] ss:$12 sps:$4 sm:$0xff]   ;;  %v10765_v5 = vld [vmem:[%s14971_s3 + $0x2d4] ss:$12 sps:$4 sm:$0xff]   ;;  %v10798_v25 = vld [vmem:[%s14971_s3 + $0x3ac] ss:$12 sps:$4 sm:$0xff]  }
  0x32   :  { %8874 = vmatmul.mubr.msk.bf16.gmra.mxu1 %vm294_vm3, %v181_v3  ;;  %372 = vmatprep.mubr.bf16.mxu0 %v14982_v0  ;;  %v778_v59 = vsel %vm775_vm4, %v776_v57, %v777_v58  ;;  %v10762_v3 = vld [vmem:[%s14971_s3 + $0x2ec] ss:$12 sps:$4 sm:$0xff]   ;;  %v10796_v26 = vld [vmem:[%s14971_s3 + $0x3a8] ss:$12 sps:$4 sm:$0xff]   ;;  %v10829_v52 = vld [vmem:[%s14971_s3 + $0x4b0] ss:$12 sps:$4 sm:$0xff]  }
  0x33   :  { %682 = vmatpush1.bf16.msra.mxu1 %v10690_v2  ;;  %443 = vmatprep.mubr.bf16.mxu1 %v14982_v0  ;;  %v10757_v2 = vld [vmem:[%s14971_s3 + $0x300] ss:$12 sps:$4 sm:$0xff]   ;;  %vm6517_vm1 = vcmask 517120   ;;  %vm7665_vm6 = vcmask 1041409   ;;  %s11816_s28 = smov [#allocation6]  }
  0x34   :  { %683 = vmatprep.subr.bf16.mxu1 %v10702_v7  ;;  %611 = vmatpush1.bf16.msra.mxu0 %v10697_v6  ;;  %v10763_v6 = vld [vmem:[%s14971_s3 + $0x2d0] ss:$12 sps:$4 sm:$0xff]   ;;  %v10790_v22 = vld [vmem:[%s14971_s3 + $0x3c0] ss:$12 sps:$4 sm:$0xff]   ;;  %s8801_s1 = sshll.u32 %s11816_s28, 4  ;;  %s8802_s1 = int_to_ptr.vmem [resolvable:$true] %s8801_s1 }
  0x35   :  { %612 = vmatprep.subr.bf16.mxu0 %v10705_v8  ;;  %v10768_v7 = vld [vmem:[%s14971_s3 + $0x2bc] ss:$12 sps:$4 sm:$0xff]   ;;  %v10766_v8 = vld [vmem:[%s14971_s3 + $0x2b8] ss:$12 sps:$4 sm:$0xff]   ;;  %v10804_v29 = vld [vmem:[%s14971_s3 + $0x394] ss:$12 sps:$4 sm:$0xff]   ;;  %p11791_p6 = scmp.lt.s32.totalorder %s8802_s1, %s8802_s1 }
  0x37   :  { %684 = vmatpush1.bf16.msra.mxu1 %v10700_v10  ;;  %v10769_v10 = vld [vmem:[%s14971_s3 + $0x2a0] ss:$12 sps:$4 sm:$0xff]  }
  0x38   :  { %685 = vmatprep.subr.bf16.mxu1 %v10708_v11  ;;  %613 = vmatpush1.bf16.msra.mxu0 %v10703_v12  ;;  %v10774_v11 = vld [vmem:[%s14971_s3 + $0x28c] ss:$12 sps:$4 sm:$0xff]   ;;  %v10772_v12 = vld [vmem:[%s14971_s3 + $0x288] ss:$12 sps:$4 sm:$0xff]  }
  0x39   :  { %8870 = vmatmul.mubr.msk.bf16.gmra.mxu0 %vm294_vm3, %v183_v13  ;;  %614 = vmatprep.subr.bf16.mxu0 %v10711_v16  ;;  %v10775_v16 = vld [vmem:[%s14971_s3 + $0x498] ss:$12 sps:$4 sm:$0xff]  }
  0x3a   :  { %8875 = vmatmul.mubr.msk.bf16.gmra.mxu1 %vm294_vm3, %v183_v13  ;;  %382 = vmatprep.mubr.bf16.mxu0 %v14982_v0  ;;  %v10780_v13 = vld [vmem:[%s14971_s3 + $0x274] ss:$12 sps:$4 sm:$0xff]  }
  0x3b   :  { %453 = vmatprep.mubr.bf16.mxu1 %v14982_v0  ;;  %686 = vmatpush1.bf16.msra.mxu1 %v10706_v14  ;;  %v10778_v14 = vld [vmem:[%s14971_s3 + $0x270] ss:$12 sps:$4 sm:$0xff]  }
  0x3c   :  { %615 = vmatpush1.bf16.msra.mxu0 %v10709_v15  ;;  %687 = vmatprep.subr.bf16.mxu1 %v10714_v17  ;;  %v10777_v15 = vld [vmem:[%s14971_s3 + $0x49c] ss:$12 sps:$4 sm:$0xff]  }
  0x3d   :  { %616 = vmatprep.subr.bf16.mxu0 %v10717_v18  ;;  %v10786_v17 = vld [vmem:[%s14971_s3 + $0x3dc] ss:$12 sps:$4 sm:$0xff]   ;;  %v10784_v18 = vld [vmem:[%s14971_s3 + $0x3d8] ss:$12 sps:$4 sm:$0xff]  }
  0x3f   :  { %688 = vmatpush1.bf16.msra.mxu1 %v10712_v20  ;;  %v10781_v20 = vld [vmem:[%s14971_s3 + $0x480] ss:$12 sps:$4 sm:$0xff]  }
  0x40   :  { %617 = vmatpush1.bf16.msra.mxu0 %v10715_v21  ;;  %8966 = vmatprep.subr.msk.bf16.mxu1 %vm307_vm0, %v8960_v23  ;;  %v10792_v21 = vld [vmem:[%s14971_s3 + $0x3c4] ss:$12 sps:$4 sm:$0xff]   ;;  %v10789_v23 = vld [vmem:[%s14971_s3 + $0x46c] ss:$12 sps:$4 sm:$0xff]  }
  0x41   :  { %8871 = vmatmul.mubr.msk.bf16.gmra.mxu0 %vm294_vm3, %v182_v9  ;;  %8961 = vmatprep.subr.msk.bf16.mxu0 %vm307_vm0, %v8958_v24  ;;  %v10787_v24 = vld [vmem:[%s14971_s3 + $0x468] ss:$12 sps:$4 sm:$0xff]   ;;  %vm6512_vm0 = vcmask 519168  }
  0x42   :  { %8876 = vmatmul.mubr.msk.bf16.gmra.mxu1 %vm294_vm3, %v182_v9  ;;  %634 = vmatprep.mubr.bf16.mxu0 %v14982_v0  ;;  %v10771_v9 = vld [vmem:[%s14971_s3 + $0x2a4] ss:$12 sps:$4 sm:$0xff]  }
  0x43   :  { %705 = vmatprep.mubr.bf16.mxu1 %v14982_v0 }
  0x49   :  { %8904 = vmatmul.mubr.msk.bf16.vlgmr.msra.gmra.mxu0 %vm294_vm3, %v8877_v27 }
  0x4a   :  { %8909 = vmatmul.mubr.msk.bf16.vlgmr.msra.gmra.mxu1 %vm294_vm3, %v8877_v27  ;;  %644 = vmatprep.mubr.bf16.mxu0 %v14982_v0  ;;  %v10795_v27 = vld [vmem:[%s14971_s3 + $0x454] ss:$12 sps:$4 sm:$0xff]  }
  0x4b   :  { %993 = vmatpush1.bf16.msra.mxu1 %v912_v30  ;;  %715 = vmatprep.mubr.bf16.mxu1 %v14982_v0  ;;  %v10802_v30 = vld [vmem:[%s14971_s3 + $0x390] ss:$12 sps:$4 sm:$0xff]  }
  0x4c   :  { %994 = vmatprep.subr.bf16.mxu1 %v10722_v28  ;;  %922 = vmatpush1.bf16.msra.mxu0 %v906_v33  ;;  %v10793_v28 = vld [vmem:[%s14971_s3 + $0x450] ss:$12 sps:$4 sm:$0xff]  }
  0x4d   :  { %923 = vmatprep.subr.bf16.mxu0 %v10730_v31  ;;  %v10801_v31 = vld [vmem:[%s14971_s3 + $0x43c] ss:$12 sps:$4 sm:$0xff]  }
  0x4e   :  { %v10810_v33 = vld [vmem:[%s14971_s3 + $0x37c] ss:$12 sps:$4 sm:$0xff]  }
  0x4f   :  { %995 = vmatpush1.bf16.msra.mxu1 %v10720_v32  ;;  %v10799_v32 = vld [vmem:[%s14971_s3 + $0x438] ss:$12 sps:$4 sm:$0xff]  }
  0x50   :  { %996 = vmatprep.subr.bf16.mxu1 %v10727_v34  ;;  %924 = vmatpush1.bf16.msra.mxu0 %v10728_v35  ;;  %v10808_v34 = vld [vmem:[%s14971_s3 + $0x378] ss:$12 sps:$4 sm:$0xff]  }
  0x51   :  { %8905 = vmatmul.mubr.msk.bf16.gmra.mxu0 %vm294_vm3, %v11998_v49  ;;  %925 = vmatprep.subr.bf16.mxu0 %v10733_v37  ;;  %v10807_v35 = vld [vmem:[%s14971_s3 + $0x424] ss:$12 sps:$4 sm:$0xff]  }
  0x52   :  { %8910 = vmatmul.mubr.msk.bf16.gmra.mxu1 %vm294_vm3, %v11998_v49  ;;  %654 = vmatprep.mubr.bf16.mxu0 %v14982_v0  ;;  %v781_v49 = vrot.slane %v10753_v60, 2  ;;  %v10816_v37 = vld [vmem:[%s14971_s3 + $0x364] ss:$12 sps:$4 sm:$0xff]  }
  0x53   :  { %997 = vmatpush1.bf16.msra.mxu1 %v10725_v36  ;;  %725 = vmatprep.mubr.bf16.mxu1 %v14982_v0  ;;  %v10805_v36 = vld [vmem:[%s14971_s3 + $0x420] ss:$12 sps:$4 sm:$0xff]  }
  0x54   :  { %998 = vmatprep.subr.bf16.mxu1 %v10736_v39  ;;  %926 = vmatpush1.bf16.msra.mxu0 %v10731_v38  ;;  %v782_v62 = vsel %vm775_vm4, %v779_v47, %v781_v49  ;;  %v10814_v38 = vld [vmem:[%s14971_s3 + $0x360] ss:$12 sps:$4 sm:$0xff]  }
  0x55   :  { %927 = vmatprep.subr.bf16.mxu0 %v10739_v40  ;;  %v10813_v39 = vld [vmem:[%s14971_s3 + $0x40c] ss:$12 sps:$4 sm:$0xff]   ;;  %v10811_v40 = vld [vmem:[%s14971_s3 + $0x408] ss:$12 sps:$4 sm:$0xff]  }
  0x57   :  { %999 = vmatpush1.bf16.msra.mxu1 %v10734_v41  ;;  %v10822_v41 = vld [vmem:[%s14971_s3 + $0x34c] ss:$12 sps:$4 sm:$0xff]  }
  0x58   :  { %1000 = vmatprep.subr.bf16.mxu1 %v10742_v42  ;;  %928 = vmatpush1.bf16.msra.mxu0 %v10737_v43  ;;  %v10820_v42 = vld [vmem:[%s14971_s3 + $0x348] ss:$12 sps:$4 sm:$0xff]  }
  0x59   :  { %8906 = vmatmul.mubr.msk.bf16.gmra.mxu0 %vm294_vm3, %v12004_v55  ;;  %929 = vmatprep.subr.bf16.mxu0 %v10746_v45  ;;  %v10819_v43 = vld [vmem:[%s14971_s3 + $0x3f4] ss:$12 sps:$4 sm:$0xff]  }
  0x5a   :  { %8911 = vmatmul.mubr.msk.bf16.gmra.mxu1 %vm294_vm3, %v12004_v55  ;;  %664 = vmatprep.mubr.bf16.mxu0 %v14982_v0  ;;  %v10756_v55 = vld [vmem:[%s14971_s3 + $0x31c] ss:$12 sps:$4 sm:$0xff]   ;;  %v10828_v45 = vld [vmem:[%s14971_s3 + $0x334] ss:$12 sps:$4 sm:$0xff]  }
  0x5b   :  { %735 = vmatprep.mubr.bf16.mxu1 %v14982_v0  ;;  %1001 = vmatpush1.bf16.msra.mxu1 %v10740_v44  ;;  %v10817_v44 = vld [vmem:[%s14971_s3 + $0x3f0] ss:$12 sps:$4 sm:$0xff]  }
  0x5c   :  { %930 = vmatpush1.bf16.msra.mxu0 %v10744_v46  ;;  %1002 = vmatprep.subr.bf16.mxu1 %v10749_v48  ;;  %v10826_v46 = vld [vmem:[%s14971_s3 + $0x330] ss:$12 sps:$4 sm:$0xff]   ;;  %v10825_v48 = vld [vmem:[%s14971_s3 + $0x4cc] ss:$12 sps:$4 sm:$0xff]  }
  0x5d   :  { %931 = vmatprep.subr.bf16.mxu0 %v10752_v50  ;;  %v10823_v50 = vld [vmem:[%s14971_s3 + $0x4c8] ss:$12 sps:$4 sm:$0xff]  }
  0x5f   :  { %1003 = vmatpush1.bf16.msra.mxu1 %v10747_v51  ;;  %v10831_v51 = vld [vmem:[%s14971_s3 + $0x4b4] ss:$12 sps:$4 sm:$0xff]  }
  0x60   :  { %932 = vmatpush1.bf16.msra.mxu0 %v10750_v53  ;;  %2081 = vmatprep.subr.bf16.mxu1 %v10777_v15  ;;  %v10834_v53 = vld [vmem:[%s14971_s3 + $0x3e0] ss:$12 sps:$4 sm:$0xff]  }
  0x61   :  { %8907 = vmatmul.mubr.msk.bf16.gmra.mxu0 %vm294_vm3, %v10743_v54  ;;  %2018 = vmatprep.subr.bf16.mxu0 %v10756_v55 }
  0x62   :  { %8912 = vmatmul.mubr.msk.bf16.gmra.mxu1 %vm294_vm3, %v10743_v54  ;;  %949 = vmatprep.mubr.bf16.mxu0 %v14982_v0 }
  0x63   :  { %1020 = vmatprep.mubr.bf16.mxu1 %v14982_v0 }
  0x69   :  { %8962 = vmatmul.mubr.msk.bf16.vlgmr.msra.gmra.mxu0 %vm294_vm3, %v778_v59 }
  0x6a   :  { %8967 = vmatmul.mubr.msk.bf16.vlgmr.msra.gmra.mxu1 %vm294_vm3, %v778_v59  ;;  %959 = vmatprep.mubr.bf16.mxu0 %v14982_v0 }
  0x6b   :  { %1030 = vmatprep.mubr.bf16.mxu1 %v14982_v0  ;;  %2019 = vmatpush1.bf16.msra.mxu0 %v10754_v63 }
  0x6c   :  { %2020 = vmatprep.subr.bf16.mxu0 %v10759_v1  ;;  %2082 = vmatpush1.bf16.msra.mxu1 %v10775_v16 }
  0x6d   :  { %2083 = vmatprep.subr.bf16.mxu1 %v10783_v19 }
  0x6f   :  { %2021 = vmatpush1.bf16.msra.mxu0 %v10757_v2 }
  0x70   :  { %2022 = vmatprep.subr.bf16.mxu0 %v10762_v3  ;;  %2084 = vmatpush1.bf16.msra.mxu1 %v10781_v20 }
  0x71   :  { %8963 = vmatmul.mubr.msk.bf16.gmra.mxu0 %vm294_vm3, %v780_v61  ;;  %2085 = vmatprep.subr.bf16.mxu1 %v10789_v23 }
  0x72   :  { %8968 = vmatmul.mubr.msk.bf16.gmra.mxu1 %vm294_vm3, %v780_v61  ;;  %969 = vmatprep.mubr.bf16.mxu0 %v14982_v0 }
  0x73   :  { %1040 = vmatprep.mubr.bf16.mxu1 %v14982_v0  ;;  %2023 = vmatpush1.bf16.msra.mxu0 %v10760_v4 }
  0x74   :  { %2024 = vmatprep.subr.bf16.mxu0 %v10765_v5  ;;  %2086 = vmatpush1.bf16.msra.mxu1 %v10787_v24 }
  0x75   :  { %2087 = vmatprep.subr.bf16.mxu1 %v10795_v27 }
  0x77   :  { %2025 = vmatpush1.bf16.msra.mxu0 %v10763_v6 }
  0x78   :  { %2026 = vmatprep.subr.bf16.mxu0 %v10768_v7  ;;  %2088 = vmatpush1.bf16.msra.mxu1 %v10793_v28 }
  0x79   :  { %8964 = vmatmul.mubr.msk.bf16.gmra.mxu0 %vm294_vm3, %v782_v62  ;;  %2089 = vmatprep.subr.bf16.mxu1 %v10801_v31 }
  0x7a   :  { %8969 = vmatmul.mubr.msk.bf16.gmra.mxu1 %vm294_vm3, %v782_v62  ;;  %979 = vmatprep.mubr.bf16.mxu0 %v14982_v0 }
  0x7b   :  { %1050 = vmatprep.mubr.bf16.mxu1 %v14982_v0  ;;  %2027 = vmatpush1.bf16.msra.mxu0 %v10766_v8 }
  0x7c   :  { %2028 = vmatprep.subr.bf16.mxu0 %v10771_v9  ;;  %2090 = vmatpush1.bf16.msra.mxu1 %v10799_v32 }
  0x7d   :  { %2091 = vmatprep.subr.bf16.mxu1 %v10807_v35 }
  0x7f   :  { %2029 = vmatpush1.bf16.msra.mxu0 %v10769_v10 }
  0x80   :  { %2030 = vmatprep.subr.bf16.mxu0 %v10774_v11  ;;  %2092 = vmatpush1.bf16.msra.mxu1 %v10805_v36 }
  0x81   :  { %8965 = vmatmul.mubr.msk.bf16.gmra.mxu0 %vm294_vm3, %v781_v49  ;;  %2093 = vmatprep.subr.bf16.mxu1 %v10813_v39 }
  0x82   :  { %8970 = vmatmul.mubr.msk.bf16.gmra.mxu1 %vm294_vm3, %v781_v49  ;;  %vm6840_vm3 = vcmask 523264  }
  0x83   :  { %2031 = vmatpush1.bf16.msra.mxu0 %v10772_v12 }
  0x84   :  { %2032 = vmatprep.subr.bf16.mxu0 %v10780_v13  ;;  %2094 = vmatpush1.bf16.msra.mxu1 %v10811_v40 }
  0x85   :  { %2095 = vmatprep.subr.bf16.mxu1 %v10819_v43 }
  0x87   :  { %2033 = vmatpush1.bf16.msra.mxu0 %v10778_v14 }
  0x88   :  { %2034 = vmatprep.subr.bf16.mxu0 %v10786_v17  ;;  %2096 = vmatpush1.bf16.msra.mxu1 %v10817_v44 }
  0x89   :  { %2109 = vmatprep.subr.bf16.mxu1 %v10825_v48 }
  0x8b   :  { %2035 = vmatpush2.bf16.msra.mxu0 %v10784_v18 }
  0x8c   :  { %2036 = vmatprep.subr.bf16.mxu0 %v10792_v21  ;;  %2110 = vmatpush2.bf16.msra.mxu1 %v10823_v50 }
  0x8d   :  { %2111 = vmatprep.subr.bf16.mxu1 %v10831_v51 }
  0x8f   :  { %2037 = vmatpush2.bf16.msra.mxu0 %v10790_v22 }
  0x90   :  { %2038 = vmatprep.subr.bf16.mxu0 %v10798_v25  ;;  %2112 = vmatpush2.bf16.msra.mxu1 %v10829_v52 }
  0x91   :  { %10349 = vmatprep.subr.bf16.mxu1 %v10834_v53 }
  0x93   :  { %2039 = vmatpush2.bf16.msra.mxu0 %v10796_v26 }
  0x94   :  { %2040 = vmatprep.subr.bf16.mxu0 %v10804_v29 }
  0x97   :  { %2041 = vmatpush2.bf16.msra.mxu0 %v10802_v30 }
  0x98   :  { %2042 = vmatprep.subr.bf16.mxu0 %v10810_v33 }
  0x9b   :  { %2043 = vmatpush2.bf16.msra.mxu0 %v10808_v34 }
  0x9c   :  { %2044 = vmatprep.subr.bf16.mxu0 %v10816_v37  ;;  %v1089_v37 = vlaneseq }
  0x9f   :  { %2045 = vmatpush2.bf16.msra.mxu0 %v10814_v38 }
  0xa0   :  { %2046 = vmatprep.subr.bf16.mxu0 %v10822_v41 }
  0xa3   :  { %2047 = vmatpush2.bf16.msra.mxu0 %v10820_v42  ;;  %v1090_v42 = vshrl.u32 %v1089_v37, 7 }
  0xa4   :  { %2048 = vmatprep.subr.bf16.mxu0 %v10828_v45 }
  0xa5   :  { %v12415_v48 = vsub.s32 0, %v1090_v42  ;;  %v12417_v50 = vsub.s32 2, %v1090_v42  ;;  %v12419_v51 = vsub.s32 1, %v1090_v42  ;;  %v1103_v52 = vsub.s32 3, %v1090_v42 }
  0xa7   :  { %2049 = vmatpush2.bf16.msra.mxu0 %v10826_v46  ;;  %14993 = vst [vmem:[#allocation12_spill] sm:$0xff] %v12415_v48  ;;  %14994 = vst [vmem:[#allocation13_spill] sm:$0xff] %v12417_v50 }
  0xa8   :  { %2201 = vmatprep.subr.bf16.mxu0 %v14982_v0  ;;  %14995 = vst [vmem:[#allocation14_spill] sm:$0xff] %v12419_v51 }
  0xe9   :  { %v12359_v54 = vpop.f32.mrf.mxu0 }
  0xea   :  { %v12361_v56 = vpop.f32.mrf.mxu1 }
  0xeb   :  { %v12363_v57 = vpop.f32.mrf.mxu0 }
  0xec   :  { %v12365_v58 = vpop.f32.mrf.mxu1 }
  0xed   :  { %v12367_v59 = vpop.f32.mrf.mxu0 }
  0xee   :  { %v12369_v47 = vpop.f32.mrf.mxu1 }
  0xef   :  { %v12371_v60 = vpop.f32.mrf.mxu0 }
  0xf0   :  { %v12373_v61 = vpop.f32.mrf.mxu1 }
  0xf1   :  { %v12375_v49 = vpop.f32.mrf.mxu0 }
  0xf2   :  { %v12377_v62 = vpop.f32.mrf.mxu1 }
  0xf3   :  { %v12379_v55 = vpop.f32.mrf.mxu0 }
  0xf4   :  { %v12381_v63 = vpop.f32.mrf.mxu1 }
  0xf5   :  { %v12383_v1 = vpop.f32.mrf.mxu0 }
  0xf6   :  { %v12385_v2 = vpop.f32.mrf.mxu1 }
  0xf7   :  { %v12387_v3 = vpop.f32.mrf.mxu0 }
  0xf8   :  { %v12389_v4 = vpop.f32.mrf.mxu1 }
  0xf9   :  { %v12391_v5 = vpop.f32.mrf.mxu0 }
  0xfa   :  { %v12393_v6 = vpop.f32.mrf.mxu1 }
  0xfb   :  { %v12395_v7 = vpop.f32.mrf.mxu0 }
  0xfc   :  { %v12397_v8 = vpop.f32.mrf.mxu1 }
  0xfd   :  { %v12399_v9 = vpop.f32.mrf.mxu0 }
  0xfe   :  { %v12401_v10 = vpop.f32.mrf.mxu1 }
  0xff   :  { %v12403_v11 = vpop.f32.mrf.mxu0 }
 0x100   :  { %v12405_v12 = vpop.f32.mrf.mxu1 }
 0x101   :  { %v12407_v13 = vpop.f32.mrf.mxu0 }
 0x102   :  { %v12409_v14 = vpop.f32.mrf.mxu1 }
 0x103   :  { %14990 = vst [vmem:[#allocation9_spill] sm:$0xff] %v12409_v14  ;;  %v12411_v15 = vpop.f32.mrf.mxu0 }
 0x104   :  { %14991 = vst [vmem:[#allocation10_spill] sm:$0xff] %v12411_v15  ;;  %v12413_v16 = vpop.f32.mrf.mxu1 }
 0x105   :  { %14992 = vst [vmem:[#allocation11_spill] sm:$0xff] %v12413_v16  ;;  %v388_v17 = vpop.f32.mrf.mxu0 }
 0x106   :  { %v459_v18 = vpop.f32.mrf.mxu1 }
 0x107   :  { %v389_v19 = vpop.f32.mrf.mxu0 }
 0x108   :  { %v460_v20 = vpop.f32.mrf.mxu1 }
 0x109   :  { %v636_v21 = vpop.f32.mrf.mxu0  ;;  %v1087_v20 = vld [vmem:[%s14970_s2] sm:$0xf] }
 0x10a   :  { %v707_v22 = vpop.f32.mrf.mxu1  ;;  %v12433_v16 = vrot.slane %v1087_v20, %v12415_v48  ;;  %v12436_v15 = vrot.slane %v1087_v20, %v12417_v50  ;;  %v12439_v42 = vrot.slane %v1087_v20, %v12419_v51 }
 0x10b   :  { %v638_v23 = vpop.f32.mrf.mxu0 }
 0x10c   :  { %v709_v24 = vpop.f32.mrf.mxu1 }
 0x10d   :  { %v640_v25 = vpop.f32.mrf.mxu0 }
 0x10e   :  { %v711_v26 = vpop.f32.mrf.mxu1  ;;  %v641_v50 = vadd.f32 %v640_v25, %v12367_v59 }
 0x10f   :  { %v642_v27 = vpop.f32.mrf.mxu0 }
 0x110   :  { %v713_v28 = vpop.f32.mrf.mxu1  ;;  %v643_v51 = vadd.f32 %v642_v27, %v12371_v60 }
 0x111   :  { %v646_v29 = vpop.f32.mrf.mxu0 }
 0x112   :  { %v717_v30 = vpop.f32.mrf.mxu1 }
 0x113   :  { %v648_v31 = vpop.f32.mrf.mxu0 }
 0x114   :  { %v719_v32 = vpop.f32.mrf.mxu1 }
 0x115   :  { %v650_v33 = vpop.f32.mrf.mxu0 }
 0x116   :  { %v721_v34 = vpop.f32.mrf.mxu1 }
 0x117   :  { %v652_v35 = vpop.f32.mrf.mxu0  ;;  %v12459_v59 = vadd.f32 %v721_v34, %v12385_v2 }
 0x118   :  { %v723_v36 = vpop.f32.mrf.mxu1 }
 0x119   :  { %v656_v38 = vpop.f32.mrf.mxu0 }
 0x11a   :  { %v727_v39 = vpop.f32.mrf.mxu1 }
 0x11b   :  { %v658_v40 = vpop.f32.mrf.mxu0 }
 0x11c   :  { %v729_v41 = vpop.f32.mrf.mxu1 }
 0x11d   :  { %v660_v43 = vpop.f32.mrf.mxu0 }
 0x11e   :  { %v731_v44 = vpop.f32.mrf.mxu1 }
 0x11f   :  { %v662_v45 = vpop.f32.mrf.mxu0 }
 0x120   :  { %v733_v46 = vpop.f32.mrf.mxu1  ;;  %v12490_v27 = vadd.f32 %v662_v45, %v12403_v11 }
 0x121   :  { %v12421_v53 = vpop.f32.mrf.mxu0 }
 0x122   :  { %14996 = vst [vmem:[#allocation15_spill] sm:$0xff] %v12421_v53  ;;  %v12423_v17 = vpop.f32.mrf.mxu1  ;;  %v712_v53 = vadd.f32 %v711_v26, %v12369_v47 }
 0x123   :  { %14997 = vst [vmem:[#allocation16_spill] sm:$0xff] %v12423_v17  ;;  %v12425_v18 = vpop.f32.mrf.mxu0  ;;  %v12441_v17 = vrot.slane %v1087_v20, %v1103_v52  ;;  %v714_v52 = vadd.f32 %v713_v28, %v12373_v61  ;;  %v647_v20 = vadd.f32 %v646_v29, %v12375_v49  ;;  %v12462_v61 = vadd.f32 %v652_v35, %v12387_v3 }
 0x124   :  { %14998 = vst [vmem:[#allocation17_spill] sm:$0xff] %v12425_v18  ;;  %v12427_v19 = vpop.f32.mrf.mxu1  ;;  %v708_v18 = vadd.f32 %v707_v22, %v12361_v56  ;;  %v649_v56 = vadd.f32 %v648_v31, %v12379_v55  ;;  %v12465_v49 = vadd.f32 %v723_v36, %v12389_v4  ;;  %v12471_v55 = vadd.f32 %v727_v39, %v12393_v6 }
 0x125   :  { %14999 = vst [vmem:[#allocation18_spill] sm:$0xff] %v12427_v19  ;;  %v670_v37 = vpop.f32.mrf.mxu0  ;;  %v637_v19 = vadd.f32 %v636_v21, %v12359_v54  ;;  %v718_v54 = vadd.f32 %v717_v30, %v12377_v62  ;;  %v12468_v62 = vadd.f32 %v656_v38, %v12391_v5  ;;  %v12478_v3 = vadd.f32 %v658_v40, %v12395_v7 }
 0x126   :  { %v741_v0 = vpop.f32.mrf.mxu1  ;;  %v639_v37 = vadd.f32 %v638_v23, %v12363_v57  ;;  %v720_v57 = vadd.f32 %v719_v32, %v12381_v63  ;;  %v12481_v4 = vadd.f32 %v729_v41, %v12397_v8  ;;  %v12484_v5 = vadd.f32 %v660_v43, %v12399_v9 }
 0x127   :  { %v710_v0 = vadd.f32 %v709_v24, %v12365_v58  ;;  %v671_v48 = vpop.f32.mrf.mxu0  ;;  %v12487_v6 = vadd.f32 %v731_v44, %v12401_v10  ;;  %v12493_v28 = vadd.f32 %v733_v46, %v12405_v12  ;;  %v15001_v12 = vld [vmem:[#allocation9_spill] sm:$0xff] }
 0x128   :  { %v742_v14 = vpop.f32.mrf.mxu1 }
 0x129   :  { %v951_v21 = vpop.f32.mrf.mxu0  ;;  %v12456_v14 = vadd.f32 %v650_v33, %v12383_v1  ;;  %v15000_v11 = vld [vmem:[#allocation15_spill] sm:$0xff] }
 0x12a   :  { %v1022_v58 = vpop.f32.mrf.mxu1  ;;  %v1059_v47 = vadd.f32 %v951_v21, %v637_v19  ;;  %v12500_v38 = vadd.f32 %v15000_v11, %v12407_v13  ;;  %v15002_v39 = vld [vmem:[#allocation16_spill] sm:$0xff] }
 0x12b   :  { %v1061_v60 = vadd.f32 %v1022_v58, %v708_v18  ;;  %v953_v63 = vpop.f32.mrf.mxu0  ;;  %v12504_v40 = vadd.f32 %v15002_v39, %v15001_v12 }
 0x12c   :  { %v1024_v1 = vpop.f32.mrf.mxu1  ;;  %v12474_v22 = vadd.f32 %v12433_v16, %v1059_v47  ;;  %v1060_v23 = vadd.f32 %v953_v63, %v639_v37  ;;  %v15005_v63 = vld [vmem:[#allocation10_spill] sm:$0xff] }
 0x12d   :  { %v1111_v2 = vadd.f32 %v12436_v15, %v1061_v60  ;;  %v1062_v24 = vadd.f32 %v1024_v1, %v710_v0  ;;  %v955_v25 = vpop.f32.mrf.mxu0  ;;  %v15006_v1 = vld [vmem:[#allocation17_spill] sm:$0xff] }
 0x12e   :  { %v1026_v26 = vpop.f32.mrf.mxu1  ;;  %v1110_v7 = vadd.f32 %v12439_v42, %v1060_v23  ;;  %v1137_v8 = vmax.f32 %v12474_v22, 0.0  ;;  %v1063_v9 = vadd.f32 %v955_v25, %v641_v50  ;;  %v12520_v22 = vadd.f32 %v15006_v1, %v15005_v63  ;;  %v15008_v23 = vld [vmem:[#allocation18_spill] sm:$0xff] }
 0x12f   :  { %v1112_v29 = vadd.f32 %v12441_v17, %v1062_v24  ;;  %v1139_v30 = vmax.f32 %v1111_v2, 0.0  ;;  %v1065_v31 = vadd.f32 %v1026_v26, %v712_v53  ;;  %v957_v32 = vpop.f32.mrf.mxu0  ;;  %v15007_v2 = vld [vmem:[#allocation11_spill] sm:$0xff] }
 0x130   :  { %v1028_v10 = vpop.f32.mrf.mxu1  ;;  %v1138_v33 = vmax.f32 %v1110_v7, 0.0  ;;  %v1064_v35 = vadd.f32 %v957_v32, %v643_v51  ;;  %v1113_v43 = vadd.f32 %v12433_v16, %v1063_v9  ;;  %v12524_v24 = vadd.f32 %v15008_v23, %v15007_v2 }
 0x131   :  { %v1140_v34 = vmax.f32 %v1112_v29, 0.0  ;;  %v1066_v36 = vadd.f32 %v1028_v10, %v714_v52  ;;  %v1115_v44 = vadd.f32 %v12436_v15, %v1065_v31  ;;  %v961_v45 = vpop.f32.mrf.mxu0 }
 0x132   :  { %v1032_v46 = vpop.f32.mrf.mxu1  ;;  %v10315_v48 = vpack.c.bf16 %v1138_v33, %v1137_v8  ;;  %v1114_v13 = vadd.f32 %v12439_v42, %v1064_v35  ;;  %v1141_v53 = vmax.f32 %v1113_v43, 0.0  ;;  %v1067_v19 = vadd.f32 %v961_v45, %v647_v20 }
 0x133   :  { %v10316_v50 = vpack.c.bf16 %v1140_v34, %v1139_v30  ;;  %v1116_v51 = vadd.f32 %v12441_v17, %v1066_v36  ;;  %v1143_v18 = vmax.f32 %v1115_v44, 0.0  ;;  %v1069_v37 = vadd.f32 %v1032_v46, %v718_v54  ;;  %v963_v0 = vpop.f32.mrf.mxu0 }
 0x134   :  { %v1034_v52 = vpop.f32.mrf.mxu1  ;;  %1253 = vst [vmem:[#allocation2] sm:$0xff] %v10315_v48  ;;  %v1142_v21 = vmax.f32 %v1114_v13, 0.0  ;;  %v1068_v47 = vadd.f32 %v963_v0, %v649_v56  ;;  %v12527_v20 = vadd.f32 %v12433_v16, %v1067_v19  ;;  %v12545_v45 = vpack.c.bf16 %v1141_v53, %v1137_v8 }
 0x135   :  { %1257 = vst.msk [vmem:[#allocation2 + $0x8] sm:$0xff] %vm12508_vm7, %v10316_v50  ;;  %v1144_v58 = vmax.f32 %v1116_v51, 0.0  ;;  %v1070_v60 = vadd.f32 %v1034_v52, %v720_v57  ;;  %v1119_v54 = vadd.f32 %v12436_v15, %v1069_v37  ;;  %v965_v25 = vpop.f32.mrf.mxu0 }
 0x136   :  { %v1036_v26 = vpop.f32.mrf.mxu1  ;;  %v12530_v7 = vpack.c.bf16 %v1142_v21, %v1141_v53  ;;  %v1118_v56 = vadd.f32 %v12439_v42, %v1068_v47  ;;  %v1145_v30 = vmax.f32 %v12527_v20, 0.0  ;;  %v1071_v31 = vadd.f32 %v965_v25, %v12456_v14 }
 0x137   :  { %v10318_v29 = vpack.c.bf16 %v1144_v58, %v1143_v18  ;;  %v1120_v57 = vadd.f32 %v12441_v17, %v1070_v60  ;;  %v1147_v9 = vmax.f32 %v1119_v54, 0.0  ;;  %v1073_v32 = vadd.f32 %v1036_v26, %v12459_v59  ;;  %v967_v10 = vpop.f32.mrf.mxu0 }
 0x138   :  { %v1038_v34 = vpop.f32.mrf.mxu1  ;;  %v1146_v35 = vmax.f32 %v1118_v56, 0.0  ;;  %v1072_v11 = vadd.f32 %v967_v10, %v12462_v61  ;;  %v12542_v39 = vadd.f32 %v12433_v16, %v1071_v31  ;;  %v12547_v59 = vpack.c.bf16 %v1142_v21, %v1138_v33 }
 0x139   :  { %1259 = vst.msk [vmem:[#allocation2 + $0x18] sm:$0xff] %vm12508_vm7, %v10318_v29  ;;  %v1148_v36 = vmax.f32 %v1120_v57, 0.0  ;;  %v1074_v12 = vadd.f32 %v1038_v34, %v12465_v49  ;;  %v1123_v43 = vadd.f32 %v12436_v15, %v1073_v32  ;;  %v971_v44 = vpop.f32.mrf.mxu0 }
 0x13a   :  { %v1042_v14 = vpop.f32.mrf.mxu1  ;;  %v1122_v48 = vadd.f32 %v12439_v42, %v1072_v11  ;;  %v1149_v61 = vmax.f32 %v12542_v39, 0.0  ;;  %v1075_v49 = vadd.f32 %v971_v44, %v12468_v62 }
 0x13b   :  { %v10320_v46 = vpack.c.bf16 %v1148_v36, %v1147_v9  ;;  %v1124_v50 = vadd.f32 %v12441_v17, %v1074_v12  ;;  %v1151_v13 = vmax.f32 %v1123_v43, 0.0  ;;  %v1077_v51 = vadd.f32 %v1042_v14, %v12471_v55  ;;  %v973_v18 = vpop.f32.mrf.mxu0  ;;  %v12554_v37 = vld [vmem:[#allocation2] sm:$0xee] }
 0x13c   :  { %v1044_v19 = vpop.f32.mrf.mxu1  ;;  %v1150_v8 = vmax.f32 %v1122_v48, 0.0  ;;  %v1076_v53 = vadd.f32 %v973_v18, %v12478_v3  ;;  %v12561_v52 = vadd.f32 %v12433_v16, %v1075_v49  ;;  %v9090_v58 = vcombine.high %v12554_v37, %v12530_v7  ;;  %v1389_v49 = vld [vmem:[#allocation2 + $0x8] sm:$0xee] }
 0x13d   :  { %1261 = vst.msk [vmem:[#allocation2 + $0x28] sm:$0xff] %vm12508_vm7, %v10320_v46  ;;  %v1152_v33 = vmax.f32 %v1124_v50, 0.0  ;;  %v1078_v0 = vadd.f32 %v1044_v19, %v12481_v4  ;;  %v1127_v62 = vadd.f32 %v12436_v15, %v1077_v51  ;;  %v975_v21 = vpop.f32.mrf.mxu0  ;;  %v9089_v47 = vcombine.low %v12554_v37, %v12530_v7 }
 0x13e   :  { %v1046_v55 = vpop.f32.mrf.mxu1  ;;  %v12569_v63 = vadd.f32 %v12439_v42, %v1076_v53  ;;  %v1153_v4 = vmax.f32 %v12561_v52, 0.0  ;;  %v1079_v2 = vadd.f32 %v975_v21, %v12484_v5  ;;  %v12584_v10 = vpack.c.bf16 %v1150_v8, %v1146_v35 }
 0x13f   :  { %v10322_v60 = vpack.c.bf16 %v1152_v33, %v1151_v13  ;;  %v1128_v3 = vadd.f32 %v12441_v17, %v1078_v0  ;;  %v1155_v1 = vmax.f32 %v1127_v62, 0.0  ;;  %v1081_v23 = vadd.f32 %v1046_v55, %v12487_v6  ;;  %v977_v54 = vpop.f32.mrf.mxu0 }
 0x140   :  { %v1048_v25 = vpop.f32.mrf.mxu1  ;;  %v1154_v26 = vmax.f32 %v12569_v63, 0.0  ;;  %v1080_v56 = vadd.f32 %v977_v54, %v12490_v27  ;;  %v12580_v9 = vld [vmem:[#allocation2 + $0x18] sm:$0xff]  ;;  %v1129_v31 = vadd.f32 %v12433_v16, %v1079_v2  ;;  %v1558_v34 = vrot.slane %v9090_v58, 1 }
 0x141   :  { %1263 = vst.msk [vmem:[#allocation2 + $0x38] sm:$0xff] %vm12508_vm7, %v10322_v60  ;;  %v1156_v29 = vmax.f32 %v1128_v3, 0.0  ;;  %v1082_v57 = vadd.f32 %v1048_v25, %v12493_v28  ;;  %v1131_v5 = vadd.f32 %v12436_v15, %v1081_v23  ;;  %v981_v32 = vpop.f32.mrf.mxu0  ;;  %v9091_v41 = vcombine.low %v1389_v49, %v12580_v9  ;;  %v10836_v23 = vld [vmem:[%s14971_s3 + $0x320] ss:$12 sps:$4 sm:$0xff]   ;;  %v10838_v25 = vld [vmem:[%s14971_s3 + $0x3c8] ss:$12 sps:$4 sm:$0xff]  }
 0x142   :  { %v1052_v6 = vpop.f32.mrf.mxu1  ;;  %v1130_v11 = vadd.f32 %v12439_v42, %v1080_v56  ;;  %v1157_v27 = vmax.f32 %v1129_v31, 0.0  ;;  %v1083_v28 = vadd.f32 %v981_v32, %v12500_v38  ;;  %v1559_v38 = vrot.slane %v12584_v10, 1  ;;  %v10839_v56 = vld [vmem:[%s14971_s3 + $0x308] ss:$12 sps:$4 sm:$0xff]  }
 0x143   :  { %v10324_v36 = vpack.c.bf16 %v1156_v29, %v1155_v1  ;;  %v1132_v12 = vadd.f32 %v12441_v17, %v1082_v57  ;;  %v1159_v43 = vmax.f32 %v1131_v5, 0.0  ;;  %v1085_v44 = vadd.f32 %v1052_v6, %v12504_v40  ;;  %v983_v14 = vpop.f32.mrf.mxu0 }
 0x144   :  { %v1054_v46 = vpop.f32.mrf.mxu1  ;;  %v1158_v35 = vmax.f32 %v1130_v11, 0.0  ;;  %v1084_v50 = vadd.f32 %v983_v14, %v12520_v22  ;;  %v1133_v51 = vadd.f32 %v12433_v16, %v1083_v28  ;;  %v9092_v40 = vcombine.high %v1389_v49, %v12580_v9 }
 0x145   :  { %1265 = vst.msk [vmem:[#allocation2 + $0x48] sm:$0xff] %vm12508_vm7, %v10324_v36  ;;  %v1160_v48 = vmax.f32 %v1132_v12, 0.0  ;;  %v1086_v13 = vadd.f32 %v1054_v46, %v12524_v24  ;;  %v1135_v18 = vadd.f32 %v12436_v15, %v1085_v44  ;;  %v985_v37 = vpop.f32.mrf.mxu0  ;;  %v12601_v24 = vsel %vm176_vm2, %v1558_v34, %v1559_v38  ;;  %v10843_v34 = vld [vmem:[%s14971_s3 + $0x3b0] ss:$12 sps:$4 sm:$0xff]  }
 0x146   :  { %v1056_v19 = vpop.f32.mrf.mxu1  ;;  %v1134_v33 = vadd.f32 %v12439_v42, %v1084_v50  ;;  %v1161_v0 = vmax.f32 %v1133_v51, 0.0  ;;  %v1564_v16 = vrot.slane %v9092_v40, 1  ;;  %2050 = vmatprep.mubr.bf16.mxu0 %v12601_v24  ;;  %v1555_v42 = vrot.slane %v9089_v47, 1  ;;  %v10845_v44 = vld [vmem:[%s14971_s3 + $0x2f0] ss:$12 sps:$4 sm:$0xff]  }
 0x147   :  { %v10326_v8 = vpack.c.bf16 %v1160_v48, %v1159_v43  ;;  %v1136_v53 = vadd.f32 %v12441_v17, %v1086_v13  ;;  %v1163_v22 = vmax.f32 %v1135_v18, 0.0  ;;  %v986_v62 = vpop.f32.mrf.mxu0  ;;  %v12612_v17 = vpack.c.bf16 %v1149_v61, %v1145_v30  ;;  %v10837_v61 = vld [vmem:[%s14971_s3 + $0x4a0] ss:$12 sps:$4 sm:$0xff]   ;;  %v10849_v50 = vld [vmem:[%s14971_s3 + $0x398] ss:$12 sps:$4 sm:$0xff]  }
 0x148   :  { %v12603_v52 = vld [vmem:[#allocation2 + $0x2c] ss:$16 sps:$4 sm:$0xff]   ;;  %v1057_v15 = vpop.f32.mrf.mxu1  ;;  %v1162_v21 = vmax.f32 %v1134_v33, 0.0  ;;  %v12614_v58 = vld [vmem:[#allocation2 + $0x28] ss:$16 sps:$4 sm:$0xff]   ;;  %v12620_v63 = vpack.c.bf16 %v1158_v35, %v1154_v26  ;;  %v12622_v3 = vpack.c.bf16 %v1157_v27, %v1153_v4  ;;  %v1561_v2 = vrot.slane %v9091_v41, 1 }
 0x149   :  { %1267 = vst.msk [vmem:[#allocation2 + $0x58] sm:$0xff] %vm12508_vm7, %v10326_v8  ;;  %v1164_v55 = vmax.f32 %v1136_v53, 0.0  ;;  %v1565_v60 = vrot.slane %v12603_v52, 1  ;;  %v1556_v39 = vrot.slane %v12612_v17, 1  ;;  %v1562_v30 = vrot.slane %v12614_v58, 1 }
 0x14a   :  { %v10327_v1 = vpack.c.bf16 %v1162_v21, %v1161_v0  ;;  %v1569_v4 = vrot.slane %v12620_v63, 1  ;;  %v10840_v26 = vld [vmem:[%s14971_s3 + $0x488] ss:$12 sps:$4 sm:$0xff]   ;;  %v1567_v31 = vrot.slane %v12622_v3, 1  ;;  %v15009_v5 = vmov 0  }
 0x14b   :  { %v10328_v20 = vpack.c.bf16 %v1164_v55, %v1163_v22  ;;  %v12630_v47 = vsel %vm176_vm2, %v1564_v16, %v1565_v60  ;;  %v12639_v54 = vsel %vm176_vm2, %v1555_v42, %v1556_v39  ;;  %v12649_v29 = vsel %vm176_vm2, %v1561_v2, %v1562_v30  ;;  %v10846_v27 = vld [vmem:[%s14971_s3 + $0x470] ss:$12 sps:$4 sm:$0xff]   ;;  %v10851_v13 = vld [vmem:[%s14971_s3 + $0x458] ss:$12 sps:$4 sm:$0xff]   ;;  %v10852_v33 = vld [vmem:[%s14971_s3 + $0x380] ss:$12 sps:$4 sm:$0xff]  }
 0x14c   :  { %1268 = vst [vmem:[#allocation2 + $0x60] sm:$0x33] %v10327_v1  ;;  %9183 = vmatprep.mubr.msk.bf16.mxu1 %vm2008_vm9, %v12630_v47  ;;  %2051 = vmatmul.mubr.bf16.vlgmr.msra.gmra.mxu0 %v12639_v54  ;;  %v12655_v57 = vsel %vm176_vm2, %v1559_v38, %v1569_v4  ;;  %v12671_v12 = vsel %vm176_vm2, %v1556_v39, %v1567_v31  ;;  %v10850_v40 = vld [vmem:[%s14971_s3 + $0x2d8] ss:$12 sps:$4 sm:$0xff]   ;;  %v10855_v22 = vld [vmem:[%s14971_s3 + $0x2c0] ss:$12 sps:$4 sm:$0xff]  }
 0x14d   :  { %1271 = vst.msk [vmem:[#allocation2 + $0x68] sm:$0x33] %vm1270_vm10, %v10328_v20  ;;  %2114 = vmatmul.mubr.bf16.vlgmr.msra.gmra.mxu1 %v12649_v29  ;;  %2202 = vmatpush1.bf16.msra.mxu0 %v10837_v61  ;;  %v10856_v16 = vld [vmem:[%s14971_s3 + $0x440] ss:$12 sps:$4 sm:$0xff]   ;;  %v10857_v15 = vld [vmem:[%s14971_s3 + $0x368] ss:$12 sps:$4 sm:$0xff]  }
 0x14e   :  { %10350 = vmatpush3.bf16.msra.mxu1 %v10836_v23  ;;  %2203 = vmatprep.subr.bf16.mxu0 %v15009_v5  ;;  %v10859_v62 = vld [vmem:[%s14971_s3 + $0x428] ss:$12 sps:$4 sm:$0xff]   ;;  %v10860_v42 = vld [vmem:[%s14971_s3 + $0x350] ss:$12 sps:$4 sm:$0xff]   ;;  %v10863_v41 = vld [vmem:[%s14971_s3 + $0x338] ss:$12 sps:$4 sm:$0xff]  }
 0x14f   :  { %10351 = vmatprep.subr.bf16.mxu1 %v10838_v25  ;;  %2060 = vmatprep.mubr.bf16.mxu0 %v12655_v57  ;;  %v10858_v55 = vld [vmem:[%s14971_s3 + $0x2a8] ss:$12 sps:$4 sm:$0xff]   ;;  %v10864_v1 = vld [vmem:[%s14971_s3 + $0x278] ss:$12 sps:$4 sm:$0xff]   ;;  %v10869_v61 = vld [vmem:[%s14971_s3 + $0x4d0] ss:$12 sps:$4 sm:$0xff]  }
 0x150   :  { %v12660_v32 = vld [vmem:[#allocation2 + $0x4c] ss:$16 sps:$4 sm:$0xff]   ;;  %v12662_v6 = vld [vmem:[#allocation2 + $0x48] ss:$16 sps:$4 sm:$0xff]   ;;  %vm7666_vm7 = vcmask 783365   ;;  %vm7686_vm10 = vcmask 1042434  }
 0x151   :  { %v1573_v36 = vrot.slane %v12660_v32, 1  ;;  %v1571_v11 = vrot.slane %v12662_v6, 1  ;;  %2204 = vmatpush1.bf16.msra.mxu0 %v10840_v26  ;;  %v10865_v20 = vld [vmem:[%s14971_s3 + $0x3f8] ss:$12 sps:$4 sm:$0xff]   ;;  %v10870_v2 = vld [vmem:[%s14971_s3 + $0x90] ss:$12 sps:$4 sm:$0xff]  }
 0x152   :  { %10352 = vmatpush3.bf16.msra.mxu1 %v10839_v56  ;;  %2205 = vmatprep.subr.bf16.mxu0 %v15009_v5  ;;  %v10868_v39 = vld [vmem:[%s14971_s3 + $0xac] ss:$12 sps:$4 sm:$0xff]   ;;  %v10876_v25 = vld [vmem:[%s14971_s3 + $0x7c] ss:$12 sps:$4 sm:$0xff]   ;;  %v10882_v56 = vld [vmem:[%s14971_s3 + $0x64] ss:$12 sps:$4 sm:$0xff]  }
 0x153   :  { %v12677_v43 = vsel %vm176_vm2, %v1565_v60, %v1573_v36  ;;  %v12681_v28 = vsel %vm176_vm2, %v1562_v30, %v1571_v11  ;;  %v1390_v14 = vld [vmem:[#allocation2 + $0x60] sm:$0x11]  ;;  %10353 = vmatprep.subr.bf16.mxu1 %v10843_v34  ;;  %v10861_v60 = vld [vmem:[%s14971_s3 + $0x290] ss:$12 sps:$4 sm:$0xff]   ;;  %v10866_v30 = vld [vmem:[%s14971_s3 + $0xa8] ss:$12 sps:$4 sm:$0xff]  }
 0x154   :  { %v1391_v46 = vld [vmem:[#allocation2 + $0x68] sm:$0x11]  ;;  %9184 = vmatprep.mubr.msk.bf16.mxu1 %vm2008_vm9, %v12677_v43  ;;  %v9102_v35 = vcombine.high %v1390_v14, %v1390_v14  ;;  %v9101_v49 = vcombine.low %v1390_v14, %v1390_v14  ;;  %2061 = vmatmul.mubr.bf16.gmra.mxu0 %v12671_v12  ;;  %v10873_v23 = vld [vmem:[%s14971_s3 + $0x4b8] ss:$12 sps:$4 sm:$0xff]   ;;  %v10883_v34 = vld [vmem:[%s14971_s3 + $0x210] ss:$12 sps:$4 sm:$0xff]  }
 0x155   :  { %v9104_v48 = vcombine.high %v1391_v46, %v1391_v46  ;;  %v9103_v51 = vcombine.low %v1391_v46, %v1391_v46  ;;  %2124 = vmatmul.mubr.bf16.gmra.mxu1 %v12681_v28  ;;  %2206 = vmatpush1.bf16.msra.mxu0 %v10846_v27  ;;  %v10874_v26 = vld [vmem:[%s14971_s3 + $0x78] ss:$12 sps:$4 sm:$0xff]   ;;  %v10894_v27 = vld [vmem:[%s14971_s3 + $0x34] ss:$12 sps:$4 sm:$0xff]  }
 0x156   :  { %v1577_v18 = vrot.slane %v9102_v35, 1  ;;  %v1575_v38 = vrot.slane %v9101_v49, 1  ;;  %10354 = vmatpush3.bf16.msra.mxu1 %v10845_v44  ;;  %2207 = vmatprep.subr.bf16.mxu0 %v15009_v5  ;;  %v10892_v44 = vld [vmem:[%s14971_s3 + $0x30] ss:$12 sps:$4 sm:$0xff]   ;;  %v10895_v14 = vld [vmem:[%s14971_s3 + $0x1e0] ss:$12 sps:$4 sm:$0xff]  }
 0x157   :  { %v1581_v19 = vrot.slane %v9104_v48, 1  ;;  %10355 = vmatprep.subr.bf16.mxu1 %v10849_v50  ;;  %v1579_v53 = vrot.slane %v9103_v51, 1  ;;  %v10898_v46 = vld [vmem:[%s14971_s3 + $0x18] ss:$12 sps:$4 sm:$0xff]   ;;  %v10901_v48 = vld [vmem:[%s14971_s3 + $0x1c8] ss:$12 sps:$4 sm:$0xff]  }
 0x158   :  { %v12701_v37 = vsel %vm176_vm2, %v1569_v4, %v1577_v18  ;;  %v12713_v0 = vsel %vm176_vm2, %v1567_v31, %v1575_v38  ;;  %v10879_v4 = vld [vmem:[%s14971_s3 + $0x22c] ss:$12 sps:$4 sm:$0xff]   ;;  %v10909_v51 = vld [vmem:[%s14971_s3 + $0x1b4] ss:$12 sps:$4 sm:$0xff]  }
 0x159   :  { %v12704_v8 = vsel %vm176_vm2, %v1573_v36, %v1581_v19  ;;  %2070 = vmatprep.mubr.bf16.mxu0 %v12701_v37  ;;  %2208 = vmatpush1.bf16.msra.mxu0 %v10851_v13  ;;  %v12730_v21 = vsel %vm176_vm2, %v1571_v11, %v1579_v53  ;;  %v10880_v31 = vld [vmem:[%s14971_s3 + $0x60] ss:$12 sps:$4 sm:$0xff]   ;;  %v10891_v36 = vld [vmem:[%s14971_s3 + $0x1fc] ss:$12 sps:$4 sm:$0xff]   ;;  %v10906_v13 = vld [vmem:[%s14971_s3 + $0x4] ss:$12 sps:$4 sm:$0xff]  }
 0x15a   :  { %9185 = vmatprep.mubr.msk.bf16.mxu1 %vm2008_vm9, %v12704_v8  ;;  %10356 = vmatpush3.bf16.msra.mxu1 %v10850_v40  ;;  %v10886_v11 = vld [vmem:[%s14971_s3 + $0x48] ss:$12 sps:$4 sm:$0xff]   ;;  %v10903_v35 = vld [vmem:[%s14971_s3 + $0x1cc] ss:$12 sps:$4 sm:$0xff]   ;;  %v10907_v19 = vld [vmem:[%s14971_s3 + $0x1b0] ss:$12 sps:$4 sm:$0xff]  }
 0x15b   :  { %2209 = vmatprep.subr.bf16.mxu0 %v15009_v5  ;;  %10357 = vmatprep.subr.bf16.mxu1 %v10852_v33  ;;  %v1273_v50 = vld [vmem:[#allocation2 + $0x8] sm:$0xff]  ;;  %v10918_v33 = vld [vmem:[%s14971_s3 + $0x154] ss:$12 sps:$4 sm:$0xff]   ;;  %v10916_v53 = vld [vmem:[%s14971_s3 + $0x150] ss:$12 sps:$4 sm:$0xff]  }
 0x15c   :  { %2071 = vmatmul.mubr.bf16.gmra.mxu0 %v12713_v0  ;;  %v12856_v49 = vcombine.high %v1273_v50, %v12580_v9  ;;  %v10904_v18 = vld [vmem:[%s14971_s3] ss:$12 sps:$4 sm:$0xff]   ;;  %v10915_v40 = vld [vmem:[%s14971_s3 + $0x19c] ss:$12 sps:$4 sm:$0xff]  }
 0x15d   :  { %2134 = vmatmul.mubr.bf16.gmra.mxu1 %v12730_v21  ;;  %2210 = vmatpush1.bf16.msra.mxu0 %v10856_v16  ;;  %v10912_v38 = vld [vmem:[%s14971_s3 + $0x16c] ss:$12 sps:$4 sm:$0xff]   ;;  %v10924_v16 = vld [vmem:[%s14971_s3 + $0x13c] ss:$12 sps:$4 sm:$0xff]  }
 0x15e   :  { %10358 = vmatpush3.bf16.msra.mxu1 %v10855_v22  ;;  %2176 = vmatprep.mubr.bf16.mxu1 %v12601_v24  ;;  %v10862_v24 = vld [vmem:[%s14971_s3 + $0x410] ss:$12 sps:$4 sm:$0xff]   ;;  %v10919_v22 = vld [vmem:[%s14971_s3 + $0x180] ss:$12 sps:$4 sm:$0xff]  }
 0x15f   :  { %9186 = vmatprep.mubr.msk.bf16.mxu0 %vm2008_vm9, %v12630_v47  ;;  %10359 = vmatprep.subr.bf16.mxu1 %v10857_v15  ;;  %v10872_v47 = vld [vmem:[%s14971_s3 + $0x94] ss:$12 sps:$4 sm:$0xff]   ;;  %v10927_v15 = vld [vmem:[%s14971_s3 + $0x25c] ss:$12 sps:$4 sm:$0xff]  }
 0x160   :  { %2211 = vmatprep.subr.bf16.mxu0 %v15009_v5 }
 0x161   :  { %2212 = vmatpush1.bf16.msra.mxu0 %v10859_v62  ;;  %v10922_v62 = vld [vmem:[%s14971_s3 + $0x138] ss:$12 sps:$4 sm:$0xff]  }
 0x162   :  { %10360 = vmatpush3.bf16.msra.mxu1 %v10858_v55  ;;  %2213 = vmatprep.subr.bf16.mxu0 %v15009_v5  ;;  %v10930_v55 = vld [vmem:[%s14971_s3 + $0x124] ss:$12 sps:$4 sm:$0xff]  }
 0x163   :  { %10361 = vmatprep.subr.bf16.mxu1 %v10860_v42  ;;  %v10933_v42 = vld [vmem:[%s14971_s3 + $0x244] ss:$12 sps:$4 sm:$0xff]  }
 0x165   :  { %2214 = vmatpush1.bf16.msra.mxu0 %v10862_v24  ;;  %v10931_v24 = vld [vmem:[%s14971_s3 + $0x240] ss:$12 sps:$4 sm:$0xff]  }
 0x166   :  { %10362 = vmatpush3.bf16.msra.mxu1 %v10861_v60  ;;  %2215 = vmatprep.subr.bf16.mxu0 %v15009_v5  ;;  %v10928_v60 = vld [vmem:[%s14971_s3 + $0x120] ss:$12 sps:$4 sm:$0xff]  }
 0x167   :  { %10363 = vmatprep.subr.bf16.mxu1 %v10863_v41  ;;  %v10936_v41 = vld [vmem:[%s14971_s3 + $0x10c] ss:$12 sps:$4 sm:$0xff]  }
 0x169   :  { %2216 = vmatpush1.bf16.msra.mxu0 %v10865_v20  ;;  %v10937_v20 = vld [vmem:[%s14971_s3 + $0x230] ss:$12 sps:$4 sm:$0xff]  }
 0x16a   :  { %10364 = vmatpush3.bf16.msra.mxu1 %v10864_v1  ;;  %2229 = vmatprep.subr.bf16.mxu0 %v15009_v5  ;;  %v10934_v1 = vld [vmem:[%s14971_s3 + $0x108] ss:$12 sps:$4 sm:$0xff]  }
 0x16b   :  { %2702 = vmatprep.subr.bf16.mxu1 %v10868_v39  ;;  %v10940_v39 = vld [vmem:[%s14971_s3 + $0xf4] ss:$12 sps:$4 sm:$0xff]  }
 0x16d   :  { %2177 = vmatmul.mubr.bf16.vlgmr.msra.gmra.mxu1 %v12639_v54  ;;  %2230 = vmatpush2.bf16.msra.mxu0 %v10869_v61  ;;  %v10877_v54 = vld [vmem:[%s14971_s3 + $0x228] ss:$12 sps:$4 sm:$0xff]   ;;  %v10938_v61 = vld [vmem:[%s14971_s3 + $0xf0] ss:$12 sps:$4 sm:$0xff]  }
 0x16e   :  { %2184 = vmatprep.mubr.bf16.mxu1 %v12655_v57  ;;  %2703 = vmatpush1.bf16.msra.mxu1 %v10866_v30  ;;  %v10885_v57 = vld [vmem:[%s14971_s3 + $0x214] ss:$12 sps:$4 sm:$0xff]   ;;  %v12931_v30 = vcombine.low %v1273_v50, %v12580_v9  ;;  %v10942_v9 = vld [vmem:[%s14971_s3 + $0xd8] ss:$12 sps:$4 sm:$0xff]  }
 0x16f   :  { %2231 = vmatprep.subr.bf16.mxu0 %v15009_v5  ;;  %2704 = vmatprep.subr.bf16.mxu1 %v10872_v47  ;;  %v10941_v47 = vld [vmem:[%s14971_s3 + $0x218] ss:$12 sps:$4 sm:$0xff]   ;;  %v10969_v50 = vld [vmem:[%s14971_s3 + $0x708] ss:$12 sps:$4 sm:$0xff]  }
 0x171   :  { %2232 = vmatpush2.bf16.msra.mxu0 %v10873_v23  ;;  %v10945_v23 = vld [vmem:[%s14971_s3 + $0x200] ss:$12 sps:$4 sm:$0xff]  }
 0x172   :  { %2705 = vmatpush1.bf16.msra.mxu1 %v10870_v2  ;;  %2765 = vmatprep.subr.bf16.mxu0 %v10879_v4  ;;  %v10944_v2 = vld [vmem:[%s14971_s3 + $0xdc] ss:$12 sps:$4 sm:$0xff]   ;;  %v10948_v4 = vld [vmem:[%s14971_s3 + $0xc4] ss:$12 sps:$4 sm:$0xff]  }
 0x173   :  { %2706 = vmatprep.subr.bf16.mxu1 %v10876_v25  ;;  %v10949_v25 = vld [vmem:[%s14971_s3 + $0x1e8] ss:$12 sps:$4 sm:$0xff]  }
 0x174   :  { %2234 = vmatmul.mubr.bf16.vlgmr.msra.gmra.mxu0 %v12649_v29  ;;  %v10888_v29 = vld [vmem:[%s14971_s3 + $0x4c] ss:$12 sps:$4 sm:$0xff]  }
 0x175   :  { %2185 = vmatmul.mubr.bf16.gmra.mxu1 %v12671_v12  ;;  %9187 = vmatprep.mubr.msk.bf16.mxu0 %vm2008_vm9, %v12677_v43  ;;  %v10889_v12 = vld [vmem:[%s14971_s3 + $0x1f8] ss:$12 sps:$4 sm:$0xff]  }
 0x176   :  { %2192 = vmatprep.mubr.bf16.mxu1 %v12701_v37  ;;  %2707 = vmatpush1.bf16.msra.mxu1 %v10874_v26  ;;  %v10897_v43 = vld [vmem:[%s14971_s3 + $0x1e4] ss:$12 sps:$4 sm:$0xff]   ;;  %v10910_v37 = vld [vmem:[%s14971_s3 + $0x168] ss:$12 sps:$4 sm:$0xff]  }
 0x177   :  { %2766 = vmatpush1.bf16.msra.mxu0 %v10877_v54  ;;  %2708 = vmatprep.subr.bf16.mxu1 %v10882_v56  ;;  %v10950_v26 = vld [vmem:[%s14971_s3 + $0x170] ss:$12 sps:$4 sm:$0xff]   ;;  %v10953_v56 = vld [vmem:[%s14971_s3 + $0x158] ss:$12 sps:$4 sm:$0xff]  }
 0x178   :  { %2767 = vmatprep.subr.bf16.mxu0 %v10885_v57  ;;  %v10951_v54 = vld [vmem:[%s14971_s3 + $0xb0] ss:$12 sps:$4 sm:$0xff]   ;;  %v10954_v57 = vld [vmem:[%s14971_s3 + $0x98] ss:$12 sps:$4 sm:$0xff]  }
 0x17a   :  { %2709 = vmatpush1.bf16.msra.mxu1 %v10880_v31  ;;  %v10955_v31 = vld [vmem:[%s14971_s3 + $0x1b8] ss:$12 sps:$4 sm:$0xff]  }
 0x17b   :  { %2768 = vmatpush1.bf16.msra.mxu0 %v10883_v34  ;;  %2710 = vmatprep.subr.bf16.mxu1 %v10888_v29  ;;  %v10956_v34 = vld [vmem:[%s14971_s3 + $0x140] ss:$12 sps:$4 sm:$0xff]  }
 0x17c   :  { %2242 = vmatmul.mubr.bf16.gmra.mxu0 %v12681_v28  ;;  %2769 = vmatprep.subr.bf16.mxu0 %v10891_v36  ;;  %v10900_v28 = vld [vmem:[%s14971_s3 + $0x1c] ss:$12 sps:$4 sm:$0xff]   ;;  %v10958_v29 = vld [vmem:[%s14971_s3 + $0x1a0] ss:$12 sps:$4 sm:$0xff]  }
 0x17d   :  { %2193 = vmatmul.mubr.bf16.gmra.mxu1 %v12713_v0  ;;  %9188 = vmatprep.mubr.msk.bf16.mxu0 %vm2008_vm9, %v12704_v8  ;;  %v10913_v8 = vld [vmem:[%s14971_s3 + $0x198] ss:$12 sps:$4 sm:$0xff]   ;;  %v10959_v36 = vld [vmem:[%s14971_s3 + $0x128] ss:$12 sps:$4 sm:$0xff]  }
 0x17e   :  { %2711 = vmatpush1.bf16.msra.mxu1 %v10886_v11  ;;  %2734 = vmatprep.mubr.bf16.mxu1 %v12547_v59  ;;  %v10921_v0 = vld [vmem:[%s14971_s3 + $0x184] ss:$12 sps:$4 sm:$0xff]   ;;  %v10960_v11 = vld [vmem:[%s14971_s3 + $0x68] ss:$12 sps:$4 sm:$0xff]  }
 0x17f   :  { %2770 = vmatpush1.bf16.msra.mxu0 %v10889_v12  ;;  %2712 = vmatprep.subr.bf16.mxu1 %v10894_v27  ;;  %v10961_v12 = vld [vmem:[%s14971_s3 + $0x188] ss:$12 sps:$4 sm:$0xff]   ;;  %v10962_v27 = vld [vmem:[%s14971_s3 + $0x110] ss:$12 sps:$4 sm:$0xff]  }
 0x180   :  { %2771 = vmatprep.subr.bf16.mxu0 %v10897_v43  ;;  %v10963_v43 = vld [vmem:[%s14971_s3 + $0x50] ss:$12 sps:$4 sm:$0xff]  }
 0x182   :  { %2713 = vmatpush1.bf16.msra.mxu1 %v10892_v44  ;;  %v10964_v44 = vld [vmem:[%s14971_s3 + $0x260] ss:$12 sps:$4 sm:$0xff]  }
 0x183   :  { %2772 = vmatpush1.bf16.msra.mxu0 %v10895_v14  ;;  %2714 = vmatprep.subr.bf16.mxu1 %v10900_v28  ;;  %v10965_v14 = vld [vmem:[%s14971_s3 + $0xf8] ss:$12 sps:$4 sm:$0xff]  }
 0x184   :  { %2250 = vmatmul.mubr.bf16.gmra.mxu0 %v12730_v21  ;;  %2773 = vmatprep.subr.bf16.mxu0 %v10903_v35  ;;  %v10925_v21 = vld [vmem:[%s14971_s3 + $0x258] ss:$12 sps:$4 sm:$0xff]   ;;  %v10968_v35 = vld [vmem:[%s14971_s3 + $0xe0] ss:$12 sps:$4 sm:$0xff]  }
 0x185   :  { %9271 = vmatprep.mubr.msk.bf16.mxu0 %vm2008_vm9, %v12856_v49  ;;  %v10966_v28 = vld [vmem:[%s14971_s3 + $0x38] ss:$12 sps:$4 sm:$0xff]  }
 0x186   :  { %2715 = vmatpush1.bf16.msra.mxu1 %v10898_v46  ;;  %v10967_v46 = vld [vmem:[%s14971_s3 + $0x248] ss:$12 sps:$4 sm:$0xff]  }
 0x187   :  { %2774 = vmatpush1.bf16.msra.mxu0 %v10901_v48  ;;  %2716 = vmatprep.subr.bf16.mxu1 %v10906_v13  ;;  %v10972_v48 = vld [vmem:[%s14971_s3 + $0x20] ss:$12 sps:$4 sm:$0xff]   ;;  %v10973_v13 = vld [vmem:[%s14971_s3 + $0xc8] ss:$12 sps:$4 sm:$0xff]  }
 0x188   :  { %2775 = vmatprep.subr.bf16.mxu0 %v10909_v51  ;;  %v13055_v51 = vld [vmem:[#allocation2 + $0x2c] ss:$16 sps:$4 sm:$0xff]  }
 0x18a   :  { %2717 = vmatpush1.bf16.msra.mxu1 %v10904_v18  ;;  %v10977_v18 = vld [vmem:[%s14971_s3 + $0x8] ss:$12 sps:$4 sm:$0xff]  }
 0x18b   :  { %2776 = vmatpush1.bf16.msra.mxu0 %v10907_v19  ;;  %2718 = vmatprep.subr.bf16.mxu1 %v10912_v38  ;;  %v10974_v19 = vld [vmem:[%s14971_s3 + $0x6f0] ss:$12 sps:$4 sm:$0xff]   ;;  %v10980_v38 = vld [vmem:[%s14971_s3 + $0x58c] ss:$12 sps:$4 sm:$0xff]  }
 0x18c   :  { %2777 = vmatprep.subr.bf16.mxu0 %v10915_v40  ;;  %v10983_v40 = vld [vmem:[%s14971_s3 + $0x6dc] ss:$12 sps:$4 sm:$0xff]  }
 0x18e   :  { %2719 = vmatpush2.bf16.msra.mxu1 %v10910_v37  ;;  %v10978_v37 = vld [vmem:[%s14971_s3 + $0x588] ss:$12 sps:$4 sm:$0xff]  }
 0x18f   :  { %2778 = vmatpush1.bf16.msra.mxu0 %v10913_v8  ;;  %2720 = vmatprep.subr.bf16.mxu1 %v10918_v33  ;;  %v10981_v8 = vld [vmem:[%s14971_s3 + $0x6d8] ss:$12 sps:$4 sm:$0xff]   ;;  %v10986_v33 = vld [vmem:[%s14971_s3 + $0x574] ss:$12 sps:$4 sm:$0xff]  }
 0x190   :  { %2779 = vmatprep.subr.bf16.mxu0 %v10921_v0  ;;  %v13084_v0 = vld [vmem:[#allocation2 + $0x28] ss:$16 sps:$4 sm:$0xff]  }
 0x192   :  { %2721 = vmatpush2.bf16.msra.mxu1 %v10916_v53  ;;  %v10989_v53 = vld [vmem:[%s14971_s3 + $0x6c4] ss:$12 sps:$4 sm:$0xff]  }
 0x193   :  { %2780 = vmatpush1.bf16.msra.mxu0 %v10919_v22  ;;  %2722 = vmatprep.subr.bf16.mxu1 %v10924_v16  ;;  %v13090_v22 = vld [vmem:[#allocation2 + $0x8] sm:$0xcc]  ;;  %v10984_v16 = vld [vmem:[%s14971_s3 + $0x570] ss:$12 sps:$4 sm:$0xff]  }
 0x194   :  { %2793 = vmatprep.subr.bf16.mxu0 %v10927_v15  ;;  %v13098_v15 = vld [vmem:[#allocation2 + $0x18] sm:$0xff] }
 0x196   :  { %2723 = vmatpush2.bf16.msra.mxu1 %v10922_v62  ;;  %v9384_v62 = vcombine.high %v13090_v22, %v13098_v15 }
 0x197   :  { %2794 = vmatpush2.bf16.msra.mxu0 %v10925_v21  ;;  %2724 = vmatprep.subr.bf16.mxu1 %v10930_v55  ;;  %v10995_v21 = vld [vmem:[%s14971_s3 + $0x6ac] ss:$12 sps:$4 sm:$0xff]   ;;  %v3081_v55 = vrot.slane %v13055_v51, 2 }
 0x198   :  { %2795 = vmatprep.subr.bf16.mxu0 %v10933_v42  ;;  %v10990_v42 = vld [vmem:[%s14971_s3 + $0x558] ss:$12 sps:$4 sm:$0xff]  }
 0x19a   :  { %2725 = vmatpush2.bf16.msra.mxu1 %v10928_v60  ;;  %v10993_v60 = vld [vmem:[%s14971_s3 + $0x6a8] ss:$12 sps:$4 sm:$0xff]  }
 0x19b   :  { %2796 = vmatpush2.bf16.msra.mxu0 %v10931_v24  ;;  %2726 = vmatprep.subr.bf16.mxu1 %v10936_v41  ;;  %v3080_v24 = vrot.slane %v9384_v62, 2  ;;  %v10998_v41 = vld [vmem:[%s14971_s3 + $0x544] ss:$12 sps:$4 sm:$0xff]  }
 0x19c   :  { %2885 = vmatprep.subr.bf16.mxu0 %v15009_v5 }
 0x19e   :  { %2798 = vmatmul.mubr.bf16.vlgmr.msra.gmra.mxu0 %v12931_v30  ;;  %2727 = vmatpush2.bf16.msra.mxu1 %v10934_v1  ;;  %v11001_v1 = vld [vmem:[%s14971_s3 + $0x694] ss:$12 sps:$4 sm:$0xff]  }
 0x19f   :  { %9272 = vmatprep.mubr.msk.bf16.mxu0 %vm2008_vm9, %v12603_v52  ;;  %2886 = vmatpush1.bf16.msra.mxu0 %v10937_v20  ;;  %v10946_v52 = vld [vmem:[%s14971_s3 + $0xc0] ss:$12 sps:$4 sm:$0xff]  }
 0x1a0   :  { %2728 = vmatprep.subr.bf16.mxu1 %v10940_v39  ;;  %2887 = vmatprep.subr.bf16.mxu0 %v15009_v5  ;;  %v13121_v20 = vld [vmem:[#allocation2] sm:$0xcc]  ;;  %v13124_v39 = vld [vmem:[#allocation2 + $0x48] ss:$16 sps:$4 sm:$0xff]  }
 0x1a2   :  { %2729 = vmatpush2.bf16.msra.mxu1 %v10938_v61  ;;  %v10996_v61 = vld [vmem:[%s14971_s3 + $0x540] ss:$12 sps:$4 sm:$0xff]  }
 0x1a3   :  { %2888 = vmatpush1.bf16.msra.mxu0 %v10941_v47  ;;  %2730 = vmatprep.subr.bf16.mxu1 %v10944_v2  ;;  %v10999_v47 = vld [vmem:[%s14971_s3 + $0x690] ss:$12 sps:$4 sm:$0xff]   ;;  %v9382_v2 = vcombine.high %v13121_v20, %v12530_v7 }
 0x1a4   :  { %2889 = vmatprep.subr.bf16.mxu0 %v15009_v5 }
 0x1a6   :  { %2808 = vmatmul.mubr.bf16.gmra.mxu0 %v12614_v58  ;;  %2731 = vmatpush2.bf16.msra.mxu1 %v10942_v9  ;;  %v10952_v58 = vld [vmem:[%s14971_s3 + $0x1d0] ss:$12 sps:$4 sm:$0xff]   ;;  %v11004_v9 = vld [vmem:[%s14971_s3 + $0x52c] ss:$12 sps:$4 sm:$0xff]  }
 0x1a7   :  { %9273 = vmatprep.mubr.msk.bf16.mxu0 %vm2008_vm9, %v12660_v32  ;;  %2890 = vmatpush1.bf16.msra.mxu0 %v10945_v23  ;;  %v11007_v23 = vld [vmem:[%s14971_s3 + $0x67c] ss:$12 sps:$4 sm:$0xff]  }
 0x1a8   :  { %2732 = vmatprep.subr.bf16.mxu1 %v10948_v4  ;;  %2891 = vmatprep.subr.bf16.mxu0 %v15009_v5  ;;  %v3075_v4 = vrot.slane %v12584_v10, 2 }
 0x1aa   :  { %2733 = vmatpush2.bf16.msra.mxu1 %v10946_v52  ;;  %v11002_v52 = vld [vmem:[%s14971_s3 + $0x528] ss:$12 sps:$4 sm:$0xff]  }
 0x1ab   :  { %2892 = vmatpush1.bf16.msra.mxu0 %v10949_v25  ;;  %10383 = vmatprep.subr.bf16.mxu1 %v10950_v26  ;;  %v11005_v25 = vld [vmem:[%s14971_s3 + $0x678] ss:$12 sps:$4 sm:$0xff]   ;;  %v3074_v26 = vrot.slane %v9382_v2, 2 }
 0x1ac   :  { %2893 = vmatprep.subr.bf16.mxu0 %v15009_v5 }
 0x1ad   :  { %2735 = vmatmul.mubr.bf16.vlgmr.msra.gmra.mxu1 %v12545_v45 }
 0x1ae   :  { %2818 = vmatmul.mubr.bf16.gmra.mxu0 %v12662_v6  ;;  %2744 = vmatprep.mubr.bf16.mxu1 %v12584_v10  ;;  %v10957_v6 = vld [vmem:[%s14971_s3 + $0x80] ss:$12 sps:$4 sm:$0xff]  }
 0x1af   :  { %10384 = vmatpush3.bf16.msra.mxu1 %v10951_v54  ;;  %2894 = vmatpush1.bf16.msra.mxu0 %v10952_v58  ;;  %v11010_v54 = vld [vmem:[%s14971_s3 + $0x514] ss:$12 sps:$4 sm:$0xff]   ;;  %v11013_v58 = vld [vmem:[%s14971_s3 + $0x664] ss:$12 sps:$4 sm:$0xff]  }
 0x1b0   :  { %9274 = vmatprep.mubr.msk.bf16.mxu0 %vm2008_vm9, %v12856_v49  ;;  %10385 = vmatprep.subr.bf16.mxu1 %v10953_v56  ;;  %v10976_v49 = vld [vmem:[%s14971_s3 + $0x6f4] ss:$12 sps:$4 sm:$0xff]   ;;  %v13166_v56 = vsel %vm775_vm4, %v3074_v26, %v3075_v4 }
 0x1b1   :  { %2895 = vmatprep.subr.bf16.mxu0 %v15009_v5  ;;  %v11061_v26 = vld [vmem:[%s14971_s3 + $0x5c0] ss:$12 sps:$4 sm:$0xff]  }
 0x1b3   :  { %10386 = vmatpush3.bf16.msra.mxu1 %v10954_v57  ;;  %2896 = vmatpush1.bf16.msra.mxu0 %v10955_v31  ;;  %v11008_v57 = vld [vmem:[%s14971_s3 + $0x510] ss:$12 sps:$4 sm:$0xff]   ;;  %v11011_v31 = vld [vmem:[%s14971_s3 + $0x660] ss:$12 sps:$4 sm:$0xff]  }
 0x1b4   :  { %10387 = vmatprep.subr.bf16.mxu1 %v10956_v34  ;;  %2897 = vmatprep.subr.bf16.mxu0 %v15009_v5  ;;  %v11016_v34 = vld [vmem:[%s14971_s3 + $0x4fc] ss:$12 sps:$4 sm:$0xff]  }
 0x1b5   :  { %2745 = vmatmul.mubr.bf16.gmra.mxu1 %v12612_v17 }
 0x1b6   :  { %2754 = vmatprep.mubr.bf16.mxu1 %v12620_v63 }
 0x1b7   :  { %10388 = vmatpush3.bf16.msra.mxu1 %v10957_v6  ;;  %2898 = vmatpush1.bf16.msra.mxu0 %v10958_v29  ;;  %v11019_v6 = vld [vmem:[%s14971_s3 + $0x73c] ss:$12 sps:$4 sm:$0xff]   ;;  %v11014_v29 = vld [vmem:[%s14971_s3 + $0x4f8] ss:$12 sps:$4 sm:$0xff]  }
 0x1b8   :  { %10389 = vmatprep.subr.bf16.mxu1 %v10959_v36  ;;  %2899 = vmatprep.subr.bf16.mxu0 %v15009_v5  ;;  %v11017_v36 = vld [vmem:[%s14971_s3 + $0x738] ss:$12 sps:$4 sm:$0xff]  }
 0x1bb   :  { %10390 = vmatpush3.bf16.msra.mxu1 %v10960_v11  ;;  %2900 = vmatpush1.bf16.msra.mxu0 %v10961_v12  ;;  %v11022_v11 = vld [vmem:[%s14971_s3 + $0x4e4] ss:$12 sps:$4 sm:$0xff]  }
 0x1bc   :  { %10391 = vmatprep.subr.bf16.mxu1 %v10962_v27  ;;  %2913 = vmatprep.subr.bf16.mxu0 %v15009_v5  ;;  %v11025_v12 = vld [vmem:[%s14971_s3 + $0x724] ss:$12 sps:$4 sm:$0xff]   ;;  %v11020_v27 = vld [vmem:[%s14971_s3 + $0x4e0] ss:$12 sps:$4 sm:$0xff]  }
 0x1bd   :  { %2755 = vmatmul.mubr.bf16.gmra.mxu1 %v12622_v3 }
 0x1be   :  { %2860 = vmatprep.mubr.bf16.mxu1 %v12547_v59  ;;  %v10971_v59 = vld [vmem:[%s14971_s3 + $0x70c] ss:$12 sps:$4 sm:$0xff]  }
 0x1bf   :  { %10392 = vmatpush3.bf16.msra.mxu1 %v10963_v43  ;;  %2914 = vmatpush2.bf16.msra.mxu0 %v10964_v44  ;;  %v11023_v43 = vld [vmem:[%s14971_s3 + $0x720] ss:$12 sps:$4 sm:$0xff]   ;;  %v9383_v44 = vcombine.low %v13090_v22, %v13098_v15  ;;  %v11044_v15 = vld [vmem:[%s14971_s3 + $0x604] ss:$12 sps:$4 sm:$0xff]  }
 0x1c0   :  { %10393 = vmatprep.subr.bf16.mxu1 %v10965_v14  ;;  %2915 = vmatprep.subr.bf16.mxu0 %v15009_v5  ;;  %v11028_v14 = vld [vmem:[%s14971_s3 + $0x64c] ss:$12 sps:$4 sm:$0xff]  }
 0x1c3   :  { %10394 = vmatpush3.bf16.msra.mxu1 %v10966_v28  ;;  %2916 = vmatpush2.bf16.msra.mxu0 %v10967_v46  ;;  %v11029_v28 = vld [vmem:[%s14971_s3 + $0x650] ss:$12 sps:$4 sm:$0xff]   ;;  %v3078_v46 = vrot.slane %v13084_v0, 2 }
 0x1c4   :  { %10395 = vmatprep.subr.bf16.mxu1 %v10968_v35  ;;  %3596 = vmatprep.subr.bf16.mxu0 %v10971_v59  ;;  %v11757_v35 = vld [vmem:[#allocation2 + $0x4c] ss:$16 sps:$4 sm:$0xff]  }
 0x1c5   :  { %v3089_v59 = vrot.slane %v11757_v35, 2 }
 0x1c6   :  { %2918 = vmatmul.mubr.bf16.vlgmr.msra.gmra.mxu0 %v12931_v30  ;;  %v13130_v30 = vsel %vm775_vm4, %v3080_v24, %v3081_v55  ;;  %v11049_v24 = vld [vmem:[%s14971_s3 + $0x5ec] ss:$12 sps:$4 sm:$0xff]  }
 0x1c7   :  { %10396 = vmatpush3.bf16.msra.mxu1 %v10972_v48  ;;  %9275 = vmatprep.mubr.msk.bf16.mxu0 %vm2008_vm9, %v13055_v51  ;;  %v11026_v48 = vld [vmem:[%s14971_s3 + $0x648] ss:$12 sps:$4 sm:$0xff]  }
 0x1c8   :  { %3597 = vmatpush1.bf16.msra.mxu0 %v10969_v50  ;;  %10397 = vmatprep.subr.bf16.mxu1 %v10973_v13  ;;  %v3077_v50 = vrot.slane %v9383_v44, 2  ;;  %v2945_v13 = vld [vmem:[#allocation2 + $0x68] sm:$0x33] }
 0x1c9   :  { %3598 = vmatprep.subr.bf16.mxu0 %v10976_v49  ;;  %v11030_v49 = vld [vmem:[%s14971_s3 + $0x590] ss:$12 sps:$4 sm:$0xff]  }
 0x1ca   :  { %v11038_v51 = vld [vmem:[%s14971_s3 + $0x61c] ss:$12 sps:$4 sm:$0xff]  }
 0x1cb   :  { %10398 = vmatpush3.bf16.msra.mxu1 %v10977_v18  ;;  %v11033_v18 = vld [vmem:[%s14971_s3 + $0x634] ss:$12 sps:$4 sm:$0xff]  }
 0x1cc   :  { %3599 = vmatpush1.bf16.msra.mxu0 %v10974_v19  ;;  %3533 = vmatprep.subr.bf16.mxu1 %v10980_v38  ;;  %v13218_v19 = vsel %vm775_vm4, %v3077_v50, %v3078_v46  ;;  %v11034_v38 = vld [vmem:[%s14971_s3 + $0x638] ss:$12 sps:$4 sm:$0xff]  }
 0x1cd   :  { %3600 = vmatprep.subr.bf16.mxu0 %v10983_v40  ;;  %v13227_v40 = vsel %vm775_vm4, %v3081_v55, %v3089_v59 }
 0x1ce   :  { %2861 = vmatmul.mubr.bf16.vlgmr.msra.gmra.mxu1 %v12545_v45  ;;  %2926 = vmatmul.mubr.bf16.gmra.mxu0 %v13084_v0  ;;  %v10987_v45 = vld [vmem:[%s14971_s3 + $0x6c0] ss:$12 sps:$4 sm:$0xff]  }
 0x1cf   :  { %2868 = vmatprep.mubr.bf16.mxu1 %v12584_v10  ;;  %9276 = vmatprep.mubr.msk.bf16.mxu0 %vm2008_vm9, %v12660_v32  ;;  %v10992_v32 = vld [vmem:[%s14971_s3 + $0x55c] ss:$12 sps:$4 sm:$0xff]   ;;  %v11039_v0 = vld [vmem:[%s14971_s3 + $0x620] ss:$12 sps:$4 sm:$0xff]  }
 0x1d0   :  { %3534 = vmatpush1.bf16.msra.mxu1 %v10978_v37  ;;  %3601 = vmatpush1.bf16.msra.mxu0 %v10981_v8  ;;  %v9388_v37 = vcombine.high %v2945_v13, %v2945_v13  ;;  %v11031_v8 = vld [vmem:[%s14971_s3 + $0x630] ss:$12 sps:$4 sm:$0xff]  }
 0x1d1   :  { %3535 = vmatprep.subr.bf16.mxu1 %v10986_v33  ;;  %3602 = vmatprep.subr.bf16.mxu0 %v10989_v53  ;;  %v11035_v33 = vld [vmem:[%s14971_s3 + $0x578] ss:$12 sps:$4 sm:$0xff]   ;;  %v3087_v53 = vrot.slane %v13124_v39, 2 }
 0x1d2   :  { %v3097_v22 = vrot.slane %v9388_v37, 2  ;;  %v11071_v37 = vld [vmem:[%s14971_s3 + $0x6e0] ss:$12 sps:$4 sm:$0xff]  }
 0x1d3   :  { %v13254_v62 = vsel %vm775_vm4, %v3078_v46, %v3087_v53 }
 0x1d4   :  { %3536 = vmatpush1.bf16.msra.mxu1 %v10984_v16  ;;  %3603 = vmatpush1.bf16.msra.mxu0 %v10987_v45  ;;  %v11036_v16 = vld [vmem:[%s14971_s3 + $0x618] ss:$12 sps:$4 sm:$0xff]   ;;  %v11041_v45 = vld [vmem:[%s14971_s3 + $0x560] ss:$12 sps:$4 sm:$0xff]   ;;  %v13261_v55 = vsel %vm775_vm4, %v3089_v59, %v3097_v22 }
 0x1d5   :  { %3537 = vmatprep.subr.bf16.mxu1 %v10992_v32  ;;  %3604 = vmatprep.subr.bf16.mxu0 %v10995_v21  ;;  %v11045_v32 = vld [vmem:[%s14971_s3 + $0x608] ss:$12 sps:$4 sm:$0xff]   ;;  %v9387_v21 = vcombine.low %v2945_v13, %v2945_v13 }
 0x1d6   :  { %2869 = vmatmul.mubr.bf16.gmra.mxu1 %v12612_v17  ;;  %2934 = vmatmul.mubr.bf16.gmra.mxu0 %v13124_v39  ;;  %v11047_v39 = vld [vmem:[%s14971_s3 + $0x5e8] ss:$12 sps:$4 sm:$0xff]  }
 0x1d7   :  { %2876 = vmatprep.mubr.bf16.mxu1 %v12620_v63  ;;  %9467 = vmatprep.mubr.msk.bf16.mxu0 %vm2008_vm9, %v13130_v30 }
 0x1d8   :  { %3538 = vmatpush1.bf16.msra.mxu1 %v10990_v42  ;;  %3605 = vmatpush1.bf16.msra.mxu0 %v10993_v60  ;;  %v11042_v42 = vld [vmem:[%s14971_s3 + $0x600] ss:$12 sps:$4 sm:$0xff]   ;;  %v11046_v60 = vld [vmem:[%s14971_s3 + $0x548] ss:$12 sps:$4 sm:$0xff]  }
 0x1d9   :  { %3539 = vmatprep.subr.bf16.mxu1 %v10998_v41  ;;  %3606 = vmatprep.subr.bf16.mxu0 %v11001_v1  ;;  %v3095_v41 = vrot.slane %v9387_v21, 2  ;;  %v11051_v1 = vld [vmem:[%s14971_s3 + $0x5f0] ss:$12 sps:$4 sm:$0xff]  }
 0x1db   :  { %v13287_v2 = vsel %vm775_vm4, %v3087_v53, %v3095_v41 }
 0x1dc   :  { %3540 = vmatpush1.bf16.msra.mxu1 %v10996_v61  ;;  %3607 = vmatpush1.bf16.msra.mxu0 %v10999_v47  ;;  %v11052_v61 = vld [vmem:[%s14971_s3 + $0x530] ss:$12 sps:$4 sm:$0xff]   ;;  %v11055_v47 = vld [vmem:[%s14971_s3 + $0x5d4] ss:$12 sps:$4 sm:$0xff]  }
 0x1dd   :  { %3541 = vmatprep.subr.bf16.mxu1 %v11004_v9  ;;  %3608 = vmatprep.subr.bf16.mxu0 %v11007_v23  ;;  %v11056_v9 = vld [vmem:[%s14971_s3 + $0x5d8] ss:$12 sps:$4 sm:$0xff]   ;;  %v11053_v23 = vld [vmem:[%s14971_s3 + $0x5d0] ss:$12 sps:$4 sm:$0xff]  }
 0x1de   :  { %2877 = vmatmul.mubr.bf16.gmra.mxu1 %v12622_v3 }
 0x1df   :  { %3565 = vmatprep.mubr.bf16.mxu1 %v13166_v56 }
 0x1e0   :  { %3542 = vmatpush1.bf16.msra.mxu1 %v11002_v52  ;;  %3609 = vmatpush1.bf16.msra.mxu0 %v11005_v25  ;;  %v11057_v52 = vld [vmem:[%s14971_s3 + $0x518] ss:$12 sps:$4 sm:$0xff]   ;;  %v11060_v25 = vld [vmem:[%s14971_s3 + $0x5bc] ss:$12 sps:$4 sm:$0xff]  }
 0x1e1   :  { %3543 = vmatprep.subr.bf16.mxu1 %v11010_v54  ;;  %3610 = vmatprep.subr.bf16.mxu0 %v11013_v58  ;;  %v11058_v54 = vld [vmem:[%s14971_s3 + $0x5b8] ss:$12 sps:$4 sm:$0xff]   ;;  %v11062_v58 = vld [vmem:[%s14971_s3 + $0x500] ss:$12 sps:$4 sm:$0xff]  }
 0x1e4   :  { %3544 = vmatpush1.bf16.msra.mxu1 %v11008_v57  ;;  %3611 = vmatpush1.bf16.msra.mxu0 %v11011_v31  ;;  %v11066_v57 = vld [vmem:[%s14971_s3 + $0x5a8] ss:$12 sps:$4 sm:$0xff]   ;;  %v11063_v31 = vld [vmem:[%s14971_s3 + $0x5a0] ss:$12 sps:$4 sm:$0xff]  }
 0x1e5   :  { %3545 = vmatprep.subr.bf16.mxu1 %v11016_v34  ;;  %3624 = vmatprep.subr.bf16.mxu0 %v11019_v6  ;;  %v9381_v34 = vcombine.low %v13121_v20, %v12530_v7  ;;  %v11067_v6 = vld [vmem:[%s14971_s3 + $0x4e8] ss:$12 sps:$4 sm:$0xff]   ;;  %v11068_v7 = vld [vmem:[%s14971_s3 + $0x710] ss:$12 sps:$4 sm:$0xff]  }
 0x1e8   :  { %3546 = vmatpush1.bf16.msra.mxu1 %v11014_v29  ;;  %3625 = vmatpush2.bf16.msra.mxu0 %v11017_v36  ;;  %v3072_v29 = vrot.slane %v12612_v17, 2  ;;  %v3085_v36 = vrot.slane %v12620_v63, 2 }
 0x1e9   :  { %3547 = vmatprep.subr.bf16.mxu1 %v11022_v11  ;;  %3626 = vmatprep.subr.bf16.mxu0 %v11025_v12  ;;  %v3071_v11 = vrot.slane %v9381_v34, 2 }
 0x1ea   :  { %v3086_v17 = vsel %vm775_vm4, %v3075_v4, %v3085_v36  ;;  %v3083_v4 = vrot.slane %v12622_v3, 2 }
 0x1eb   :  { %v3073_v20 = vsel %vm775_vm4, %v3071_v11, %v3072_v29 }
 0x1ec   :  { %3548 = vmatpush1.bf16.msra.mxu1 %v11020_v27  ;;  %3627 = vmatpush2.bf16.msra.mxu0 %v11023_v43  ;;  %v2944_v27 = vld [vmem:[#allocation2 + $0x60] sm:$0x33] }
 0x1ed   :  { %3549 = vmatprep.subr.bf16.mxu1 %v11028_v14  ;;  %10417 = vmatprep.subr.bf16.mxu0 %v11029_v28  ;;  %v9386_v28 = vcombine.high %v2944_v27, %v2944_v27  ;;  %v9385_v53 = vcombine.low %v2944_v27, %v2944_v27 }
 0x1ef   :  { %3629 = vmatmul.mubr.bf16.vlgmr.msra.gmra.mxu0 %v13218_v19 }
 0x1f0   :  { %3550 = vmatpush2.bf16.msra.mxu1 %v11026_v48  ;;  %9468 = vmatprep.mubr.msk.bf16.mxu0 %vm2008_vm9, %v13227_v40  ;;  %v11069_v48 = vld [vmem:[%s14971_s3 + $0x6f8] ss:$12 sps:$4 sm:$0xff]  }
 0x1f1   :  { %10418 = vmatpush3.bf16.msra.mxu0 %v11030_v49  ;;  %3551 = vmatprep.subr.bf16.mxu1 %v11033_v18  ;;  %v3093_v49 = vrot.slane %v9386_v28, 2 }
 0x1f2   :  { %10419 = vmatprep.subr.bf16.mxu0 %v11034_v38 }
 0x1f3   :  { %v3094_v3 = vsel %vm775_vm4, %v3085_v36, %v3093_v49  ;;  %v11079_v36 = vld [vmem:[%s14971_s3 + $0x728] ss:$12 sps:$4 sm:$0xff]  }
 0x1f4   :  { %3552 = vmatpush2.bf16.msra.mxu1 %v11031_v8  ;;  %v3084_v8 = vsel %vm775_vm4, %v3072_v29, %v3083_v4 }
 0x1f5   :  { %10420 = vmatpush3.bf16.msra.mxu0 %v11035_v33  ;;  %3553 = vmatprep.subr.bf16.mxu1 %v11038_v51 }
 0x1f6   :  { %10421 = vmatprep.subr.bf16.mxu0 %v11039_v0 }
 0x1f7   :  { %3639 = vmatmul.mubr.bf16.gmra.mxu0 %v13254_v62 }
 0x1f8   :  { %3554 = vmatpush2.bf16.msra.mxu1 %v11036_v16  ;;  %9469 = vmatprep.mubr.msk.bf16.mxu0 %vm2008_vm9, %v13261_v55 }
 0x1f9   :  { %10422 = vmatpush3.bf16.msra.mxu0 %v11041_v45  ;;  %3555 = vmatprep.subr.bf16.mxu1 %v11044_v15  ;;  %v11072_v15 = vld [vmem:[%s14971_s3 + $0x6c8] ss:$12 sps:$4 sm:$0xff]  }
 0x1fa   :  { %10423 = vmatprep.subr.bf16.mxu0 %v11045_v32 }
 0x1fc   :  { %3556 = vmatpush2.bf16.msra.mxu1 %v11042_v42  ;;  %v3091_v42 = vrot.slane %v9385_v53, 2 }
 0x1fd   :  { %10424 = vmatpush3.bf16.msra.mxu0 %v11046_v60  ;;  %3557 = vmatprep.subr.bf16.mxu1 %v11049_v24 }
 0x1fe   :  { %10425 = vmatprep.subr.bf16.mxu0 %v11051_v1  ;;  %v11074_v1 = vld [vmem:[%s14971_s3 + $0x6b0] ss:$12 sps:$4 sm:$0xff]  }
 0x1ff   :  { %3649 = vmatmul.mubr.bf16.gmra.mxu0 %v13287_v2 }
 0x200   :  { %3558 = vmatpush2.bf16.msra.mxu1 %v11047_v39  ;;  %3691 = vmatprep.mubr.bf16.mxu0 %v13166_v56  ;;  %v11065_v56 = vld [vmem:[%s14971_s3 + $0x5a4] ss:$12 sps:$4 sm:$0xff]   ;;  %v3092_v39 = vsel %vm775_vm4, %v3083_v4, %v3091_v42 }
 0x201   :  { %10426 = vmatpush3.bf16.msra.mxu0 %v11052_v61  ;;  %3559 = vmatprep.subr.bf16.mxu1 %v11055_v47 }
 0x202   :  { %10427 = vmatprep.subr.bf16.mxu0 %v11056_v9 }
 0x204   :  { %3560 = vmatpush2.bf16.msra.mxu1 %v11053_v23 }
 0x205   :  { %10428 = vmatpush3.bf16.msra.mxu0 %v11057_v52  ;;  %3561 = vmatprep.subr.bf16.mxu1 %v11060_v25 }
 0x206   :  { %10429 = vmatprep.subr.bf16.mxu0 %v11061_v26  ;;  %v11075_v26 = vld [vmem:[%s14971_s3 + $0x698] ss:$12 sps:$4 sm:$0xff]  }
 0x208   :  { %3562 = vmatpush2.bf16.msra.mxu1 %v11058_v54 }
 0x209   :  { %10430 = vmatpush3.bf16.msra.mxu0 %v11062_v58  ;;  %3563 = vmatprep.subr.bf16.mxu1 %v11065_v56  ;;  %v11076_v58 = vld [vmem:[%s14971_s3 + $0x680] ss:$12 sps:$4 sm:$0xff]  }
 0x20a   :  { %10431 = vmatprep.subr.bf16.mxu0 %v11066_v57 }
 0x20c   :  { %3564 = vmatpush2.bf16.msra.mxu1 %v11063_v31  ;;  %v2052_v12 = vpop.f32.mrf.mxu0  ;;  %v11078_v31 = vld [vmem:[%s14971_s3 + $0x740] ss:$12 sps:$4 sm:$0xff]  }
 0x20d   :  { %10432 = vmatpush3.bf16.msra.mxu0 %v11067_v6  ;;  %3716 = vmatprep.subr.bf16.mxu1 %v15009_v5  ;;  %v2115_v43 = vpop.f32.mrf.mxu1 }
 0x20e   :  { %v13333_v44 = vadd.f32 %v2115_v43, %v2052_v12  ;;  %v2054_v14 = vpop.f32.mrf.mxu0 }
 0x20f   :  { %3566 = vmatmul.mubr.bf16.vlgmr.msra.gmra.mxu1 %v3073_v20  ;;  %v2117_v63 = vpop.f32.mrf.mxu1 }
 0x210   :  { %3692 = vmatmul.mubr.bf16.vlgmr.msra.gmra.mxu0 %v3073_v20  ;;  %3575 = vmatprep.mubr.bf16.mxu1 %v3086_v17  ;;  %v13338_v46 = vadd.f32 %v2117_v63, %v2054_v14  ;;  %v2056_v35 = vpop.f32.mrf.mxu0 }
 0x211   :  { %3699 = vmatprep.mubr.bf16.mxu0 %v3086_v17  ;;  %3717 = vmatpush1.bf16.msra.mxu1 %v11068_v7  ;;  %v2119_v59 = vpop.f32.mrf.mxu1 }
 0x212   :  { %3718 = vmatprep.subr.bf16.mxu1 %v15009_v5  ;;  %v13344_v50 = vadd.f32 %v2119_v59, %v2056_v35  ;;  %v13346_v10 = vpop.f32.mrf.mxu0 }
 0x213   :  { %v13349_v13 = vpop.f32.mrf.mxu1 }
 0x214   :  { %v2062_v18 = vpop.f32.mrf.mxu0 }
 0x215   :  { %3719 = vmatpush1.bf16.msra.mxu1 %v11069_v48  ;;  %v2125_v38 = vpop.f32.mrf.mxu1 }
 0x216   :  { %3720 = vmatprep.subr.bf16.mxu1 %v15009_v5  ;;  %v13356_v33 = vadd.f32 %v2125_v38, %v2062_v18  ;;  %v2064_v51 = vpop.f32.mrf.mxu0 }
 0x217   :  { %3576 = vmatmul.mubr.bf16.gmra.mxu1 %v3084_v8  ;;  %v2127_v0 = vpop.f32.mrf.mxu1 }
 0x218   :  { %3700 = vmatmul.mubr.bf16.gmra.mxu0 %v3084_v8  ;;  %3585 = vmatprep.mubr.bf16.mxu1 %v3094_v3  ;;  %v13359_v22 = vadd.f32 %v2127_v0, %v2064_v51  ;;  %v2066_v16 = vpop.f32.mrf.mxu0 }
 0x219   :  { %3707 = vmatprep.mubr.bf16.mxu0 %v3094_v3  ;;  %3721 = vmatpush1.bf16.msra.mxu1 %v11071_v37  ;;  %v2129_v45 = vpop.f32.mrf.mxu1 }
 0x21a   :  { %3722 = vmatprep.subr.bf16.mxu1 %v15009_v5  ;;  %v13365_v32 = vadd.f32 %v2129_v45, %v2066_v16  ;;  %v13367_v21 = vpop.f32.mrf.mxu0 }
 0x21b   :  { %v13369_v60 = vpop.f32.mrf.mxu1 }
 0x21c   :  { %v2072_v24 = vpop.f32.mrf.mxu0 }
 0x21d   :  { %3723 = vmatpush1.bf16.msra.mxu1 %v11072_v15  ;;  %v2135_v41 = vpop.f32.mrf.mxu1 }
 0x21e   :  { %3724 = vmatprep.subr.bf16.mxu1 %v15009_v5  ;;  %v13376_v61 = vadd.f32 %v2135_v41, %v2072_v24  ;;  %v2074_v47 = vpop.f32.mrf.mxu0 }
 0x21f   :  { %3586 = vmatmul.mubr.bf16.gmra.mxu1 %v3092_v39  ;;  %v2137_v9 = vpop.f32.mrf.mxu1 }
 0x220   :  { %3708 = vmatmul.mubr.bf16.gmra.mxu0 %v3092_v39  ;;  %9470 = vmatprep.mubr.msk.bf16.mxu1 %vm2008_vm9, %v13130_v30  ;;  %v13380_v23 = vadd.f32 %v2137_v9, %v2074_v47  ;;  %v2076_v52 = vpop.f32.mrf.mxu0  ;;  %v11077_v30 = vld [vmem:[%s14971_s3 + $0x668] ss:$12 sps:$4 sm:$0xff]  }
 0x221   :  { %3725 = vmatpush1.bf16.msra.mxu1 %v11074_v1  ;;  %v2139_v25 = vpop.f32.mrf.mxu1 }
 0x222   :  { %3726 = vmatprep.subr.bf16.mxu1 %v15009_v5  ;;  %v13386_v54 = vadd.f32 %v2139_v25, %v2076_v52  ;;  %v13405_v11 = vpop.f32.mrf.mxu0 }
 0x223   :  { %v13396_v56 = vpop.f32.mrf.mxu1 }
 0x225   :  { %3727 = vmatpush1.bf16.msra.mxu1 %v11075_v26 }
 0x226   :  { %3728 = vmatprep.subr.bf16.mxu1 %v15009_v5 }
 0x229   :  { %3729 = vmatpush1.bf16.msra.mxu1 %v11076_v58 }
 0x22a   :  { %3730 = vmatprep.subr.bf16.mxu1 %v15009_v5 }
 0x22d   :  { %3731 = vmatpush1.bf16.msra.mxu1 %v11077_v30  ;;  %v10365_v57 = vpop.f32.mrf.mxu1 }
 0x22e   :  { %3744 = vmatprep.subr.bf16.mxu1 %v15009_v5 }
 0x22f   :  { %v10366_v34 = vpop.f32.mrf.mxu1 }
 0x230   :  { %v10367_v6 = vadd.f32 %v10366_v34, %v10365_v57 }
 0x231   :  { %3745 = vmatpush2.bf16.msra.mxu1 %v11078_v31  ;;  %v10368_v29 = vpop.f32.mrf.mxu1 }
 0x232   :  { %3746 = vmatprep.subr.bf16.mxu1 %v15009_v5 }
 0x233   :  { %v10369_v12 = vpop.f32.mrf.mxu1 }
 0x234   :  { %v2235_v27 = vpop.f32.mrf.mxu0  ;;  %v10370_v43 = vadd.f32 %v10369_v12, %v10368_v29 }
 0x235   :  { %3747 = vmatpush2.bf16.msra.mxu1 %v11079_v36  ;;  %v10371_v7 = vpop.f32.mrf.mxu1  ;;  %v13408_v20 = vadd.f32 %v10367_v6, %v2235_v27 }
 0x236   :  { %v2237_v14 = vpop.f32.mrf.mxu0 }
 0x237   :  { %v10372_v17 = vpop.f32.mrf.mxu1 }
 0x238   :  { %3749 = vmatmul.mubr.bf16.vlgmr.msra.gmra.mxu1 %v13218_v19  ;;  %v10373_v63 = vadd.f32 %v10372_v17, %v10371_v7  ;;  %v2238_v28 = vpop.f32.mrf.mxu0 }
 0x239   :  { %9471 = vmatprep.mubr.msk.bf16.mxu1 %vm2008_vm9, %v13227_v40  ;;  %v10374_v35 = vpop.f32.mrf.mxu1  ;;  %v13413_v59 = vadd.f32 %v10370_v43, %v2238_v28 }
 0x23a   :  { %v2240_v48 = vpop.f32.mrf.mxu0 }
 0x23b   :  { %v10375_v4 = vpop.f32.mrf.mxu1 }
 0x23c   :  { %v2243_v49 = vpop.f32.mrf.mxu0  ;;  %v10376_v18 = vadd.f32 %v10375_v4, %v10374_v35 }
 0x23d   :  { %v10377_v38 = vpop.f32.mrf.mxu1  ;;  %v13415_v37 = vadd.f32 %v10373_v63, %v2243_v49 }
 0x23e   :  { %v2245_v8 = vpop.f32.mrf.mxu0 }
 0x23f   :  { %v10378_v51 = vpop.f32.mrf.mxu1 }
 0x240   :  { %3757 = vmatmul.mubr.bf16.gmra.mxu1 %v13254_v62  ;;  %v10379_v19 = vadd.f32 %v10378_v51, %v10377_v38  ;;  %v2246_v53 = vpop.f32.mrf.mxu0 }
 0x241   :  { %9472 = vmatprep.mubr.msk.bf16.mxu1 %vm2008_vm9, %v13261_v55  ;;  %v10380_v40 = vpop.f32.mrf.mxu1  ;;  %v13420_v3 = vadd.f32 %v10376_v18, %v2246_v53  ;;  %vm7667_vm9 = vmor %vm7666_vm7, %vm7665_vm6 }
 0x242   :  { %v2248_v0 = vpop.f32.mrf.mxu0 }
 0x243   :  { %v10381_v16 = vpop.f32.mrf.mxu1 }
 0x244   :  { %v2251_v45 = vpop.f32.mrf.mxu0  ;;  %v10382_v15 = vadd.f32 %v10381_v16, %v10380_v40 }
 0x245   :  { %v13422_v42 = vadd.f32 %v10379_v19, %v2251_v45 }
 0x246   :  { %v2253_v24 = vpop.f32.mrf.mxu0 }
 0x248   :  { %3765 = vmatmul.mubr.bf16.gmra.mxu1 %v13287_v2  ;;  %v2254_v41 = vpop.f32.mrf.mxu0 }
 0x249   :  { %v13425_v1 = vadd.f32 %v10382_v15, %v2254_v41  ;;  %5029 = vmatprep.mubr.bf16.mxu1 %v15009_v5 }
 0x24a   :  { %v2256_v62 = vpop.f32.mrf.mxu0 }
 0x25e   :  { %v2799_v39 = vpop.f32.mrf.mxu0 }
 0x260   :  { %v2801_v55 = vpop.f32.mrf.mxu0 }
 0x262   :  { %v2803_v47 = vpop.f32.mrf.mxu0 }
 0x264   :  { %v13428_v9 = vpop.f32.mrf.mxu0 }
 0x266   :  { %v2809_v52 = vpop.f32.mrf.mxu0 }
 0x268   :  { %v2811_v25 = vpop.f32.mrf.mxu0 }
 0x26a   :  { %v2813_v57 = vpop.f32.mrf.mxu0 }
 0x26c   :  { %v13439_v12 = vpop.f32.mrf.mxu0 }
 0x26d   :  { %v2736_v26 = vpop.f32.mrf.mxu1 }
 0x26e   :  { %v2737_v58 = vadd.f32 %v2736_v26, %v13333_v44  ;;  %v2819_v14 = vpop.f32.mrf.mxu0 }
 0x26f   :  { %v2738_v30 = vpop.f32.mrf.mxu1 }
 0x270   :  { %v13431_v31 = vadd.f32 %v2799_v39, %v2737_v58  ;;  %v2739_v2 = vadd.f32 %v2738_v30, %v13338_v46  ;;  %v2821_v48 = vpop.f32.mrf.mxu0 }
 0x271   :  { %v2740_v34 = vpop.f32.mrf.mxu1 }
 0x272   :  { %v13434_v6 = vadd.f32 %v2801_v55, %v2739_v2  ;;  %v2741_v29 = vadd.f32 %v2740_v34, %v13344_v50  ;;  %v2823_v38 = vpop.f32.mrf.mxu0 }
 0x273   :  { %v13437_v36 = vpop.f32.mrf.mxu1 }
 0x274   :  { %v13441_v27 = vadd.f32 %v2803_v47, %v2741_v29 }
 0x275   :  { %v2746_v43 = vpop.f32.mrf.mxu1 }
 0x276   :  { %v2747_v44 = vadd.f32 %v2746_v43, %v13356_v33 }
 0x277   :  { %v2748_v7 = vpop.f32.mrf.mxu1 }
 0x278   :  { %v13444_v17 = vadd.f32 %v2809_v52, %v2747_v44  ;;  %v2749_v46 = vadd.f32 %v2748_v7, %v13359_v22 }
 0x279   :  { %v2750_v63 = vpop.f32.mrf.mxu1 }
 0x27a   :  { %v13447_v28 = vadd.f32 %v2811_v25, %v2749_v46  ;;  %v2751_v50 = vadd.f32 %v2750_v63, %v13365_v32  ;;  %v13461_v32 = vpop.f32.mrf.mxu0 }
 0x27b   :  { %v13450_v35 = vpop.f32.mrf.mxu1 }
 0x27c   :  { %v13452_v4 = vadd.f32 %v2813_v57, %v2751_v50 }
 0x27d   :  { %v2756_v49 = vpop.f32.mrf.mxu1 }
 0x27e   :  { %v2757_v18 = vadd.f32 %v2756_v49, %v13376_v61 }
 0x27f   :  { %v2758_v33 = vpop.f32.mrf.mxu1 }
 0x280   :  { %v13455_v8 = vadd.f32 %v2819_v14, %v2757_v18  ;;  %v2759_v51 = vadd.f32 %v2758_v33, %v13380_v23 }
 0x281   :  { %v2760_v22 = vpop.f32.mrf.mxu1 }
 0x282   :  { %v13458_v19 = vadd.f32 %v2821_v48, %v2759_v51  ;;  %v2761_v53 = vadd.f32 %v2760_v22, %v13386_v54 }
 0x283   :  { %v13465_v15 = vpop.f32.mrf.mxu1 }
 0x284   :  { %v13463_v40 = vadd.f32 %v2823_v38, %v2761_v53 }
 0x286   :  { %v2919_v0 = vpop.f32.mrf.mxu0 }
 0x288   :  { %v2921_v16 = vpop.f32.mrf.mxu0 }
 0x28a   :  { %v2922_v45 = vpop.f32.mrf.mxu0 }
 0x28c   :  { %v2924_v61 = vpop.f32.mrf.mxu0 }
 0x28e   :  { %v10399_v24 = vpop.f32.mrf.mxu1  ;;  %v2927_v41 = vpop.f32.mrf.mxu0 }
 0x290   :  { %v10400_v62 = vpop.f32.mrf.mxu1  ;;  %v2929_v39 = vpop.f32.mrf.mxu0 }
 0x291   :  { %v10401_v23 = vadd.f32 %v10400_v62, %v10399_v24 }
 0x292   :  { %v10402_v55 = vpop.f32.mrf.mxu1  ;;  %v2930_v47 = vpop.f32.mrf.mxu0 }
 0x293   :  { %v2863_v52 = vadd.f32 %v10401_v23, %v13408_v20 }
 0x294   :  { %v10403_v54 = vpop.f32.mrf.mxu1  ;;  %v2932_v25 = vpop.f32.mrf.mxu0 }
 0x295   :  { %v10404_v26 = vadd.f32 %v10403_v54, %v10402_v55  ;;  %v13468_v58 = vadd.f32 %v2919_v0, %v2863_v52  ;;  %v15010_v25 = vld [vmem:[#allocation12_spill] sm:$0xff] }
 0x296   :  { %v10405_v30 = vpop.f32.mrf.mxu1  ;;  %v2935_v57 = vpop.f32.mrf.mxu0 }
 0x297   :  { %v2866_v2 = vadd.f32 %v10404_v26, %v13413_v59 }
 0x298   :  { %v10406_v34 = vpop.f32.mrf.mxu1  ;;  %v2937_v29 = vpop.f32.mrf.mxu0 }
 0x299   :  { %v10407_v43 = vadd.f32 %v10406_v34, %v10405_v30  ;;  %v13471_v44 = vadd.f32 %v2922_v45, %v2866_v2 }
 0x29a   :  { %v10408_v7 = vpop.f32.mrf.mxu1  ;;  %v2938_v14 = vpop.f32.mrf.mxu0 }
 0x29b   :  { %v2871_v46 = vadd.f32 %v10407_v43, %v13415_v37  ;;  %v15011_v43 = vld [vmem:[#allocation14_spill] sm:$0xff] }
 0x29c   :  { %v10409_v63 = vpop.f32.mrf.mxu1  ;;  %v2940_v20 = vpop.f32.mrf.mxu0 }
 0x29d   :  { %v10410_v50 = vadd.f32 %v10409_v63, %v10408_v7  ;;  %v13474_v48 = vadd.f32 %v2927_v41, %v2871_v46 }
 0x29e   :  { %v10411_v49 = vpop.f32.mrf.mxu1 }
 0x29f   :  { %v2874_v18 = vadd.f32 %v10410_v50, %v13420_v3 }
 0x2a0   :  { %v10412_v33 = vpop.f32.mrf.mxu1 }
 0x2a1   :  { %v10413_v38 = vadd.f32 %v10412_v33, %v10411_v49  ;;  %v13477_v59 = vadd.f32 %v2930_v47, %v2874_v18  ;;  %v2132_v18 = vadd.f32 %v13369_v60, %v13367_v21 }
 0x2a2   :  { %v10414_v51 = vpop.f32.mrf.mxu1 }
 0x2a3   :  { %v2879_v22 = vadd.f32 %v10413_v38, %v13422_v42  ;;  %v13488_v42 = vld [vmem:[%s14972_s4] sm:$0x7] }
 0x2a4   :  { %v10415_v53 = vpop.f32.mrf.mxu1  ;;  %v13494_v26 = vrot.slane %v13488_v42, %v15010_v25  ;;  %v13500_v7 = vrot.slane %v13488_v42, %v15011_v43 }
 0x2a5   :  { %v10416_v0 = vadd.f32 %v10415_v53, %v10414_v51  ;;  %v13480_v16 = vadd.f32 %v2935_v57, %v2879_v22 }
 0x2a7   :  { %v2882_v37 = vadd.f32 %v10416_v0, %v13425_v1  ;;  %v2122_v1 = vadd.f32 %v13349_v13, %v13346_v10 }
 0x2a9   :  { %v13483_v45 = vadd.f32 %v2938_v14, %v2882_v37  ;;  %v2743_v57 = vadd.f32 %v13437_v36, %v2122_v1  ;;  %v2753_v37 = vadd.f32 %v13450_v35, %v2132_v18 }
 0x2ab   :  { %v2806_v20 = vadd.f32 %v13428_v9, %v2743_v57  ;;  %v2816_v35 = vadd.f32 %v13439_v12, %v2753_v37 }
 0x2af   :  { %v3630_v61 = vpop.f32.mrf.mxu0 }
 0x2b1   :  { %v3632_v24 = vpop.f32.mrf.mxu0 }
 0x2b3   :  { %v3634_v41 = vpop.f32.mrf.mxu0 }
 0x2b5   :  { %v3636_v62 = vpop.f32.mrf.mxu0 }
 0x2b7   :  { %v3640_v3 = vpop.f32.mrf.mxu0 }
 0x2b9   :  { %v3642_v39 = vpop.f32.mrf.mxu0 }
 0x2bb   :  { %v3644_v23 = vpop.f32.mrf.mxu0 }
 0x2bd   :  { %v3646_v55 = vpop.f32.mrf.mxu0 }
 0x2bf   :  { %v3650_v47 = vpop.f32.mrf.mxu0 }
 0x2c1   :  { %v3652_v2 = vpop.f32.mrf.mxu0 }
 0x2c3   :  { %v3654_v50 = vpop.f32.mrf.mxu0 }
 0x2c5   :  { %v3656_v9 = vpop.f32.mrf.mxu0 }
 0x2cf   :  { %v3567_v52 = vpop.f32.mrf.mxu1 }
 0x2d0   :  { %v3631_v54 = vadd.f32 %v3630_v61, %v3567_v52  ;;  %v13513_v52 = vpop.f32.mrf.mxu0 }
 0x2d1   :  { %v3569_v30 = vpop.f32.mrf.mxu1 }
 0x2d2   :  { %v3773_v34 = vadd.f32 %v3631_v54, %v13431_v31  ;;  %v3633_v29 = vadd.f32 %v3632_v24, %v3569_v30 }
 0x2d3   :  { %v3571_v14 = vpop.f32.mrf.mxu1 }
 0x2d4   :  { %v3808_v46 = vadd.f32 %v13494_v26, %v3773_v34  ;;  %v3774_v10 = vadd.f32 %v3633_v29, %v13434_v6  ;;  %v3635_v13 = vadd.f32 %v3634_v41, %v3571_v14  ;;  %v13520_v14 = vpop.f32.mrf.mxu0 }
 0x2d5   :  { %v3573_v63 = vpop.f32.mrf.mxu1 }
 0x2d6   :  { %v3809_v36 = vadd.f32 %v13500_v7, %v3774_v10  ;;  %v3776_v49 = vadd.f32 %v3635_v13, %v13441_v27  ;;  %v3637_v31 = vadd.f32 %v3636_v62, %v3573_v63  ;;  %v3826_v33 = vmax.f32 %v3808_v46, 0.0 }
 0x2d7   :  { %v3577_v38 = vpop.f32.mrf.mxu1 }
 0x2d8   :  { %v3827_v51 = vmax.f32 %v3809_v36, 0.0  ;;  %v3811_v22 = vadd.f32 %v13494_v26, %v3776_v49  ;;  %v3777_v53 = vadd.f32 %v3637_v31, %v2806_v20  ;;  %v3641_v6 = vadd.f32 %v3640_v3, %v3577_v38  ;;  %v13528_v38 = vpop.f32.mrf.mxu0 }
 0x2d9   :  { %v3579_v0 = vpop.f32.mrf.mxu1 }
 0x2da   :  { %v10329_v61 = vpack.c.bf16 %v3827_v51, %v3826_v33  ;;  %v3812_v24 = vadd.f32 %v13500_v7, %v3777_v53  ;;  %v3779_v27 = vadd.f32 %v3641_v6, %v13444_v17  ;;  %v3643_v41 = vadd.f32 %v3642_v39, %v3579_v0 }
 0x2db   :  { %v3581_v62 = vpop.f32.mrf.mxu1  ;;  %v3829_v21 = vmax.f32 %v3811_v22, 0.0 }
 0x2dc   :  { %3904 = vst [vmem:[#allocation2] sm:$0xff] %v10329_v61  ;;  %v3830_v60 = vmax.f32 %v3812_v24, 0.0  ;;  %v3645_v1 = vadd.f32 %v3644_v23, %v3581_v62  ;;  %v3814_v54 = vadd.f32 %v13494_v26, %v3779_v27  ;;  %v3780_v3 = vadd.f32 %v3643_v41, %v13447_v28  ;;  %v13537_v41 = vpop.f32.mrf.mxu0 }
 0x2dd   :  { %v3583_v30 = vpop.f32.mrf.mxu1  ;;  %v2142_v28 = vadd.f32 %v13396_v56, %v13405_v11 }
 0x2de   :  { %v10331_v57 = vpack.c.bf16 %v3830_v60, %v3829_v21  ;;  %v3782_v34 = vadd.f32 %v3645_v1, %v13452_v4  ;;  %v3647_v29 = vadd.f32 %v3646_v55, %v3583_v30  ;;  %v3815_v17 = vadd.f32 %v13500_v7, %v3780_v3  ;;  %v11080_v21 = vld [vmem:[%s14973_s5 + $0x2d0] ss:$12 sps:$4 sm:$0xff]   ;;  %v11082_v1 = vld [vmem:[%s14973_s5 + $0x2d4] ss:$12 sps:$4 sm:$0xff]  }
 0x2df   :  { %v3587_v39 = vpop.f32.mrf.mxu1  ;;  %v3832_v13 = vmax.f32 %v3814_v54, 0.0  ;;  %v2763_v36 = vadd.f32 %v13465_v15, %v2142_v28  ;;  %4946 = vmatprep.subr.bf16.mxu0 %v11082_v1 }
 0x2e0   :  { %3906 = vst [vmem:[#allocation2 + $0x10] sm:$0xff] %v10331_v57  ;;  %v3817_v46 = vadd.f32 %v13494_v26, %v3782_v34  ;;  %v3783_v23 = vadd.f32 %v3647_v29, %v2816_v35  ;;  %v3651_v10 = vadd.f32 %v3650_v47, %v3587_v39  ;;  %v3833_v63 = vmax.f32 %v3815_v17, 0.0  ;;  %v11085_v35 = vld [vmem:[%s14973_s5 + $0x2bc] ss:$12 sps:$4 sm:$0xff]   ;;  %v10439_v34 = vpop.f32.mrf.mxu0  ;;  %4947 = vmatpush1.bf16.msra.mxu0 %v11080_v21  ;;  %v11083_v17 = vld [vmem:[%s14973_s5 + $0x2b8] ss:$12 sps:$4 sm:$0xff]  }
 0x2e1   :  { %v3589_v12 = vpop.f32.mrf.mxu1  ;;  %v2826_v0 = vadd.f32 %v13461_v32, %v2763_v36  ;;  %4948 = vmatprep.subr.bf16.mxu0 %v11085_v35 }
 0x2e2   :  { %v3818_v20 = vadd.f32 %v13500_v7, %v3783_v23  ;;  %v3785_v4 = vadd.f32 %v3651_v10, %v13455_v8  ;;  %v3653_v55 = vadd.f32 %v3652_v2, %v3589_v12  ;;  %v10333_v49 = vpack.c.bf16 %v3833_v63, %v3832_v13  ;;  %v11088_v23 = vld [vmem:[%s14973_s5 + $0x2a4] ss:$12 sps:$4 sm:$0xff]   ;;  %v10440_v12 = vpop.f32.mrf.mxu0 }
 0x2e3   :  { %v3835_v31 = vmax.f32 %v3817_v46, 0.0  ;;  %v3591_v18 = vpop.f32.mrf.mxu1  ;;  %v3951_v33 = vld [vmem:[#allocation2] sm:$0x88]  ;;  %v3949_v2 = vld [vmem:[#allocation2] sm:$0x44]  ;;  %v10441_v21 = vadd.f32 %v10440_v12, %v10439_v34 }
 0x2e4   :  { %v3836_v47 = vmax.f32 %v3818_v20, 0.0  ;;  %v3820_v51 = vadd.f32 %v13494_v26, %v3785_v4  ;;  %v3786_v56 = vadd.f32 %v3653_v55, %v13458_v19  ;;  %v3655_v11 = vadd.f32 %v3654_v50, %v3591_v18  ;;  %3908 = vst [vmem:[#allocation2 + $0x20] sm:$0xff] %v10333_v49  ;;  %4949 = vmatpush1.bf16.msra.mxu0 %v11083_v17  ;;  %v11086_v55 = vld [vmem:[%s14973_s5 + $0x2a0] ss:$12 sps:$4 sm:$0xff]  }
 0x2e5   :  { %v3593_v22 = vpop.f32.mrf.mxu1  ;;  %v9487_v53 = vrot.slane %v3951_v33, 9  ;;  %4950 = vmatprep.subr.bf16.mxu0 %v11088_v23  ;;  %v11091_v33 = vld [vmem:[%s14973_s5 + $0x28c] ss:$12 sps:$4 sm:$0xff]  }
 0x2e6   :  { %v10335_v6 = vpack.c.bf16 %v3836_v47, %v3835_v31  ;;  %v3821_v8 = vadd.f32 %v13500_v7, %v3786_v56  ;;  %v3788_v15 = vadd.f32 %v3655_v11, %v13463_v40  ;;  %v3838_v37 = vmax.f32 %v3820_v51, 0.0  ;;  %v10442_v51 = vpop.f32.mrf.mxu0  ;;  %v11089_v56 = vld [vmem:[%s14973_s5 + $0x288] ss:$12 sps:$4 sm:$0xff]  }
 0x2e7   :  { %v3657_v61 = vadd.f32 %v3656_v9, %v3593_v22  ;;  %v13535_v24 = vmax.bf16 %v9487_v53, %v3949_v2  ;;  %v3990_v27 = vld [vmem:[#allocation2 + $0x10] sm:$0x22]  ;;  %v4027_v62 = vld [vmem:[#allocation2 + $0x10] sm:$0x88]  ;;  %v3988_v32 = vld [vmem:[#allocation2 + $0x10] sm:$0x11]  ;;  %v10435_v22 = vadd.f32 %v13520_v14, %v13513_v52 }
 0x2e8   :  { %3910 = vst [vmem:[#allocation2 + $0x30] sm:$0xff] %v10335_v6  ;;  %v3839_v19 = vmax.f32 %v3821_v8, 0.0  ;;  %v9491_v50 = vrot.slane %v3990_v27, 9  ;;  %v3823_v40 = vadd.f32 %v13494_v26, %v3788_v15  ;;  %v9493_v9 = vrot.slane %v4027_v62, 9  ;;  %v4025_v30 = vld [vmem:[#allocation2 + $0x10] sm:$0x44]  ;;  %4951 = vmatpush1.bf16.msra.mxu0 %v11086_v55  ;;  %v10443_v53 = vpop.f32.mrf.mxu0 }
 0x2e9   :  { %v3789_v60 = vadd.f32 %v3657_v61, %v2826_v0  ;;  %3965 = vrot.lane.b32.xlu0 %v13535_v24, %s11814_s23  ;;  %v11094_v11 = vld [vmem:[%s14973_s5 + $0x274] ss:$12 sps:$4 sm:$0xff]   ;;  %4952 = vmatprep.subr.bf16.mxu0 %v11091_v33  ;;  %v11092_v8 = vld [vmem:[%s14973_s5 + $0x270] ss:$12 sps:$4 sm:$0xff]   ;;  %v10438_v61 = vadd.f32 %v13537_v41, %v13528_v38  ;;  %v10444_v41 = vadd.f32 %v10443_v53, %v10442_v51 }
 0x2ea   :  { %v10337_v54 = vpack.c.bf16 %v3839_v19, %v3838_v37  ;;  %v13548_v3 = vmax.bf16 %v9491_v50, %v3988_v32  ;;  %v13554_v57 = vmax.bf16 %v9493_v9, %v4025_v30  ;;  %v3841_v39 = vmax.f32 %v3823_v40, 0.0  ;;  %v15012_v2 = vld [vmem:[#allocation13_spill] sm:$0xff]  ;;  %v10445_v52 = vpop.f32.mrf.mxu0  ;;  %v11097_v51 = vld [vmem:[%s14973_s5 + $0x25c] ss:$12 sps:$4 sm:$0xff]  }
 0x2eb   :  { %v3824_v26 = vadd.f32 %v13500_v7, %v3789_v60  ;;  %v4094_v29 = vld [vmem:[#allocation2 + $0x20] sm:$0x88]  ;;  %v4092_v10 = vld [vmem:[#allocation2 + $0x20] sm:$0x44]  ;;  %v13597_v0 = vrot.slane %v13488_v42, %v15012_v2 }
 0x2ec   :  { %3912 = vst [vmem:[#allocation2 + $0x40] sm:$0xff] %v10337_v54  ;;  %4004 = vrot.lane.b32.xlu1 %v13548_v3, %s11814_s23  ;;  %v9497_v7 = vrot.slane %v4094_v29, 9  ;;  %4953 = vmatpush1.bf16.msra.mxu0 %v11089_v56  ;;  %v10446_v42 = vpop.f32.mrf.mxu0 }
 0x2ed   :  { %v3842_v46 = vmax.f32 %v3824_v26, 0.0  ;;  %4041 = vrot.lane.b32.xlu0 %v13554_v57, %s11814_s23  ;;  %4954 = vmatprep.subr.bf16.mxu0 %v11094_v11 }
 0x2ee   :  { %v13566_v13 = vmax.bf16 %v9497_v7, %v4092_v10  ;;  %v10448_v35 = vpop.f32.mrf.mxu0 }
 0x2ef   :  { %v10339_v28 = vpack.c.bf16 %v3842_v46, %v3841_v39  ;;  %v4168_v63 = vld [vmem:[#allocation2 + $0x30] sm:$0x88]  ;;  %v4132_v4 = vld [vmem:[#allocation2 + $0x30] sm:$0x22]  ;;  %v4166_v36 = vld [vmem:[#allocation2 + $0x30] sm:$0x44] }
 0x2f0   :  { %v9503_v20 = vrot.slane %v4168_v63, 9  ;;  %4108 = vrot.lane.b32.xlu1 %v13566_v13, %s11814_s23  ;;  %v9501_v49 = vrot.slane %v4132_v4, 9  ;;  %v4130_v18 = vld [vmem:[#allocation2 + $0x30] sm:$0x11]  ;;  %4955 = vmatpush1.bf16.msra.mxu0 %v11092_v8  ;;  %v10449_v23 = vpop.f32.mrf.mxu0 }
 0x2f1   :  { %3914 = vst [vmem:[#allocation2 + $0x50] sm:$0xff] %v10339_v28  ;;  %v10450_v4 = vadd.f32 %v10449_v23, %v10448_v35  ;;  %4956 = vmatprep.subr.bf16.mxu0 %v11097_v51  ;;  %v11104_v35 = vld [vmem:[%s14973_s5 + $0x228] ss:$12 sps:$4 sm:$0xff]  }
 0x2f2   :  { %v13573_v31 = vmax.bf16 %v9503_v20, %v4166_v36  ;;  %v13578_v47 = vmax.bf16 %v9501_v49, %v4130_v18  ;;  %v11095_v18 = vld [vmem:[%s14973_s5 + $0x258] ss:$12 sps:$4 sm:$0xff]   ;;  %v11118_v51 = vld [vmem:[%s14973_s5 + $0x37c] ss:$12 sps:$4 sm:$0xff]  }
 0x2f4   :  { %4182 = vrot.lane.b32.xlu1 %v13573_v31, %s11814_s23  ;;  %4146 = vrot.lane.b32.xlu0 %v13578_v47, %s11814_s23 }
 0x2f5   :  { %4957 = vmatpush1.bf16.msra.mxu0 %v11095_v18  ;;  %v11113_v18 = vld [vmem:[%s14973_s5 + $0x408] ss:$12 sps:$4 sm:$0xff]  }
 0x2f8   :  { %v3750_v6 = vpop.f32.mrf.mxu1 }
 0x2f9   :  { %v3751_v15 = vadd.f32 %v10435_v22, %v3750_v6 }
 0x2fa   :  { %v3752_v37 = vpop.f32.mrf.mxu1 }
 0x2fb   :  { %v3775_v27 = vadd.f32 %v3751_v15, %v13468_v58 }
 0x2fc   :  { %v3753_v14 = vpop.f32.mrf.mxu1 }
 0x2fd   :  { %v3810_v19 = vadd.f32 %v13597_v0, %v3775_v27  ;;  %v3754_v50 = vadd.f32 %v10438_v61, %v3753_v14  ;;  %v11098_v27 = vld [vmem:[%s14973_s5 + $0x240] ss:$12 sps:$4 sm:$0xff]  }
 0x2fe   :  { %v3755_v62 = vpop.f32.mrf.mxu1 }
 0x2ff   :  { %v3828_v40 = vmax.f32 %v3810_v19, 0.0  ;;  %v3778_v60 = vadd.f32 %v3754_v50, %v13471_v44  ;;  %v10447_v44 = vadd.f32 %v10446_v42, %v10445_v52  ;;  %v11100_v19 = vld [vmem:[%s14973_s5 + $0x244] ss:$12 sps:$4 sm:$0xff]  }
 0x300   :  { %v3758_v32 = vpop.f32.mrf.mxu1  ;;  %4958 = vmatprep.subr.bf16.mxu0 %v11100_v19  ;;  %v11121_v19 = vld [vmem:[%s14973_s5 + $0x3f4] ss:$12 sps:$4 sm:$0xff]  }
 0x301   :  { %v10330_v9 = vpack.c.bf16 %v3828_v40, %v3828_v40  ;;  %v3813_v1 = vadd.f32 %v13597_v0, %v3778_v60  ;;  %v3759_v54 = vadd.f32 %v10441_v21, %v3758_v32  ;;  %4959 = vmatpush1.bf16.msra.mxu0 %v11098_v27  ;;  %v11119_v27 = vld [vmem:[%s14973_s5 + $0x3f0] ss:$12 sps:$4 sm:$0xff]  }
 0x302   :  { %v3760_v38 = vpop.f32.mrf.mxu1 }
 0x303   :  { %3905 = vst [vmem:[#allocation2 + $0x8] sm:$0xf] %v10330_v9  ;;  %v3831_v58 = vmax.f32 %v3813_v1, 0.0  ;;  %v3781_v30 = vadd.f32 %v3759_v54, %v13474_v48  ;;  %v11101_v54 = vld [vmem:[%s14973_s5 + $0x438] ss:$12 sps:$4 sm:$0xff]  }
 0x304   :  { %v3761_v26 = vpop.f32.mrf.mxu1  ;;  %v11103_v38 = vld [vmem:[%s14973_s5 + $0x43c] ss:$12 sps:$4 sm:$0xff]  }
 0x305   :  { %v10332_v29 = vpack.c.bf16 %v3831_v58, %v3831_v58  ;;  %v3816_v34 = vadd.f32 %v13597_v0, %v3781_v30  ;;  %v3762_v17 = vadd.f32 %v10444_v41, %v3761_v26  ;;  %v11106_v26 = vld [vmem:[%s14973_s5 + $0x22c] ss:$12 sps:$4 sm:$0xff]   ;;  %4999 = vmatprep.subr.bf16.mxu1 %v11103_v38 }
 0x306   :  { %v3763_v39 = vpop.f32.mrf.mxu1  ;;  %5000 = vmatpush1.bf16.msra.mxu1 %v11101_v54  ;;  %4960 = vmatprep.subr.bf16.mxu0 %v11106_v26  ;;  %v11125_v54 = vld [vmem:[%s14973_s5 + $0x3d8] ss:$12 sps:$4 sm:$0xff]  }
 0x307   :  { %3907 = vst [vmem:[#allocation2 + $0x18] sm:$0xf] %v10332_v29  ;;  %v3834_v46 = vmax.f32 %v3816_v34, 0.0  ;;  %v3784_v7 = vadd.f32 %v3762_v17, %v13477_v59  ;;  %4961 = vmatpush1.bf16.msra.mxu0 %v11104_v35  ;;  %v11130_v38 = vld [vmem:[%s14973_s5 + $0x34c] ss:$12 sps:$4 sm:$0xff]  }
 0x308   :  { %v3766_v10 = vpop.f32.mrf.mxu1  ;;  %v4062_v26 = vld [vmem:[#allocation2 + $0x20] sm:$0x11] }
 0x309   :  { %v10334_v28 = vpack.c.bf16 %v3834_v46, %v3834_v46  ;;  %v3819_v63 = vadd.f32 %v13597_v0, %v3784_v7  ;;  %v3767_v12 = vadd.f32 %v10447_v44, %v3766_v10  ;;  %v11107_v46 = vld [vmem:[%s14973_s5 + $0x420] ss:$12 sps:$4 sm:$0xff]   ;;  %v11109_v10 = vld [vmem:[%s14973_s5 + $0x424] ss:$12 sps:$4 sm:$0xff]  }
 0x30a   :  { %v3768_v20 = vpop.f32.mrf.mxu1  ;;  %v3952_v48 = vld [vmem:[#allocation2 + $0x8] sm:$0x8]  ;;  %v3950_v59 = vld [vmem:[#allocation2 + $0x8] sm:$0x4]  ;;  %5001 = vmatprep.subr.bf16.mxu1 %v11109_v10  ;;  %v11131_v10 = vld [vmem:[%s14973_s5 + $0x3c0] ss:$12 sps:$4 sm:$0xff]  }
 0x30b   :  { %3909 = vst [vmem:[#allocation2 + $0x28] sm:$0xf] %v10334_v28  ;;  %v3837_v55 = vmax.f32 %v3819_v63, 0.0  ;;  %v3787_v36 = vadd.f32 %v3767_v12, %v13480_v16  ;;  %v9488_v49 = vrot.slane %v3952_v48, 9  ;;  %v11110_v63 = vld [vmem:[%s14973_s5 + $0x390] ss:$12 sps:$4 sm:$0xff]   ;;  %5002 = vmatpush1.bf16.msra.mxu1 %v11107_v46 }
 0x30c   :  { %v3769_v33 = vpop.f32.mrf.mxu1  ;;  %v11112_v12 = vld [vmem:[%s14973_s5 + $0x394] ss:$12 sps:$4 sm:$0xff]   ;;  %v11115_v20 = vld [vmem:[%s14973_s5 + $0x40c] ss:$12 sps:$4 sm:$0xff]  }
 0x30d   :  { %v10336_v56 = vpack.c.bf16 %v3837_v55, %v3837_v55  ;;  %v3822_v11 = vadd.f32 %v13597_v0, %v3787_v36  ;;  %v3770_v22 = vadd.f32 %v10450_v4, %v3769_v33  ;;  %v13617_v53 = vmax.bf16 %v9488_v49, %v3950_v59  ;;  %v4234_v55 = vld [vmem:[#allocation2 + $0x40] sm:$0x88]  ;;  %4962 = vmatprep.subr.bf16.mxu0 %v11112_v12  ;;  %v3918_v46 = vld [vmem:[#allocation2] sm:$0x22]  ;;  %v11139_v12 = vld [vmem:[%s14973_s5 + $0x3ac] ss:$12 sps:$4 sm:$0xff]  }
 0x30e   :  { %v3771_v6 = vpop.f32.mrf.mxu1  ;;  %v4028_v8 = vld [vmem:[#allocation2 + $0x18] sm:$0x8]  ;;  %v3991_v61 = vld [vmem:[#allocation2 + $0x18] sm:$0x2]  ;;  %v4026_v52 = vld [vmem:[#allocation2 + $0x18] sm:$0x4]  ;;  %4963 = vmatpush2.bf16.msra.mxu0 %v11110_v63  ;;  %5003 = vmatprep.subr.bf16.mxu1 %v11115_v20 }
 0x30f   :  { %3911 = vst [vmem:[#allocation2 + $0x38] sm:$0xf] %v10336_v56  ;;  %v3840_v16 = vmax.f32 %v3822_v11, 0.0  ;;  %v3790_v15 = vadd.f32 %v3770_v22, %v13483_v45  ;;  %3967 = vrot.lane.b32.xlu0 %v13617_v53, %s11814_s23  ;;  %v9494_v37 = vrot.slane %v4028_v8, 9  ;;  %v9492_v14 = vrot.slane %v3991_v61, 9  ;;  %4964 = vmatprep.subr.bf16.mxu0 %v11118_v51 }
 0x310   :  { %v3989_v21 = vld [vmem:[#allocation2 + $0x18] sm:$0x1]  ;;  %v4064_v61 = vld [vmem:[#allocation2 + $0x20] sm:$0x22]  ;;  %5004 = vmatpush1.bf16.msra.mxu1 %v11113_v18  ;;  %v4202_v63 = vld [vmem:[#allocation2 + $0x40] sm:$0x11] }
 0x311   :  { %v10338_v50 = vpack.c.bf16 %v3840_v16, %v3840_v16  ;;  %v3825_v62 = vadd.f32 %v13597_v0, %v3790_v15  ;;  %v13629_v45 = vmax.bf16 %v9494_v37, %v4026_v52  ;;  %v13631_v40 = vmax.bf16 %v9492_v14, %v3989_v21  ;;  %v11116_v22 = vld [vmem:[%s14973_s5 + $0x378] ss:$12 sps:$4 sm:$0xff]   ;;  %v4272_v15 = vld [vmem:[#allocation2 + $0x50] sm:$0x22]  ;;  %v11122_v21 = vld [vmem:[%s14973_s5 + $0x360] ss:$12 sps:$4 sm:$0xff]   ;;  %5005 = vmatprep.subr.bf16.mxu1 %v11121_v19 }
 0x312   :  { %v4095_v60 = vld [vmem:[#allocation2 + $0x28] sm:$0x8]  ;;  %v4093_v32 = vld [vmem:[#allocation2 + $0x28] sm:$0x4]  ;;  %v4065_v1 = vld [vmem:[#allocation2 + $0x28] sm:$0x2]  ;;  %4965 = vmatpush2.bf16.msra.mxu0 %v11116_v22 }
 0x313   :  { %3913 = vst [vmem:[#allocation2 + $0x48] sm:$0xf] %v10338_v50  ;;  %v3843_v42 = vmax.f32 %v3825_v62, 0.0  ;;  %4043 = vrot.lane.b32.xlu1 %v13629_v45, %s11814_s23  ;;  %v9498_v9 = vrot.slane %v4095_v60, 9  ;;  %4006 = vrot.lane.b32.xlu0 %v13631_v40, %s11814_s23  ;;  %v9496_v0 = vrot.slane %v4065_v1, 9  ;;  %v9507_v16 = vrot.slane %v4234_v55, 9 }
 0x314   :  { %v4063_v30 = vld [vmem:[#allocation2 + $0x28] sm:$0x1]  ;;  %v4232_v14 = vld [vmem:[#allocation2 + $0x40] sm:$0x44]  ;;  %v9511_v62 = vrot.slane %v4272_v15, 9  ;;  %5006 = vmatpush1.bf16.msra.mxu1 %v11119_v27  ;;  %v9485_v55 = vrot.slane %v3918_v46, 9 }
 0x315   :  { %v10340_v41 = vpack.c.bf16 %v3843_v42, %v3843_v42  ;;  %v13643_v58 = vmax.bf16 %v9498_v9, %v4093_v32  ;;  %v13651_v29 = vmax.bf16 %v9496_v0, %v4063_v30  ;;  %v11124_v60 = vld [vmem:[%s14973_s5 + $0x364] ss:$12 sps:$4 sm:$0xff]   ;;  %v13711_v42 = vmax.bf16 %v9507_v16, %v4232_v14  ;;  %v11127_v1 = vld [vmem:[%s14973_s5 + $0x3dc] ss:$12 sps:$4 sm:$0xff]   ;;  %v11147_v19 = vld [vmem:[%s14973_s5 + $0x300] ss:$12 sps:$4 sm:$0xff]  }
 0x316   :  { %v4167_v34 = vld [vmem:[#allocation2 + $0x38] sm:$0x4]  ;;  %v4169_v17 = vld [vmem:[#allocation2 + $0x38] sm:$0x8]  ;;  %v4133_v44 = vld [vmem:[#allocation2 + $0x38] sm:$0x2]  ;;  %4966 = vmatprep.subr.bf16.mxu0 %v11124_v60  ;;  %5007 = vmatprep.subr.bf16.mxu1 %v11127_v1 }
 0x317   :  { %3915 = vst [vmem:[#allocation2 + $0x58] sm:$0xf] %v10340_v41  ;;  %4110 = vrot.lane.b32.xlu1 %v13643_v58, %s11814_s23  ;;  %v9504_v39 = vrot.slane %v4169_v17, 9  ;;  %4080 = vrot.lane.b32.xlu0 %v13651_v29, %s11814_s23  ;;  %v4131_v7 = vld [vmem:[#allocation2 + $0x38] sm:$0x1]  ;;  %v9502_v23 = vrot.slane %v4133_v44, 9 }
 0x318   :  { %v9495_v32 = vrot.slane %v4064_v61, 9  ;;  %v4204_v9 = vld [vmem:[#allocation2 + $0x40] sm:$0x22]  ;;  %v3919_v0 = vld [vmem:[#allocation2 + $0x8] sm:$0x2]  ;;  %4967 = vmatpush2.bf16.msra.mxu0 %v11122_v21  ;;  %5008 = vmatpush1.bf16.msra.mxu1 %v11125_v54 }
 0x319   :  { %v13663_v28 = vmax.bf16 %v9504_v39, %v4167_v34  ;;  %v13674_v48 = vmax.bf16 %v9502_v23, %v4131_v7  ;;  %v4270_v41 = vld [vmem:[#allocation2 + $0x50] sm:$0x11]  ;;  %v9505_v34 = vrot.slane %v4204_v9, 9  ;;  %v9486_v44 = vrot.slane %v3919_v0, 9  ;;  %4968 = vmatprep.subr.bf16.mxu0 %v11130_v38  ;;  %v11140_v15 = vld [vmem:[%s14973_s5 + $0x318] ss:$12 sps:$4 sm:$0xff]  }
 0x31a   :  { %v4205_v4 = vld [vmem:[#allocation2 + $0x48] sm:$0x2]  ;;  %v4235_v49 = vld [vmem:[#allocation2 + $0x48] sm:$0x8]  ;;  %v4203_v33 = vld [vmem:[#allocation2 + $0x48] sm:$0x1]  ;;  %v13729_v35 = vmax.bf16 %v9511_v62, %v4270_v41  ;;  %v13734_v39 = vmax.bf16 %v9495_v32, %v4062_v26 }
 0x31b   :  { %4184 = vrot.lane.b32.xlu1 %v13663_v28, %s11814_s23  ;;  %v9506_v36 = vrot.slane %v4205_v4, 9  ;;  %4148 = vrot.lane.b32.xlu0 %v13674_v48, %s11814_s23  ;;  %v9508_v59 = vrot.slane %v4235_v49, 9  ;;  %v4233_v11 = vld [vmem:[#allocation2 + $0x48] sm:$0x4]  ;;  %v11133_v30 = vld [vmem:[%s14973_s5 + $0x3c4] ss:$12 sps:$4 sm:$0xff]   ;;  %v13749_v20 = vmax.bf16 %v9505_v34, %v4202_v63 }
 0x31c   :  { %v11128_v17 = vld [vmem:[%s14973_s5 + $0x348] ss:$12 sps:$4 sm:$0xff]   ;;  %5009 = vmatprep.subr.bf16.mxu1 %v11133_v30  ;;  %v11143_v61 = vld [vmem:[%s14973_s5 + $0x398] ss:$12 sps:$4 sm:$0xff]   ;;  %v13799_v60 = vld [vmem:[%s14973_s5 + $0x440] ss:$12 sps:$4 sm:$0xff]  }
 0x31d   :  { %v13686_v56 = vmax.bf16 %v9506_v36, %v4203_v33  ;;  %v13691_v6 = vmax.bf16 %v9508_v59, %v4233_v11  ;;  %v11136_v7 = vld [vmem:[%s14973_s5 + $0x334] ss:$12 sps:$4 sm:$0xff]   ;;  %v3917_v4 = vld [vmem:[#allocation2 + $0x8] sm:$0x1]  ;;  %4969 = vmatpush2.bf16.msra.mxu0 %v11128_v17  ;;  %v11134_v36 = vld [vmem:[%s14973_s5 + $0x330] ss:$12 sps:$4 sm:$0xff]   ;;  %5010 = vmatpush1.bf16.msra.mxu1 %v11131_v10 }
 0x31e   :  { %v4273_v8 = vld [vmem:[#allocation2 + $0x58] sm:$0x2]  ;;  %v4271_v52 = vld [vmem:[#allocation2 + $0x58] sm:$0x1]  ;;  %v4309_v23 = vld [vmem:[#allocation2 + $0x58] sm:$0x8]  ;;  %v13754_v49 = vmax.bf16 %v9486_v44, %v3917_v4  ;;  %4970 = vmatprep.subr.bf16.mxu0 %v11136_v7  ;;  %5011 = vmatprep.subr.bf16.mxu1 %v11139_v12 }
 0x31f   :  { %4220 = vrot.lane.b32.xlu1 %v13686_v56, %s11814_s23  ;;  %v9512_v37 = vrot.slane %v4273_v8, 9  ;;  %4250 = vrot.lane.b32.xlu0 %v13691_v6, %s11814_s23  ;;  %v9514_v18 = vrot.slane %v4309_v23, 9  ;;  %v4308_v33 = vld [vmem:[#allocation2 + $0x50] sm:$0x88]  ;;  %v11142_v59 = vld [vmem:[%s14973_s5 + $0x31c] ss:$12 sps:$4 sm:$0xff]  }
 0x320   :  { %v11137_v51 = vld [vmem:[%s14973_s5 + $0x3a8] ss:$12 sps:$4 sm:$0xff]   ;;  %v3916_v11 = vld [vmem:[#allocation2] sm:$0x11]  ;;  %v4307_v22 = vld [vmem:[#allocation2 + $0x58] sm:$0x4] }
 0x321   :  { %v13703_v50 = vmax.bf16 %v9512_v37, %v4271_v52  ;;  %v13766_v8 = vmax.bf16 %v9485_v55, %v3916_v11  ;;  %v9513_v16 = vrot.slane %v4308_v33, 9  ;;  %4971 = vmatpush2.bf16.msra.mxu0 %v11134_v36  ;;  %v13771_v37 = vmax.bf16 %v9514_v18, %v4307_v22  ;;  %5012 = vmatpush1.bf16.msra.mxu1 %v11137_v51  ;;  %v11149_v27 = vld [vmem:[%s14973_s5 + $0x304] ss:$12 sps:$4 sm:$0xff]   ;;  %v11154_v62 = vld [vmem:[%s14973_s5 + $0x2ec] ss:$12 sps:$4 sm:$0xff]  }
 0x322   :  { %4972 = vmatprep.subr.bf16.mxu0 %v11142_v59  ;;  %v4306_v52 = vld [vmem:[#allocation2 + $0x50] sm:$0x44]  ;;  %10451 = vmatprep.subr.bf16.mxu1 %v11143_v61 }
 0x323   :  { %4288 = vrot.lane.b32.xlu1 %v13703_v50, %s11814_s23  ;;  %4248 = vrot.lane.b32.xlu0 %v13711_v42, %s11814_s23  ;;  %v13783_v14 = vmax.bf16 %v9513_v16, %v4306_v52  ;;  %v11152_v21 = vld [vmem:[%s14973_s5 + $0x2e8] ss:$12 sps:$4 sm:$0xff]  }
 0x325   :  { %4973 = vmatpush2.bf16.msra.mxu0 %v11140_v15 }
 0x326   :  { %4974 = vmatprep.subr.bf16.mxu0 %v11149_v27 }
 0x327   :  { %4286 = vrot.lane.b32.xlu1 %v13729_v35, %s11814_s23  ;;  %4078 = vrot.lane.b32.xlu0 %v13734_v39, %s11814_s23 }
 0x329   :  { %4975 = vmatpush2.bf16.msra.mxu0 %v11147_v19 }
 0x32a   :  { %4976 = vmatprep.subr.bf16.mxu0 %v11154_v62 }
 0x32b   :  { %4218 = vrot.lane.b32.xlu1 %v13749_v20, %s11814_s23  ;;  %3934 = vrot.lane.b32.xlu0 %v13754_v49, %s11814_s23 }
 0x32d   :  { %4977 = vmatpush2.bf16.msra.mxu0 %v11152_v21 }
 0x32e   :  { %10584 = vmatprep.subr.bf16.mxu0 %v13799_v60 }
 0x32f   :  { %3932 = vrot.lane.b32.xlu1 %v13766_v8, %s11814_s23  ;;  %4324 = vrot.lane.b32.xlu0 %v13771_v37, %s11814_s23 }
 0x333   :  { %4322 = vrot.lane.b32.xlu1 %v13783_v14, %s11814_s23  ;;  %s11786_s23 = scalar_lea.vmem %s8802_s1, 32 }
 0x334   :  { %p11787_p5 = scmp.ne.s32.totalorder %s8802_s1, %s11786_s23  ;;  %p11792_p7 = scmp.lt.s32.totalorder %s11786_s23, %s11786_s23 }
 0x336   :  { %p11793_p8 = por %p11792_p7, %p11791_p6 }
 0x338   :  { %p11794_p9 = pnand %p11793_p8, %p11787_p5 }
 0x35b   :  { %v3966_v32 = vpop.permute.xlu0 %3965 }
 0x35c   :  { %v3969_v30 = vrot.slane %v3966_v32, 4 }
 0x35e   :  { %v4005_v9 = vpop.permute.xlu1 %4004 }
 0x35f   :  { %v4042_v1 = vpop.permute.xlu0 %4041  ;;  %v4008_v55 = vrot.slane %v4005_v9, 4 }
 0x360   :  { %v4045_v23 = vrot.slane %v4042_v1, 4 }
 0x362   :  { %v4109_v0 = vpop.permute.xlu1 %4108 }
 0x363   :  { %v4112_v51 = vrot.slane %v4109_v0, 4 }
 0x366   :  { %v13802_v54 = vpop.permute.xlu0 %4146  ;;  %v13804_v38 = vpop.permute.xlu1 %4182 }
 0x381   :  { %v3968_v41 = vpop.permute.xlu0 %3967 }
 0x382   :  { %v3970_v26 = vrot.slane %v3968_v41, 4  ;;  %v3976_v34 = vmax.bf16 %v3968_v41, %v13617_v53 }
 0x384   :  { %v3971_v17 = vsel %vm1254_vm5, %v3969_v30, %v3970_v26  ;;  %v9490_v44 = vrot.slane %v3976_v34, 9  ;;  %v4150_v26 = vrot.slane %v13802_v54, 4 }
 0x385   :  { %v3972_v46 = vsel %vm3940_vm11, %v3966_v32, %v3971_v17  ;;  %v4044_v7 = vpop.permute.xlu1 %4043  ;;  %v4007_v4 = vpop.permute.xlu0 %4006 }
 0x386   :  { %v3975_v10 = vmax.bf16 %v3972_v46, %v13535_v24  ;;  %3987 = vst.msk [vmem:[#allocation2 + $0x8] sm:$0x2] %vm3986_vm12, %v9490_v44  ;;  %v4046_v63 = vrot.slane %v4044_v7, 4  ;;  %v4052_v12 = vmax.bf16 %v4044_v7, %v13629_v45  ;;  %v4009_v36 = vrot.slane %v4007_v4, 4 }
 0x387   :  { %v4015_v53 = vmax.bf16 %v4007_v4, %v13631_v40 }
 0x388   :  { %v9489_v18 = vrot.slane %v3975_v10, 9  ;;  %v4047_v33 = vsel %vm1254_vm5, %v4045_v23, %v4046_v63  ;;  %v4056_v59 = vrot.slane %v4052_v12, 7  ;;  %v4010_v24 = vsel %vm1254_vm5, %v4008_v55, %v4009_v36 }
 0x389   :  { %v4048_v11 = vsel %vm3940_vm11, %v4042_v1, %v4047_v33  ;;  %v4019_v22 = vrot.slane %v4015_v53, 6  ;;  %v4111_v16 = vpop.permute.xlu1 %4110  ;;  %v4011_v15 = vsel %vm3940_vm11, %v4005_v9, %v4010_v24  ;;  %v13819_v27 = vpop.permute.xlu0 %4080  ;;  %v4186_v1 = vrot.slane %v13804_v38, 4 }
 0x38a   :  { %3985 = vst [vmem:[#allocation2] sm:$0x22] %v9489_v18  ;;  %v4051_v45 = vmax.bf16 %v4048_v11, %v13554_v57  ;;  %v4113_v61 = vrot.slane %v4111_v16, 4  ;;  %v4119_v40 = vmax.bf16 %v4111_v16, %v13643_v58  ;;  %4061 = vst.msk [vmem:[#allocation2 + $0x8] sm:$0x8] %vm4060_vm14, %v4056_v59  ;;  %v4014_v52 = vmax.bf16 %v4011_v15, %v13548_v3 }
 0x38b   :  { %v4089_v19 = vmax.bf16 %v13819_v27, %v13651_v29  ;;  %4024 = vst.msk [vmem:[#allocation2 + $0x8] sm:$0x4] %vm4023_vm15, %v4019_v22  ;;  %v4083_v16 = vrot.slane %v13819_v27, 4 }
 0x38c   :  { %v4055_v62 = vrot.slane %v4051_v45, 7  ;;  %v4114_v21 = vsel %vm1254_vm5, %v4112_v51, %v4113_v61  ;;  %v9500_v57 = vrot.slane %v4119_v40, 9  ;;  %v4018_v32 = vrot.slane %v4014_v52, 6 }
 0x38d   :  { %v4115_v9 = vsel %vm3940_vm11, %v4109_v0, %v4114_v21  ;;  %4091 = vst.msk [vmem:[#allocation2 + $0x18] sm:$0x1] %vm3947_vm13, %v4089_v19  ;;  %v4185_v58 = vpop.permute.xlu1 %4184  ;;  %v4149_v30 = vpop.permute.xlu0 %4148 }
 0x38e   :  { %4059 = vst [vmem:[#allocation2] sm:$0x88] %v4055_v62  ;;  %v4118_v3 = vmax.bf16 %v4115_v9, %v13566_v13  ;;  %4129 = vst.msk [vmem:[#allocation2 + $0x18] sm:$0x2] %vm3986_vm12, %v9500_v57  ;;  %v4187_v29 = vrot.slane %v4185_v58, 4  ;;  %v4193_v41 = vmax.bf16 %v4185_v58, %v13663_v28  ;;  %v4151_v34 = vrot.slane %v4149_v30, 4 }
 0x38f   :  { %4022 = vst [vmem:[#allocation2] sm:$0x44] %v4018_v32  ;;  %v4157_v0 = vmax.bf16 %v4149_v30, %v13674_v48 }
 0x390   :  { %v9499_v17 = vrot.slane %v4118_v3, 9  ;;  %v4188_v44 = vsel %vm1254_vm5, %v4186_v1, %v4187_v29  ;;  %v4197_v46 = vrot.slane %v4193_v41, 7  ;;  %v4152_v13 = vsel %vm1254_vm5, %v4150_v26, %v4151_v34 }
 0x391   :  { %v4189_v7 = vsel %vm3940_vm11, %v13804_v38, %v4188_v44  ;;  %v4161_v23 = vrot.slane %v4157_v0, 6  ;;  %v4221_v10 = vpop.permute.xlu1 %4220  ;;  %v4153_v63 = vsel %vm3940_vm11, %v13802_v54, %v4152_v13  ;;  %v4251_v12 = vpop.permute.xlu0 %4250 }
 0x392   :  { %4128 = vst [vmem:[#allocation2 + $0x10] sm:$0x22] %v9499_v17  ;;  %v4192_v28 = vmax.bf16 %v4189_v7, %v13573_v31  ;;  %4201 = vst.msk [vmem:[#allocation2 + $0x18] sm:$0x8] %vm4060_vm14, %v4197_v46  ;;  %v4229_v48 = vmax.bf16 %v4221_v10, %v13686_v56  ;;  %v4156_v4 = vmax.bf16 %v4153_v63, %v13578_v47  ;;  %v4253_v54 = vrot.slane %v4251_v12, 4 }
 0x393   :  { %4165 = vst.msk [vmem:[#allocation2 + $0x18] sm:$0x4] %vm4023_vm15, %v4161_v23  ;;  %v4259_v38 = vmax.bf16 %v4251_v12, %v13691_v6  ;;  %v4223_v21 = vrot.slane %v4221_v10, 4  ;;  %v4441_v58 = vld [vmem:[#allocation2 + $0x8] sm:$0xe] }
 0x394   :  { %v4196_v55 = vrot.slane %v4192_v28, 7  ;;  %4231 = vst.msk [vmem:[#allocation2 + $0x28] sm:$0x1] %vm3947_vm13, %v4229_v48  ;;  %v4160_v36 = vrot.slane %v4156_v4, 6  ;;  %v11146_v7 = vld [vmem:[%s14973_s5 + $0x2d8] ss:$12 sps:$4 sm:$0xff]  }
 0x395   :  { %v9510_v53 = vrot.slane %v4259_v38, 9  ;;  %v4289_v31 = vpop.permute.xlu1 %4288  ;;  %v4249_v33 = vpop.permute.xlu0 %4248  ;;  %v11150_v23 = vld [vmem:[%s14973_s5 + $0x380] ss:$12 sps:$4 sm:$0xff]  }
 0x396   :  { %4200 = vst [vmem:[#allocation2 + $0x10] sm:$0x88] %v4196_v55  ;;  %v4297_v18 = vmax.bf16 %v4289_v31, %v13703_v50  ;;  %4164 = vst [vmem:[#allocation2 + $0x10] sm:$0x44] %v4160_v36  ;;  %v4252_v56 = vrot.slane %v4249_v33, 4  ;;  %v4291_v6 = vrot.slane %v4289_v31, 4 }
 0x397   :  { %4269 = vst.msk [vmem:[#allocation2 + $0x28] sm:$0x2] %vm3986_vm12, %v9510_v53  ;;  %v11151_v4 = vld [vmem:[%s14973_s5 + $0x2c0] ss:$12 sps:$4 sm:$0xff]   ;;  %vm7707_vm12 = vcmask 1043459  }
 0x398   :  { %v4301_v47 = vrot.slane %v4297_v18, 6  ;;  %v4254_v59 = vsel %vm1254_vm5, %v4252_v56, %v4253_v54  ;;  %v4440_v53 = vld [vmem:[#allocation2] sm:$0xee]  ;;  %v11156_v54 = vld [vmem:[%s14973_s5 + $0x2a8] ss:$12 sps:$4 sm:$0xff]  }
 0x399   :  { %v4287_v51 = vpop.permute.xlu1 %4286  ;;  %v4255_v11 = vsel %vm3940_vm11, %v4249_v33, %v4254_v59  ;;  %v4079_v22 = vpop.permute.xlu0 %4078 }
 0x39a   :  { %4305 = vst.msk [vmem:[#allocation2 + $0x28] sm:$0x4] %vm4023_vm15, %v4301_v47  ;;  %v4290_v24 = vrot.slane %v4287_v51, 4  ;;  %v4258_v50 = vmax.bf16 %v4255_v11, %v13711_v42  ;;  %v4082_v45 = vrot.slane %v4079_v22, 4  ;;  %v13856_v61 = vld [vmem:[#allocation2 + $0x18] sm:$0xf] }
 0x39b   :  { %v9609_v3 = vcombine.low %v4441_v58, %v13856_v61  ;;  %v11145_v26 = vld [vmem:[#allocation2 + $0x28] ss:$0 sps:$4 sm:$0x77]   ;;  %v11175_v58 = vld [vmem:[%s14973_s5 + $0x230] ss:$12 sps:$4 sm:$0xff]  }
 0x39c   :  { %v4292_v15 = vsel %vm1254_vm5, %v4290_v24, %v4291_v6  ;;  %v9509_v40 = vrot.slane %v4258_v50, 9  ;;  %v4084_v19 = vsel %vm1254_vm5, %v4082_v45, %v4083_v16  ;;  %v13870_v46 = vrot.slane %v11145_v26, 1  ;;  %v11162_v6 = vld [vmem:[%s14973_s5 + $0x350] ss:$12 sps:$4 sm:$0xff]  }
 0x39d   :  { %v4293_v52 = vsel %vm3940_vm11, %v4287_v51, %v4292_v15  ;;  %v4219_v62 = vpop.permute.xlu1 %4218  ;;  %v4085_v32 = vsel %vm3940_vm11, %v4079_v22, %v4084_v19  ;;  %v3935_v27 = vpop.permute.xlu0 %3934  ;;  %v4564_v44 = vrot.slane %v9609_v3, 1  ;;  %v11163_v45 = vld [vmem:[%s14973_s5 + $0x290] ss:$12 sps:$4 sm:$0xff]   ;;  %v11164_v15 = vld [vmem:[%s14973_s5 + $0x428] ss:$12 sps:$4 sm:$0xff]  }
 0x39e   :  { %v4296_v57 = vmax.bf16 %v4293_v52, %v13729_v35  ;;  %v4222_v9 = vrot.slane %v4219_v62, 4  ;;  %4268 = vst [vmem:[#allocation2 + $0x20] sm:$0x22] %v9509_v40  ;;  %v4088_v42 = vmax.bf16 %v4085_v32, %v13734_v39  ;;  %v3945_v1 = vmax.bf16 %v3935_v27, %v13754_v49  ;;  %v11165_v40 = vld [vmem:[%s14973_s5 + $0x338] ss:$12 sps:$4 sm:$0xff]  }
 0x39f   :  { %v3937_v0 = vrot.slane %v3935_v27, 4  ;;  %v11166_v52 = vld [vmem:[%s14973_s5 + $0x278] ss:$12 sps:$4 sm:$0xff]   ;;  %v11167_v19 = vld [vmem:[%s14973_s5 + $0x410] ss:$12 sps:$4 sm:$0xff]  }
 0x3a0   :  { %v4300_v29 = vrot.slane %v4296_v57, 6  ;;  %v4224_v41 = vsel %vm1254_vm5, %v4222_v9, %v4223_v21  ;;  %4090 = vst [vmem:[#allocation2 + $0x10] sm:$0x11] %v4088_v42  ;;  %3948 = vst.msk [vmem:[#allocation2 + $0x8] sm:$0x1] %vm3947_vm13, %v3945_v1  ;;  %vm7708_vm13 = vcmask 785415  }
 0x3a1   :  { %v4225_v30 = vsel %vm3940_vm11, %v4219_v62, %v4224_v41  ;;  %v3933_v35 = vpop.permute.xlu1 %3932  ;;  %v4325_v17 = vpop.permute.xlu0 %4324  ;;  %v11168_v62 = vld [vmem:[%s14973_s5 + $0x320] ss:$12 sps:$4 sm:$0xff]   ;;  %v11170_v21 = vld [vmem:[%s14973_s5 + $0x3f8] ss:$12 sps:$4 sm:$0xff]   ;;  %v11171_v57 = vld [vmem:[%s14973_s5 + $0x308] ss:$12 sps:$4 sm:$0xff]  }
 0x3a2   :  { %4304 = vst [vmem:[#allocation2 + $0x20] sm:$0x44] %v4300_v29  ;;  %v4228_v34 = vmax.bf16 %v4225_v30, %v13749_v20  ;;  %v3936_v39 = vrot.slane %v3933_v35, 4  ;;  %v4333_v49 = vmax.bf16 %v4325_v17, %v13771_v37  ;;  %v4566_v37 = vsel %vm176_vm2, %v4564_v44, %v13870_v46  ;;  %v11172_v32 = vld [vmem:[%s14973_s5 + $0x248] ss:$12 sps:$4 sm:$0xff]   ;;  %vm7709_vm15 = vmor %vm7708_vm13, %vm7707_vm12 }
 0x3a3   :  { %v4327_v63 = vrot.slane %v4325_v17, 4  ;;  %9682 = vmatmul.mubr.msk.bf16.vlgmr.msra.gmra.mxu1 %vm3940_vm11, %v4566_v37  ;;  %v11173_v9 = vld [vmem:[%s14973_s5 + $0x3e0] ss:$12 sps:$4 sm:$0xff]   ;;  %v11174_v27 = vld [vmem:[%s14973_s5 + $0x2f0] ss:$12 sps:$4 sm:$0xff]  }
 0x3a4   :  { %4230 = vst [vmem:[#allocation2 + $0x20] sm:$0x11] %v4228_v34  ;;  %v3939_v13 = vsel %vm1254_vm5, %v3936_v39, %v3937_v0  ;;  %v4337_v20 = vrot.slane %v4333_v49, 7  ;;  %10452 = vmatpush3.bf16.msra.mxu1 %v11146_v7  ;;  %5039 = vmatprep.mubr.bf16.mxu1 %v15009_v5  ;;  %v11176_v42 = vld [vmem:[%s14973_s5 + $0x3c8] ss:$12 sps:$4 sm:$0xff]  }
 0x3a5   :  { %v3941_v10 = vsel %vm3940_vm11, %v3933_v35, %v3939_v13  ;;  %v4323_v28 = vpop.permute.xlu1 %4322  ;;  %10453 = vmatprep.subr.bf16.mxu1 %v11150_v23  ;;  %v11179_v1 = vld [vmem:[%s14973_s5 + $0xac] ss:$12 sps:$4 sm:$0xff]   ;;  %v11177_v3 = vld [vmem:[%s14973_s5 + $0xa8] ss:$12 sps:$4 sm:$0xff]   ;;  %v11180_v29 = vld [vmem:[%s14973_s5 + $0x3b0] ss:$12 sps:$4 sm:$0xff]  }
 0x3a6   :  { %v3944_v48 = vmax.bf16 %v3941_v10, %v13766_v8  ;;  %v4326_v12 = vrot.slane %v4323_v28, 4  ;;  %4341 = vst.msk [vmem:[#allocation2 + $0x28] sm:$0x8] %vm4060_vm14, %v4337_v20  ;;  %v11155_v8 = vld [vmem:[%s14973_s5 + $0x368] ss:$12 sps:$4 sm:$0xff]  }
 0x3a7   :  { %v13893_v55 = vld [vmem:[#allocation2 + $0x10] sm:$0xff]  ;;  %v11189_v26 = vld [vmem:[%s14973_s5 + $0x7c] ss:$12 sps:$4 sm:$0xff]   ;;  %v11187_v17 = vld [vmem:[%s14973_s5 + $0x78] ss:$12 sps:$4 sm:$0xff]  }
 0x3a8   :  { %3946 = vst [vmem:[#allocation2] sm:$0x11] %v3944_v48  ;;  %v4328_v38 = vsel %vm1254_vm5, %v4326_v12, %v4327_v63  ;;  %v9608_v18 = vcombine.high %v4440_v53, %v13893_v55  ;;  %v9607_v33 = vcombine.low %v4440_v53, %v13893_v55  ;;  %10454 = vmatpush3.bf16.msra.mxu1 %v11151_v4  ;;  %v11183_v41 = vld [vmem:[%s14973_s5 + $0x94] ss:$12 sps:$4 sm:$0xff]   ;;  %v11181_v30 = vld [vmem:[%s14973_s5 + $0x90] ss:$12 sps:$4 sm:$0xff]  }
 0x3a9   :  { %v4329_v36 = vsel %vm3940_vm11, %v4323_v28, %v4328_v38  ;;  %10455 = vmatprep.subr.bf16.mxu1 %v11155_v8  ;;  %v11186_v35 = vld [vmem:[%s14973_s5 + $0x214] ss:$12 sps:$4 sm:$0xff]   ;;  %v11184_v34 = vld [vmem:[%s14973_s5 + $0x210] ss:$12 sps:$4 sm:$0xff]   ;;  %v11192_v7 = vld [vmem:[%s14973_s5 + $0x1f8] ss:$12 sps:$4 sm:$0xff]  }
 0x3aa   :  { %v4332_v31 = vmax.bf16 %v4329_v36, %v13783_v14  ;;  %v4561_v11 = vrot.slane %v9608_v18, 1  ;;  %v4558_v22 = vrot.slane %v9607_v33, 1  ;;  %v11194_v39 = vld [vmem:[%s14973_s5 + $0x1fc] ss:$12 sps:$4 sm:$0xff]   ;;  %v11197_v49 = vld [vmem:[%s14973_s5 + $0x64] ss:$12 sps:$4 sm:$0xff]  }
 0x3ab   :  { %v4442_v56 = vld [vmem:[#allocation2 + $0x20] sm:$0x77]  ;;  %9683 = vmatmul.mubr.msk.bf16.gmra.mxu1 %vm3940_vm11, %v13870_v46  ;;  %v11203_v23 = vld [vmem:[%s14973_s5 + $0x4c] ss:$12 sps:$4 sm:$0xff]   ;;  %v11201_v10 = vld [vmem:[%s14973_s5 + $0x48] ss:$12 sps:$4 sm:$0xff]  }
 0x3ac   :  { %v4336_v47 = vrot.slane %v4332_v31, 7  ;;  %v9610_v59 = vcombine.low %v4442_v56, %v4442_v56  ;;  %v9611_v51 = vcombine.high %v4442_v56, %v4442_v56  ;;  %10456 = vmatpush3.bf16.msra.mxu1 %v11156_v54  ;;  %v11195_v13 = vld [vmem:[%s14973_s5 + $0x60] ss:$12 sps:$4 sm:$0xff]   ;;  %v11204_v63 = vld [vmem:[%s14973_s5 + $0x1c8] ss:$12 sps:$4 sm:$0xff]   ;;  %vm7644_vm5 = vcmask 782340  }
 0x3ad   :  { %10457 = vmatprep.subr.bf16.mxu1 %v11162_v6  ;;  %v11198_v20 = vld [vmem:[%s14973_s5 + $0x1e0] ss:$12 sps:$4 sm:$0xff]   ;;  %v11207_v48 = vld [vmem:[%s14973_s5 + $0x30] ss:$12 sps:$4 sm:$0xff]   ;;  %v11213_v8 = vld [vmem:[%s14973_s5 + $0x18] ss:$12 sps:$4 sm:$0xff]  }
 0x3ae   :  { %4340 = vst [vmem:[#allocation2 + $0x20] sm:$0x88] %v4336_v47  ;;  %v13907_v14 = vrot.slane %v9610_v59, 1  ;;  %v4562_v24 = vrot.slane %v9611_v51, 1  ;;  %v11206_v28 = vld [vmem:[%s14973_s5 + $0x1cc] ss:$12 sps:$4 sm:$0xff]  }
 0x3af   :  { %v13981_v0 = vld [vmem:[#allocation2] sm:$0xff]  ;;  %v11215_v4 = vld [vmem:[%s14973_s5 + $0x1c] ss:$12 sps:$4 sm:$0xff]   ;;  %v11227_v54 = vld [vmem:[%s14973_s5 + $0x16c] ss:$12 sps:$4 sm:$0xff]  }
 0x3b0   :  { %v4563_v16 = vsel %vm176_vm2, %v4561_v11, %v4562_v24  ;;  %v4560_v50 = vsel %vm176_vm2, %v4558_v22, %v13907_v14  ;;  %10458 = vmatpush3.bf16.msra.mxu1 %v11163_v45  ;;  %v13996_v44 = vcombine.high %v13981_v0, %v13893_v55  ;;  %v11212_v12 = vld [vmem:[%s14973_s5 + $0x1b4] ss:$12 sps:$4 sm:$0xff]   ;;  %v11210_v38 = vld [vmem:[%s14973_s5 + $0x1b0] ss:$12 sps:$4 sm:$0xff]   ;;  %v11216_v31 = vld [vmem:[%s14973_s5 + $0x198] ss:$12 sps:$4 sm:$0xff]  }
 0x3b1   :  { %4978 = vmatprep.mubr.bf16.mxu0 %v4563_v16  ;;  %5080 = vmatprep.mubr.bf16.mxu1 %v4563_v16  ;;  %v11218_v36 = vld [vmem:[%s14973_s5 + $0x19c] ss:$12 sps:$4 sm:$0xff]   ;;  %v11221_v53 = vld [vmem:[%s14973_s5 + $0x4] ss:$12 sps:$4 sm:$0xff]   ;;  %v11219_v18 = vld [vmem:[%s14973_s5] ss:$12 sps:$4 sm:$0xff]  }
 0x3b2   :  { %4979 = vmatmul.mubr.bf16.vlgmr.msra.gmra.mxu0 %v4560_v50  ;;  %10459 = vmatprep.subr.bf16.mxu1 %v11165_v40  ;;  %v11224_v33 = vld [vmem:[%s14973_s5 + $0x184] ss:$12 sps:$4 sm:$0xff]   ;;  %v11222_v56 = vld [vmem:[%s14973_s5 + $0x180] ss:$12 sps:$4 sm:$0xff]   ;;  %v11225_v47 = vld [vmem:[%s14973_s5 + $0x168] ss:$12 sps:$4 sm:$0xff]  }
 0x3b3   :  { %10585 = vmatpush3.bf16.msra.mxu0 %v13799_v60  ;;  %4988 = vmatprep.mubr.bf16.mxu0 %v4562_v24  ;;  %v11169_v60 = vld [vmem:[%s14973_s5 + $0x260] ss:$12 sps:$4 sm:$0xff]   ;;  %v11229_v59 = vld [vmem:[%s14973_s5 + $0x170] ss:$12 sps:$4 sm:$0xff]   ;;  %v4343_v51 = vld [vmem:[#allocation2 + $0x8] sm:$0xf] }
 0x3b4   :  { %10586 = vmatprep.subr.bf16.mxu0 %v11164_v15  ;;  %10460 = vmatpush3.bf16.msra.mxu1 %v11166_v52  ;;  %v11232_v6 = vld [vmem:[%s14973_s5 + $0x154] ss:$12 sps:$4 sm:$0xff]   ;;  %v14077_v11 = vcombine.low %v4343_v51, %v13856_v61  ;;  %v11234_v22 = vld [vmem:[%s14973_s5 + $0x158] ss:$12 sps:$4 sm:$0xff]   ;;  %v11237_v16 = vld [vmem:[%s14973_s5 + $0x13c] ss:$12 sps:$4 sm:$0xff]  }
 0x3b5   :  { %10461 = vmatprep.subr.bf16.mxu1 %v11168_v62  ;;  %v11235_v45 = vld [vmem:[%s14973_s5 + $0x138] ss:$12 sps:$4 sm:$0xff]   ;;  %v11241_v52 = vld [vmem:[%s14973_s5 + $0x120] ss:$12 sps:$4 sm:$0xff]  }
 0x3b6   :  { %v11243_v40 = vld [vmem:[%s14973_s5 + $0x124] ss:$12 sps:$4 sm:$0xff]   ;;  %v14109_v62 = vld [vmem:[#allocation2 + $0x28] ss:$0 sps:$4 sm:$0x33]  }
 0x3b7   :  { %10587 = vmatpush3.bf16.msra.mxu0 %v11164_v15  ;;  %v11240_v15 = vld [vmem:[%s14973_s5 + $0x140] ss:$12 sps:$4 sm:$0xff]   ;;  %v11289_v51 = vld [vmem:[%s14973_s5 + $0x498] ss:$12 sps:$4 sm:$0xff]  }
 0x3b8   :  { %10588 = vmatprep.subr.bf16.mxu0 %v11167_v19  ;;  %10462 = vmatpush3.bf16.msra.mxu1 %v11169_v60  ;;  %v11245_v60 = vld [vmem:[%s14973_s5 + $0x128] ss:$12 sps:$4 sm:$0xff]  }
 0x3b9   :  { %10463 = vmatprep.subr.bf16.mxu1 %v11171_v57  ;;  %v11249_v57 = vld [vmem:[%s14973_s5 + $0x68] ss:$12 sps:$4 sm:$0xff]  }
 0x3ba   :  { %4989 = vmatmul.mubr.bf16.gmra.mxu0 %v13907_v14 }
 0x3bb   :  { %10589 = vmatpush3.bf16.msra.mxu0 %v11167_v19  ;;  %10598 = vmatprep.mubr.msk.bf16.mxu0 %vm3940_vm11, %v4566_v37  ;;  %v11209_v37 = vld [vmem:[%s14973_s5 + $0x34] ss:$12 sps:$4 sm:$0xff]  }
 0x3bc   :  { %10590 = vmatprep.subr.bf16.mxu0 %v11170_v21  ;;  %10464 = vmatpush3.bf16.msra.mxu1 %v11172_v32  ;;  %v11244_v19 = vld [vmem:[%s14973_s5 + $0x80] ss:$12 sps:$4 sm:$0xff]   ;;  %v11246_v32 = vld [vmem:[%s14973_s5 + $0x108] ss:$12 sps:$4 sm:$0xff]  }
 0x3bd   :  { %10465 = vmatprep.subr.bf16.mxu1 %v11174_v27  ;;  %v11253_v27 = vld [vmem:[%s14973_s5 + $0xf4] ss:$12 sps:$4 sm:$0xff]  }
 0x3bf   :  { %10591 = vmatpush3.bf16.msra.mxu0 %v11170_v21  ;;  %v11248_v21 = vld [vmem:[%s14973_s5 + $0x10c] ss:$12 sps:$4 sm:$0xff]  }
 0x3c0   :  { %10592 = vmatprep.subr.bf16.mxu0 %v11173_v9  ;;  %10466 = vmatpush3.bf16.msra.mxu1 %v11175_v58  ;;  %v11254_v58 = vld [vmem:[%s14973_s5 + $0x50] ss:$12 sps:$4 sm:$0xff]  }
 0x3c1   :  { %5538 = vmatprep.subr.bf16.mxu1 %v11179_v1  ;;  %v11255_v1 = vld [vmem:[%s14973_s5 + $0xf8] ss:$12 sps:$4 sm:$0xff]  }
 0x3c3   :  { %10593 = vmatpush3.bf16.msra.mxu0 %v11173_v9  ;;  %5081 = vmatmul.mubr.bf16.vlgmr.msra.gmra.mxu1 %v4560_v50  ;;  %v11238_v50 = vld [vmem:[%s14973_s5 + $0x98] ss:$12 sps:$4 sm:$0xff]   ;;  %v11250_v9 = vld [vmem:[%s14973_s5 + $0x110] ss:$12 sps:$4 sm:$0xff]  }
 0x3c4   :  { %10594 = vmatprep.subr.bf16.mxu0 %v11176_v42  ;;  %5088 = vmatprep.mubr.bf16.mxu1 %v4562_v24  ;;  %v11230_v24 = vld [vmem:[%s14973_s5 + $0x150] ss:$12 sps:$4 sm:$0xff]  }
 0x3c5   :  { %5539 = vmatpush1.bf16.msra.mxu1 %v11177_v3  ;;  %v11258_v3 = vld [vmem:[%s14973_s5 + $0xdc] ss:$12 sps:$4 sm:$0xff]  }
 0x3c6   :  { %5540 = vmatprep.subr.bf16.mxu1 %v11183_v41  ;;  %v11256_v41 = vld [vmem:[%s14973_s5 + $0xd8] ss:$12 sps:$4 sm:$0xff]  }
 0x3c7   :  { %10595 = vmatpush3.bf16.msra.mxu0 %v11176_v42  ;;  %v11251_v42 = vld [vmem:[%s14973_s5 + $0xf0] ss:$12 sps:$4 sm:$0xff]  }
 0x3c8   :  { %10596 = vmatprep.subr.bf16.mxu0 %v11180_v29 }
 0x3c9   :  { %5541 = vmatpush1.bf16.msra.mxu1 %v11181_v30  ;;  %v11260_v30 = vld [vmem:[%s14973_s5 + $0xe0] ss:$12 sps:$4 sm:$0xff]  }
 0x3ca   :  { %5542 = vmatprep.subr.bf16.mxu1 %v11189_v26  ;;  %v11264_v26 = vld [vmem:[%s14973_s5 + $0x20] ss:$12 sps:$4 sm:$0xff]  }
 0x3cb   :  { %10597 = vmatpush3.bf16.msra.mxu0 %v11180_v29  ;;  %5089 = vmatmul.mubr.bf16.gmra.mxu1 %v13907_v14  ;;  %v11233_v14 = vld [vmem:[%s14973_s5 + $0xb0] ss:$12 sps:$4 sm:$0xff]   ;;  %v11259_v29 = vld [vmem:[%s14973_s5 + $0x38] ss:$12 sps:$4 sm:$0xff]  }
 0x3cc   :  { %5591 = vmatprep.subr.bf16.mxu0 %v11186_v35  ;;  %5570 = vmatprep.mubr.bf16.mxu1 %v13996_v44  ;;  %v11263_v35 = vld [vmem:[%s14973_s5 + $0xc4] ss:$12 sps:$4 sm:$0xff]  }
 0x3cd   :  { %5543 = vmatpush1.bf16.msra.mxu1 %v11187_v17  ;;  %v11265_v17 = vld [vmem:[%s14973_s5 + $0xc8] ss:$12 sps:$4 sm:$0xff]  }
 0x3ce   :  { %10599 = vmatmul.mubr.msk.bf16.vlgmr.msra.gmra.mxu0 %vm3940_vm11, %v13870_v46  ;;  %v11200_v46 = vld [vmem:[%s14973_s5 + $0x1e4] ss:$12 sps:$4 sm:$0xff]   ;;  %5544 = vmatprep.subr.bf16.mxu1 %v11197_v49  ;;  %v11266_v49 = vld [vmem:[%s14973_s5 + $0x8] ss:$12 sps:$4 sm:$0xff]  }
 0x3cf   :  { %5592 = vmatpush1.bf16.msra.mxu0 %v11184_v34  ;;  %5621 = vmatprep.mubr.bf16.mxu0 %v15009_v5  ;;  %v11261_v34 = vld [vmem:[%s14973_s5 + $0xc0] ss:$12 sps:$4 sm:$0xff]  }
 0x3d0   :  { %5593 = vmatprep.subr.bf16.mxu0 %v11194_v39  ;;  %v11267_v39 = vld [vmem:[%s14973_s5 + $0x218] ss:$12 sps:$4 sm:$0xff]  }
 0x3d1   :  { %5545 = vmatpush1.bf16.msra.mxu1 %v11195_v13  ;;  %v11271_v13 = vld [vmem:[%s14973_s5 + $0x4fc] ss:$12 sps:$4 sm:$0xff]  }
 0x3d2   :  { %5546 = vmatprep.subr.bf16.mxu1 %v11203_v23 }
 0x3d3   :  { %5594 = vmatpush1.bf16.msra.mxu0 %v11192_v7  ;;  %v9686_v7 = vcombine.low %v13981_v0, %v13893_v55  ;;  %v11275_v0 = vld [vmem:[%s14973_s5 + $0x4e4] ss:$12 sps:$4 sm:$0xff]  }
 0x3d4   :  { %5595 = vmatprep.subr.bf16.mxu0 %v11200_v46  ;;  %v11272_v46 = vld [vmem:[%s14973_s5 + $0x200] ss:$12 sps:$4 sm:$0xff]  }
 0x3d5   :  { %5547 = vmatpush1.bf16.msra.mxu1 %v11201_v10  ;;  %v14182_v10 = vld [vmem:[#allocation2 + $0x20] sm:$0xff] }
 0x3d6   :  { %5548 = vmatprep.subr.bf16.mxu1 %v11209_v37  ;;  %v9861_v37 = vcombine.high %v14182_v10, %v14182_v10 }
 0x3d7   :  { %5596 = vmatpush1.bf16.msra.mxu0 %v11198_v20  ;;  %v11269_v20 = vld [vmem:[%s14973_s5 + $0x4f8] ss:$12 sps:$4 sm:$0xff]  }
 0x3d8   :  { %5597 = vmatprep.subr.bf16.mxu0 %v11206_v28  ;;  %v11277_v28 = vld [vmem:[%s14973_s5 + $0x1e8] ss:$12 sps:$4 sm:$0xff]  }
 0x3d9   :  { %5549 = vmatpush1.bf16.msra.mxu1 %v11207_v48  ;;  %v14195_v48 = vld [vmem:[#allocation2] sm:$0xcc] }
 0x3da   :  { %5550 = vmatprep.subr.bf16.mxu1 %v11215_v4 }
 0x3db   :  { %5598 = vmatpush1.bf16.msra.mxu0 %v11204_v63  ;;  %v11273_v63 = vld [vmem:[%s14973_s5 + $0x4e0] ss:$12 sps:$4 sm:$0xff]  }
 0x3dc   :  { %5599 = vmatprep.subr.bf16.mxu0 %v11212_v12  ;;  %v9858_v12 = vcombine.high %v14195_v48, %v13893_v55 }
 0x3dd   :  { %5551 = vmatpush1.bf16.msra.mxu1 %v11213_v8  ;;  %v11281_v8 = vld [vmem:[%s14973_s5 + $0x1d0] ss:$12 sps:$4 sm:$0xff]  }
 0x3de   :  { %5552 = vmatprep.subr.bf16.mxu1 %v11221_v53  ;;  %v11278_v53 = vld [vmem:[%s14973_s5 + $0x4c8] ss:$12 sps:$4 sm:$0xff]  }
 0x3df   :  { %5600 = vmatpush1.bf16.msra.mxu0 %v11210_v38  ;;  %v11280_v38 = vld [vmem:[%s14973_s5 + $0x4cc] ss:$12 sps:$4 sm:$0xff]  }
 0x3e0   :  { %5601 = vmatprep.subr.bf16.mxu0 %v11218_v36  ;;  %v14205_v36 = vrot.slane %v9861_v37, 2  ;;  %v11349_v37 = vld [vmem:[%s14973_s5 + $0x5a8] ss:$12 sps:$4 sm:$0xff]  }
 0x3e1   :  { %5553 = vmatpush1.bf16.msra.mxu1 %v11219_v18  ;;  %v11287_v18 = vld [vmem:[%s14973_s5 + $0x4b4] ss:$12 sps:$4 sm:$0xff]  }
 0x3e2   :  { %5554 = vmatprep.subr.bf16.mxu1 %v11227_v54 }
 0x3e3   :  { %5602 = vmatpush1.bf16.msra.mxu0 %v11216_v31  ;;  %v5852_v31 = vrot.slane %v9858_v12, 2  ;;  %v11346_v12 = vld [vmem:[%s14973_s5 + $0x528] ss:$12 sps:$4 sm:$0xff]  }
 0x3e4   :  { %5603 = vmatprep.subr.bf16.mxu0 %v11224_v33  ;;  %v11288_v33 = vld [vmem:[%s14973_s5 + $0x1b8] ss:$12 sps:$4 sm:$0xff]  }
 0x3e5   :  { %5555 = vmatpush2.bf16.msra.mxu1 %v11225_v47  ;;  %v14220_v54 = vsel %vm775_vm4, %v5852_v31, %v14205_v36  ;;  %v11291_v47 = vld [vmem:[%s14973_s5 + $0x49c] ss:$12 sps:$4 sm:$0xff]  }
 0x3e6   :  { %5556 = vmatprep.subr.bf16.mxu1 %v11232_v6  ;;  %v11295_v6 = vld [vmem:[%s14973_s5 + $0x484] ss:$12 sps:$4 sm:$0xff]  }
 0x3e7   :  { %5604 = vmatpush1.bf16.msra.mxu0 %v11222_v56  ;;  %v11285_v56 = vld [vmem:[%s14973_s5 + $0x4b0] ss:$12 sps:$4 sm:$0xff]  }
 0x3e8   :  { %10488 = vmatprep.subr.bf16.mxu0 %v11229_v59  ;;  %v11292_v59 = vld [vmem:[%s14973_s5 + $0x1a0] ss:$12 sps:$4 sm:$0xff]   ;;  %v11351_v31 = vld [vmem:[%s14973_s5 + $0x510] ss:$12 sps:$4 sm:$0xff]  }
 0x3e9   :  { %5557 = vmatpush2.bf16.msra.mxu1 %v11230_v24  ;;  %v11299_v24 = vld [vmem:[%s14973_s5 + $0x46c] ss:$12 sps:$4 sm:$0xff]  }
 0x3ea   :  { %9761 = vmatmul.mubr.msk.bf16.vlgmr.msra.gmra.mxu0 %vm3940_vm11, %v14077_v11  ;;  %5558 = vmatprep.subr.bf16.mxu1 %v11237_v16  ;;  %v11297_v16 = vld [vmem:[%s14973_s5 + $0x468] ss:$12 sps:$4 sm:$0xff]  }
 0x3eb   :  { %10489 = vmatpush3.bf16.msra.mxu0 %v11233_v14  ;;  %5631 = vmatprep.mubr.bf16.mxu0 %v15009_v5  ;;  %v11296_v14 = vld [vmem:[%s14973_s5 + $0x188] ss:$12 sps:$4 sm:$0xff]  }
 0x3ec   :  { %10490 = vmatprep.subr.bf16.mxu0 %v11234_v22  ;;  %v11302_v22 = vld [vmem:[%s14973_s5 + $0x664] ss:$12 sps:$4 sm:$0xff]  }
 0x3ed   :  { %5559 = vmatpush2.bf16.msra.mxu1 %v11235_v45  ;;  %v11305_v45 = vld [vmem:[%s14973_s5 + $0x454] ss:$12 sps:$4 sm:$0xff]  }
 0x3ee   :  { %5560 = vmatprep.subr.bf16.mxu1 %v11243_v40  ;;  %v11303_v40 = vld [vmem:[%s14973_s5 + $0x450] ss:$12 sps:$4 sm:$0xff]  }
 0x3ef   :  { %10491 = vmatpush3.bf16.msra.mxu0 %v11238_v50  ;;  %v11300_v50 = vld [vmem:[%s14973_s5 + $0x660] ss:$12 sps:$4 sm:$0xff]  }
 0x3f0   :  { %10492 = vmatprep.subr.bf16.mxu0 %v11240_v15  ;;  %v11308_v15 = vld [vmem:[%s14973_s5 + $0x64c] ss:$12 sps:$4 sm:$0xff]  }
 0x3f1   :  { %5561 = vmatpush2.bf16.msra.mxu1 %v11241_v52  ;;  %v11306_v52 = vld [vmem:[%s14973_s5 + $0x648] ss:$12 sps:$4 sm:$0xff]  }
 0x3f2   :  { %9762 = vmatmul.mubr.msk.bf16.gmra.mxu0 %vm3940_vm11, %v14109_v62  ;;  %5562 = vmatprep.subr.bf16.mxu1 %v11248_v21  ;;  %v11312_v21 = vld [vmem:[%s14973_s5 + $0x630] ss:$12 sps:$4 sm:$0xff]  }
 0x3f3   :  { %10493 = vmatpush3.bf16.msra.mxu0 %v11244_v19  ;;  %5672 = vmatprep.mubr.bf16.mxu0 %v13996_v44  ;;  %v4346_v44 = vld [vmem:[#allocation2 + $0x20] sm:$0x33]  ;;  %v11311_v19 = vld [vmem:[%s14973_s5 + $0x5bc] ss:$12 sps:$4 sm:$0xff]  }
 0x3f4   :  { %10494 = vmatprep.subr.bf16.mxu0 %v11245_v60  ;;  %v9690_v23 = vcombine.high %v4346_v44, %v4346_v44  ;;  %v9689_v4 = vcombine.low %v4346_v44, %v4346_v44  ;;  %v11309_v60 = vld [vmem:[%s14973_s5 + $0x5b8] ss:$12 sps:$4 sm:$0xff]   ;;  %v11336_v44 = vld [vmem:[%s14973_s5 + $0x5d0] ss:$12 sps:$4 sm:$0xff]  }
 0x3f5   :  { %5563 = vmatpush2.bf16.msra.mxu1 %v11246_v32  ;;  %v11320_v32 = vld [vmem:[%s14973_s5 + $0x61c] ss:$12 sps:$4 sm:$0xff]  }
 0x3f6   :  { %5564 = vmatprep.subr.bf16.mxu1 %v11253_v27  ;;  %v11318_v27 = vld [vmem:[%s14973_s5 + $0x618] ss:$12 sps:$4 sm:$0xff]  }
 0x3f7   :  { %10495 = vmatpush3.bf16.msra.mxu0 %v11249_v57  ;;  %v11317_v57 = vld [vmem:[%s14973_s5 + $0x5a4] ss:$12 sps:$4 sm:$0xff]  }
 0x3f8   :  { %10496 = vmatprep.subr.bf16.mxu0 %v11250_v9  ;;  %v11315_v9 = vld [vmem:[%s14973_s5 + $0x5a0] ss:$12 sps:$4 sm:$0xff]  }
 0x3f9   :  { %5565 = vmatpush2.bf16.msra.mxu1 %v11251_v42  ;;  %v11326_v42 = vld [vmem:[%s14973_s5 + $0x604] ss:$12 sps:$4 sm:$0xff]  }
 0x3fa   :  { %5566 = vmatprep.subr.bf16.mxu1 %v11258_v3  ;;  %v11324_v3 = vld [vmem:[%s14973_s5 + $0x600] ss:$12 sps:$4 sm:$0xff]  }
 0x3fb   :  { %10497 = vmatpush3.bf16.msra.mxu0 %v11254_v58  ;;  %v11323_v58 = vld [vmem:[%s14973_s5 + $0x58c] ss:$12 sps:$4 sm:$0xff]  }
 0x3fc   :  { %10498 = vmatprep.subr.bf16.mxu0 %v11255_v1  ;;  %v11321_v1 = vld [vmem:[%s14973_s5 + $0x588] ss:$12 sps:$4 sm:$0xff]  }
 0x3fd   :  { %5567 = vmatpush2.bf16.msra.mxu1 %v11256_v41  ;;  %v11332_v41 = vld [vmem:[%s14973_s5 + $0x5ec] ss:$12 sps:$4 sm:$0xff]  }
 0x3fe   :  { %5568 = vmatprep.subr.bf16.mxu1 %v11263_v35  ;;  %v11330_v35 = vld [vmem:[%s14973_s5 + $0x5e8] ss:$12 sps:$4 sm:$0xff]  }
 0x3ff   :  { %10499 = vmatpush3.bf16.msra.mxu0 %v11259_v29  ;;  %v11329_v29 = vld [vmem:[%s14973_s5 + $0x574] ss:$12 sps:$4 sm:$0xff]  }
 0x400   :  { %10500 = vmatprep.subr.bf16.mxu0 %v11260_v30  ;;  %v11327_v30 = vld [vmem:[%s14973_s5 + $0x570] ss:$12 sps:$4 sm:$0xff]  }
 0x401   :  { %5569 = vmatpush2.bf16.msra.mxu1 %v11261_v34  ;;  %v11338_v34 = vld [vmem:[%s14973_s5 + $0x5d4] ss:$12 sps:$4 sm:$0xff]  }
 0x402   :  { %10602 = vmatprep.subr.bf16.mxu1 %v11267_v39 }
 0x403   :  { %10501 = vmatpush3.bf16.msra.mxu0 %v11264_v26  ;;  %v11335_v26 = vld [vmem:[%s14973_s5 + $0x55c] ss:$12 sps:$4 sm:$0xff]  }
 0x404   :  { %10502 = vmatprep.subr.bf16.mxu0 %v11265_v17  ;;  %5571 = vmatmul.mubr.bf16.vlgmr.msra.gmra.mxu1 %v9686_v7  ;;  %v11343_v17 = vld [vmem:[#allocation2 + $0x28] ss:$0 sps:$4 sm:$0xff]  }
 0x405   :  { %5580 = vmatprep.mubr.bf16.mxu1 %v9690_v23  ;;  %10603 = vmatpush3.bf16.msra.mxu1 %v11267_v39  ;;  %v11333_v39 = vld [vmem:[%s14973_s5 + $0x558] ss:$12 sps:$4 sm:$0xff]  }
 0x406   :  { %10604 = vmatprep.subr.bf16.mxu1 %v11272_v46 }
 0x407   :  { %10503 = vmatpush3.bf16.msra.mxu0 %v11266_v49  ;;  %v5737_v49 = vld [vmem:[#allocation2 + $0x8] sm:$0xc] }
 0x408   :  { %6236 = vmatprep.subr.bf16.mxu0 %v11271_v13  ;;  %v9859_v13 = vcombine.low %v5737_v49, %v13856_v61  ;;  %v11348_v61 = vld [vmem:[%s14973_s5 + $0x52c] ss:$12 sps:$4 sm:$0xff]  }
 0x409   :  { %10605 = vmatpush3.bf16.msra.mxu1 %v11272_v46  ;;  %v11344_v46 = vld [vmem:[%s14973_s5 + $0x5c0] ss:$12 sps:$4 sm:$0xff]  }
 0x40a   :  { %5673 = vmatmul.mubr.bf16.vlgmr.msra.gmra.mxu0 %v9686_v7  ;;  %10606 = vmatprep.subr.bf16.mxu1 %v11277_v28  ;;  %v11341_v7 = vld [vmem:[%s14973_s5 + $0x544] ss:$12 sps:$4 sm:$0xff]  }
 0x40b   :  { %5680 = vmatprep.mubr.bf16.mxu0 %v9690_v23  ;;  %6237 = vmatpush1.bf16.msra.mxu0 %v11269_v20  ;;  %v14338_v23 = vrot.slane %v11343_v17, 2  ;;  %v11339_v20 = vld [vmem:[%s14973_s5 + $0x540] ss:$12 sps:$4 sm:$0xff]  }
 0x40c   :  { %6238 = vmatprep.subr.bf16.mxu0 %v11275_v0  ;;  %5581 = vmatmul.mubr.bf16.gmra.mxu1 %v9689_v4  ;;  %v5855_v0 = vrot.slane %v9859_v13, 2 }
 0x40d   :  { %10607 = vmatpush3.bf16.msra.mxu1 %v11277_v28  ;;  %10616 = vmatprep.mubr.msk.bf16.mxu1 %vm3940_vm11, %v14077_v11  ;;  %v11293_v11 = vld [vmem:[%s14973_s5 + $0x480] ss:$12 sps:$4 sm:$0xff]  }
 0x40e   :  { %10608 = vmatprep.subr.bf16.mxu1 %v11281_v8  ;;  %v11345_v28 = vld [vmem:[%s14973_s5 + $0x500] ss:$12 sps:$4 sm:$0xff]  }
 0x40f   :  { %6239 = vmatpush1.bf16.msra.mxu0 %v11273_v63  ;;  %v5857_v63 = vsel %vm775_vm4, %v5855_v0, %v14338_v23 }
 0x410   :  { %6240 = vmatprep.subr.bf16.mxu0 %v11280_v38  ;;  %v11353_v38 = vld [vmem:[%s14973_s5 + $0x514] ss:$12 sps:$4 sm:$0xff]  }
 0x411   :  { %10609 = vmatpush3.bf16.msra.mxu1 %v11281_v8  ;;  %v9860_v8 = vcombine.low %v14182_v10, %v14182_v10  ;;  %v11355_v10 = vld [vmem:[%s14973_s5 + $0x4d0] ss:$12 sps:$4 sm:$0xff]  }
 0x412   :  { %5681 = vmatmul.mubr.bf16.gmra.mxu0 %v9689_v4  ;;  %10610 = vmatprep.subr.bf16.mxu1 %v11288_v33  ;;  %v11350_v4 = vld [vmem:[%s14973_s5 + $0x4e8] ss:$12 sps:$4 sm:$0xff]  }
 0x413   :  { %6241 = vmatpush1.bf16.msra.mxu0 %v11278_v53  ;;  %6268 = vmatprep.mubr.bf16.mxu0 %v14220_v54  ;;  %v11354_v53 = vld [vmem:[%s14973_s5 + $0x590] ss:$12 sps:$4 sm:$0xff]  }
 0x414   :  { %6242 = vmatprep.subr.bf16.mxu0 %v11287_v18  ;;  %v9857_v18 = vcombine.low %v14195_v48, %v13893_v55  ;;  %v11359_v48 = vld [vmem:[%s14973_s5 + $0x4b8] ss:$12 sps:$4 sm:$0xff]  }
 0x415   :  { %10611 = vmatpush3.bf16.msra.mxu1 %v11288_v33  ;;  %v5850_v33 = vrot.slane %v9860_v8, 2  ;;  %v11394_v8 = vld [vmem:[%s14975_s7 + $0x154] ss:$8 sps:$4 sm:$0xff]  }
 0x416   :  { %10612 = vmatprep.subr.bf16.mxu1 %v11292_v59  ;;  %v5849_v55 = vrot.slane %v9857_v18, 2  ;;  %v11395_v18 = vld [vmem:[%s14975_s7 + $0x140] ss:$8 sps:$4 sm:$0xff]  }
 0x417   :  { %6243 = vmatpush1.bf16.msra.mxu0 %v11285_v56  ;;  %v11357_v56 = vld [vmem:[%s14973_s5 + $0x668] ss:$12 sps:$4 sm:$0xff]  }
 0x418   :  { %6244 = vmatprep.subr.bf16.mxu0 %v11291_v47  ;;  %v11358_v47 = vld [vmem:[%s14973_s5 + $0x578] ss:$12 sps:$4 sm:$0xff]  }
 0x419   :  { %10613 = vmatpush3.bf16.msra.mxu1 %v11292_v59  ;;  %v11360_v59 = vld [vmem:[%s14973_s5 + $0x650] ss:$12 sps:$4 sm:$0xff]  }
 0x41a   :  { %10614 = vmatprep.subr.bf16.mxu1 %v11296_v14 }
 0x41b   :  { %6245 = vmatpush1.bf16.msra.mxu0 %v11289_v51  ;;  %v5851_v51 = vsel %vm775_vm4, %v5849_v55, %v5850_v33 }
 0x41c   :  { %6246 = vmatprep.subr.bf16.mxu0 %v11295_v6  ;;  %v11361_v6 = vld [vmem:[%s14973_s5 + $0x560] ss:$12 sps:$4 sm:$0xff]  }
 0x41d   :  { %10615 = vmatpush3.bf16.msra.mxu1 %v11296_v14  ;;  %v11363_v14 = vld [vmem:[%s14973_s5 + $0x638] ss:$12 sps:$4 sm:$0xff]  }
 0x41e   :  { %6289 = vmatprep.subr.bf16.mxu1 %v11302_v22  ;;  %v11366_v22 = vld [vmem:[%s14973_s5 + $0x620] ss:$12 sps:$4 sm:$0xff]  }
 0x41f   :  { %6247 = vmatpush1.bf16.msra.mxu0 %v11293_v11  ;;  %v11364_v11 = vld [vmem:[%s14973_s5 + $0x548] ss:$12 sps:$4 sm:$0xff]  }
 0x420   :  { %6248 = vmatprep.subr.bf16.mxu0 %v11299_v24  ;;  %10617 = vmatmul.mubr.msk.bf16.vlgmr.msra.gmra.mxu1 %vm3940_vm11, %v14109_v62  ;;  %v11314_v62 = vld [vmem:[%s14973_s5 + $0x634] ss:$12 sps:$4 sm:$0xff]  }
 0x421   :  { %6290 = vmatpush1.bf16.msra.mxu1 %v11300_v50  ;;  %6319 = vmatprep.mubr.bf16.mxu1 %v15009_v5  ;;  %v11365_v24 = vld [vmem:[%s14973_s5 + $0x488] ss:$12 sps:$4 sm:$0xff]   ;;  %v11368_v50 = vld [vmem:[%s14973_s5 + $0x470] ss:$12 sps:$4 sm:$0xff]  }
 0x422   :  { %6291 = vmatprep.subr.bf16.mxu1 %v11308_v15  ;;  %v11370_v15 = vld [vmem:[%s14973_s5 + $0x518] ss:$12 sps:$4 sm:$0xff]  }
 0x423   :  { %6249 = vmatpush1.bf16.msra.mxu0 %v11297_v16  ;;  %v11367_v16 = vld [vmem:[%s14973_s5 + $0x530] ss:$12 sps:$4 sm:$0xff]  }
 0x424   :  { %6250 = vmatprep.subr.bf16.mxu0 %v11305_v45  ;;  %v11369_v45 = vld [vmem:[%s14973_s5 + $0x608] ss:$12 sps:$4 sm:$0xff]  }
 0x425   :  { %6292 = vmatpush1.bf16.msra.mxu1 %v11306_v52  ;;  %v11372_v52 = vld [vmem:[%s14973_s5 + $0x5f0] ss:$12 sps:$4 sm:$0xff]  }
 0x426   :  { %6293 = vmatprep.subr.bf16.mxu1 %v11314_v62 }
 0x427   :  { %6251 = vmatpush1.bf16.msra.mxu0 %v11303_v40  ;;  %v11371_v40 = vld [vmem:[%s14973_s5 + $0x458] ss:$12 sps:$4 sm:$0xff]  }
 0x428   :  { %6252 = vmatprep.subr.bf16.mxu0 %v11311_v19  ;;  %v11373_v19 = vld [vmem:[%s14973_s5 + $0x5d8] ss:$12 sps:$4 sm:$0xff]  }
 0x429   :  { %6294 = vmatpush1.bf16.msra.mxu1 %v11312_v21 }
 0x42a   :  { %6295 = vmatprep.subr.bf16.mxu1 %v11320_v32  ;;  %v11376_v32 = vld [vmem:[%s14975_s7 + $0x1b4] ss:$8 sps:$4 sm:$0xff]  }
 0x42b   :  { %6253 = vmatpush2.bf16.msra.mxu0 %v11309_v60 }
 0x42c   :  { %6254 = vmatprep.subr.bf16.mxu0 %v11317_v57  ;;  %v11374_v57 = vld [vmem:[%s14975_s7 + $0x1b0] ss:$8 sps:$4 sm:$0xff]  }
 0x42d   :  { %6296 = vmatpush1.bf16.msra.mxu1 %v11318_v27  ;;  %v11377_v27 = vld [vmem:[%s14975_s7 + $0x1a0] ss:$8 sps:$4 sm:$0xff]  }
 0x42e   :  { %6297 = vmatprep.subr.bf16.mxu1 %v11326_v42  ;;  %v11382_v42 = vld [vmem:[%s14975_s7 + $0x194] ss:$8 sps:$4 sm:$0xff]  }
 0x42f   :  { %6255 = vmatpush2.bf16.msra.mxu0 %v11315_v9 }
 0x430   :  { %6256 = vmatprep.subr.bf16.mxu0 %v11323_v58 }
 0x431   :  { %6298 = vmatpush1.bf16.msra.mxu1 %v11324_v3  ;;  %v11380_v3 = vld [vmem:[%s14975_s7 + $0x190] ss:$8 sps:$4 sm:$0xff]  }
 0x432   :  { %6299 = vmatprep.subr.bf16.mxu1 %v11332_v41 }
 0x433   :  { %6257 = vmatpush2.bf16.msra.mxu0 %v11321_v1 }
 0x434   :  { %6258 = vmatprep.subr.bf16.mxu0 %v11329_v29 }
 0x435   :  { %6300 = vmatpush1.bf16.msra.mxu1 %v11330_v35 }
 0x436   :  { %6301 = vmatprep.subr.bf16.mxu1 %v11338_v34 }
 0x437   :  { %6259 = vmatpush2.bf16.msra.mxu0 %v11327_v30  ;;  %v11385_v30 = vld [vmem:[%s14975_s7 + $0x184] ss:$8 sps:$4 sm:$0xff]  }
 0x438   :  { %6260 = vmatprep.subr.bf16.mxu0 %v11335_v26 }
 0x439   :  { %6302 = vmatpush1.bf16.msra.mxu1 %v11336_v44  ;;  %v11388_v44 = vld [vmem:[%s14975_s7 + $0x174] ss:$8 sps:$4 sm:$0xff]  }
 0x43a   :  { %10525 = vmatprep.subr.bf16.mxu1 %v11344_v46 }
 0x43b   :  { %6261 = vmatpush2.bf16.msra.mxu0 %v11333_v39  ;;  %v11383_v39 = vld [vmem:[%s14975_s7 + $0x180] ss:$8 sps:$4 sm:$0xff]  }
 0x43c   :  { %6262 = vmatprep.subr.bf16.mxu0 %v11341_v7  ;;  %9932 = vmatmul.mubr.msk.bf16.vlgmr.msra.gmra.mxu1 %vm3940_vm11, %v5857_v63 }
 0x43d   :  { %10526 = vmatpush3.bf16.msra.mxu1 %v11345_v28  ;;  %6329 = vmatprep.mubr.bf16.mxu1 %v15009_v5 }
 0x43e   :  { %10527 = vmatprep.subr.bf16.mxu1 %v11349_v37 }
 0x43f   :  { %6263 = vmatpush2.bf16.msra.mxu0 %v11339_v20 }
 0x440   :  { %6264 = vmatprep.subr.bf16.mxu0 %v11348_v61 }
 0x441   :  { %10528 = vmatpush3.bf16.msra.mxu1 %v11350_v4  ;;  %v11391_v4 = vld [vmem:[%s14975_s7 + $0x164] ss:$8 sps:$4 sm:$0xff]  }
 0x442   :  { %10529 = vmatprep.subr.bf16.mxu1 %v11354_v53 }
 0x443   :  { %6265 = vmatpush2.bf16.msra.mxu0 %v11346_v12  ;;  %v11389_v12 = vld [vmem:[%s14975_s7 + $0x160] ss:$8 sps:$4 sm:$0xff]  }
 0x444   :  { %6266 = vmatprep.subr.bf16.mxu0 %v11353_v38  ;;  %9933 = vmatmul.mubr.msk.bf16.gmra.mxu1 %vm3940_vm11, %v14338_v23  ;;  %v11392_v38 = vld [vmem:[%s14975_s7 + $0x150] ss:$8 sps:$4 sm:$0xff]  }
 0x445   :  { %10530 = vmatpush3.bf16.msra.mxu1 %v11355_v10  ;;  %6370 = vmatprep.mubr.bf16.mxu1 %v14220_v54  ;;  %v11362_v54 = vld [vmem:[%s14973_s5 + $0x4a0] ss:$12 sps:$4 sm:$0xff]  }
 0x446   :  { %10531 = vmatprep.subr.bf16.mxu1 %v11358_v47  ;;  %v11397_v10 = vld [vmem:[%s14975_s7 + $0x144] ss:$8 sps:$4 sm:$0xff]  }
 0x447   :  { %6267 = vmatpush2.bf16.msra.mxu0 %v11351_v31 }
 0x448   :  { %10620 = vmatprep.subr.bf16.mxu0 %v11357_v56 }
 0x449   :  { %10532 = vmatpush3.bf16.msra.mxu1 %v11359_v48 }
 0x44a   :  { %6269 = vmatmul.mubr.bf16.vlgmr.msra.gmra.mxu0 %v5851_v51  ;;  %10533 = vmatprep.subr.bf16.mxu1 %v11361_v6 }
 0x44b   :  { %6278 = vmatprep.mubr.bf16.mxu0 %v14205_v36  ;;  %10621 = vmatpush3.bf16.msra.mxu0 %v11357_v56 }
 0x44c   :  { %10622 = vmatprep.subr.bf16.mxu0 %v11360_v59 }
 0x44d   :  { %10534 = vmatpush3.bf16.msra.mxu1 %v11362_v54 }
 0x44e   :  { %10535 = vmatprep.subr.bf16.mxu1 %v11364_v11 }
 0x44f   :  { %10623 = vmatpush3.bf16.msra.mxu0 %v11360_v59 }
 0x450   :  { %10624 = vmatprep.subr.bf16.mxu0 %v11363_v14 }
 0x451   :  { %10536 = vmatpush3.bf16.msra.mxu1 %v11365_v24 }
 0x452   :  { %6279 = vmatmul.mubr.bf16.gmra.mxu0 %v5850_v33  ;;  %10537 = vmatprep.subr.bf16.mxu1 %v11367_v16 }
 0x453   :  { %10625 = vmatpush3.bf16.msra.mxu0 %v11363_v14  ;;  %10634 = vmatprep.mubr.msk.bf16.mxu0 %vm3940_vm11, %v5857_v63 }
 0x454   :  { %10626 = vmatprep.subr.bf16.mxu0 %v11366_v22 }
 0x455   :  { %10538 = vmatpush3.bf16.msra.mxu1 %v11368_v50 }
 0x456   :  { %10539 = vmatprep.subr.bf16.mxu1 %v11370_v15  ;;  %v11398_v15 = vld [vmem:[%s14975_s7 + $0x230] ss:$8 sps:$4 sm:$0xff]  }
 0x457   :  { %10627 = vmatpush3.bf16.msra.mxu0 %v11366_v22 }
 0x458   :  { %10628 = vmatprep.subr.bf16.mxu0 %v11369_v45 }
 0x459   :  { %10540 = vmatpush3.bf16.msra.mxu1 %v11371_v40  ;;  %v11400_v40 = vld [vmem:[%s14975_s7 + $0x234] ss:$8 sps:$4 sm:$0xff]  }
 0x45a   :  { %6844 = vmatprep.subr.bf16.mxu1 %v11376_v32  ;;  %v11412_v32 = vld [vmem:[%s14975_s7 + $0x1f4] ss:$8 sps:$4 sm:$0xff]  }
 0x45b   :  { %10629 = vmatpush3.bf16.msra.mxu0 %v11369_v45 }
 0x45c   :  { %10630 = vmatprep.subr.bf16.mxu0 %v11372_v52  ;;  %6371 = vmatmul.mubr.bf16.vlgmr.msra.gmra.mxu1 %v5851_v51 }
 0x45d   :  { %6378 = vmatprep.mubr.bf16.mxu1 %v14205_v36  ;;  %v11379_v36 = vld [vmem:[%s14975_s7 + $0x1a4] ss:$8 sps:$4 sm:$0xff]   ;;  %6845 = vmatpush1.bf16.msra.mxu1 %v11374_v57  ;;  %v11407_v57 = vld [vmem:[%s14975_s7 + $0x200] ss:$8 sps:$4 sm:$0xff]  }
 0x45e   :  { %6846 = vmatprep.subr.bf16.mxu1 %v11379_v36  ;;  %v11410_v36 = vld [vmem:[%s14975_s7 + $0x1f0] ss:$8 sps:$4 sm:$0xff]  }
 0x45f   :  { %10631 = vmatpush3.bf16.msra.mxu0 %v11372_v52  ;;  %v11403_v52 = vld [vmem:[%s14975_s7 + $0x224] ss:$8 sps:$4 sm:$0xff]  }
 0x460   :  { %10632 = vmatprep.subr.bf16.mxu0 %v11373_v19 }
 0x461   :  { %6847 = vmatpush1.bf16.msra.mxu1 %v11377_v27 }
 0x462   :  { %6848 = vmatprep.subr.bf16.mxu1 %v11382_v42 }
 0x463   :  { %10633 = vmatpush3.bf16.msra.mxu0 %v11373_v19  ;;  %v5031_v62 = vpop.f32.mrf.mxu1  ;;  %v11401_v19 = vld [vmem:[%s14975_s7 + $0x220] ss:$8 sps:$4 sm:$0xff]  }
 0x464   :  { %6379 = vmatmul.mubr.bf16.gmra.mxu1 %v5850_v33 }
 0x465   :  { %v5033_v60 = vpop.f32.mrf.mxu1  ;;  %6849 = vmatpush1.bf16.msra.mxu1 %v11380_v3 }
 0x466   :  { %10635 = vmatmul.mubr.msk.bf16.vlgmr.msra.gmra.mxu0 %vm3940_vm11, %v14338_v23  ;;  %6850 = vmatprep.subr.bf16.mxu1 %v11385_v30  ;;  %v11386_v23 = vld [vmem:[%s14975_s7 + $0x170] ss:$8 sps:$4 sm:$0xff]   ;;  %vm7687_vm11 = vcmask 784390  }
 0x467   :  { %6919 = vmatprep.mubr.bf16.mxu0 %v15009_v5  ;;  %v5035_v21 = vpop.f32.mrf.mxu1  ;;  %vm7688_vm14 = vmor %vm7687_vm11, %vm7686_vm10 }
 0x469   :  { %v5037_v9 = vpop.f32.mrf.mxu1  ;;  %6851 = vmatpush1.bf16.msra.mxu1 %v11383_v39  ;;  %v11421_v39 = vld [vmem:[%s14975_s7 + $0x1c4] ss:$8 sps:$4 sm:$0xff]  }
 0x46a   :  { %6852 = vmatprep.subr.bf16.mxu1 %v11388_v44  ;;  %v11427_v44 = vld [vmem:[%s14975_s7 + $0x270] ss:$8 sps:$4 sm:$0xff]  }
 0x46b   :  { %v5041_v58 = vpop.f32.mrf.mxu1 }
 0x46d   :  { %v5043_v1 = vpop.f32.mrf.mxu1  ;;  %6853 = vmatpush1.bf16.msra.mxu1 %v11386_v23  ;;  %v11429_v23 = vld [vmem:[%s14975_s7 + $0x274] ss:$8 sps:$4 sm:$0xff]  }
 0x46e   :  { %6854 = vmatprep.subr.bf16.mxu1 %v11391_v4  ;;  %6895 = vmatprep.subr.bf16.mxu0 %v11429_v23  ;;  %v11447_v4 = vld [vmem:[%s14975_s7 + $0x244] ss:$8 sps:$4 sm:$0xff]  }
 0x46f   :  { %v5045_v41 = vpop.f32.mrf.mxu1  ;;  %6896 = vmatpush1.bf16.msra.mxu0 %v11427_v44 }
 0x471   :  { %v5046_v34 = vpop.f32.mrf.mxu1  ;;  %6855 = vmatpush1.bf16.msra.mxu1 %v11389_v12  ;;  %v11439_v12 = vld [vmem:[%s14975_s7 + $0x250] ss:$8 sps:$4 sm:$0xff]  }
 0x472   :  { %v4980_v29 = vpop.f32.mrf.mxu0  ;;  %6856 = vmatprep.subr.bf16.mxu1 %v11394_v8  ;;  %v11419_v34 = vld [vmem:[%s14975_s7 + $0x1c0] ss:$8 sps:$4 sm:$0xff]   ;;  %v11456_v8 = vld [vmem:[%s14975_s7 + $0x74] ss:$8 sps:$4 sm:$0xff]  }
 0x473   :  { %v14460_v35 = vadd.f32 %v5031_v62, %v4980_v29  ;;  %v11404_v62 = vld [vmem:[%s14975_s7 + $0x210] ss:$8 sps:$4 sm:$0xff]  }
 0x474   :  { %v4982_v26 = vpop.f32.mrf.mxu0  ;;  %v11416_v29 = vld [vmem:[%s14975_s7 + $0x1d0] ss:$8 sps:$4 sm:$0xff]  }
 0x475   :  { %v14462_v17 = vadd.f32 %v5033_v60, %v4982_v26  ;;  %6857 = vmatpush1.bf16.msra.mxu1 %v11392_v38  ;;  %v11406_v60 = vld [vmem:[%s14975_s7 + $0x214] ss:$8 sps:$4 sm:$0xff]   ;;  %v11445_v38 = vld [vmem:[%s14975_s7 + $0x240] ss:$8 sps:$4 sm:$0xff]  }
 0x476   :  { %v4984_v49 = vpop.f32.mrf.mxu0  ;;  %6858 = vmatprep.subr.bf16.mxu1 %v11397_v10 }
 0x477   :  { %v14470_v7 = vadd.f32 %v5035_v21, %v4984_v49  ;;  %v11409_v21 = vld [vmem:[%s14975_s7 + $0x204] ss:$8 sps:$4 sm:$0xff]   ;;  %v11426_v49 = vld [vmem:[%s14975_s7 + $0x134] ss:$8 sps:$4 sm:$0xff]  }
 0x478   :  { %v4986_v13 = vpop.f32.mrf.mxu0 }
 0x479   :  { %v14472_v46 = vadd.f32 %v5037_v9, %v4986_v13  ;;  %6859 = vmatpush1.bf16.msra.mxu1 %v11395_v18  ;;  %v11415_v9 = vld [vmem:[%s14975_s7 + $0x1e4] ss:$8 sps:$4 sm:$0xff]  }
 0x47a   :  { %v4990_v20 = vpop.f32.mrf.mxu0  ;;  %6860 = vmatprep.subr.bf16.mxu1 %v11400_v40 }
 0x47b   :  { %v14477_v0 = vadd.f32 %v5041_v58, %v4990_v20  ;;  %v11413_v58 = vld [vmem:[%s14975_s7 + $0x1e0] ss:$8 sps:$4 sm:$0xff]   ;;  %v11435_v20 = vld [vmem:[%s14975_s7 + $0x264] ss:$8 sps:$4 sm:$0xff]  }
 0x47c   :  { %v4992_v28 = vpop.f32.mrf.mxu0  ;;  %6897 = vmatprep.subr.bf16.mxu0 %v11435_v20 }
 0x47d   :  { %v14479_v61 = vadd.f32 %v5043_v1, %v4992_v28  ;;  %6861 = vmatpush2.bf16.msra.mxu1 %v11398_v15  ;;  %v11418_v1 = vld [vmem:[%s14975_s7 + $0x1d4] ss:$8 sps:$4 sm:$0xff]  }
 0x47e   :  { %v4994_v37 = vpop.f32.mrf.mxu0  ;;  %6862 = vmatprep.subr.bf16.mxu1 %v11403_v52 }
 0x47f   :  { %v11433_v37 = vld [vmem:[%s14975_s7 + $0x260] ss:$8 sps:$4 sm:$0xff]  }
 0x480   :  { %v4995_v63 = vpop.f32.mrf.mxu0  ;;  %6898 = vmatpush1.bf16.msra.mxu0 %v11433_v37 }
 0x481   :  { %6863 = vmatpush2.bf16.msra.mxu1 %v11401_v19  ;;  %v11441_v63 = vld [vmem:[%s14975_s7 + $0x254] ss:$8 sps:$4 sm:$0xff]  }
 0x482   :  { %6864 = vmatprep.subr.bf16.mxu1 %v11406_v60  ;;  %6899 = vmatprep.subr.bf16.mxu0 %v11441_v63 }
 0x483   :  { %v10467_v53 = vpop.f32.mrf.mxu1 }
 0x484   :  { %6900 = vmatpush1.bf16.msra.mxu0 %v11439_v12 }
 0x485   :  { %v10468_v31 = vpop.f32.mrf.mxu1  ;;  %6865 = vmatpush2.bf16.msra.mxu1 %v11404_v62  ;;  %6901 = vmatprep.subr.bf16.mxu0 %v11447_v4 }
 0x486   :  { %v10469_v33 = vadd.f32 %v10468_v31, %v10467_v53  ;;  %6866 = vmatprep.subr.bf16.mxu1 %v11409_v21 }
 0x487   :  { %v10470_v56 = vpop.f32.mrf.mxu1 }
 0x488   :  { %6902 = vmatpush1.bf16.msra.mxu0 %v11445_v38 }
 0x489   :  { %v10471_v47 = vpop.f32.mrf.mxu1  ;;  %6867 = vmatpush2.bf16.msra.mxu1 %v11407_v57  ;;  %7143 = vmatprep.subr.bf16.mxu0 %v11456_v8 }
 0x48a   :  { %v10472_v55 = vadd.f32 %v10471_v47, %v10470_v56  ;;  %6868 = vmatprep.subr.bf16.mxu1 %v11412_v32 }
 0x48b   :  { %v10473_v59 = vpop.f32.mrf.mxu1 }
 0x48d   :  { %v10474_v54 = vpop.f32.mrf.mxu1  ;;  %6869 = vmatpush2.bf16.msra.mxu1 %v11410_v36 }
 0x48e   :  { %v10600_v48 = vpop.f32.mrf.mxu0  ;;  %v10475_v14 = vadd.f32 %v10474_v54, %v10473_v59  ;;  %6870 = vmatprep.subr.bf16.mxu1 %v11415_v9 }
 0x48f   :  { %v10476_v24 = vpop.f32.mrf.mxu1 }
 0x490   :  { %v5130_v51 = vpop.f32.mrf.mxu0  ;;  %v14501_v22 = vadd.f32 %v10600_v48, %v10475_v14 }
 0x491   :  { %v14499_v6 = vadd.f32 %v10469_v33, %v5130_v51  ;;  %v10477_v45 = vpop.f32.mrf.mxu1  ;;  %6871 = vmatpush2.bf16.msra.mxu1 %v11413_v58 }
 0x492   :  { %v10601_v11 = vpop.f32.mrf.mxu0  ;;  %6872 = vmatprep.subr.bf16.mxu1 %v11418_v1 }
 0x494   :  { %v5133_v16 = vpop.f32.mrf.mxu0 }
 0x495   :  { %v14503_v50 = vadd.f32 %v10472_v55, %v5133_v16  ;;  %6873 = vmatpush2.bf16.msra.mxu1 %v11416_v29 }
 0x496   :  { %6874 = vmatprep.subr.bf16.mxu1 %v11421_v39 }
 0x499   :  { %6875 = vmatpush2.bf16.msra.mxu1 %v11419_v34  ;;  %v6443_v34 = vld [vmem:[%s14974_s6] sm:$0x7] }
 0x49a   :  { %7194 = vmatprep.subr.bf16.mxu1 %v11426_v49  ;;  %v6448_v44 = vrot.slane %v6443_v34, %v15010_v25  ;;  %v6452_v37 = vrot.slane %v6443_v34, %v15011_v43 }
 0x4aa   :  { %v5623_v27 = vpop.f32.mrf.mxu0 }
 0x4ac   :  { %v5625_v42 = vpop.f32.mrf.mxu0 }
 0x4ae   :  { %v5627_v3 = vpop.f32.mrf.mxu0 }
 0x4b0   :  { %v5629_v41 = vpop.f32.mrf.mxu0 }
 0x4b2   :  { %v5633_v30 = vpop.f32.mrf.mxu0 }
 0x4b4   :  { %v5635_v26 = vpop.f32.mrf.mxu0 }
 0x4b6   :  { %v5637_v13 = vpop.f32.mrf.mxu0 }
 0x4b8   :  { %v5638_v28 = vpop.f32.mrf.mxu0 }
 0x4c4   :  { %v5572_v53 = vpop.f32.mrf.mxu1 }
 0x4c5   :  { %v5573_v31 = vadd.f32 %v5572_v53, %v14460_v35 }
 0x4c6   :  { %v5574_v18 = vpop.f32.mrf.mxu1 }
 0x4c7   :  { %v5624_v10 = vadd.f32 %v5623_v27, %v5573_v31  ;;  %v5575_v33 = vadd.f32 %v5574_v18, %v14462_v17 }
 0x4c8   :  { %v5576_v47 = vpop.f32.mrf.mxu1 }
 0x4c9   :  { %v5626_v55 = vadd.f32 %v5625_v42, %v5575_v33  ;;  %v5577_v48 = vadd.f32 %v5576_v47, %v14470_v7 }
 0x4ca   :  { %v10504_v56 = vpop.f32.mrf.mxu0  ;;  %v5578_v54 = vpop.f32.mrf.mxu1 }
 0x4cb   :  { %v5628_v14 = vadd.f32 %v5627_v3, %v5577_v48  ;;  %v5579_v11 = vadd.f32 %v5578_v54, %v14472_v46 }
 0x4cc   :  { %v10505_v59 = vpop.f32.mrf.mxu0  ;;  %v5582_v16 = vpop.f32.mrf.mxu1 }
 0x4cd   :  { %v10506_v51 = vadd.f32 %v10505_v59, %v10504_v56  ;;  %v5630_v35 = vadd.f32 %v5629_v41, %v5579_v11  ;;  %v5583_v15 = vadd.f32 %v5582_v16, %v14477_v0 }
 0x4ce   :  { %v10507_v24 = vpop.f32.mrf.mxu0  ;;  %v5584_v52 = vpop.f32.mrf.mxu1 }
 0x4cf   :  { %v5675_v45 = vadd.f32 %v10506_v51, %v14499_v6  ;;  %v5634_v19 = vadd.f32 %v5633_v30, %v5583_v15  ;;  %v5585_v62 = vadd.f32 %v5584_v52, %v14479_v61 }
 0x4d0   :  { %v10508_v40 = vpop.f32.mrf.mxu0  ;;  %v5586_v60 = vpop.f32.mrf.mxu1 }
 0x4d1   :  { %v10509_v17 = vadd.f32 %v10508_v40, %v10507_v24  ;;  %v5636_v57 = vadd.f32 %v5635_v26, %v5585_v62 }
 0x4d2   :  { %v10510_v7 = vpop.f32.mrf.mxu0  ;;  %v5587_v36 = vpop.f32.mrf.mxu1 }
 0x4d3   :  { %v14591_v21 = vadd.f32 %v10509_v17, %v14503_v50 }
 0x4d4   :  { %v10511_v46 = vpop.f32.mrf.mxu0 }
 0x4d5   :  { %v10512_v32 = vadd.f32 %v10511_v46, %v10510_v7 }
 0x4d6   :  { %v10513_v9 = vpop.f32.mrf.mxu0 }
 0x4d7   :  { %v5683_v6 = vadd.f32 %v10512_v32, %v14501_v22 }
 0x4d8   :  { %v10514_v27 = vpop.f32.mrf.mxu0 }
 0x4e0   :  { %v10618_v0 = vpop.f32.mrf.mxu1 }
 0x4e1   :  { %v14594_v58 = vadd.f32 %v10618_v0, %v5683_v6 }
 0x4e2   :  { %v5722_v42 = vpop.f32.mrf.mxu1 }
 0x4e3   :  { %v14596_v1 = vadd.f32 %v5722_v42, %v5675_v45 }
 0x4e4   :  { %v10619_v61 = vpop.f32.mrf.mxu1 }
 0x4e6   :  { %v14598_v3 = vpop.f32.mrf.mxu1 }
 0x4fc   :  { %v6321_v29 = vpop.f32.mrf.mxu1 }
 0x4fe   :  { %v6323_v50 = vpop.f32.mrf.mxu1 }
 0x500   :  { %v6325_v41 = vpop.f32.mrf.mxu1 }
 0x502   :  { %v6327_v30 = vpop.f32.mrf.mxu1 }
 0x504   :  { %v6331_v26 = vpop.f32.mrf.mxu1 }
 0x506   :  { %v6333_v22 = vpop.f32.mrf.mxu1 }
 0x508   :  { %v6335_v13 = vpop.f32.mrf.mxu1 }
 0x50a   :  { %v6270_v39 = vpop.f32.mrf.mxu0  ;;  %v6336_v63 = vpop.f32.mrf.mxu1 }
 0x50b   :  { %v6322_v49 = vadd.f32 %v6321_v29, %v6270_v39 }
 0x50c   :  { %v6272_v23 = vpop.f32.mrf.mxu0 }
 0x50d   :  { %v6434_v20 = vadd.f32 %v6322_v49, %v5624_v10  ;;  %v6324_v28 = vadd.f32 %v6323_v50, %v6272_v23  ;;  %v6456_v49 = vrot.slane %v6443_v34, %v15012_v2  ;;  %v11432_v34 = vld [vmem:[%s14975_s7 + $0x124] ss:$8 sps:$4 sm:$0xff]  }
 0x50e   :  { %v6274_v12 = vpop.f32.mrf.mxu0 }
 0x50f   :  { %v6460_v4 = vadd.f32 %v6448_v44, %v6434_v20  ;;  %v6435_v38 = vadd.f32 %v6324_v28, %v5626_v55  ;;  %v6326_v8 = vadd.f32 %v6325_v41, %v6274_v12 }
 0x510   :  { %v6276_v53 = vpop.f32.mrf.mxu0 }
 0x511   :  { %v6461_v31 = vadd.f32 %v6452_v37, %v6435_v38  ;;  %v6437_v18 = vadd.f32 %v6326_v8, %v5628_v14  ;;  %v6328_v33 = vadd.f32 %v6327_v30, %v6276_v53  ;;  %v6469_v56 = vmax.f32 %v6460_v4, 0.0  ;;  %v11424_v8 = vld [vmem:[%s14975_s7 + $0x130] ss:$8 sps:$4 sm:$0xff]  }
 0x512   :  { %v6280_v47 = vpop.f32.mrf.mxu0 }
 0x513   :  { %v6470_v48 = vmax.f32 %v6461_v31, 0.0  ;;  %v6463_v59 = vadd.f32 %v6448_v44, %v6437_v18  ;;  %v6438_v51 = vadd.f32 %v6328_v33, %v5630_v35  ;;  %v6332_v54 = vadd.f32 %v6331_v26, %v6280_v47 }
 0x514   :  { %v6282_v11 = vpop.f32.mrf.mxu0  ;;  %v5726_v33 = vadd.f32 %v14598_v3, %v14591_v21  ;;  %v11438_v21 = vld [vmem:[%s14975_s7 + $0x114] ss:$8 sps:$4 sm:$0xff]  }
 0x515   :  { %v10341_v10 = vpack.c.bf16 %v6470_v48, %v6469_v56  ;;  %v6464_v24 = vadd.f32 %v6452_v37, %v6438_v51  ;;  %v6440_v16 = vadd.f32 %v6332_v54, %v5634_v19  ;;  %v6334_v45 = vadd.f32 %v6333_v22, %v6282_v11  ;;  %v11430_v54 = vld [vmem:[%s14975_s7 + $0x120] ss:$8 sps:$4 sm:$0xff]  }
 0x516   :  { %v6284_v15 = vpop.f32.mrf.mxu0  ;;  %v6472_v40 = vmax.f32 %v6463_v59, 0.0 }
 0x517   :  { %6511 = vst [vmem:[#allocation2] sm:$0xff] %v10341_v10  ;;  %v6473_v55 = vmax.f32 %v6464_v24, 0.0  ;;  %v6466_v17 = vadd.f32 %v6448_v44, %v6440_v16  ;;  %v6441_v52 = vadd.f32 %v6334_v45, %v5636_v57  ;;  %v11436_v16 = vld [vmem:[%s14975_s7 + $0x110] ss:$8 sps:$4 sm:$0xff]   ;;  %v11444_v15 = vld [vmem:[%s14975_s7 + $0x104] ss:$8 sps:$4 sm:$0xff]  }
 0x518   :  { %v6285_v62 = vpop.f32.mrf.mxu0  ;;  %v14607_v60 = vpack.c.bf16 %v6472_v40, %v6469_v56 }
 0x519   :  { %v14605_v14 = vpack.c.bf16 %v6473_v55, %v6472_v40  ;;  %v6467_v7 = vadd.f32 %v6452_v37, %v6441_v52  ;;  %v14609_v46 = vpack.c.bf16 %v6473_v55, %v6470_v48  ;;  %v6475_v35 = vmax.f32 %v6466_v17, 0.0  ;;  %v11442_v17 = vld [vmem:[%s14975_s7 + $0x100] ss:$8 sps:$4 sm:$0xff]   ;;  %v11450_v52 = vld [vmem:[%s14975_s7 + $0x2f4] ss:$8 sps:$4 sm:$0xff]  }
 0x51b   :  { %v6476_v32 = vmax.f32 %v6467_v7, 0.0 }
 0x51c   :  { %v10541_v9 = vpop.f32.mrf.mxu1 }
 0x51d   :  { %v10345_v36 = vpack.c.bf16 %v6476_v32, %v6475_v35  ;;  %v11448_v32 = vld [vmem:[%s14975_s7 + $0x2f0] ss:$8 sps:$4 sm:$0xff]  }
 0x51e   :  { %v10542_v19 = vpop.f32.mrf.mxu1  ;;  %v6563_v6 = vld [vmem:[#allocation2] sm:$0xee] }
 0x51f   :  { %6516 = vst [vmem:[#allocation2 + $0x20] sm:$0x33] %v10345_v36  ;;  %v9983_v42 = vcombine.high %v6563_v6, %v14605_v14  ;;  %v9982_v61 = vcombine.low %v6563_v6, %v14605_v14  ;;  %v10543_v29 = vadd.f32 %v10542_v19, %v10541_v9  ;;  %v14649_v62 = vld [vmem:[#allocation2] sm:$0xcc] }
 0x520   :  { %v10544_v27 = vpop.f32.mrf.mxu1  ;;  %v10114_v35 = vcombine.high %v14649_v62, %v14605_v14 }
 0x521   :  { %v6632_v13 = vrot.slane %v9983_v42, 1  ;;  %v6629_v63 = vrot.slane %v9982_v61, 1  ;;  %v11460_v61 = vld [vmem:[%s14975_s7 + $0x2e4] ss:$8 sps:$4 sm:$0xff]  }
 0x522   :  { %v10545_v0 = vpop.f32.mrf.mxu1  ;;  %v7293_v42 = vrot.slane %v10114_v35, 2  ;;  %v11523_v35 = vld [vmem:[%s14975_s7 + $0xc4] ss:$8 sps:$4 sm:$0xff]  }
 0x523   :  { %v10546_v12 = vadd.f32 %v10545_v0, %v10544_v27 }
 0x524   :  { %v10547_v50 = vpop.f32.mrf.mxu1 }
 0x526   :  { %v10636_v57 = vpop.f32.mrf.mxu0  ;;  %v6565_v41 = vld [vmem:[#allocation2 + $0x20] sm:$0x11]  ;;  %v10548_v44 = vpop.f32.mrf.mxu1 }
 0x527   :  { %v9985_v26 = vcombine.low %v6565_v41, %v6565_v41  ;;  %v9986_v22 = vcombine.high %v6565_v41, %v6565_v41  ;;  %v10549_v23 = vadd.f32 %v10548_v44, %v10547_v50  ;;  %v14640_v55 = vld [vmem:[#allocation2 + $0x20] sm:$0x33]  ;;  %v11454_v50 = vld [vmem:[%s14975_s7 + $0x70] ss:$8 sps:$4 sm:$0xff]  }
 0x528   :  { %v6420_v30 = vpop.f32.mrf.mxu0  ;;  %v10550_v38 = vpop.f32.mrf.mxu1  ;;  %v10117_v7 = vcombine.high %v14640_v55, %v14640_v55  ;;  %v11461_v44 = vld [vmem:[%s14975_s7 + $0x60] ss:$8 sps:$4 sm:$0xff]  }
 0x529   :  { %v6421_v39 = vadd.f32 %v10543_v29, %v6420_v30  ;;  %v6630_v28 = vrot.slane %v9985_v26, 1  ;;  %v6633_v37 = vrot.slane %v9986_v22, 1  ;;  %v6429_v53 = vadd.f32 %v10636_v57, %v10549_v23  ;;  %v11458_v26 = vld [vmem:[%s14975_s7 + $0x2e0] ss:$8 sps:$4 sm:$0xff]   ;;  %v11463_v22 = vld [vmem:[%s14975_s7 + $0x64] ss:$8 sps:$4 sm:$0xff]  }
 0x52a   :  { %v10637_v20 = vpop.f32.mrf.mxu0  ;;  %v10551_v47 = vpop.f32.mrf.mxu1  ;;  %v7294_v9 = vrot.slane %v10117_v7, 2  ;;  %v11469_v23 = vld [vmem:[%s14975_s7 + $0x54] ss:$8 sps:$4 sm:$0xff]   ;;  %v11518_v7 = vld [vmem:[%s14975_s7 + $0x340] ss:$8 sps:$4 sm:$0xff]  }
 0x52b   :  { %v6436_v4 = vadd.f32 %v6421_v39, %v14596_v1  ;;  %v6634_v18 = vsel %vm176_vm2, %v6632_v13, %v6633_v37  ;;  %v6631_v2 = vsel %vm176_vm2, %v6629_v63, %v6630_v28  ;;  %v6442_v48 = vadd.f32 %v6429_v53, %v14594_v58  ;;  %v11464_v13 = vld [vmem:[%s14975_s7 + $0x2d0] ss:$8 sps:$4 sm:$0xff]   ;;  %v11472_v20 = vld [vmem:[%s14975_s7 + $0x2c4] ss:$8 sps:$4 sm:$0xff]   ;;  %v11470_v28 = vld [vmem:[%s14975_s7 + $0x2c0] ss:$8 sps:$4 sm:$0xff]  }
 0x52c   :  { %v6423_v31 = vpop.f32.mrf.mxu0  ;;  %6876 = vmatprep.mubr.bf16.mxu1 %v6634_v18  ;;  %v7295_v29 = vsel %vm775_vm4, %v7293_v42, %v7294_v9  ;;  %v11475_v37 = vld [vmem:[%s14975_s7 + $0x44] ss:$8 sps:$4 sm:$0xff]   ;;  %v11478_v63 = vld [vmem:[%s14975_s7 + $0x2b4] ss:$8 sps:$4 sm:$0xff]   ;;  %v11479_v53 = vld [vmem:[%s14975_s7 + $0x30] ss:$8 sps:$4 sm:$0xff]  }
 0x52d   :  { %v6462_v56 = vadd.f32 %v6456_v49, %v6436_v4  ;;  %v6424_v1 = vadd.f32 %v10546_v12, %v6423_v31  ;;  %6877 = vmatmul.mubr.bf16.vlgmr.msra.gmra.mxu1 %v6631_v2  ;;  %v6468_v11 = vadd.f32 %v6456_v49, %v6442_v48  ;;  %v11473_v12 = vld [vmem:[%s14975_s7 + $0x40] ss:$8 sps:$4 sm:$0xff]   ;;  %v11476_v4 = vld [vmem:[%s14975_s7 + $0x2b0] ss:$8 sps:$4 sm:$0xff]   ;;  %v11481_v38 = vld [vmem:[%s14975_s7 + $0x34] ss:$8 sps:$4 sm:$0xff]  }
 0x52e   :  { %7195 = vmatpush1.bf16.msra.mxu1 %v11424_v8  ;;  %7218 = vmatprep.mubr.bf16.mxu1 %v15009_v5  ;;  %v11484_v8 = vld [vmem:[%s14975_s7 + $0x2a4] ss:$8 sps:$4 sm:$0xff]   ;;  %v11482_v31 = vld [vmem:[%s14975_s7 + $0x2a0] ss:$8 sps:$4 sm:$0xff]   ;;  %v11490_v2 = vld [vmem:[%s14975_s7 + $0x294] ss:$8 sps:$4 sm:$0xff]  }
 0x52f   :  { %v6471_v59 = vmax.f32 %v6462_v56, 0.0  ;;  %v6439_v51 = vadd.f32 %v6424_v1, %v5726_v33  ;;  %7196 = vmatprep.subr.bf16.mxu1 %v11432_v34  ;;  %v6477_v58 = vmax.f32 %v6468_v11, 0.0  ;;  %v11487_v18 = vld [vmem:[%s14975_s7 + $0x24] ss:$8 sps:$4 sm:$0xff]   ;;  %v11485_v34 = vld [vmem:[%s14975_s7 + $0x20] ss:$8 sps:$4 sm:$0xff]  }
 0x530   :  { %v11488_v33 = vld [vmem:[%s14975_s7 + $0x290] ss:$8 sps:$4 sm:$0xff]   ;;  %v11493_v56 = vld [vmem:[%s14975_s7 + $0x14] ss:$8 sps:$4 sm:$0xff]   ;;  %v11496_v1 = vld [vmem:[%s14975_s7 + $0x284] ss:$8 sps:$4 sm:$0xff]  }
 0x531   :  { %v10342_v3 = vpack.c.bf16 %v6471_v59, %v6471_v59  ;;  %v6465_v10 = vadd.f32 %v6456_v49, %v6439_v51  ;;  %v10346_v45 = vpack.c.bf16 %v6477_v58, %v6477_v58  ;;  %v11466_v49 = vld [vmem:[%s14975_s7 + $0x2d4] ss:$8 sps:$4 sm:$0xff]   ;;  %v11491_v47 = vld [vmem:[%s14975_s7 + $0x10] ss:$8 sps:$4 sm:$0xff]   ;;  %v11494_v48 = vld [vmem:[%s14975_s7 + $0x280] ss:$8 sps:$4 sm:$0xff]  }
 0x532   :  { %7197 = vmatpush1.bf16.msra.mxu1 %v11430_v54  ;;  %v11499_v59 = vld [vmem:[%s14975_s7 + $0x4] ss:$8 sps:$4 sm:$0xff]   ;;  %v11502_v51 = vld [vmem:[%s14975_s7 + $0x374] ss:$8 sps:$4 sm:$0xff]   ;;  %v11497_v54 = vld [vmem:[%s14975_s7] ss:$8 sps:$4 sm:$0xff]  }
 0x533   :  { %v6474_v24 = vmax.f32 %v6465_v10, 0.0  ;;  %6513 = vst.msk [vmem:[#allocation2 + $0x8] sm:$0xf] %vm6512_vm0, %v10342_v3  ;;  %7198 = vmatprep.subr.bf16.mxu1 %v11438_v21  ;;  %v11500_v11 = vld [vmem:[%s14975_s7 + $0x370] ss:$8 sps:$4 sm:$0xff]  }
 0x534   :  { %6518 = vst.msk [vmem:[#allocation2 + $0x28] sm:$0x3] %vm6517_vm1, %v10346_v45  ;;  %v11505_v21 = vld [vmem:[%s14975_s7 + $0xf4] ss:$8 sps:$4 sm:$0xff]   ;;  %v11508_v3 = vld [vmem:[%s14975_s7 + $0x364] ss:$8 sps:$4 sm:$0xff]  }
 0x535   :  { %v10344_v40 = vpack.c.bf16 %v6474_v24, %v6474_v24  ;;  %v11503_v10 = vld [vmem:[%s14975_s7 + $0xf0] ss:$8 sps:$4 sm:$0xff]   ;;  %v11506_v58 = vld [vmem:[%s14975_s7 + $0x360] ss:$8 sps:$4 sm:$0xff]   ;;  %v11511_v24 = vld [vmem:[%s14975_s7 + $0xe4] ss:$8 sps:$4 sm:$0xff]  }
 0x536   :  { %7199 = vmatpush1.bf16.msra.mxu1 %v11436_v16  ;;  %v11514_v16 = vld [vmem:[%s14975_s7 + $0x354] ss:$8 sps:$4 sm:$0xff]   ;;  %v11509_v45 = vld [vmem:[%s14975_s7 + $0xe0] ss:$8 sps:$4 sm:$0xff]   ;;  %v11524_v9 = vld [vmem:[%s14975_s7 + $0x330] ss:$8 sps:$4 sm:$0xff]  }
 0x537   :  { %6515 = vst.msk [vmem:[#allocation2 + $0x18] sm:$0xf] %vm6512_vm0, %v10344_v40  ;;  %7200 = vmatprep.subr.bf16.mxu1 %v11444_v15  ;;  %v11512_v15 = vld [vmem:[%s14975_s7 + $0x350] ss:$8 sps:$4 sm:$0xff]   ;;  %v11517_v40 = vld [vmem:[%s14975_s7 + $0xd4] ss:$8 sps:$4 sm:$0xff]  }
 0x538   :  { %v11530_v42 = vld [vmem:[%s14975_s7 + $0x320] ss:$8 sps:$4 sm:$0xff]  }
 0x53a   :  { %7201 = vmatpush1.bf16.msra.mxu1 %v11442_v17  ;;  %v6520_v36 = vld [vmem:[#allocation2 + $0x8] sm:$0xf]  ;;  %v11520_v17 = vld [vmem:[%s14975_s7 + $0x344] ss:$8 sps:$4 sm:$0xff]  }
 0x53b   :  { %7504 = vmatprep.subr.bf16.mxu1 %v11450_v52  ;;  %v11457_v19 = vld [vmem:[#allocation2 + $0x28] ss:$0 sps:$4 sm:$0x11]   ;;  %v6564_v27 = vld [vmem:[#allocation2 + $0x8] sm:$0xe] }
 0x53c   :  { %v6636_v30 = vrot.slane %v11457_v19, 1  ;;  %v11515_v52 = vld [vmem:[%s14975_s7 + $0xd0] ss:$8 sps:$4 sm:$0xff]   ;;  %v11529_v19 = vld [vmem:[%s14975_s7 + $0xb4] ss:$8 sps:$4 sm:$0xff]  }
 0x53e   :  { %v14658_v6 = vld [vmem:[#allocation2 + $0x18] sm:$0xf] }
 0x53f   :  { %v10031_v0 = vcombine.low %v6520_v36, %v14658_v6  ;;  %v9984_v57 = vcombine.low %v6564_v27, %v14658_v6  ;;  %v11521_v36 = vld [vmem:[%s14975_s7 + $0xc0] ss:$8 sps:$4 sm:$0xff]   ;;  %v11532_v27 = vld [vmem:[%s14975_s7 + $0x324] ss:$8 sps:$4 sm:$0xff]  }
 0x541   :  { %10072 = vmatmul.mubr.msk.bf16.vlgmr.msra.gmra.mxu1 %vm6840_vm3, %v10031_v0  ;;  %v6635_v41 = vrot.slane %v9984_v57, 1  ;;  %v11527_v0 = vld [vmem:[%s14975_s7 + $0xb0] ss:$8 sps:$4 sm:$0xff]   ;;  %v11535_v57 = vld [vmem:[%s14975_s7 + $0xa4] ss:$8 sps:$4 sm:$0xff]  }
 0x542   :  { %7505 = vmatpush1.bf16.msra.mxu1 %v11448_v32  ;;  %7536 = vmatprep.mubr.bf16.mxu1 %v7295_v29  ;;  %v11526_v32 = vld [vmem:[%s14975_s7 + $0x334] ss:$8 sps:$4 sm:$0xff]   ;;  %v11533_v29 = vld [vmem:[%s14975_s7 + $0xa0] ss:$8 sps:$4 sm:$0xff]  }
 0x543   :  { %v6637_v39 = vsel %vm176_vm2, %v6635_v41, %v6636_v30  ;;  %7506 = vmatprep.subr.bf16.mxu1 %v11460_v61  ;;  %v11538_v61 = vld [vmem:[%s14975_s7 + $0x314] ss:$8 sps:$4 sm:$0xff]   ;;  %v11544_v30 = vld [vmem:[%s14975_s7 + $0x304] ss:$8 sps:$4 sm:$0xff]   ;;  %vm7639_vm2 = vcmask 785408  }
 0x544   :  { %10028 = vmatmul.mubr.msk.bf16.vlgmr.msra.gmra.mxu0 %vm6840_vm3, %v6637_v39  ;;  %v11541_v41 = vld [vmem:[%s14975_s7 + $0x94] ss:$8 sps:$4 sm:$0xff]   ;;  %v11542_v39 = vld [vmem:[%s14975_s7 + $0x300] ss:$8 sps:$4 sm:$0xff]  }
 0x545   :  { %7144 = vmatpush1.bf16.msra.mxu0 %v11454_v50  ;;  %7175 = vmatprep.mubr.bf16.mxu0 %v14609_v46  ;;  %v11467_v46 = vld [vmem:[%s14975_s7 + $0x50] ss:$8 sps:$4 sm:$0xff]  }
 0x546   :  { %7507 = vmatpush1.bf16.msra.mxu1 %v11458_v26  ;;  %7145 = vmatprep.subr.bf16.mxu0 %v11463_v22  ;;  %v11536_v50 = vld [vmem:[%s14975_s7 + $0x310] ss:$8 sps:$4 sm:$0xff]   ;;  %v10116_v26 = vcombine.low %v14640_v55, %v14640_v55 }
 0x547   :  { %7508 = vmatprep.subr.bf16.mxu1 %v11466_v49  ;;  %v11539_v22 = vld [vmem:[%s14975_s7 + $0x90] ss:$8 sps:$4 sm:$0xff]   ;;  %v11547_v49 = vld [vmem:[%s14975_s7 + $0x84] ss:$8 sps:$4 sm:$0xff]  }
 0x548   :  { %v7291_v55 = vrot.slane %v10116_v26, 2  ;;  %v11618_v26 = vld [vmem:[#allocation3 + $0x1a0] ss:$8 sps:$4 sm:$0xff]  }
 0x549   :  { %7146 = vmatpush1.bf16.msra.mxu0 %v11461_v44  ;;  %v10113_v44 = vcombine.low %v14649_v62, %v14605_v14  ;;  %v11548_v14 = vld [vmem:[%s14975_s7 + $0x3b0] ss:$8 sps:$4 sm:$0xff]   ;;  %v11553_v62 = vld [vmem:[%s14975_s7 + $0x3a4] ss:$8 sps:$4 sm:$0xff]  }
 0x54a   :  { %7509 = vmatpush1.bf16.msra.mxu1 %v11464_v13  ;;  %7147 = vmatprep.subr.bf16.mxu0 %v11469_v23  ;;  %v11545_v13 = vld [vmem:[%s14975_s7 + $0x80] ss:$8 sps:$4 sm:$0xff]  }
 0x54b   :  { %7510 = vmatprep.subr.bf16.mxu1 %v11472_v20  ;;  %v7290_v23 = vrot.slane %v10113_v44, 2  ;;  %v11550_v20 = vld [vmem:[%s14975_s7 + $0x3b4] ss:$8 sps:$4 sm:$0xff]  }
 0x54d   :  { %7148 = vmatpush1.bf16.msra.mxu0 %v11467_v46  ;;  %v7292_v46 = vsel %vm775_vm4, %v7290_v23, %v7291_v55 }
 0x54e   :  { %7511 = vmatpush1.bf16.msra.mxu1 %v11470_v28  ;;  %7149 = vmatprep.subr.bf16.mxu0 %v11475_v37  ;;  %v11551_v28 = vld [vmem:[%s14975_s7 + $0x3a0] ss:$8 sps:$4 sm:$0xff]   ;;  %v11556_v37 = vld [vmem:[%s14975_s7 + $0x394] ss:$8 sps:$4 sm:$0xff]  }
 0x54f   :  { %7512 = vmatprep.subr.bf16.mxu1 %v11478_v63  ;;  %v11554_v63 = vld [vmem:[%s14975_s7 + $0x390] ss:$8 sps:$4 sm:$0xff]  }
 0x551   :  { %7150 = vmatpush1.bf16.msra.mxu0 %v11473_v12  ;;  %v7230_v12 = vld [vmem:[#allocation2 + $0x8] sm:$0xc] }
 0x552   :  { %7513 = vmatpush1.bf16.msra.mxu1 %v11476_v4  ;;  %7151 = vmatprep.subr.bf16.mxu0 %v11481_v38  ;;  %v10115_v4 = vcombine.low %v7230_v12, %v14658_v6  ;;  %v11560_v38 = vld [vmem:[#allocation2 + $0x28] ss:$0 sps:$4 sm:$0x33]   ;;  %v11572_v6 = vld [vmem:[#allocation3 + $0x144] ss:$8 sps:$4 sm:$0xff]  }
 0x553   :  { %7514 = vmatprep.subr.bf16.mxu1 %v11484_v8 }
 0x554   :  { %v7296_v8 = vrot.slane %v10115_v4, 2 }
 0x555   :  { %7152 = vmatpush1.bf16.msra.mxu0 %v11479_v53  ;;  %v7297_v53 = vrot.slane %v11560_v38, 2 }
 0x556   :  { %7515 = vmatpush1.bf16.msra.mxu1 %v11482_v31  ;;  %7153 = vmatprep.subr.bf16.mxu0 %v11487_v18  ;;  %v11561_v18 = vld [vmem:[#allocation3 + $0x70] ss:$8 sps:$4 sm:$0xff]  }
 0x557   :  { %7516 = vmatprep.subr.bf16.mxu1 %v11490_v2  ;;  %v7298_v31 = vsel %vm775_vm4, %v7296_v8, %v7297_v53  ;;  %v11563_v2 = vld [vmem:[#allocation3 + $0x74] ss:$8 sps:$4 sm:$0xff]   ;;  %vm7643_vm4 = vcmask 1040384  }
 0x558   :  { %vm7645_vm8 = vmor %vm7644_vm5, %vm7643_vm4 }
 0x559   :  { %7154 = vmatpush1.bf16.msra.mxu0 %v11485_v34  ;;  %v11564_v34 = vld [vmem:[#allocation3 + $0x150] ss:$8 sps:$4 sm:$0xff]  }
 0x55a   :  { %7517 = vmatpush1.bf16.msra.mxu1 %v11488_v33  ;;  %7155 = vmatprep.subr.bf16.mxu0 %v11493_v56  ;;  %v11566_v33 = vld [vmem:[#allocation3 + $0x154] ss:$8 sps:$4 sm:$0xff]   ;;  %v11569_v56 = vld [vmem:[#allocation3 + $0x64] ss:$8 sps:$4 sm:$0xff]  }
 0x55b   :  { %7518 = vmatprep.subr.bf16.mxu1 %v11496_v1  ;;  %v11567_v1 = vld [vmem:[#allocation3 + $0x60] ss:$8 sps:$4 sm:$0xff]  }
 0x55d   :  { %7156 = vmatpush1.bf16.msra.mxu0 %v11491_v47  ;;  %v11570_v47 = vld [vmem:[#allocation3 + $0x140] ss:$8 sps:$4 sm:$0xff]  }
 0x55e   :  { %7519 = vmatpush1.bf16.msra.mxu1 %v11494_v48  ;;  %7157 = vmatprep.subr.bf16.mxu0 %v11499_v59  ;;  %v11575_v48 = vld [vmem:[#allocation3 + $0x54] ss:$8 sps:$4 sm:$0xff]  }
 0x55f   :  { %7520 = vmatprep.subr.bf16.mxu1 %v11502_v51  ;;  %v11578_v59 = vld [vmem:[#allocation3 + $0x134] ss:$8 sps:$4 sm:$0xff]   ;;  %v11573_v51 = vld [vmem:[#allocation3 + $0x50] ss:$8 sps:$4 sm:$0xff]  }
 0x561   :  { %7158 = vmatpush1.bf16.msra.mxu0 %v11497_v54  ;;  %v11576_v54 = vld [vmem:[#allocation3 + $0x130] ss:$8 sps:$4 sm:$0xff]  }
 0x562   :  { %7521 = vmatpush2.bf16.msra.mxu1 %v11500_v11  ;;  %7159 = vmatprep.subr.bf16.mxu0 %v11505_v21  ;;  %v11581_v11 = vld [vmem:[#allocation3 + $0x44] ss:$8 sps:$4 sm:$0xff]  }
 0x563   :  { %7522 = vmatprep.subr.bf16.mxu1 %v11508_v3  ;;  %v11584_v21 = vld [vmem:[#allocation3 + $0x124] ss:$8 sps:$4 sm:$0xff]   ;;  %v11579_v3 = vld [vmem:[#allocation3 + $0x40] ss:$8 sps:$4 sm:$0xff]  }
 0x565   :  { %7160 = vmatpush2.bf16.msra.mxu0 %v11503_v10  ;;  %v11582_v10 = vld [vmem:[#allocation3 + $0x120] ss:$8 sps:$4 sm:$0xff]  }
 0x566   :  { %7523 = vmatpush2.bf16.msra.mxu1 %v11506_v58  ;;  %7161 = vmatprep.subr.bf16.mxu0 %v11511_v24  ;;  %v11587_v58 = vld [vmem:[#allocation3 + $0x34] ss:$8 sps:$4 sm:$0xff]  }
 0x567   :  { %7524 = vmatprep.subr.bf16.mxu1 %v11514_v16  ;;  %v11590_v24 = vld [vmem:[#allocation3 + $0x114] ss:$8 sps:$4 sm:$0xff]   ;;  %v11585_v16 = vld [vmem:[#allocation3 + $0x30] ss:$8 sps:$4 sm:$0xff]  }
 0x569   :  { %7162 = vmatpush2.bf16.msra.mxu0 %v11509_v45  ;;  %v11588_v45 = vld [vmem:[#allocation3 + $0x110] ss:$8 sps:$4 sm:$0xff]  }
 0x56a   :  { %7525 = vmatpush2.bf16.msra.mxu1 %v11512_v15  ;;  %7163 = vmatprep.subr.bf16.mxu0 %v11517_v40  ;;  %v11593_v15 = vld [vmem:[#allocation3 + $0x24] ss:$8 sps:$4 sm:$0xff]  }
 0x56b   :  { %7526 = vmatprep.subr.bf16.mxu1 %v11520_v17  ;;  %v11596_v40 = vld [vmem:[#allocation3 + $0x104] ss:$8 sps:$4 sm:$0xff]   ;;  %v11591_v17 = vld [vmem:[#allocation3 + $0x20] ss:$8 sps:$4 sm:$0xff]  }
 0x56d   :  { %7164 = vmatpush2.bf16.msra.mxu0 %v11515_v52  ;;  %v11594_v52 = vld [vmem:[#allocation3 + $0x100] ss:$8 sps:$4 sm:$0xff]  }
 0x56e   :  { %7527 = vmatpush2.bf16.msra.mxu1 %v11518_v7  ;;  %7165 = vmatprep.subr.bf16.mxu0 %v11523_v35  ;;  %v11599_v7 = vld [vmem:[#allocation3 + $0x14] ss:$8 sps:$4 sm:$0xff]  }
 0x56f   :  { %7528 = vmatprep.subr.bf16.mxu1 %v11526_v32  ;;  %v11602_v35 = vld [vmem:[#allocation3 + $0xf4] ss:$8 sps:$4 sm:$0xff]   ;;  %v11597_v32 = vld [vmem:[#allocation3 + $0x10] ss:$8 sps:$4 sm:$0xff]  }
 0x571   :  { %7166 = vmatpush2.bf16.msra.mxu0 %v11521_v36  ;;  %v11600_v36 = vld [vmem:[#allocation3 + $0xf0] ss:$8 sps:$4 sm:$0xff]  }
 0x572   :  { %7529 = vmatpush2.bf16.msra.mxu1 %v11524_v9  ;;  %7167 = vmatprep.subr.bf16.mxu0 %v11529_v19  ;;  %v11605_v9 = vld [vmem:[#allocation3 + $0x4] ss:$8 sps:$4 sm:$0xff]  }
 0x573   :  { %7530 = vmatprep.subr.bf16.mxu1 %v11532_v27  ;;  %v11608_v19 = vld [vmem:[#allocation3 + $0xe4] ss:$8 sps:$4 sm:$0xff]   ;;  %v11603_v27 = vld [vmem:[#allocation3] ss:$8 sps:$4 sm:$0xff]  }
 0x575   :  { %7168 = vmatpush2.bf16.msra.mxu0 %v11527_v0  ;;  %v11606_v0 = vld [vmem:[#allocation3 + $0xe0] ss:$8 sps:$4 sm:$0xff]  }
 0x576   :  { %7531 = vmatpush2.bf16.msra.mxu1 %v11530_v42  ;;  %7169 = vmatprep.subr.bf16.mxu0 %v11535_v57  ;;  %v11611_v42 = vld [vmem:[#allocation3 + $0xd4] ss:$8 sps:$4 sm:$0xff]  }
 0x577   :  { %7532 = vmatprep.subr.bf16.mxu1 %v11538_v61  ;;  %v11614_v57 = vld [vmem:[#allocation3 + $0x1b4] ss:$8 sps:$4 sm:$0xff]   ;;  %v11609_v61 = vld [vmem:[#allocation3 + $0xd0] ss:$8 sps:$4 sm:$0xff]  }
 0x579   :  { %7170 = vmatpush2.bf16.msra.mxu0 %v11533_v29  ;;  %v11612_v29 = vld [vmem:[#allocation3 + $0x1b0] ss:$8 sps:$4 sm:$0xff]  }
 0x57a   :  { %7533 = vmatpush2.bf16.msra.mxu1 %v11536_v50  ;;  %7171 = vmatprep.subr.bf16.mxu0 %v11541_v41  ;;  %v11617_v50 = vld [vmem:[#allocation3 + $0xc4] ss:$8 sps:$4 sm:$0xff]  }
 0x57b   :  { %7534 = vmatprep.subr.bf16.mxu1 %v11544_v30  ;;  %v11620_v41 = vld [vmem:[#allocation3 + $0x1a4] ss:$8 sps:$4 sm:$0xff]   ;;  %v11615_v30 = vld [vmem:[#allocation3 + $0xc0] ss:$8 sps:$4 sm:$0xff]  }
 0x57d   :  { %7172 = vmatpush2.bf16.msra.mxu0 %v11539_v22  ;;  %v11623_v22 = vld [vmem:[#allocation3 + $0xb4] ss:$8 sps:$4 sm:$0xff]  }
 0x57e   :  { %7535 = vmatpush2.bf16.msra.mxu1 %v11542_v39  ;;  %7173 = vmatprep.subr.bf16.mxu0 %v11547_v49  ;;  %v11621_v39 = vld [vmem:[#allocation3 + $0xb0] ss:$8 sps:$4 sm:$0xff]  }
 0x57f   :  { %8112 = vmatprep.subr.bf16.mxu1 %v11563_v2 }
 0x581   :  { %7174 = vmatpush2.bf16.msra.mxu0 %v11545_v13  ;;  %7537 = vmatmul.mubr.bf16.vlgmr.msra.gmra.mxu1 %v7292_v46 }
 0x582   :  { %7555 = vmatprep.subr.bf16.mxu0 %v11550_v20  ;;  %8113 = vmatpush1.bf16.msra.mxu1 %v11561_v18 }
 0x583   :  { %8114 = vmatprep.subr.bf16.mxu1 %v11569_v56 }
 0x584   :  { %7176 = vmatmul.mubr.bf16.vlgmr.msra.gmra.mxu0 %v14607_v60  ;;  %v11559_v60 = vld [vmem:[%s14975_s7 + $0x384] ss:$8 sps:$4 sm:$0xff]  }
 0x585   :  { %7556 = vmatpush1.bf16.msra.mxu0 %v11548_v14  ;;  %7579 = vmatprep.mubr.bf16.mxu0 %v15009_v5  ;;  %v11557_v5 = vld [vmem:[%s14975_s7 + $0x380] ss:$8 sps:$4 sm:$0xff]  }
 0x586   :  { %7557 = vmatprep.subr.bf16.mxu0 %v11553_v62  ;;  %8115 = vmatpush1.bf16.msra.mxu1 %v11567_v1 }
 0x587   :  { %8116 = vmatprep.subr.bf16.mxu1 %v11575_v48 }
 0x589   :  { %7558 = vmatpush1.bf16.msra.mxu0 %v11551_v28 }
 0x58a   :  { %7559 = vmatprep.subr.bf16.mxu0 %v11556_v37  ;;  %8117 = vmatpush1.bf16.msra.mxu1 %v11573_v51 }
 0x58b   :  { %8118 = vmatprep.subr.bf16.mxu1 %v11581_v11 }
 0x58d   :  { %7560 = vmatpush1.bf16.msra.mxu0 %v11554_v63 }
 0x58e   :  { %7561 = vmatprep.subr.bf16.mxu0 %v11559_v60  ;;  %8119 = vmatpush1.bf16.msra.mxu1 %v11579_v3 }
 0x58f   :  { %8120 = vmatprep.subr.bf16.mxu1 %v11587_v58 }
 0x591   :  { %7562 = vmatpush1.bf16.msra.mxu0 %v11557_v5 }
 0x592   :  { %7922 = vmatprep.subr.bf16.mxu0 %v11566_v33  ;;  %8121 = vmatpush1.bf16.msra.mxu1 %v11585_v16 }
 0x593   :  { %8122 = vmatprep.subr.bf16.mxu1 %v11593_v15 }
 0x594   :  { %10159 = vmatmul.mubr.msk.bf16.vlgmr.msra.gmra.mxu0 %vm6840_vm3, %v7298_v31  ;;  %v7594_v31 = vld [vmem:[%s14976_s8] sm:$0x3]  ;;  %s11815_s8 = smov 96  }
 0x595   :  { %7923 = vmatpush1.bf16.msra.mxu0 %v11564_v34  ;;  %v7603_v11 = vrot.slane %v7594_v31, %v15011_v43 }
 0x596   :  { %7924 = vmatprep.subr.bf16.mxu0 %v11572_v6  ;;  %8123 = vmatpush1.bf16.msra.mxu1 %v11591_v17  ;;  %v7599_v6 = vrot.slane %v7594_v31, %v15010_v25 }
 0x597   :  { %8124 = vmatprep.subr.bf16.mxu1 %v11599_v7 }
 0x599   :  { %7925 = vmatpush1.bf16.msra.mxu0 %v11570_v47 }
 0x59a   :  { %7926 = vmatprep.subr.bf16.mxu0 %v11578_v59  ;;  %8125 = vmatpush1.bf16.msra.mxu1 %v11597_v32 }
 0x59b   :  { %8126 = vmatprep.subr.bf16.mxu1 %v11605_v9 }
 0x59d   :  { %7927 = vmatpush1.bf16.msra.mxu0 %v11576_v54 }
 0x59e   :  { %7928 = vmatprep.subr.bf16.mxu0 %v11584_v21  ;;  %8127 = vmatpush1.bf16.msra.mxu1 %v11603_v27 }
 0x59f   :  { %8132 = vmatprep.subr.bf16.mxu1 %v11611_v42 }
 0x5a1   :  { %7929 = vmatpush1.bf16.msra.mxu0 %v11582_v10 }
 0x5a2   :  { %7930 = vmatprep.subr.bf16.mxu0 %v11590_v24  ;;  %8133 = vmatpush2.bf16.msra.mxu1 %v11609_v61 }
 0x5a3   :  { %8134 = vmatprep.subr.bf16.mxu1 %v11617_v50 }
 0x5a5   :  { %7931 = vmatpush1.bf16.msra.mxu0 %v11588_v45 }
 0x5a6   :  { %7932 = vmatprep.subr.bf16.mxu0 %v11596_v40  ;;  %8135 = vmatpush2.bf16.msra.mxu1 %v11615_v30  ;;  %v11626_v30 = vld [vmem:[#allocation3 + $0x194] ss:$8 sps:$4 sm:$0xff]  }
 0x5a7   :  { %8136 = vmatprep.subr.bf16.mxu1 %v11623_v22  ;;  %v11629_v22 = vld [vmem:[#allocation3 + $0xa4] ss:$8 sps:$4 sm:$0xff]  }
 0x5a9   :  { %7933 = vmatpush1.bf16.msra.mxu0 %v11594_v52 }
 0x5aa   :  { %7934 = vmatprep.subr.bf16.mxu0 %v11602_v35  ;;  %8137 = vmatpush2.bf16.msra.mxu1 %v11621_v39 }
 0x5ab   :  { %8138 = vmatprep.subr.bf16.mxu1 %v11629_v22 }
 0x5ad   :  { %7935 = vmatpush1.bf16.msra.mxu0 %v11600_v36 }
 0x5ae   :  { %7936 = vmatprep.subr.bf16.mxu0 %v11608_v19 }
 0x5b1   :  { %7937 = vmatpush1.bf16.msra.mxu0 %v11606_v0 }
 0x5b2   :  { %7942 = vmatprep.subr.bf16.mxu0 %v11614_v57 }
 0x5b5   :  { %7943 = vmatpush2.bf16.msra.mxu0 %v11612_v29 }
 0x5b6   :  { %7944 = vmatprep.subr.bf16.mxu0 %v11620_v41  ;;  %v11624_v41 = vld [vmem:[#allocation3 + $0x190] ss:$8 sps:$4 sm:$0xff]  }
 0x5b9   :  { %7945 = vmatpush2.bf16.msra.mxu0 %v11618_v26  ;;  %v11627_v26 = vld [vmem:[#allocation3 + $0xa0] ss:$8 sps:$4 sm:$0xff]  }
 0x5ba   :  { %7946 = vmatprep.subr.bf16.mxu0 %v11626_v30  ;;  %8139 = vmatpush2.bf16.msra.mxu1 %v11627_v26  ;;  %v11660_v30 = vld [vmem:[#allocation3 + $0x224] ss:$8 sps:$4 sm:$0xff]  }
 0x5bd   :  { %7947 = vmatpush2.bf16.msra.mxu0 %v11624_v41  ;;  %v11655_v41 = vld [vmem:[#allocation3 + $0x300] ss:$8 sps:$4 sm:$0xff]  }
 0x5ed   :  { %v6878_v49 = vpop.f32.mrf.mxu1 }
 0x5ef   :  { %v6880_v44 = vpop.f32.mrf.mxu1 }
 0x5f1   :  { %v6882_v13 = vpop.f32.mrf.mxu1 }
 0x5f3   :  { %v6884_v20 = vpop.f32.mrf.mxu1 }
 0x601   :  { %v7220_v46 = vpop.f32.mrf.mxu1 }
 0x603   :  { %v7222_v62 = vpop.f32.mrf.mxu1 }
 0x604   :  { %v6921_v55 = vpop.f32.mrf.mxu0 }
 0x605   :  { %v7224_v63 = vpop.f32.mrf.mxu1  ;;  %v6922_v38 = vadd.f32 %v6921_v55, %v6878_v49 }
 0x606   :  { %v6923_v23 = vpop.f32.mrf.mxu0 }
 0x607   :  { %v7226_v12 = vpop.f32.mrf.mxu1  ;;  %v6924_v8 = vadd.f32 %v6923_v23, %v6880_v44  ;;  %v11630_v23 = vld [vmem:[#allocation3 + $0x180] ss:$8 sps:$4 sm:$0xff]  }
 0x608   :  { %v6925_v14 = vpop.f32.mrf.mxu0 }
 0x609   :  { %v6926_v34 = vadd.f32 %v6925_v14, %v6882_v13 }
 0x60a   :  { %v6927_v28 = vpop.f32.mrf.mxu0 }
 0x60b   :  { %v6928_v1 = vadd.f32 %v6927_v28, %v6884_v20  ;;  %v11632_v20 = vld [vmem:[#allocation3 + $0x184] ss:$8 sps:$4 sm:$0xff]   ;;  %v11635_v28 = vld [vmem:[#allocation3 + $0x94] ss:$8 sps:$4 sm:$0xff]  }
 0x60c   :  { %7948 = vmatprep.subr.bf16.mxu0 %v11632_v20  ;;  %8140 = vmatprep.subr.bf16.mxu1 %v11635_v28  ;;  %v11671_v28 = vld [vmem:[#allocation3 + $0x2e0] ss:$8 sps:$4 sm:$0xff]  }
 0x60d   :  { %7949 = vmatpush2.bf16.msra.mxu0 %v11630_v23  ;;  %v11663_v23 = vld [vmem:[#allocation3 + $0x2f0] ss:$8 sps:$4 sm:$0xff]  }
 0x641   :  { %v7538_v4 = vpop.f32.mrf.mxu1 }
 0x643   :  { %v7540_v18 = vpop.f32.mrf.mxu1 }
 0x644   :  { %v7177_v37 = vpop.f32.mrf.mxu0 }
 0x645   :  { %v7178_v53 = vadd.f32 %v7177_v37, %v6922_v38  ;;  %v7542_v51 = vpop.f32.mrf.mxu1 }
 0x646   :  { %v7179_v60 = vpop.f32.mrf.mxu0 }
 0x647   :  { %v7180_v33 = vadd.f32 %v7179_v60, %v6924_v8  ;;  %v7221_v47 = vadd.f32 %v7220_v46, %v7178_v53  ;;  %v7544_v17 = vpop.f32.mrf.mxu1  ;;  %v11636_v60 = vld [vmem:[#allocation3 + $0x170] ss:$8 sps:$4 sm:$0xff]   ;;  %v11641_v53 = vld [vmem:[#allocation3 + $0x84] ss:$8 sps:$4 sm:$0xff]  }
 0x648   :  { %v7181_v5 = vpop.f32.mrf.mxu0 }
 0x649   :  { %v7182_v48 = vadd.f32 %v7181_v5, %v6926_v34  ;;  %v7223_v21 = vadd.f32 %v7222_v62, %v7180_v33  ;;  %v11633_v62 = vld [vmem:[#allocation3 + $0x90] ss:$8 sps:$4 sm:$0xff]   ;;  %v11638_v5 = vld [vmem:[#allocation3 + $0x174] ss:$8 sps:$4 sm:$0xff]   ;;  %v11644_v34 = vld [vmem:[#allocation3 + $0x164] ss:$8 sps:$4 sm:$0xff]  }
 0x64a   :  { %v7183_v2 = vpop.f32.mrf.mxu0  ;;  %8141 = vmatpush2.bf16.msra.mxu1 %v11633_v62  ;;  %7950 = vmatprep.subr.bf16.mxu0 %v11638_v5  ;;  %v11668_v62 = vld [vmem:[#allocation3 + $0x210] ss:$8 sps:$4 sm:$0xff]   ;;  %v11685_v5 = vld [vmem:[#allocation3 + $0x2c4] ss:$8 sps:$4 sm:$0xff]  }
 0x64b   :  { %v7184_v3 = vadd.f32 %v7183_v2, %v6928_v1  ;;  %v7225_v16 = vadd.f32 %v7224_v63, %v7182_v48  ;;  %v11639_v2 = vld [vmem:[#allocation3 + $0x80] ss:$8 sps:$4 sm:$0xff]   ;;  %8142 = vmatprep.subr.bf16.mxu1 %v11641_v53  ;;  %7951 = vmatpush2.bf16.msra.mxu0 %v11636_v60  ;;  %v11654_v1 = vld [vmem:[#allocation3 + $0x234] ss:$8 sps:$4 sm:$0xff]   ;;  %v11688_v53 = vld [vmem:[#allocation3 + $0x1e4] ss:$8 sps:$4 sm:$0xff]  }
 0x64c   :  { %7952 = vmatprep.subr.bf16.mxu0 %v11644_v34  ;;  %v11674_v60 = vld [vmem:[#allocation3 + $0x200] ss:$8 sps:$4 sm:$0xff]   ;;  %v11694_v34 = vld [vmem:[#allocation3 + $0x1d4] ss:$8 sps:$4 sm:$0xff]  }
 0x64d   :  { %v7227_v7 = vadd.f32 %v7226_v12, %v7184_v3 }
 0x64e   :  { %8143 = vmatpush2.bf16.msra.mxu1 %v11639_v2  ;;  %v11689_v2 = vld [vmem:[#allocation3 + $0x2b0] ss:$8 sps:$4 sm:$0xff]  }
 0x654   :  { %v7581_v56 = vpop.f32.mrf.mxu0 }
 0x655   :  { %v7582_v59 = vadd.f32 %v7581_v56, %v7538_v4  ;;  %v11649_v56 = vld [vmem:[#allocation3 + $0x314] ss:$8 sps:$4 sm:$0xff]  }
 0x656   :  { %v7583_v54 = vpop.f32.mrf.mxu0  ;;  %8558 = vmatprep.subr.bf16.mxu1 %v11649_v56  ;;  %v11692_v56 = vld [vmem:[#allocation3 + $0x1d0] ss:$8 sps:$4 sm:$0xff]  }
 0x657   :  { %v7590_v10 = vadd.f32 %v7582_v59, %v7221_v47  ;;  %v7584_v58 = vadd.f32 %v7583_v54, %v7540_v18 }
 0x658   :  { %v7585_v24 = vpop.f32.mrf.mxu0 }
 0x659   :  { %v7606_v45 = vadd.f32 %v7599_v6, %v7590_v10  ;;  %v7591_v15 = vadd.f32 %v7584_v58, %v7223_v21  ;;  %v7586_v40 = vadd.f32 %v7585_v24, %v7542_v51 }
 0x65a   :  { %v7587_v52 = vpop.f32.mrf.mxu0 }
 0x65b   :  { %v7607_v35 = vadd.f32 %v7603_v11, %v7591_v15  ;;  %v7592_v32 = vadd.f32 %v7586_v40, %v7225_v16  ;;  %v7588_v36 = vadd.f32 %v7587_v52, %v7544_v17  ;;  %v7610_v9 = vmax.f32 %v7606_v45, 0.0 }
 0x65d   :  { %v7611_v19 = vmax.f32 %v7607_v35, 0.0  ;;  %v7608_v27 = vadd.f32 %v7599_v6, %v7592_v32  ;;  %v7593_v0 = vadd.f32 %v7588_v36, %v7227_v7  ;;  %v11642_v6 = vld [vmem:[#allocation3 + $0x160] ss:$8 sps:$4 sm:$0xff]  }
 0x65e   :  { %7953 = vmatpush2.bf16.msra.mxu0 %v11642_v6  ;;  %v11695_v6 = vld [vmem:[#allocation3 + $0x2a0] ss:$8 sps:$4 sm:$0xff]  }
 0x65f   :  { %v10347_v42 = vpack.c.bf16 %v7611_v19, %v7610_v9  ;;  %v7609_v57 = vadd.f32 %v7603_v11, %v7593_v0  ;;  %v7612_v61 = vmax.f32 %v7608_v27, 0.0  ;;  %8334 = vmatprep.subr.bf16.mxu0 %v11654_v1  ;;  %v11647_v19 = vld [vmem:[#allocation3 + $0x310] ss:$8 sps:$4 sm:$0xff]   ;;  %v11700_v1 = vld [vmem:[#allocation3 + $0x1c4] ss:$8 sps:$4 sm:$0xff]  }
 0x661   :  { %7626 = vst [vmem:[#allocation2] sm:$0xff] %v10347_v42  ;;  %v7613_v29 = vmax.f32 %v7609_v57, 0.0  ;;  %v11657_v57 = vld [vmem:[#allocation3 + $0x304] ss:$8 sps:$4 sm:$0xff]  }
 0x663   :  { %v10348_v50 = vpack.c.bf16 %v7613_v29, %v7612_v61 }
 0x665   :  { %7627 = vst [vmem:[#allocation2 + $0x10] sm:$0xff] %v10348_v50  ;;  %v11652_v50 = vld [vmem:[#allocation3 + $0x230] ss:$8 sps:$4 sm:$0xff]  }
 0x668   :  { %v7648_v39 = vld [vmem:[#allocation2] sm:$0x88]  ;;  %v7647_v49 = vld [vmem:[#allocation2] sm:$0x44]  ;;  %v7629_v55 = vld [vmem:[#allocation2] sm:$0x22] }
 0x669   :  { %v10163_v44 = vrot.slane %v7648_v39, 9  ;;  %v10162_v13 = vrot.slane %v7629_v55, 9  ;;  %v7628_v14 = vld [vmem:[#allocation2] sm:$0x11]  ;;  %v11658_v55 = vld [vmem:[#allocation3 + $0x220] ss:$8 sps:$4 sm:$0xff]  }
 0x66a   :  { %v11665_v39 = vld [vmem:[#allocation3 + $0x2f4] ss:$8 sps:$4 sm:$0xff]  }
 0x66b   :  { %v7653_v46 = vmax.bf16 %v10163_v44, %v7647_v49  ;;  %v7634_v37 = vmax.bf16 %v10162_v13, %v7628_v14  ;;  %v11673_v14 = vld [vmem:[#allocation3 + $0x2e4] ss:$8 sps:$4 sm:$0xff]  }
 0x66c   :  { %v7670_v63 = vld [vmem:[#allocation2 + $0x10] sm:$0x22]  ;;  %v7691_v4 = vld [vmem:[#allocation2 + $0x10] sm:$0x88]  ;;  %v7669_v38 = vld [vmem:[#allocation2 + $0x10] sm:$0x11] }
 0x66d   :  { %7655 = vrot.lane.b32.xlu0 %v7653_v46, %s11815_s8  ;;  %v10165_v12 = vrot.slane %v7670_v63, 9  ;;  %7636 = vrot.lane.b32.xlu1 %v7634_v37, %s11815_s8  ;;  %v10166_v8 = vrot.slane %v7691_v4, 9  ;;  %v7690_v18 = vld [vmem:[#allocation2 + $0x10] sm:$0x44]  ;;  %v11679_v63 = vld [vmem:[#allocation3 + $0x2d4] ss:$8 sps:$4 sm:$0xff]  }
 0x66e   :  { %v11682_v4 = vld [vmem:[#allocation3 + $0x1f4] ss:$8 sps:$4 sm:$0xff]  }
 0x66f   :  { %v7675_v31 = vmax.bf16 %v10165_v12, %v7669_v38  ;;  %v7696_v33 = vmax.bf16 %v10166_v8, %v7690_v18  ;;  %v11677_v12 = vld [vmem:[#allocation3 + $0x2d0] ss:$8 sps:$4 sm:$0xff]   ;;  %v11683_v8 = vld [vmem:[#allocation3 + $0x2c0] ss:$8 sps:$4 sm:$0xff]  }
 0x670   :  { %v11680_v38 = vld [vmem:[#allocation3 + $0x1f0] ss:$8 sps:$4 sm:$0xff]   ;;  %v11686_v18 = vld [vmem:[#allocation3 + $0x1e0] ss:$8 sps:$4 sm:$0xff]  }
 0x671   :  { %7677 = vrot.lane.b32.xlu0 %v7675_v31, %s11815_s8  ;;  %7698 = vrot.lane.b32.xlu1 %v7696_v33, %s11815_s8 }
 0x6df   :  { %v7656_v47 = vpop.permute.xlu0 %7655  ;;  %v7637_v59 = vpop.permute.xlu1 %7636 }
 0x6e0   :  { %v7657_v48 = vrot.slane %v7656_v47, 4  ;;  %v7638_v51 = vrot.slane %v7637_v59, 4 }
 0x6e2   :  { %v7658_v54 = vsel %vm7639_vm2, %v7656_v47, %v7657_v48  ;;  %v7640_v21 = vsel %vm7639_vm2, %v7637_v59, %v7638_v51  ;;  %v11703_v47 = vld [vmem:[#allocation3 + $0x374] ss:$8 sps:$4 sm:$0xff]   ;;  %v11698_v48 = vld [vmem:[#allocation3 + $0x1c0] ss:$8 sps:$4 sm:$0xff]   ;;  %v11701_v59 = vld [vmem:[#allocation3 + $0x370] ss:$8 sps:$4 sm:$0xff]  }
 0x6e3   :  { %v7660_v11 = vmax.bf16 %v7658_v54, %v7653_v46  ;;  %v7678_v3 = vpop.permute.xlu0 %7677  ;;  %v7642_v10 = vmax.bf16 %v7640_v21, %v7634_v37  ;;  %v7699_v24 = vpop.permute.xlu1 %7698  ;;  %v11670_v46 = vld [vmem:[#allocation3 + $0x214] ss:$8 sps:$4 sm:$0xff]   ;;  %v11676_v37 = vld [vmem:[#allocation3 + $0x204] ss:$8 sps:$4 sm:$0xff]   ;;  %v11707_v21 = vld [vmem:[#allocation3 + $0x360] ss:$8 sps:$4 sm:$0xff]  }
 0x6e4   :  { %v7679_v58 = vrot.slane %v7678_v3, 4  ;;  %v7700_v45 = vrot.slane %v7699_v24, 4  ;;  %v11706_v51 = vld [vmem:[#allocation3 + $0x294] ss:$8 sps:$4 sm:$0xff]   ;;  %v11709_v54 = vld [vmem:[#allocation3 + $0x364] ss:$8 sps:$4 sm:$0xff]  }
 0x6e5   :  { %v10164_v16 = vrot.slane %v7660_v11, 9  ;;  %7646 = vst.msk [vmem:[#allocation2] sm:$0x11] %vm7645_vm8, %v7642_v10  ;;  %v11704_v11 = vld [vmem:[#allocation3 + $0x290] ss:$8 sps:$4 sm:$0xff]  }
 0x6e6   :  { %v7680_v15 = vsel %vm7639_vm2, %v7678_v3, %v7679_v58  ;;  %v7701_v17 = vsel %vm7639_vm2, %v7699_v24, %v7700_v45  ;;  %v11712_v3 = vld [vmem:[#allocation3 + $0x284] ss:$8 sps:$4 sm:$0xff]   ;;  %v11715_v10 = vld [vmem:[#allocation3 + $0x354] ss:$8 sps:$4 sm:$0xff]   ;;  %v11710_v58 = vld [vmem:[#allocation3 + $0x280] ss:$8 sps:$4 sm:$0xff]  }
 0x6e7   :  { %v7682_v40 = vmax.bf16 %v7680_v15, %v7675_v31  ;;  %7668 = vst.msk [vmem:[#allocation2] sm:$0x22] %vm7667_vm9, %v10164_v16  ;;  %v7703_v52 = vmax.bf16 %v7701_v17, %v7696_v33  ;;  %v11691_v31 = vld [vmem:[#allocation3 + $0x2b4] ss:$8 sps:$4 sm:$0xff]   ;;  %v11697_v33 = vld [vmem:[#allocation3 + $0x2a4] ss:$8 sps:$4 sm:$0xff]  }
 0x6e8   :  { %v11713_v24 = vld [vmem:[#allocation3 + $0x350] ss:$8 sps:$4 sm:$0xff]   ;;  %v11718_v16 = vld [vmem:[#allocation3 + $0x274] ss:$8 sps:$4 sm:$0xff]   ;;  %v11721_v45 = vld [vmem:[#allocation3 + $0x344] ss:$8 sps:$4 sm:$0xff]  }
 0x6e9   :  { %v7684_v7 = vrot.slane %v7682_v40, 6  ;;  %v7705_v35 = vrot.slane %v7703_v52, 7  ;;  %v11716_v15 = vld [vmem:[#allocation3 + $0x270] ss:$8 sps:$4 sm:$0xff]   ;;  %v11719_v40 = vld [vmem:[#allocation3 + $0x340] ss:$8 sps:$4 sm:$0xff]  }
 0x6ea   :  { %v11724_v17 = vld [vmem:[#allocation3 + $0x264] ss:$8 sps:$4 sm:$0xff]   ;;  %v11727_v52 = vld [vmem:[#allocation3 + $0x334] ss:$8 sps:$4 sm:$0xff]  }
 0x6eb   :  { %7689 = vst.msk [vmem:[#allocation2] sm:$0x44] %vm7688_vm14, %v7684_v7  ;;  %v11722_v7 = vld [vmem:[#allocation3 + $0x260] ss:$8 sps:$4 sm:$0xff]  }
 0x6ec   :  { %7710 = vst.msk [vmem:[#allocation2] sm:$0x88] %vm7709_vm15, %v7705_v35  ;;  %v7711_v32 = vld [vmem:[#allocation2] sm:$0x11] }
 0x6ed   :  { %v10198_v36 = vcombine.low %v7711_v32, %v7711_v32  ;;  %v10199_v9 = vcombine.high %v7711_v32, %v7711_v32  ;;  %v11725_v35 = vld [vmem:[#allocation3 + $0x330] ss:$8 sps:$4 sm:$0xff]   ;;  %v11730_v32 = vld [vmem:[#allocation3 + $0x254] ss:$8 sps:$4 sm:$0xff]  }
 0x6ee   :  { %v7740_v27 = vld [vmem:[#allocation2] sm:$0x22] }
 0x6ef   :  { %v10167_v0 = vcombine.low %v7740_v27, %v7740_v27  ;;  %v10168_v42 = vcombine.high %v7740_v27, %v7740_v27  ;;  %10228 = vmatprep.mubr.msk.bf16.mxu1 %vm7639_vm2, %v10199_v9  ;;  %v11728_v9 = vld [vmem:[#allocation3 + $0x250] ss:$8 sps:$4 sm:$0xff]   ;;  %v11736_v27 = vld [vmem:[#allocation3 + $0x244] ss:$8 sps:$4 sm:$0xff]  }
 0x6f0   :  { %8145 = vmatmul.mubr.bf16.vlgmr.msra.gmra.mxu1 %v10198_v36  ;;  %v11733_v36 = vld [vmem:[#allocation3 + $0x324] ss:$8 sps:$4 sm:$0xff]  }
 0x6f1   :  { %v7775_v61 = vrot.slane %v10167_v0, 1  ;;  %v7776_v29 = vrot.slane %v10168_v42, 1  ;;  %8559 = vmatpush1.bf16.msra.mxu1 %v11647_v19  ;;  %v11731_v19 = vld [vmem:[#allocation3 + $0x320] ss:$8 sps:$4 sm:$0xff]  }
 0x6f2   :  { %v14894_v26 = vld [vmem:[#allocation2] sm:$0x44]  ;;  %8560 = vmatprep.subr.bf16.mxu1 %v11657_v57  ;;  %v11734_v42 = vld [vmem:[#allocation3 + $0x240] ss:$8 sps:$4 sm:$0xff]  }
 0x6f3   :  { %10197 = vmatprep.mubr.msk.bf16.mxu0 %vm7639_vm2, %v7776_v29  ;;  %v10230_v22 = vcombine.high %v14894_v26, %v14894_v26  ;;  %v14899_v49 = vld [vmem:[#allocation2] sm:$0x88]  ;;  %v10229_v57 = vcombine.low %v14894_v26, %v14894_v26  ;;  %v11740_v26 = vld [vmem:[%s14979_s11 + $0x30] sm:$0xff]  }
 0x6f4   :  { %7955 = vmatmul.mubr.bf16.vlgmr.msra.gmra.mxu0 %v7775_v61  ;;  %v10261_v44 = vcombine.high %v14899_v49, %v14899_v49  ;;  %v10260_v0 = vcombine.low %v14899_v49, %v14899_v49  ;;  %v11743_v49 = vld [vmem:[%s14979_s11 + $0x60] sm:$0xff]  }
 0x6f5   :  { %8335 = vmatpush1.bf16.msra.mxu0 %v11652_v50  ;;  %v8189_v13 = vrot.slane %v10230_v22, 2  ;;  %8561 = vmatpush1.bf16.msra.mxu1 %v11655_v41  ;;  %v8188_v29 = vrot.slane %v10229_v57, 2  ;;  %v11737_v50 = vld [vmem:[%s14979_s11 + $0x78] sm:$0xff]   ;;  %v11741_v22 = vld [vmem:[%s14979_s11 + $0x68] sm:$0xff]  }
 0x6f6   :  { %8336 = vmatprep.subr.bf16.mxu0 %v11660_v30  ;;  %v8413_v20 = vrot.slane %v10261_v44, 3  ;;  %8562 = vmatprep.subr.bf16.mxu1 %v11665_v39  ;;  %v8412_v61 = vrot.slane %v10260_v0, 3  ;;  %v11738_v41 = vld [vmem:[%s14979_s11 + $0x38] sm:$0xff]   ;;  %v11739_v30 = vld [vmem:[%s14979_s11 + $0x70] sm:$0xff]   ;;  %v11742_v39 = vld [vmem:[%s14979_s11 + $0x28] sm:$0xff]  }
 0x6f7   :  { %10259 = vmatprep.mubr.msk.bf16.mxu0 %vm7639_vm2, %v8189_v13  ;;  %v11744_v44 = vld [vmem:[%s14979_s11 + $0x20] sm:$0xff]   ;;  %v11746_v13 = vld [vmem:[%s14979_s11 + $0x18] sm:$0xff]  }
 0x6f8   :  { %10290 = vmatprep.mubr.msk.bf16.mxu1 %vm7639_vm2, %v8413_v20  ;;  %v11748_v20 = vld [vmem:[%s14979_s11 + $0x10] sm:$0xff]  }
 0x6f9   :  { %8337 = vmatpush1.bf16.msra.mxu0 %v11658_v55  ;;  %8563 = vmatpush1.bf16.msra.mxu1 %v11663_v23  ;;  %v11745_v55 = vld [vmem:[%s14979_s11 + $0x58] sm:$0xff]   ;;  %v11747_v23 = vld [vmem:[%s14979_s11 + $0x50] sm:$0xff]  }
 0x6fa   :  { %8338 = vmatprep.subr.bf16.mxu0 %v11670_v46  ;;  %8564 = vmatprep.subr.bf16.mxu1 %v11673_v14  ;;  %v11749_v46 = vld [vmem:[%s14979_s11 + $0x48] sm:$0xff]  }
 0x6fb   :  { %v11750_v14 = vld [vmem:[%s14979_s11 + $0x8] sm:$0xff]  }
 0x6fd   :  { %8339 = vmatpush1.bf16.msra.mxu0 %v11668_v62  ;;  %8565 = vmatpush1.bf16.msra.mxu1 %v11671_v28  ;;  %v11751_v62 = vld [vmem:[%s14979_s11 + $0x40] sm:$0xff]  }
 0x6fe   :  { %8340 = vmatprep.subr.bf16.mxu0 %v11676_v37  ;;  %8566 = vmatprep.subr.bf16.mxu1 %v11679_v63  ;;  %v11752_v28 = vld [vmem:[%s14979_s11] sm:$0xff]  }
 0x701   :  { %8341 = vmatpush1.bf16.msra.mxu0 %v11674_v60  ;;  %8567 = vmatpush1.bf16.msra.mxu1 %v11677_v12 }
 0x702   :  { %8342 = vmatprep.subr.bf16.mxu0 %v11682_v4  ;;  %8568 = vmatprep.subr.bf16.mxu1 %v11685_v5 }
 0x705   :  { %8343 = vmatpush1.bf16.msra.mxu0 %v11680_v38  ;;  %8569 = vmatpush1.bf16.msra.mxu1 %v11683_v8 }
 0x706   :  { %8344 = vmatprep.subr.bf16.mxu0 %v11688_v53  ;;  %8570 = vmatprep.subr.bf16.mxu1 %v11691_v31  ;;  %v8601_v31 = vld [vmem:[%s14978_s10] sm:$0x3] }
 0x709   :  { %8345 = vmatpush1.bf16.msra.mxu0 %v11686_v18  ;;  %8571 = vmatpush1.bf16.msra.mxu1 %v11689_v2 }
 0x70a   :  { %8346 = vmatprep.subr.bf16.mxu0 %v11694_v34  ;;  %8572 = vmatprep.subr.bf16.mxu1 %v11697_v33 }
 0x70d   :  { %8347 = vmatpush1.bf16.msra.mxu0 %v11692_v56  ;;  %8573 = vmatpush1.bf16.msra.mxu1 %v11695_v6  ;;  %v8606_v6 = vrot.slane %v8601_v31, %v15010_v25  ;;  %v10291_v25 = vld [vmem:[%s14980_s12] ss:$0 sm:$0xff] }
 0x70e   :  { %8348 = vmatprep.subr.bf16.mxu0 %v11700_v1  ;;  %8578 = vmatprep.subr.bf16.mxu1 %v11703_v47 }
 0x711   :  { %8349 = vmatpush1.bf16.msra.mxu0 %v11698_v48  ;;  %8579 = vmatpush2.bf16.msra.mxu1 %v11701_v59 }
 0x712   :  { %8354 = vmatprep.subr.bf16.mxu0 %v11706_v51  ;;  %8580 = vmatprep.subr.bf16.mxu1 %v11709_v54  ;;  %v8610_v51 = vrot.slane %v8601_v31, %v15011_v43 }
 0x715   :  { %8355 = vmatpush2.bf16.msra.mxu0 %v11704_v11  ;;  %8581 = vmatpush2.bf16.msra.mxu1 %v11707_v21 }
 0x716   :  { %8356 = vmatprep.subr.bf16.mxu0 %v11712_v3  ;;  %8582 = vmatprep.subr.bf16.mxu1 %v11715_v10 }
 0x719   :  { %8357 = vmatpush2.bf16.msra.mxu0 %v11710_v58  ;;  %8583 = vmatpush2.bf16.msra.mxu1 %v11713_v24 }
 0x71a   :  { %8358 = vmatprep.subr.bf16.mxu0 %v11718_v16  ;;  %8584 = vmatprep.subr.bf16.mxu1 %v11721_v45 }
 0x71d   :  { %8359 = vmatpush2.bf16.msra.mxu0 %v11716_v15  ;;  %8585 = vmatpush2.bf16.msra.mxu1 %v11719_v40 }
 0x71e   :  { %8360 = vmatprep.subr.bf16.mxu0 %v11724_v17  ;;  %8586 = vmatprep.subr.bf16.mxu1 %v11727_v52 }
 0x721   :  { %8361 = vmatpush2.bf16.msra.mxu0 %v11722_v7  ;;  %8587 = vmatpush2.bf16.msra.mxu1 %v11725_v35 }
 0x722   :  { %8362 = vmatprep.subr.bf16.mxu0 %v11730_v32  ;;  %8588 = vmatprep.subr.bf16.mxu1 %v11733_v36 }
 0x725   :  { %8363 = vmatpush2.bf16.msra.mxu0 %v11728_v9  ;;  %8589 = vmatpush2.bf16.msra.mxu1 %v11731_v19 }
 0x726   :  { %8364 = vmatprep.subr.bf16.mxu0 %v11736_v27 }
 0x728   :  { %8591 = vmatmul.mubr.bf16.vlgmr.msra.gmra.mxu1 %v8412_v61 }
 0x729   :  { %8365 = vmatpush2.bf16.msra.mxu0 %v11734_v42 }
 0x72a   :  { %10562 = vmatprep.subr.bf16.mxu0 %v11737_v50 }
 0x72c   :  { %8367 = vmatmul.mubr.bf16.vlgmr.msra.gmra.mxu0 %v8188_v29 }
 0x72d   :  { %10563 = vmatpush3.bf16.msra.mxu0 %v11738_v41 }
 0x72e   :  { %10564 = vmatprep.subr.bf16.mxu0 %v11739_v30 }
 0x731   :  { %10565 = vmatpush3.bf16.msra.mxu0 %v11740_v26 }
 0x732   :  { %10566 = vmatprep.subr.bf16.mxu0 %v11741_v22 }
 0x735   :  { %10567 = vmatpush3.bf16.msra.mxu0 %v11742_v39 }
 0x736   :  { %10568 = vmatprep.subr.bf16.mxu0 %v11743_v49 }
 0x739   :  { %10569 = vmatpush3.bf16.msra.mxu0 %v11744_v44 }
 0x73a   :  { %10570 = vmatprep.subr.bf16.mxu0 %v11745_v55 }
 0x73d   :  { %10571 = vmatpush3.bf16.msra.mxu0 %v11746_v13 }
 0x73e   :  { %10572 = vmatprep.subr.bf16.mxu0 %v11747_v23 }
 0x741   :  { %10573 = vmatpush3.bf16.msra.mxu0 %v11748_v20 }
 0x742   :  { %10574 = vmatprep.subr.bf16.mxu0 %v11749_v46 }
 0x745   :  { %10575 = vmatpush3.bf16.msra.mxu0 %v11750_v14 }
 0x746   :  { %10576 = vmatprep.subr.bf16.mxu0 %v11751_v62 }
 0x749   :  { %10577 = vmatpush3.bf16.msra.mxu0 %v11752_v28 }
 0x7b0   :  { %v8146_v37 = vpop.f32.mrf.mxu1 }
 0x7b2   :  { %v8148_v63 = vpop.f32.mrf.mxu1 }
 0x7b4   :  { %v7956_v60 = vpop.f32.mrf.mxu0  ;;  %v8150_v12 = vpop.f32.mrf.mxu1 }
 0x7b5   :  { %v8147_v18 = vadd.f32 %v8146_v37, %v7956_v60 }
 0x7b6   :  { %v7958_v4 = vpop.f32.mrf.mxu0  ;;  %v8151_v5 = vpop.f32.mrf.mxu1 }
 0x7b7   :  { %v8149_v33 = vadd.f32 %v8148_v63, %v7958_v4 }
 0x7b8   :  { %v7960_v38 = vpop.f32.mrf.mxu0 }
 0x7ba   :  { %v7961_v8 = vpop.f32.mrf.mxu0 }
 0x7e8   :  { %v8592_v53 = vpop.f32.mrf.mxu1 }
 0x7ea   :  { %v8594_v2 = vpop.f32.mrf.mxu1 }
 0x7ec   :  { %v8368_v34 = vpop.f32.mrf.mxu0  ;;  %v8596_v1 = vpop.f32.mrf.mxu1 }
 0x7ed   :  { %v8375_v56 = vadd.f32 %v8368_v34, %v8147_v18 }
 0x7ee   :  { %v8370_v47 = vpop.f32.mrf.mxu0  ;;  %v8597_v54 = vpop.f32.mrf.mxu1 }
 0x7ef   :  { %v8599_v48 = vadd.f32 %v8592_v53, %v8375_v56  ;;  %v8376_v59 = vadd.f32 %v8370_v47, %v8149_v33 }
 0x7f0   :  { %v8372_v11 = vpop.f32.mrf.mxu0 }
 0x7f1   :  { %v8613_v21 = vadd.f32 %v8606_v6, %v8599_v48  ;;  %v8600_v3 = vadd.f32 %v8594_v2, %v8376_v59 }
 0x7f2   :  { %v8373_v10 = vpop.f32.mrf.mxu0 }
 0x7f3   :  { %v8614_v58 = vadd.f32 %v8610_v51, %v8600_v3  ;;  %v8615_v24 = vmax.f32 %v8613_v21, 0.0 }
 0x7f5   :  { %v8616_v16 = vmax.f32 %v8614_v58, 0.0  ;;  %v8617_v15 = vpack.c.bf16 %v8615_v24, %v8615_v24 }
 0x7f7   :  { %v8618_v45 = vpack.c.bf16 %v8616_v16, %v8616_v16 }
 0x7f9   :  { %8786 = vmatprep.mubr.bf16.mxu0 %v8618_v45 }
 0x7fa   :  { %8787 = vmatmul.mubr.bf16.vlgmr.msra.gmra.mxu0 %v8617_v15 }
 0x8ba   :  { %v10578_v40 = vpop.f32.mrf.mxu0 }
 0x8bc   :  { %v10579_v17 = vpop.f32.mrf.mxu0 }
 0x8bd   :  { %v10580_v43 = vadd.f32 %v10579_v17, %v10578_v40 }
 0x8be   :  { %v10581_v52 = vpop.f32.mrf.mxu0 }
 0x8bf   :  { %v8789_v7 = vadd.f32 %v10580_v43, %v10291_v25 }
 0x8c0   :  { %v10582_v35 = vpop.f32.mrf.mxu0 }
 0x8c1   :  { %8794 = vst [vmem:[#allocation6] sm:$0x3] %v8789_v7 }
 0x8c2   :  { %11797 = shalt.err (!%p11794_p9)
}
 0x8c3   :  { %8804 = dma.vmem_to_hbm [thread:$0]  %s8802_s1, 32, %s14981_s13, [#allocation5]  }
 0x8c4   :  { %11808 = dma.done.wait [#allocation5], 32  }
 0x8c5   :  { %11809 = vsyncadd [#allocation5], 4294967264 }
 0x8c6   :  { %8808 = vsyncpa [#allocation4], 1 }
 0x8c7   :  { %8809 = vsyncpa [#allocation5], 1 }

</bundles_post_ra>
